<compile_context>
chip_gen: v7x
topology: tpu7x:2x2x1
jax: 0.10.0
libtpu: 0.0.40
codegen_flags: <defaults>
</compile_context>

<pallas_src>
import jax
import jax.numpy as jnp
from jax.experimental import pallas as pl
from jax.experimental.pallas import tpu as pltpu

_NEG = -1e9  # large-but-finite "minus infinity": 0 * _NEG == 0 (no NaNs), exp(_NEG) == 0


def crf_kernel(em_ref, tags_ref, mask_sb_ref, mask_bs_ref, start_ref, end_ref,
               trans_ref, llh_ref):
    S, B, T = em_ref.shape          # S=seq, B=batch tile (lane/sublane dense), T=padded tags

    em = em_ref[...]                # (S, B, T) f32
    tags = tags_ref[...]            # (S, B)    i32
    mask_sb = mask_sb_ref[...]      # (S, B)    f32   (batch on lanes)
    mask_bs = mask_bs_ref[...]      # (B, S)    f32   (batch on sublanes)
    start = start_ref[...]          # (1, T)    f32   (padded tags = -1e9)
    end = end_ref[...]              # (1, T)    f32   (padded tags = 0)
    trans = trans_ref[...]          # (T, T)    f32   (padded rows/cols = -1e9)

    # ---- one-hot encoding of tags (replaces gather); padded tag lanes are 0 --
    tag_iota = jax.lax.broadcasted_iota(jnp.int32, (S, B, T), 2)
    onehot = (tag_iota == tags[:, :, None]).astype(jnp.float32)     # (S, B, T)

    # emissions[t, b, tags[t, b]]
    em_sel = jnp.sum(em * onehot, axis=-1)                          # (S, B)

    # ---- numerator: score of the given tag path (fully vectorized) ----------
    num = jnp.sum(start * onehot[0], axis=-1) + em_sel[0]           # (B,)
    if S > 1:
        # transitions[tags[t-1], tags[t]] as one MXU matmul + lane reduce.
        prev_rows = jnp.dot(onehot[:-1].reshape((S - 1) * B, T), trans,
                            preferred_element_type=jnp.float32)
        prev_rows = prev_rows.reshape(S - 1, B, T)                  # trans[tags[t-1], :]
        trans_sel = jnp.sum(prev_rows * onehot[1:], axis=-1)        # (S-1, B)
        num = num + jnp.sum(mask_sb[1:] * (trans_sel + em_sel[1:]), axis=0)

    # end_transitions[tags at the last unmasked step] (int32 compare)
    seq_ends = jnp.sum(mask_sb, axis=0).astype(jnp.int32) - 1       # (B,)
    t_iota = jax.lax.broadcasted_iota(jnp.int32, (S, B), 0)
    last_sel = (t_iota == seq_ends[None, :]).astype(jnp.float32)    # (S, B)
    last_onehot = jnp.sum(onehot * last_sel[:, :, None], axis=0)    # (B, T)
    num = num + jnp.sum(end * last_onehot, axis=-1)

    # ---- denominator: forward algorithm, logsumexp as exp -> matmul -> log --
    cmax = jnp.max(trans, axis=0, keepdims=True)                    # (1, T) column max
    exp_trans = jnp.exp(trans - cmax)                               # (T, T) hoisted, stabilized
    score = start + em[0]                                           # (B, T)
    for t in range(1, S):
        m = jnp.max(score, axis=-1, keepdims=True)                  # (B, 1)
        p = jnp.exp(score - m)                                      # (B, T)
        s = jnp.dot(p, exp_trans, preferred_element_type=jnp.float32)   # MXU
        nxt = jnp.log(s) + m + cmax + em[t]                         # (B, T)
        keep = mask_bs[:, t:t + 1] > 0.5                            # (B, 1), no relayout
        score = jnp.where(keep, nxt, score)
    score = score + end
    m2 = jnp.max(score, axis=-1, keepdims=True)
    den = jnp.log(jnp.sum(jnp.exp(score - m2), axis=-1)) + m2[:, 0]  # (B,)

    llh_ref[...] = (num - den)[None, :]                              # (1, B) lane-dense


def _round_up(x, m):
    return (x + m - 1) // m * m


def crf_forward(emissions, tags, mask, start_transitions, end_transitions,
                transitions, reduction="mean", tile_b=128):
    """Pallas CRF forward. Returns log-likelihood reduced like the PyTorch module."""
    if reduction not in ("none", "sum", "mean", "token_mean"):
        raise ValueError(f"invalid reduction: {reduction}")
    S, B, T = emissions.shape
    Tp = _round_up(T, 128)
    Bp = _round_up(B, tile_b)

    em = jnp.pad(emissions.astype(jnp.float32), ((0, 0), (0, Bp - B), (0, Tp - T)))
    tg = jnp.pad(tags.astype(jnp.int32), ((0, 0), (0, Bp - B)))
    mk_sb = jnp.pad(mask.astype(jnp.float32), ((0, 0), (0, Bp - B)))    # (S, Bp)
    mk_bs = jnp.transpose(mk_sb)                                        # (Bp, S)
    st = jnp.pad(start_transitions.astype(jnp.float32).reshape(1, T),
                 ((0, 0), (0, Tp - T)), constant_values=_NEG)
    en = jnp.pad(end_transitions.astype(jnp.float32).reshape(1, T),
                 ((0, 0), (0, Tp - T)), constant_values=0.0)
    tr = jnp.pad(transitions.astype(jnp.float32),
                 ((0, Tp - T), (0, Tp - T)), constant_values=_NEG)

    llh = pl.pallas_call(
        crf_kernel,
        out_shape=jax.ShapeDtypeStruct((1, Bp), jnp.float32),
        grid=(Bp // tile_b,),
        in_specs=[
            pl.BlockSpec((S, tile_b, Tp), lambda b: (0, b, 0)),   # emissions
            pl.BlockSpec((S, tile_b), lambda b: (0, b)),          # tags
            pl.BlockSpec((S, tile_b), lambda b: (0, b)),          # mask (S, B)
            pl.BlockSpec((tile_b, S), lambda b: (b, 0)),          # mask (B, S)
            pl.BlockSpec((1, Tp), lambda b: (0, 0)),              # start
            pl.BlockSpec((1, Tp), lambda b: (0, 0)),              # end
            pl.BlockSpec((Tp, Tp), lambda b: (0, 0)),             # transitions
        ],
        out_specs=pl.BlockSpec((1, tile_b), lambda b: (0, b)),
        compiler_params=pltpu.CompilerParams(
            dimension_semantics=("parallel",),
            vmem_limit_bytes=32 * 1024 * 1024),
    )(em, tg, mk_sb, mk_bs, st, en, tr)

    llh = llh[0, :B]                                                # (B,)
    if reduction == "none":
        return llh
    if reduction == "sum":
        return jnp.sum(llh)
    if reduction == "mean":
        return jnp.mean(llh)
    return jnp.sum(llh) / jnp.sum(mask.astype(jnp.float32))


def crf_reference(emissions, tags, mask, start, end, trans):
    """Pure-JAX reference mirroring the PyTorch CRF.forward math (reduction='none')."""
    S, B, T = emissions.shape
    maskf = mask.astype(jnp.float32)
    barange = jnp.arange(B)
    score = start[tags[0]] + emissions[0, barange, tags[0]]
    for i in range(1, S):
        score = score + trans[tags[i - 1], tags[i]] * maskf[i]
        score = score + emissions[i, barange, tags[i]] * maskf[i]
    seq_ends = maskf.sum(0).astype(jnp.int32) - 1
    last_tags = tags[seq_ends, barange]
    score = score + end[last_tags]

    z = start + emissions[0]
    for i in range(1, S):
        nz = jax.scipy.special.logsumexp(
            z[:, :, None] + trans[None, :, :] + emissions[i][:, None, :], axis=1)
        z = jnp.where(maskf[i][:, None] > 0.5, nz, z)
    z = z + end
    den = jax.scipy.special.logsumexp(z, axis=1)
    return score - den


if __name__ == "__main__":
    # Small, deterministic problem: seq=8, batch=4, num_tags=8.
    seq_len, batch, num_tags = 8, 4, 8
    key = jax.random.PRNGKey(0)
    k_em, k_tags, k_st, k_en, k_tr = jax.random.split(key, 5)

    emissions = jax.random.normal(k_em, (seq_len, batch, num_tags), jnp.float32)
    tags = jax.random.randint(k_tags, (seq_len, batch), 0, num_tags, jnp.int32)

    # Variable-length sequences; first timestep must be all-on (module contract).
    lengths = jnp.array([8, 6, 8, 5], dtype=jnp.int32)
    t_idx = jnp.arange(seq_len)[:, None]
    mask = (t_idx < lengths[None, :]).astype(jnp.float32)          # (S, B)

    # Parameters: uniform(-0.1, 0.1), as in reset_parameters().
    start_transitions = jax.random.uniform(k_st, (num_tags,), jnp.float32, -0.1, 0.1)
    end_transitions = jax.random.uniform(k_en, (num_tags,), jnp.float32, -0.1, 0.1)
    transitions = jax.random.uniform(k_tr, (num_tags, num_tags), jnp.float32, -0.1, 0.1)

    out_none = crf_forward(emissions, tags, mask, start_transitions,
                           end_transitions, transitions, reduction="none")
    out_mean = crf_forward(emissions, tags, mask, start_transitions,
                           end_transitions, transitions, reduction="mean")
    out_mean = jax.block_until_ready(out_mean)
    out_none = jax.block_until_ready(out_none)

    ref_none = crf_reference(emissions, tags, mask, start_transitions,
                             end_transitions, transitions)
    ref_mean = jnp.mean(ref_none)

    # Tolerance leaves headroom for MXU f32 multi-pass matmul rounding.
    assert jnp.allclose(out_none, ref_none, atol=2e-3, rtol=2e-3), (out_none, ref_none)
    assert jnp.allclose(out_mean, ref_mean, atol=2e-3, rtol=2e-3), (out_mean, ref_mean)

    # TODO(synk): decode()/_viterbi_decode/_viterbi_decode_nbest (argmax
    # backtracking + n-best topk) are not kernelized; only the training-time
    # forward (log-likelihood) path is implemented.
    print("KERNEL_OK")
</pallas_src>

<mosaic_0001>
module attributes {stable_mosaic.version = 11 : i64} {
  func.func @crf_kernel(%arg0: i32, %arg1: memref<8x128x128xf32, #tpu.memory_space<vmem>>, %arg2: memref<8x128xi32, #tpu.memory_space<vmem>>, %arg3: memref<8x128xf32, #tpu.memory_space<vmem>>, %arg4: memref<128x8xf32, #tpu.memory_space<vmem>>, %arg5: memref<1x128xf32, #tpu.memory_space<vmem>>, %arg6: memref<1x128xf32, #tpu.memory_space<vmem>>, %arg7: memref<128x128xf32, #tpu.memory_space<vmem>>, %arg8: memref<1x128xf32, #tpu.memory_space<vmem>>) attributes {dimension_semantics = [#tpu.dimension_semantics<parallel>], iteration_bounds = array<i64: 1>, scalar_prefetch = 0 : i64, scratch_operands = 0 : i64, tpu.core_type = #tpu.core_type<tc>, window_params = [{transform_indices = @transform_0, window_bounds = array<i64: 8, 128, 128>}, {transform_indices = @transform_1, window_bounds = array<i64: 8, 128>}, {transform_indices = @transform_2, window_bounds = array<i64: 8, 128>}, {transform_indices = @transform_3, window_bounds = array<i64: 128, 8>}, {pipeline_mode = #tpu.pipeline_mode<synchronous>, transform_indices = @transform_4, window_bounds = array<i64: 1, 128>}, {pipeline_mode = #tpu.pipeline_mode<synchronous>, transform_indices = @transform_5, window_bounds = array<i64: 1, 128>}, {pipeline_mode = #tpu.pipeline_mode<synchronous>, transform_indices = @transform_6, window_bounds = array<i64: 128, 128>}, {transform_indices = @transform_7, window_bounds = array<i64: 1, 128>}]} {
    %c0 = arith.constant 0 : index
    %c0_0 = arith.constant 0 : index
    %c0_1 = arith.constant 0 : index
    %0 = vector.load %arg1[%c0, %c0_0, %c0_1] : memref<8x128x128xf32, #tpu.memory_space<vmem>>, vector<8x128x128xf32>
    %c0_2 = arith.constant 0 : index
    %c0_3 = arith.constant 0 : index
    %1 = vector.load %arg2[%c0_2, %c0_3] : memref<8x128xi32, #tpu.memory_space<vmem>>, vector<8x128xi32>
    %c0_4 = arith.constant 0 : index
    %c0_5 = arith.constant 0 : index
    %2 = vector.load %arg3[%c0_4, %c0_5] : memref<8x128xf32, #tpu.memory_space<vmem>>, vector<8x128xf32>
    %c0_6 = arith.constant 0 : index
    %c0_7 = arith.constant 0 : index
    %3 = vector.load %arg4[%c0_6, %c0_7] : memref<128x8xf32, #tpu.memory_space<vmem>>, vector<128x8xf32>
    %c0_8 = arith.constant 0 : index
    %c0_9 = arith.constant 0 : index
    %4 = vector.load %arg5[%c0_8, %c0_9] : memref<1x128xf32, #tpu.memory_space<vmem>>, vector<1x128xf32>
    %c0_10 = arith.constant 0 : index
    %c0_11 = arith.constant 0 : index
    %5 = vector.load %arg6[%c0_10, %c0_11] : memref<1x128xf32, #tpu.memory_space<vmem>>, vector<1x128xf32>
    %c0_12 = arith.constant 0 : index
    %c0_13 = arith.constant 0 : index
    %6 = vector.load %arg7[%c0_12, %c0_13] : memref<128x128xf32, #tpu.memory_space<vmem>>, vector<128x128xf32>
    %7 = tpu.iota {dimensions = array<i32: 2>} : vector<8x128x128xi32>
    %8 = vector.shape_cast %1 : vector<8x128xi32> to vector<8x128x1xi32>
    %9 = vector.broadcast %8 : vector<8x128x1xi32> to vector<8x128x128xi32>
    %10 = arith.cmpi eq, %7, %9 : vector<8x128x128xi32>
    %11 = arith.extui %10 : vector<8x128x128xi1> to vector<8x128x128xi32>
    %12 = arith.sitofp %11 : vector<8x128x128xi32> to vector<8x128x128xf32>
    %13 = arith.mulf %0, %12 : vector<8x128x128xf32>
    %cst = arith.constant dense<0.000000e+00> : vector<8x128xf32>
    %14 = vector.multi_reduction <add>, %13, %cst [2] : vector<8x128x128xf32> to vector<8x128xf32>
    %15 = vector.extract_strided_slice %12 {offsets = [0, 0, 0], sizes = [1, 128, 128], strides = [1, 1, 1]} : vector<8x128x128xf32> to vector<1x128x128xf32>
    %16 = vector.shape_cast %15 : vector<1x128x128xf32> to vector<128x128xf32>
    %17 = vector.broadcast %4 : vector<1x128xf32> to vector<128x128xf32>
    %18 = arith.mulf %17, %16 : vector<128x128xf32>
    %cst_14 = arith.constant dense<0.000000e+00> : vector<128xf32>
    %19 = vector.multi_reduction <add>, %18, %cst_14 [1] : vector<128x128xf32> to vector<128xf32>
    %20 = vector.extract_strided_slice %14 {offsets = [0, 0], sizes = [1, 128], strides = [1, 1]} : vector<8x128xf32> to vector<1x128xf32>
    %21 = vector.shape_cast %20 : vector<1x128xf32> to vector<128xf32>
    %22 = arith.addf %19, %21 : vector<128xf32>
    %23 = vector.extract_strided_slice %12 {offsets = [0, 0, 0], sizes = [7, 128, 128], strides = [1, 1, 1]} : vector<8x128x128xf32> to vector<7x128x128xf32>
    %24 = vector.shape_cast %23 : vector<7x128x128xf32> to vector<896x128xf32>
    %cst_15 = arith.constant dense<0.000000e+00> : vector<896x128xf32>
    %25 = tpu.matmul %24, %6, %cst_15 {dimension_numbers = #tpu.dot_dimension_numbers<[1], [0], [0], [1], [0, 0, 1, 1], [], []>} : vector<896x128xf32>, vector<128x128xf32>, vector<896x128xf32> -> vector<896x128xf32>
    %26 = vector.shape_cast %25 : vector<896x128xf32> to vector<7x128x128xf32>
    %27 = vector.extract_strided_slice %12 {offsets = [1, 0, 0], sizes = [7, 128, 128], strides = [1, 1, 1]} : vector<8x128x128xf32> to vector<7x128x128xf32>
    %28 = arith.mulf %26, %27 : vector<7x128x128xf32>
    %cst_16 = arith.constant dense<0.000000e+00> : vector<7x128xf32>
    %29 = vector.multi_reduction <add>, %28, %cst_16 [2] : vector<7x128x128xf32> to vector<7x128xf32>
    %30 = vector.extract_strided_slice %2 {offsets = [1, 0], sizes = [7, 128], strides = [1, 1]} : vector<8x128xf32> to vector<7x128xf32>
    %31 = vector.extract_strided_slice %14 {offsets = [1, 0], sizes = [7, 128], strides = [1, 1]} : vector<8x128xf32> to vector<7x128xf32>
    %32 = arith.addf %29, %31 : vector<7x128xf32>
    %33 = arith.mulf %30, %32 : vector<7x128xf32>
    %cst_17 = arith.constant dense<0.000000e+00> : vector<128xf32>
    %34 = vector.multi_reduction <add>, %33, %cst_17 [0] : vector<7x128xf32> to vector<128xf32>
    %35 = arith.addf %22, %34 : vector<128xf32>
    %cst_18 = arith.constant dense<0.000000e+00> : vector<128xf32>
    %36 = vector.multi_reduction <add>, %2, %cst_18 [0] : vector<8x128xf32> to vector<128xf32>
    %37 = arith.fptosi %36 : vector<128xf32> to vector<128xi32>
    %c1_i32 = arith.constant 1 : i32
    %38 = vector.broadcast %c1_i32 : i32 to vector<128xi32>
    %39 = arith.subi %37, %38 : vector<128xi32>
    %40 = tpu.iota {dimensions = array<i32: 0>} : vector<8x128xi32>
    %41 = vector.shape_cast %39 : vector<128xi32> to vector<1x128xi32>
    %42 = vector.broadcast %41 : vector<1x128xi32> to vector<8x128xi32>
    %43 = arith.cmpi eq, %40, %42 : vector<8x128xi32>
    %44 = arith.extui %43 : vector<8x128xi1> to vector<8x128xi32>
    %45 = arith.sitofp %44 : vector<8x128xi32> to vector<8x128xf32>
    %46 = vector.shape_cast %45 : vector<8x128xf32> to vector<8x128x1xf32>
    %47 = vector.broadcast %46 : vector<8x128x1xf32> to vector<8x128x128xf32>
    %48 = arith.mulf %12, %47 : vector<8x128x128xf32>
    %cst_19 = arith.constant dense<0.000000e+00> : vector<128x128xf32>
    %49 = vector.multi_reduction <add>, %48, %cst_19 [0] : vector<8x128x128xf32> to vector<128x128xf32>
    %50 = vector.broadcast %5 : vector<1x128xf32> to vector<128x128xf32>
    %51 = arith.mulf %50, %49 : vector<128x128xf32>
    %cst_20 = arith.constant dense<0.000000e+00> : vector<128xf32>
    %52 = vector.multi_reduction <add>, %51, %cst_20 [1] : vector<128x128xf32> to vector<128xf32>
    %53 = arith.addf %35, %52 : vector<128xf32>
    %cst_21 = arith.constant dense<0xFF800000> : vector<128xf32>
    %54 = vector.multi_reduction <maximumf>, %6, %cst_21 [0] : vector<128x128xf32> to vector<128xf32>
    %55 = vector.shape_cast %54 : vector<128xf32> to vector<1x128xf32>
    %56 = vector.broadcast %55 : vector<1x128xf32> to vector<128x128xf32>
    %57 = arith.subf %6, %56 : vector<128x128xf32>
    %58 = math.exp %57 : vector<128x128xf32>
    %59 = vector.extract_strided_slice %0 {offsets = [0, 0, 0], sizes = [1, 128, 128], strides = [1, 1, 1]} : vector<8x128x128xf32> to vector<1x128x128xf32>
    %60 = vector.shape_cast %59 : vector<1x128x128xf32> to vector<128x128xf32>
    %61 = vector.broadcast %4 : vector<1x128xf32> to vector<128x128xf32>
    %62 = arith.addf %61, %60 : vector<128x128xf32>
    %cst_22 = arith.constant dense<0xFF800000> : vector<128xf32>
    %63 = vector.multi_reduction <maximumf>, %62, %cst_22 [1] : vector<128x128xf32> to vector<128xf32>
    %64 = vector.shape_cast %63 : vector<128xf32> to vector<128x1xf32>
    %65 = vector.broadcast %64 : vector<128x1xf32> to vector<128x128xf32>
    %66 = arith.subf %62, %65 : vector<128x128xf32>
    %67 = math.exp %66 : vector<128x128xf32>
    %cst_23 = arith.constant dense<0.000000e+00> : vector<128x128xf32>
    %68 = tpu.matmul %67, %58, %cst_23 {dimension_numbers = #tpu.dot_dimension_numbers<[1], [0], [0], [1], [0, 0, 1, 1], [], []>} : vector<128x128xf32>, vector<128x128xf32>, vector<128x128xf32> -> vector<128x128xf32>
    %69 = math.log %68 : vector<128x128xf32>
    %70 = vector.broadcast %64 : vector<128x1xf32> to vector<128x128xf32>
    %71 = arith.addf %69, %70 : vector<128x128xf32>
    %72 = vector.broadcast %55 : vector<1x128xf32> to vector<128x128xf32>
    %73 = arith.addf %71, %72 : vector<128x128xf32>
    %74 = vector.extract_strided_slice %0 {offsets = [1, 0, 0], sizes = [1, 128, 128], strides = [1, 1, 1]} : vector<8x128x128xf32> to vector<1x128x128xf32>
    %75 = vector.shape_cast %74 : vector<1x128x128xf32> to vector<128x128xf32>
    %76 = arith.addf %73, %75 : vector<128x128xf32>
    %77 = vector.extract_strided_slice %3 {offsets = [0, 1], sizes = [128, 1], strides = [1, 1]} : vector<128x8xf32> to vector<128x1xf32>
    %cst_24 = arith.constant 5.000000e-01 : f32
    %78 = vector.broadcast %cst_24 : f32 to vector<128x1xf32>
    %79 = arith.cmpf ogt, %77, %78 : vector<128x1xf32>
    %80 = vector.shape_cast %79 : vector<128x1xi1> to vector<128x1xi1>
    %81 = vector.broadcast %80 : vector<128x1xi1> to vector<128x128xi1>
    %82 = arith.select %81, %76, %62 : vector<128x128xi1>, vector<128x128xf32>
    %cst_25 = arith.constant dense<0xFF800000> : vector<128xf32>
    %83 = vector.multi_reduction <maximumf>, %82, %cst_25 [1] : vector<128x128xf32> to vector<128xf32>
    %84 = vector.shape_cast %83 : vector<128xf32> to vector<128x1xf32>
    %85 = vector.broadcast %84 : vector<128x1xf32> to vector<128x128xf32>
    %86 = arith.subf %82, %85 : vector<128x128xf32>
    %87 = math.exp %86 : vector<128x128xf32>
    %cst_26 = arith.constant dense<0.000000e+00> : vector<128x128xf32>
    %88 = tpu.matmul %87, %58, %cst_26 {dimension_numbers = #tpu.dot_dimension_numbers<[1], [0], [0], [1], [0, 0, 1, 1], [], []>} : vector<128x128xf32>, vector<128x128xf32>, vector<128x128xf32> -> vector<128x128xf32>
    %89 = math.log %88 : vector<128x128xf32>
    %90 = vector.broadcast %84 : vector<128x1xf32> to vector<128x128xf32>
    %91 = arith.addf %89, %90 : vector<128x128xf32>
    %92 = vector.broadcast %55 : vector<1x128xf32> to vector<128x128xf32>
    %93 = arith.addf %91, %92 : vector<128x128xf32>
    %94 = vector.extract_strided_slice %0 {offsets = [2, 0, 0], sizes = [1, 128, 128], strides = [1, 1, 1]} : vector<8x128x128xf32> to vector<1x128x128xf32>
    %95 = vector.shape_cast %94 : vector<1x128x128xf32> to vector<128x128xf32>
    %96 = arith.addf %93, %95 : vector<128x128xf32>
    %97 = vector.extract_strided_slice %3 {offsets = [0, 2], sizes = [128, 1], strides = [1, 1]} : vector<128x8xf32> to vector<128x1xf32>
    %cst_27 = arith.constant 5.000000e-01 : f32
    %98 = vector.broadcast %cst_27 : f32 to vector<128x1xf32>
    %99 = arith.cmpf ogt, %97, %98 : vector<128x1xf32>
    %100 = vector.shape_cast %99 : vector<128x1xi1> to vector<128x1xi1>
    %101 = vector.broadcast %100 : vector<128x1xi1> to vector<128x128xi1>
    %102 = arith.select %101, %96, %82 : vector<128x128xi1>, vector<128x128xf32>
    %cst_28 = arith.constant dense<0xFF800000> : vector<128xf32>
    %103 = vector.multi_reduction <maximumf>, %102, %cst_28 [1] : vector<128x128xf32> to vector<128xf32>
    %104 = vector.shape_cast %103 : vector<128xf32> to vector<128x1xf32>
    %105 = vector.broadcast %104 : vector<128x1xf32> to vector<128x128xf32>
    %106 = arith.subf %102, %105 : vector<128x128xf32>
    %107 = math.exp %106 : vector<128x128xf32>
    %cst_29 = arith.constant dense<0.000000e+00> : vector<128x128xf32>
    %108 = tpu.matmul %107, %58, %cst_29 {dimension_numbers = #tpu.dot_dimension_numbers<[1], [0], [0], [1], [0, 0, 1, 1], [], []>} : vector<128x128xf32>, vector<128x128xf32>, vector<128x128xf32> -> vector<128x128xf32>
    %109 = math.log %108 : vector<128x128xf32>
    %110 = vector.broadcast %104 : vector<128x1xf32> to vector<128x128xf32>
    %111 = arith.addf %109, %110 : vector<128x128xf32>
    %112 = vector.broadcast %55 : vector<1x128xf32> to vector<128x128xf32>
    %113 = arith.addf %111, %112 : vector<128x128xf32>
    %114 = vector.extract_strided_slice %0 {offsets = [3, 0, 0], sizes = [1, 128, 128], strides = [1, 1, 1]} : vector<8x128x128xf32> to vector<1x128x128xf32>
    %115 = vector.shape_cast %114 : vector<1x128x128xf32> to vector<128x128xf32>
    %116 = arith.addf %113, %115 : vector<128x128xf32>
    %117 = vector.extract_strided_slice %3 {offsets = [0, 3], sizes = [128, 1], strides = [1, 1]} : vector<128x8xf32> to vector<128x1xf32>
    %cst_30 = arith.constant 5.000000e-01 : f32
    %118 = vector.broadcast %cst_30 : f32 to vector<128x1xf32>
    %119 = arith.cmpf ogt, %117, %118 : vector<128x1xf32>
    %120 = vector.shape_cast %119 : vector<128x1xi1> to vector<128x1xi1>
    %121 = vector.broadcast %120 : vector<128x1xi1> to vector<128x128xi1>
    %122 = arith.select %121, %116, %102 : vector<128x128xi1>, vector<128x128xf32>
    %cst_31 = arith.constant dense<0xFF800000> : vector<128xf32>
    %123 = vector.multi_reduction <maximumf>, %122, %cst_31 [1] : vector<128x128xf32> to vector<128xf32>
    %124 = vector.shape_cast %123 : vector<128xf32> to vector<128x1xf32>
    %125 = vector.broadcast %124 : vector<128x1xf32> to vector<128x128xf32>
    %126 = arith.subf %122, %125 : vector<128x128xf32>
    %127 = math.exp %126 : vector<128x128xf32>
    %cst_32 = arith.constant dense<0.000000e+00> : vector<128x128xf32>
    %128 = tpu.matmul %127, %58, %cst_32 {dimension_numbers = #tpu.dot_dimension_numbers<[1], [0], [0], [1], [0, 0, 1, 1], [], []>} : vector<128x128xf32>, vector<128x128xf32>, vector<128x128xf32> -> vector<128x128xf32>
    %129 = math.log %128 : vector<128x128xf32>
    %130 = vector.broadcast %124 : vector<128x1xf32> to vector<128x128xf32>
    %131 = arith.addf %129, %130 : vector<128x128xf32>
    %132 = vector.broadcast %55 : vector<1x128xf32> to vector<128x128xf32>
    %133 = arith.addf %131, %132 : vector<128x128xf32>
    %134 = vector.extract_strided_slice %0 {offsets = [4, 0, 0], sizes = [1, 128, 128], strides = [1, 1, 1]} : vector<8x128x128xf32> to vector<1x128x128xf32>
    %135 = vector.shape_cast %134 : vector<1x128x128xf32> to vector<128x128xf32>
    %136 = arith.addf %133, %135 : vector<128x128xf32>
    %137 = vector.extract_strided_slice %3 {offsets = [0, 4], sizes = [128, 1], strides = [1, 1]} : vector<128x8xf32> to vector<128x1xf32>
    %cst_33 = arith.constant 5.000000e-01 : f32
    %138 = vector.broadcast %cst_33 : f32 to vector<128x1xf32>
    %139 = arith.cmpf ogt, %137, %138 : vector<128x1xf32>
    %140 = vector.shape_cast %139 : vector<128x1xi1> to vector<128x1xi1>
    %141 = vector.broadcast %140 : vector<128x1xi1> to vector<128x128xi1>
    %142 = arith.select %141, %136, %122 : vector<128x128xi1>, vector<128x128xf32>
    %cst_34 = arith.constant dense<0xFF800000> : vector<128xf32>
    %143 = vector.multi_reduction <maximumf>, %142, %cst_34 [1] : vector<128x128xf32> to vector<128xf32>
    %144 = vector.shape_cast %143 : vector<128xf32> to vector<128x1xf32>
    %145 = vector.broadcast %144 : vector<128x1xf32> to vector<128x128xf32>
    %146 = arith.subf %142, %145 : vector<128x128xf32>
    %147 = math.exp %146 : vector<128x128xf32>
    %cst_35 = arith.constant dense<0.000000e+00> : vector<128x128xf32>
    %148 = tpu.matmul %147, %58, %cst_35 {dimension_numbers = #tpu.dot_dimension_numbers<[1], [0], [0], [1], [0, 0, 1, 1], [], []>} : vector<128x128xf32>, vector<128x128xf32>, vector<128x128xf32> -> vector<128x128xf32>
    %149 = math.log %148 : vector<128x128xf32>
    %150 = vector.broadcast %144 : vector<128x1xf32> to vector<128x128xf32>
    %151 = arith.addf %149, %150 : vector<128x128xf32>
    %152 = vector.broadcast %55 : vector<1x128xf32> to vector<128x128xf32>
    %153 = arith.addf %151, %152 : vector<128x128xf32>
    %154 = vector.extract_strided_slice %0 {offsets = [5, 0, 0], sizes = [1, 128, 128], strides = [1, 1, 1]} : vector<8x128x128xf32> to vector<1x128x128xf32>
    %155 = vector.shape_cast %154 : vector<1x128x128xf32> to vector<128x128xf32>
    %156 = arith.addf %153, %155 : vector<128x128xf32>
    %157 = vector.extract_strided_slice %3 {offsets = [0, 5], sizes = [128, 1], strides = [1, 1]} : vector<128x8xf32> to vector<128x1xf32>
    %cst_36 = arith.constant 5.000000e-01 : f32
    %158 = vector.broadcast %cst_36 : f32 to vector<128x1xf32>
    %159 = arith.cmpf ogt, %157, %158 : vector<128x1xf32>
    %160 = vector.shape_cast %159 : vector<128x1xi1> to vector<128x1xi1>
    %161 = vector.broadcast %160 : vector<128x1xi1> to vector<128x128xi1>
    %162 = arith.select %161, %156, %142 : vector<128x128xi1>, vector<128x128xf32>
    %cst_37 = arith.constant dense<0xFF800000> : vector<128xf32>
    %163 = vector.multi_reduction <maximumf>, %162, %cst_37 [1] : vector<128x128xf32> to vector<128xf32>
    %164 = vector.shape_cast %163 : vector<128xf32> to vector<128x1xf32>
    %165 = vector.broadcast %164 : vector<128x1xf32> to vector<128x128xf32>
    %166 = arith.subf %162, %165 : vector<128x128xf32>
    %167 = math.exp %166 : vector<128x128xf32>
    %cst_38 = arith.constant dense<0.000000e+00> : vector<128x128xf32>
    %168 = tpu.matmul %167, %58, %cst_38 {dimension_numbers = #tpu.dot_dimension_numbers<[1], [0], [0], [1], [0, 0, 1, 1], [], []>} : vector<128x128xf32>, vector<128x128xf32>, vector<128x128xf32> -> vector<128x128xf32>
    %169 = math.log %168 : vector<128x128xf32>
    %170 = vector.broadcast %164 : vector<128x1xf32> to vector<128x128xf32>
    %171 = arith.addf %169, %170 : vector<128x128xf32>
    %172 = vector.broadcast %55 : vector<1x128xf32> to vector<128x128xf32>
    %173 = arith.addf %171, %172 : vector<128x128xf32>
    %174 = vector.extract_strided_slice %0 {offsets = [6, 0, 0], sizes = [1, 128, 128], strides = [1, 1, 1]} : vector<8x128x128xf32> to vector<1x128x128xf32>
    %175 = vector.shape_cast %174 : vector<1x128x128xf32> to vector<128x128xf32>
    %176 = arith.addf %173, %175 : vector<128x128xf32>
    %177 = vector.extract_strided_slice %3 {offsets = [0, 6], sizes = [128, 1], strides = [1, 1]} : vector<128x8xf32> to vector<128x1xf32>
    %cst_39 = arith.constant 5.000000e-01 : f32
    %178 = vector.broadcast %cst_39 : f32 to vector<128x1xf32>
    %179 = arith.cmpf ogt, %177, %178 : vector<128x1xf32>
    %180 = vector.shape_cast %179 : vector<128x1xi1> to vector<128x1xi1>
    %181 = vector.broadcast %180 : vector<128x1xi1> to vector<128x128xi1>
    %182 = arith.select %181, %176, %162 : vector<128x128xi1>, vector<128x128xf32>
    %cst_40 = arith.constant dense<0xFF800000> : vector<128xf32>
    %183 = vector.multi_reduction <maximumf>, %182, %cst_40 [1] : vector<128x128xf32> to vector<128xf32>
    %184 = vector.shape_cast %183 : vector<128xf32> to vector<128x1xf32>
    %185 = vector.broadcast %184 : vector<128x1xf32> to vector<128x128xf32>
    %186 = arith.subf %182, %185 : vector<128x128xf32>
    %187 = math.exp %186 : vector<128x128xf32>
    %cst_41 = arith.constant dense<0.000000e+00> : vector<128x128xf32>
    %188 = tpu.matmul %187, %58, %cst_41 {dimension_numbers = #tpu.dot_dimension_numbers<[1], [0], [0], [1], [0, 0, 1, 1], [], []>} : vector<128x128xf32>, vector<128x128xf32>, vector<128x128xf32> -> vector<128x128xf32>
    %189 = math.log %188 : vector<128x128xf32>
    %190 = vector.broadcast %184 : vector<128x1xf32> to vector<128x128xf32>
    %191 = arith.addf %189, %190 : vector<128x128xf32>
    %192 = vector.broadcast %55 : vector<1x128xf32> to vector<128x128xf32>
    %193 = arith.addf %191, %192 : vector<128x128xf32>
    %194 = vector.extract_strided_slice %0 {offsets = [7, 0, 0], sizes = [1, 128, 128], strides = [1, 1, 1]} : vector<8x128x128xf32> to vector<1x128x128xf32>
    %195 = vector.shape_cast %194 : vector<1x128x128xf32> to vector<128x128xf32>
    %196 = arith.addf %193, %195 : vector<128x128xf32>
    %197 = vector.extract_strided_slice %3 {offsets = [0, 7], sizes = [128, 1], strides = [1, 1]} : vector<128x8xf32> to vector<128x1xf32>
    %cst_42 = arith.constant 5.000000e-01 : f32
    %198 = vector.broadcast %cst_42 : f32 to vector<128x1xf32>
    %199 = arith.cmpf ogt, %197, %198 : vector<128x1xf32>
    %200 = vector.shape_cast %199 : vector<128x1xi1> to vector<128x1xi1>
    %201 = vector.broadcast %200 : vector<128x1xi1> to vector<128x128xi1>
    %202 = arith.select %201, %196, %182 : vector<128x128xi1>, vector<128x128xf32>
    %203 = vector.broadcast %5 : vector<1x128xf32> to vector<128x128xf32>
    %204 = arith.addf %202, %203 : vector<128x128xf32>
    %cst_43 = arith.constant dense<0xFF800000> : vector<128xf32>
    %205 = vector.multi_reduction <maximumf>, %204, %cst_43 [1] : vector<128x128xf32> to vector<128xf32>
    %206 = vector.shape_cast %205 : vector<128xf32> to vector<128x1xf32>
    %207 = vector.broadcast %206 : vector<128x1xf32> to vector<128x128xf32>
    %208 = arith.subf %204, %207 : vector<128x128xf32>
    %209 = math.exp %208 : vector<128x128xf32>
    %cst_44 = arith.constant dense<0.000000e+00> : vector<128xf32>
    %210 = vector.multi_reduction <add>, %209, %cst_44 [1] : vector<128x128xf32> to vector<128xf32>
    %211 = math.log %210 : vector<128xf32>
    %212 = vector.shape_cast %206 : vector<128x1xf32> to vector<128xf32>
    %213 = arith.addf %211, %212 : vector<128xf32>
    %214 = arith.subf %53, %213 : vector<128xf32>
    %215 = vector.shape_cast %214 : vector<128xf32> to vector<1x128xf32>
    %c0_45 = arith.constant 0 : index
    %c0_46 = arith.constant 0 : index
    %216 = vector.load %arg8[%c0_45, %c0_46] : memref<1x128xf32, #tpu.memory_space<vmem>>, vector<1x128xf32>
    tpu.vector_store %arg8[%c0_45, %c0_46], %215 {strides = array<i32>} : memref<1x128xf32, #tpu.memory_space<vmem>>, vector<1x128xf32>,
    return
  }
  func.func @transform_0(%arg0: i32) -> (i32, i32, i32) {
    %c0_i32 = arith.constant 0 : i32
    %c0_i32_0 = arith.constant 0 : i32
    %c0_i32_1 = arith.constant 0 : i32
    return %c0_i32, %arg0, %c0_i32_0 : i32, i32, i32
  }
  func.func @transform_1(%arg0: i32) -> (i32, i32) {
    %c0_i32 = arith.constant 0 : i32
    %c0_i32_0 = arith.constant 0 : i32
    return %c0_i32, %arg0 : i32, i32
  }
  func.func @transform_2(%arg0: i32) -> (i32, i32) {
    %c0_i32 = arith.constant 0 : i32
    %c0_i32_0 = arith.constant 0 : i32
    return %c0_i32, %arg0 : i32, i32
  }
  func.func @transform_3(%arg0: i32) -> (i32, i32) {
    %c0_i32 = arith.constant 0 : i32
    %c0_i32_0 = arith.constant 0 : i32
    return %arg0, %c0_i32 : i32, i32
  }
  func.func @transform_4(%arg0: i32) -> (i32, i32) {
    %c0_i32 = arith.constant 0 : i32
    %c0_i32_0 = arith.constant 0 : i32
    %c0_i32_1 = arith.constant 0 : i32
    return %c0_i32, %c0_i32_0 : i32, i32
  }
  func.func @transform_5(%arg0: i32) -> (i32, i32) {
    %c0_i32 = arith.constant 0 : i32
    %c0_i32_0 = arith.constant 0 : i32
    %c0_i32_1 = arith.constant 0 : i32
    return %c0_i32, %c0_i32_0 : i32, i32
  }
  func.func @transform_6(%arg0: i32) -> (i32, i32) {
    %c0_i32 = arith.constant 0 : i32
    %c0_i32_0 = arith.constant 0 : i32
    %c0_i32_1 = arith.constant 0 : i32
    return %c0_i32, %c0_i32_0 : i32, i32
  }
  func.func @transform_7(%arg0: i32) -> (i32, i32) {
    %c0_i32 = arith.constant 0 : i32
    %c0_i32_0 = arith.constant 0 : i32
    return %c0_i32, %arg0 : i32, i32
  }
}

</mosaic_0001>

<bundles_post_ra>
// kernel: tpu_custom_call.1
= control target key start
LH: loop header
LB: loop body
LE: loop exit
PB: predicated region body
PF: predicated region fallthrough
CT: control target
= control target key end

     0   :  { %12 = vsyncpa [#allocation3], 0  ;;  %s16027_s0 = inlined_call_operand.hbm [shape: f32[8,128,128], index: 0, kind: input, shape index: {}]   ;;  %s16028_s1 = inlined_call_operand.vmem [shape: s32[8,128], index: 1, kind: input, shape index: {}]   ;;  %s16029_s2 = inlined_call_operand.vmem [shape: f32[8,128], index: 2, kind: input, shape index: {}]   ;;  %s16030_s3 = inlined_call_operand.vmem [shape: f32[128,8], index: 3, kind: input, shape index: {}]   ;;  %s16031_s4 = inlined_call_operand.vmem [shape: f32[1,128], index: 4, kind: input, shape index: {}]   ;;  %s16032_s5 = inlined_call_operand.vmem [shape: f32[1,128], index: 5, kind: input, shape index: {}]   ;;  %s16033_s6 = inlined_call_operand.vmem [shape: f32[128,128], index: 6, kind: input, shape index: {}]   ;;  %s16034_s7 = inlined_call_operand.hbm [shape: f32[1,128], index: 7, kind: output, shape index: {}]  }
   0x1   :  { %13 = vsyncpa [#allocation4], 0  ;;  %s9672_s24 = smov [#allocation2]   ;;  %s9624_s28 = scalar_lea.hbm %s16027_s0, 16384 }
   0x2   :  { %s19_s25 = sshll.u32 %s9672_s24, 4  ;;  %p9625_p0 = scmp.ne.s32.totalorder %s16027_s0, %s9624_s28  ;;  %s20_s25 = int_to_ptr.vmem [resolvable:$true] %s19_s25 }
   0x3   :  { %p9628_p1 = scmp.lt.u32.totalorder %s9624_s28, %s16027_s0 }
   0x5   :  { %p9630_p2 = pnand %p9628_p1, %p9625_p0 }
   0x7   :  { %9633 = shalt.err (!%p9630_p2)
}
   0x8   :  { %s9634_s10 = scalar_lea.vmem %s20_s25, 16384  ;;  %p9639_p4 = scmp.lt.s32.totalorder %s20_s25, %s20_s25 }
   0x9   :  { %p9635_p3 = scmp.ne.s32.totalorder %s20_s25, %s9634_s10  ;;  %p9640_p5 = scmp.lt.s32.totalorder %s9634_s10, %s9634_s10 }
   0xb   :  { %p9641_p6 = por %p9640_p5, %p9639_p4 }
   0xd   :  { %p9642_p7 = pnand %p9641_p6, %p9635_p3 }
   0xf   :  { %9645 = shalt.err (!%p9642_p7)
}
  0x10   :  { %s9673_s11 = smov 128   ;;  %s9674_s12 = smov 8  }
  0x11   :  { %25 = dma.hbm_to_vmem [thread:$0]  %s16027_s0, 16384, %s20_s25, [#allocation3], %s9673_s11, %s9673_s11, %s9674_s12  }
  0x12   :  { %9668 = dma.done.wait [#allocation3], 16384  }
  0x13   :  { %9669 = vsyncadd [#allocation3], 4294950912  ;;  %v41_v0 = vld [vmem:[#allocation2] sm:$0xff]  ;;  %v43_v2 = vld [vmem:[#allocation2 + $0x10] sm:$0xff] }
  0x14   :  { %v9741_v1 = vld [vmem:[%s16031_s4] ss:$0 sm:$0xff]  ;;  %v42_v5 = vld [vmem:[#allocation2 + $0x8] sm:$0xff]  ;;  %v44_v6 = vld [vmem:[#allocation2 + $0x18] sm:$0xff] }
  0x15   :  { %v9744_v3 = vadd.f32 %v9741_v1, %v41_v0  ;;  %v9747_v4 = vadd.f32 %v9741_v1, %v43_v2  ;;  %v9752_v7 = vadd.f32 %v9741_v1, %v42_v5  ;;  %v9755_v8 = vadd.f32 %v9741_v1, %v44_v6  ;;  %v45_v9 = vld [vmem:[#allocation2 + $0x20] sm:$0xff]  ;;  %v46_v10 = vld [vmem:[#allocation2 + $0x28] sm:$0xff]  ;;  %v47_v12 = vld [vmem:[#allocation2 + $0x30] sm:$0xff] }
  0x16   :  { %v9760_v11 = vld [vmem:[%s16033_s6] sm:$0xff]  ;;  %v48_v13 = vld [vmem:[#allocation2 + $0x38] sm:$0xff]  ;;  %v9765_v14 = vld [vmem:[%s16033_s6 + $0x8] sm:$0xff]  ;;  %v9780_v17 = vadd.f32 %v9741_v1, %v45_v9  ;;  %v9783_v18 = vadd.f32 %v9741_v1, %v46_v10  ;;  %v9859_v38 = vadd.f32 %v9741_v1, %v47_v12 }
  0x17   :  { %4414 = vmax.xlane.f32.xlu0 %v9744_v3  ;;  %4418 = vmax.xlane.f32.xlu1 %v9747_v4  ;;  %v9770_v15 = vld [vmem:[%s16033_s6 + $0x10] sm:$0xff]  ;;  %v9775_v16 = vld [vmem:[%s16033_s6 + $0x18] sm:$0xff]  ;;  %v9788_v19 = vld [vmem:[%s16033_s6 + $0x20] sm:$0xff]  ;;  %v9862_v39 = vadd.f32 %v9741_v1, %v48_v13 }
  0x18   :  { %v9793_v20 = vld [vmem:[%s16033_s6 + $0x28] sm:$0xff]  ;;  %v9798_v21 = vld [vmem:[%s16033_s6 + $0x30] sm:$0xff]  ;;  %v9803_v22 = vld [vmem:[%s16033_s6 + $0x38] sm:$0xff]  ;;  %v4329_v25 = vmax.f32 %v9760_v11, %v9788_v19 }
  0x19   :  { %v9808_v23 = vld [vmem:[%s16033_s6 + $0x40] sm:$0xff]  ;;  %v9813_v24 = vld [vmem:[%s16033_s6 + $0x48] sm:$0xff]  ;;  %v4330_v26 = vmax.f32 %v9765_v14, %v9793_v20  ;;  %v4331_v27 = vmax.f32 %v9770_v15, %v9798_v21  ;;  %v9824_v28 = vld [vmem:[%s16033_s6 + $0x50] sm:$0xff]  ;;  %v4332_v31 = vmax.f32 %v9775_v16, %v9803_v22 }
  0x1a   :  { %v9829_v29 = vld [vmem:[%s16033_s6 + $0x58] sm:$0xff]  ;;  %v9834_v30 = vld [vmem:[%s16033_s6 + $0x60] sm:$0xff]  ;;  %v9841_v32 = vld [vmem:[%s16033_s6 + $0x68] sm:$0xff]  ;;  %v4333_v35 = vmax.f32 %v4329_v25, %v9808_v23 }
  0x1b   :  { %4416 = vmax.xlane.f32.xlu0 %v9752_v7  ;;  %4420 = vmax.xlane.f32.xlu1 %v9755_v8  ;;  %v9846_v33 = vld [vmem:[%s16033_s6 + $0x70] sm:$0xff]  ;;  %v9851_v34 = vld [vmem:[%s16033_s6 + $0x78] sm:$0xff]  ;;  %v4334_v36 = vmax.f32 %v4330_v26, %v9813_v24  ;;  %v4335_v37 = vmax.f32 %v4331_v27, %v9824_v28  ;;  %v4336_v40 = vmax.f32 %v4332_v31, %v9829_v29  ;;  %v49_v41 = vld [vmem:[#allocation2 + $0x40] sm:$0xff] }
  0x1c   :  { %v50_v42 = vld [vmem:[#allocation2 + $0x48] sm:$0xff]  ;;  %v4337_v43 = vmax.f32 %v4333_v35, %v9834_v30  ;;  %v9872_v48 = vadd.f32 %v9741_v1, %v49_v41  ;;  %v51_v51 = vld [vmem:[#allocation2 + $0x50] sm:$0xff]  ;;  %v52_v52 = vld [vmem:[#allocation2 + $0x58] sm:$0xff] }
  0x1d   :  { %v4338_v44 = vmax.f32 %v4334_v36, %v9841_v32  ;;  %v4339_v45 = vmax.f32 %v4335_v37, %v9846_v33  ;;  %v4340_v46 = vmax.f32 %v4336_v40, %v9851_v34  ;;  %v9875_v49 = vadd.f32 %v9741_v1, %v50_v42  ;;  %v53_v57 = vld [vmem:[#allocation2 + $0x60] sm:$0xff]  ;;  %v54_v58 = vld [vmem:[#allocation2 + $0x68] sm:$0xff]  ;;  %v55_v63 = vld [vmem:[#allocation2 + $0x70] sm:$0xff] }
  0x1e   :  { %v9880_v54 = vadd.f32 %v9741_v1, %v51_v51  ;;  %v9883_v55 = vadd.f32 %v9741_v1, %v52_v52  ;;  %v9888_v60 = vadd.f32 %v9741_v1, %v53_v57  ;;  %v9891_v61 = vadd.f32 %v9741_v1, %v54_v58  ;;  %v56_v0 = vld [vmem:[#allocation2 + $0x78] sm:$0xff] }
  0x1f   :  { %4422 = vmax.xlane.f32.xlu0 %v9780_v17  ;;  %4424 = vmax.xlane.f32.xlu1 %v9783_v18  ;;  %v4341_v47 = vmax.f32 %v4337_v43, %v4338_v44  ;;  %v4342_v50 = vmax.f32 %v4339_v45, %v4340_v46  ;;  %v9896_v5 = vadd.f32 %v9741_v1, %v55_v63 }
  0x20   :  { %v9899_v6 = vadd.f32 %v9741_v1, %v56_v0 }
  0x21   :  { %v4343_v53 = vmax.f32 %v4341_v47, %v4342_v50 }
  0x23   :  { %4426 = vmax.xlane.f32.xlu0 %v9859_v38  ;;  %4428 = vmax.xlane.f32.xlu1 %v9862_v39  ;;  %v4344_v56 = vrot.slane %v4343_v53, 4 }
  0x25   :  { %v4345_v59 = vmax.f32 %v4343_v53, %v4344_v56 }
  0x27   :  { %4430 = vmax.xlane.f32.xlu0 %v9872_v48  ;;  %4432 = vmax.xlane.f32.xlu1 %v9875_v49  ;;  %v4346_v62 = vrot.slane %v4345_v59, 2 }
  0x29   :  { %v4347_v2 = vmax.f32 %v4345_v59, %v4346_v62 }
  0x2b   :  { %4434 = vmax.xlane.f32.xlu0 %v9880_v54  ;;  %4436 = vmax.xlane.f32.xlu1 %v9883_v55  ;;  %v4348_v9 = vrot.slane %v4347_v2, 1 }
  0x2d   :  { %v9901_v10 = vmax.f32 %v4347_v2, %v4348_v9 }
  0x2f   :  { %4438 = vmax.xlane.f32.xlu0 %v9888_v60  ;;  %4440 = vmax.xlane.f32.xlu1 %v9891_v61  ;;  %16658 = vst [vmem:[#allocation8_spill] sm:$0xff] %v9901_v10  ;;  %v4350_v12 = vsub.f32 %v9760_v11, %v9901_v10  ;;  %v4351_v13 = vsub.f32 %v9765_v14, %v9901_v10 }
  0x30   :  { %v4352_v25 = vsub.f32 %v9770_v15, %v9901_v10  ;;  %v4353_v1 = vsub.f32 %v9775_v16, %v9901_v10  ;;  %v4354_v26 = vsub.f32 %v9788_v19, %v9901_v10  ;;  %v4355_v27 = vsub.f32 %v9793_v20, %v9901_v10 }
  0x31   :  { %v4366_v31 = vmul.f32 1.442695, %v4350_v12  ;;  %v4368_v35 = vmul.f32 1.442695, %v4351_v13  ;;  %v4356_v37 = vsub.f32 %v9798_v21, %v9901_v10  ;;  %v4357_v41 = vsub.f32 %v9803_v22, %v9901_v10 }
  0x32   :  { %v4370_v36 = vmul.f32 1.442695, %v4352_v25  ;;  %v4372_v40 = vmul.f32 1.442695, %v4353_v1  ;;  %v4374_v42 = vmul.f32 1.442695, %v4354_v26  ;;  %v4358_v19 = vsub.f32 %v9808_v23, %v9901_v10 }
  0x33   :  { %4442 = vmax.xlane.f32.xlu0 %v9896_v5  ;;  %4444 = vmax.xlane.f32.xlu1 %v9899_v6  ;;  %8969 = vpow2.f32 %v4366_v31  ;;  %v4376_v43 = vmul.f32 1.442695, %v4355_v27  ;;  %v4378_v44 = vmul.f32 1.442695, %v4356_v37  ;;  %v4380_v20 = vmul.f32 1.442695, %v4357_v41 }
  0x34   :  { %8971 = vpow2.f32 %v4368_v35  ;;  %v4359_v45 = vsub.f32 %v9813_v24, %v9901_v10  ;;  %v4382_v21 = vmul.f32 1.442695, %v4358_v19  ;;  %v4360_v22 = vsub.f32 %v9824_v28, %v9901_v10  ;;  %v172_v37 = vld [vmem:[%s16030_s3 + $0x8] sm:$0xff] }
  0x35   :  { %8973 = vpow2.f32 %v4370_v36  ;;  %v4361_v47 = vsub.f32 %v9829_v29, %v9901_v10  ;;  %v4362_v51 = vsub.f32 %v9834_v30, %v9901_v10  ;;  %v4363_v53 = vsub.f32 %v9841_v32, %v9901_v10 }
  0x36   :  { %8975 = vpow2.f32 %v4372_v40  ;;  %v4384_v46 = vmul.f32 1.442695, %v4359_v45  ;;  %v4386_v23 = vmul.f32 1.442695, %v4360_v22  ;;  %v4364_v30 = vsub.f32 %v9846_v33, %v9901_v10  ;;  %v173_v40 = vld [vmem:[%s16030_s3 + $0x10] sm:$0xff]  ;;  %v171_v45 = vld [vmem:[%s16030_s3] sm:$0xff] }
  0x37   :  { %8977 = vpow2.f32 %v4374_v42  ;;  %v4388_v24 = vmul.f32 1.442695, %v4361_v47  ;;  %v4390_v59 = vmul.f32 1.442695, %v4362_v51  ;;  %v4392_v63 = vmul.f32 1.442695, %v4363_v53 }
  0x38   :  { %8979 = vpow2.f32 %v4376_v43  ;;  %v4365_v32 = vsub.f32 %v9851_v34, %v9901_v10  ;;  %v4394_v12 = vmul.f32 1.442695, %v4364_v30  ;;  %v9675_v41 = vmov 1   ;;  %v175_v47 = vld [vmem:[%s16030_s3 + $0x20] sm:$0xff]  ;;  %v182_v51 = vld [vmem:[%s16030_s3 + $0x58] sm:$0xff]  ;;  %v176_v53 = vld [vmem:[%s16030_s3 + $0x28] sm:$0xff] }
  0x39   :  { %8981 = vpow2.f32 %v4378_v44  ;;  %8954 = vset.pattern.permute.xlu1 %v9675_v41  ;;  %vm4720_vm0 = vcmp.gt.f32.partialorder %v172_v37, 0.5  ;;  %vm4721_vm1 = vcmp.gt.f32.partialorder %v173_v40, 0.5  ;;  %8953 = vset.pattern.permute.xlu0 %v9675_v41  ;;  %v16035_v42 = vmov 0   ;;  %v174_v44 = vld [vmem:[%s16030_s3 + $0x18] sm:$0xff] }
  0x3a   :  { %8983 = vpow2.f32 %v4380_v20  ;;  %v4396_v33 = vmul.f32 1.442695, %v4365_v32  ;;  %v9966_v43 = vsel %vm4720_vm0, 1, %v16035_v42  ;;  %v9979_v22 = vsel %vm4721_vm1, 1, %v16035_v42  ;;  %v186_v30 = vld [vmem:[%s16030_s3 + $0x78] sm:$0xff] }
  0x3b   :  { %8985 = vpow2.f32 %v4382_v21  ;;  %16665 = vst [vmem:[#allocation15_spill] sm:$0xff] %v9966_v43  ;;  %16667 = vst [vmem:[#allocation17_spill] sm:$0xff] %v9979_v22  ;;  %vm4722_vm2 = vcmp.gt.f32.partialorder %v174_v44, 0.5  ;;  %vm4719_vm3 = vcmp.gt.f32.partialorder %v171_v45, 0.5  ;;  %vm4723_vm5 = vcmp.gt.f32.partialorder %v175_v47, 0.5  ;;  %v178_v32 = vld [vmem:[%s16030_s3 + $0x38] sm:$0xff] }
  0x3c   :  { %8987 = vpow2.f32 %v4384_v46  ;;  %v180_v46 = vld [vmem:[%s16030_s3 + $0x48] sm:$0xff]  ;;  %vm4730_vm6 = vcmp.gt.f32.partialorder %v182_v51, 0.5  ;;  %vm4724_vm7 = vcmp.gt.f32.partialorder %v176_v53, 0.5  ;;  %vm4734_vm10 = vcmp.gt.f32.partialorder %v186_v30, 0.5 }
  0x3d   :  { %v8970_v50 = vpop.eup %8969  ;;  %8989 = vpow2.f32 %v4386_v23  ;;  %vm4728_vm4 = vcmp.gt.f32.partialorder %v180_v46, 0.5  ;;  %vm4726_vm11 = vcmp.gt.f32.partialorder %v178_v32, 0.5 }
  0x3e   :  { %v8972_v52 = vpop.eup %8971  ;;  %8991 = vpow2.f32 %v4388_v24  ;;  %v10003_v24 = vsel %vm4728_vm4, 1, %v16035_v42 }
  0x3f   :  { %v8974_v56 = vpop.eup %8973  ;;  %v9933_v57 = vpack.c.bf16 %v8972_v52, %v8970_v50  ;;  %8993 = vpow2.f32 %v4390_v59  ;;  %v9989_v50 = vsel %vm4719_vm3, 1, %v16035_v42  ;;  %v9999_v52 = vsel %vm4722_vm2, 1, %v16035_v42  ;;  %16671 = vst [vmem:[#allocation21_spill] sm:$0xff] %v10003_v24  ;;  %v177_v59 = vld [vmem:[%s16030_s3 + $0x30] sm:$0xff] }
  0x40   :  { %v8976_v28 = vpop.eup %8975  ;;  %8995 = vpow2.f32 %v4392_v63  ;;  %16668 = vst [vmem:[#allocation18_spill] sm:$0xff] %v9989_v50  ;;  %16670 = vst [vmem:[#allocation20_spill] sm:$0xff] %v9999_v52  ;;  %vm4725_vm9 = vcmp.gt.f32.partialorder %v177_v59, 0.5 }
  0x41   :  { %16659 = vst [vmem:[#allocation9_spill] sm:$0xff] %v9933_v57  ;;  %v8978_v58 = vpop.eup %8977  ;;  %8714 = vmatprep.subr.bf16.mxu1 %v9933_v57  ;;  %v9936_v29 = vpack.c.bf16 %v8976_v28, %v8974_v56  ;;  %8997 = vpow2.f32 %v4394_v12  ;;  %v184_v56 = vld [vmem:[%s16030_s3 + $0x68] sm:$0xff]  ;;  %v10015_v28 = vsel %vm4723_vm5, 1, %v16035_v42  ;;  %v179_v12 = vld [vmem:[%s16030_s3 + $0x40] sm:$0xff] }
  0x42   :  { %v8980_v62 = vpop.eup %8979  ;;  %8716 = vmatpush3.bf16.msra.mxu1 %v9933_v57  ;;  %8999 = vpow2.f32 %v4396_v33  ;;  %16672 = vst [vmem:[#allocation22_spill] sm:$0xff] %v10015_v28  ;;  %vm4732_vm8 = vcmp.gt.f32.partialorder %v184_v56, 0.5  ;;  %v10053_v33 = vsel %vm4726_vm11, 1, %v16035_v42  ;;  %vm4727_vm12 = vcmp.gt.f32.partialorder %v179_v12, 0.5 }
  0x43   :  { %16660 = vst [vmem:[#allocation10_spill] sm:$0xff] %v9936_v29  ;;  %v8982_v0 = vpop.eup %8981  ;;  %8718 = vmatprep.subr.bf16.mxu1 %v9936_v29  ;;  %v9944_v2 = vpack.c.bf16 %v8980_v62, %v8978_v58  ;;  %v10019_v58 = vsel %vm4730_vm6, 1, %v16035_v42  ;;  %v10031_v62 = vsel %vm4724_vm7, 1, %v16035_v42  ;;  %v10035_v63 = vsel %vm4732_vm8, 1, %v16035_v42  ;;  %16678 = vst [vmem:[#allocation28_spill] sm:$0xff] %v10053_v33 }
  0x44   :  { %v8984_v9 = vpop.eup %8983  ;;  %4755 = vperm.xlu1 %8954, %v9966_v43   ;;  %16673 = vst [vmem:[#allocation23_spill] sm:$0xff] %v10019_v58  ;;  %16674 = vst [vmem:[#allocation24_spill] sm:$0xff] %v10031_v62 }
  0x45   :  { %16661 = vst [vmem:[#allocation11_spill] sm:$0xff] %v9944_v2  ;;  %v8986_v13 = vpop.eup %8985  ;;  %v9948_v25 = vpack.c.bf16 %v8984_v9, %v8982_v0  ;;  %16675 = vst [vmem:[#allocation25_spill] sm:$0xff] %v10035_v63  ;;  %v10042_v0 = vsel %vm4725_vm9, 1, %v16035_v42  ;;  %v10046_v9 = vsel %vm4734_vm10, 1, %v16035_v42 }
  0x46   :  { %8720 = vmatpush3.bf16.msra.mxu1 %v9936_v29  ;;  %v8988_v1 = vpop.eup %8987  ;;  %16676 = vst [vmem:[#allocation26_spill] sm:$0xff] %v10042_v0  ;;  %16677 = vst [vmem:[#allocation27_spill] sm:$0xff] %v10046_v9 }
  0x47   :  { %8722 = vmatprep.subr.bf16.mxu1 %v9944_v2  ;;  %16662 = vst [vmem:[#allocation12_spill] sm:$0xff] %v9948_v25  ;;  %v8990_v34 = vpop.eup %8989  ;;  %v9952_v26 = vpack.c.bf16 %v8988_v1, %v8986_v13  ;;  %v181_v13 = vld [vmem:[%s16030_s3 + $0x50] sm:$0xff]  ;;  %v10061_v1 = vsel %vm4727_vm12, 1, %v16035_v42 }
  0x48   :  { %v8992_v27 = vpop.eup %8991  ;;  %4758 = vperm.xlu1 %8954, %v9979_v22   ;;  %16679 = vst [vmem:[#allocation29_spill] sm:$0xff] %v10061_v1  ;;  %vm4729_vm13 = vcmp.gt.f32.partialorder %v181_v13, 0.5 }
  0x49   :  { %16663 = vst [vmem:[#allocation13_spill] sm:$0xff] %v9952_v26  ;;  %v8994_v31 = vpop.eup %8993  ;;  %v9956_v35 = vpack.c.bf16 %v8992_v27, %v8990_v34  ;;  %4752 = vperm.xlu0 %8953, %v9989_v50   ;;  %v183_v34 = vld [vmem:[%s16030_s3 + $0x60] sm:$0xff]  ;;  %v10068_v27 = vsel %vm4729_vm13, 1, %v16035_v42 }
  0x4a   :  { %8724 = vmatpush3.bf16.msra.mxu1 %v9944_v2  ;;  %v8996_v36 = vpop.eup %8995  ;;  %16680 = vst [vmem:[#allocation30_spill] sm:$0xff] %v10068_v27  ;;  %vm4731_vm14 = vcmp.gt.f32.partialorder %v183_v34, 0.5 }
  0x4b   :  { %8726 = vmatprep.subr.bf16.mxu1 %v9948_v25  ;;  %16664 = vst [vmem:[#allocation14_spill] sm:$0xff] %v9956_v35  ;;  %v8998_v19 = vpop.eup %8997  ;;  %v9972_v20 = vpack.c.bf16 %v8996_v36, %v8994_v31  ;;  %v185_v31 = vld [vmem:[%s16030_s3 + $0x70] sm:$0xff]  ;;  %v10075_v36 = vsel %vm4731_vm14, 1, %v16035_v42 }
  0x4c   :  { %v9000_v21 = vpop.eup %8999  ;;  %4761 = vperm.xlu1 %8954, %v9999_v52   ;;  %16681 = vst [vmem:[#allocation31_spill] sm:$0xff] %v10075_v36  ;;  %vm4733_vm15 = vcmp.gt.f32.partialorder %v185_v31, 0.5 }
  0x4d   :  { %16666 = vst [vmem:[#allocation16_spill] sm:$0xff] %v9972_v20  ;;  %v9992_v23 = vpack.c.bf16 %v9000_v21, %v8998_v19  ;;  %4779 = vperm.xlu0 %8953, %v10003_v24   ;;  %v10079_v37 = vsel %vm4733_vm15, 1, %v16035_v42  ;;  %v58_v24 = vld [vmem:[#allocation2 + $0x88] sm:$0xff] }
  0x4e   :  { %8728 = vmatpush3.bf16.msra.mxu1 %v9948_v25  ;;  %16682 = vst [vmem:[#allocation32_spill] sm:$0xff] %v10079_v37 }
  0x4f   :  { %8730 = vmatprep.subr.bf16.mxu1 %v9952_v26  ;;  %16669 = vst [vmem:[#allocation19_spill] sm:$0xff] %v9992_v23 }
  0x50   :  { %4764 = vperm.xlu1 %8954, %v10015_v28  }
  0x51   :  { %4785 = vperm.xlu0 %8953, %v10019_v58  }
  0x52   :  { %8732 = vmatpush3.bf16.msra.mxu1 %v9952_v26 }
  0x53   :  { %8734 = vmatprep.subr.bf16.mxu1 %v9956_v35 }
  0x54   :  { %4767 = vperm.xlu1 %8954, %v10031_v62  }
  0x55   :  { %4791 = vperm.xlu0 %8953, %v10035_v63  }
  0x56   :  { %8736 = vmatpush3.bf16.msra.mxu1 %v9956_v35 }
  0x57   :  { %8738 = vmatprep.subr.bf16.mxu1 %v9972_v20 }
  0x58   :  { %4770 = vperm.xlu1 %8954, %v10042_v0   ;;  %v57_v0 = vld [vmem:[#allocation2 + $0x80] sm:$0xff] }
  0x59   :  { %4797 = vperm.xlu0 %8953, %v10046_v9  }
  0x5a   :  { %8740 = vmatpush3.bf16.msra.mxu1 %v9972_v20 }
  0x5b   :  { %8742 = vmatprep.subr.bf16.mxu1 %v9992_v23 }
  0x5c   :  { %4773 = vperm.xlu1 %8954, %v10053_v33  }
  0x5e   :  { %8744 = vmatpush3.bf16.msra.mxu1 %v9992_v23 }
  0x5f   :  { %8746 = vmatprep.subr.bf16.mxu1 %v9933_v57 }
  0x60   :  { %4776 = vperm.xlu1 %8954, %v10061_v1  }
  0x64   :  { %4782 = vperm.xlu1 %8954, %v10068_v27  }
  0x68   :  { %4788 = vperm.xlu1 %8954, %v10075_v36  }
  0x6c   :  { %4794 = vperm.xlu1 %8954, %v10079_v37  }
  0xa4   :  { %v10082_v40 = vpop.xlane.xlu0 %4414  ;;  %v10084_v41 = vpop.xlane.xlu1 %4418 }
  0xa5   :  { %v4448_v44 = vsub.f32 %v9747_v4, %v10084_v41  ;;  %v4446_v19 = vsub.f32 %v9744_v3, %v10082_v40 }
  0xa7   :  { %v4462_v45 = vmul.f32 1.442695, %v4446_v19  ;;  %v4466_v21 = vmul.f32 1.442695, %v4448_v44 }
  0xa8   :  { %v10090_v46 = vpop.xlane.xlu0 %4416  ;;  %v10092_v47 = vpop.xlane.xlu1 %4420 }
  0xa9   :  { %v4447_v51 = vsub.f32 %v9752_v7, %v10090_v46  ;;  %v4449_v53 = vsub.f32 %v9755_v8, %v10092_v47  ;;  %9001 = vpow2.f32 %v4462_v45 }
  0xaa   :  { %9003 = vpow2.f32 %v4466_v21 }
  0xab   :  { %v4464_v56 = vmul.f32 1.442695, %v4447_v51  ;;  %v4468_v59 = vmul.f32 1.442695, %v4449_v53 }
  0xac   :  { %v10098_v30 = vpop.xlane.xlu0 %4422  ;;  %v10100_v32 = vpop.xlane.xlu1 %4424 }
  0xad   :  { %9005 = vpow2.f32 %v4464_v56  ;;  %v4450_v12 = vsub.f32 %v9780_v17, %v10098_v30  ;;  %v4451_v13 = vsub.f32 %v9783_v18, %v10100_v32 }
  0xae   :  { %9007 = vpow2.f32 %v4468_v59 }
  0xaf   :  { %v4470_v34 = vmul.f32 1.442695, %v4450_v12  ;;  %v4472_v31 = vmul.f32 1.442695, %v4451_v13 }
  0xb0   :  { %v10106_v44 = vpop.xlane.xlu0 %4426  ;;  %v10108_v19 = vpop.xlane.xlu1 %4428 }
  0xb1   :  { %9009 = vpow2.f32 %v4470_v34  ;;  %v4452_v45 = vsub.f32 %v9859_v38, %v10106_v44  ;;  %v4453_v21 = vsub.f32 %v9862_v39, %v10108_v19 }
  0xb2   :  { %9011 = vpow2.f32 %v4472_v31 }
  0xb3   :  { %v4474_v51 = vmul.f32 1.442695, %v4452_v45  ;;  %v4476_v53 = vmul.f32 1.442695, %v4453_v21  ;;  %v9002_v56 = vpop.eup %9001 }
  0xb4   :  { %v10114_v42 = vpop.xlane.xlu0 %4430  ;;  %v10116_v59 = vpop.xlane.xlu1 %4432  ;;  %8321 = vmatprep.mubr.f32.mxu1 %v9002_v56 }
  0xb5   :  { %9013 = vpow2.f32 %v4474_v51  ;;  %v4454_v12 = vsub.f32 %v9872_v48, %v10114_v42  ;;  %v4455_v13 = vsub.f32 %v9875_v49, %v10116_v59  ;;  %v9004_v34 = vpop.eup %9003 }
  0xb6   :  { %9015 = vpow2.f32 %v4476_v53 }
  0xb7   :  { %v9006_v9 = vpop.eup %9005  ;;  %v4478_v37 = vmul.f32 1.442695, %v4454_v12  ;;  %v4480_v31 = vmul.f32 1.442695, %v4455_v13 }
  0xb8   :  { %8322 = vmatmul.mubr.f32.vlgmr.msra.gmra.mrb[0].mxu1 %v9006_v9  ;;  %v10122_v45 = vpop.xlane.xlu0 %4434  ;;  %v10124_v21 = vpop.xlane.xlu1 %4436 }
  0xb9   :  { %v9008_v63 = vpop.eup %9007  ;;  %9017 = vpow2.f32 %v4478_v37  ;;  %8324 = vmatprep.mubr.f32.mxu1 %v9004_v34  ;;  %v4456_v51 = vsub.f32 %v9880_v54, %v10122_v45  ;;  %v4457_v56 = vsub.f32 %v9883_v55, %v10124_v21  ;;  %8748 = vmatpush3.bf16.msra.mxu1 %v9933_v57 }
  0xba   :  { %8750 = vmatprep.subr.bf16.mxu1 %v9936_v29  ;;  %9019 = vpow2.f32 %v4480_v31 }
  0xbb   :  { %v9010_v53 = vpop.eup %9009  ;;  %v4482_v9 = vmul.f32 1.442695, %v4456_v51  ;;  %v4484_v12 = vmul.f32 1.442695, %v4457_v56 }
  0xbc   :  { %8325 = vmatmul.mubr.f32.gmra.mrb[2].mxu1 %v9008_v63  ;;  %v10132_v13 = vpop.xlane.xlu0 %4438  ;;  %v10134_v36 = vpop.xlane.xlu1 %4440 }
  0xbd   :  { %v9012_v37 = vpop.eup %9011  ;;  %9021 = vpow2.f32 %v4482_v9  ;;  %8327 = vmatprep.mubr.f32.mxu1 %v9010_v53  ;;  %v4458_v34 = vsub.f32 %v9888_v60, %v10132_v13  ;;  %v4459_v58 = vsub.f32 %v9891_v61, %v10134_v36  ;;  %8752 = vmatpush3.bf16.msra.mxu1 %v9936_v29 }
  0xbe   :  { %8754 = vmatprep.subr.bf16.mxu1 %v9944_v2  ;;  %9023 = vpow2.f32 %v4484_v12 }
  0xbf   :  { %v9014_v31 = vpop.eup %9013  ;;  %v4486_v63 = vmul.f32 1.442695, %v4458_v34  ;;  %v4488_v51 = vmul.f32 1.442695, %v4459_v58 }
  0xc0   :  { %8328 = vmatmul.mubr.f32.gmra.mrb[4].mxu1 %v9012_v37  ;;  %v10142_v56 = vpop.xlane.xlu0 %4442  ;;  %v10144_v27 = vpop.xlane.xlu1 %4444 }
  0xc1   :  { %v9016_v53 = vpop.eup %9015  ;;  %9025 = vpow2.f32 %v4486_v63  ;;  %8330 = vmatprep.mubr.f32.mxu1 %v9014_v31  ;;  %v4460_v9 = vsub.f32 %v9896_v5, %v10142_v56  ;;  %v4461_v29 = vsub.f32 %v9899_v6, %v10144_v27  ;;  %8756 = vmatpush3.bf16.msra.mxu1 %v9944_v2 }
  0xc2   :  { %8758 = vmatprep.subr.bf16.mxu1 %v9948_v25  ;;  %9027 = vpow2.f32 %v4488_v51 }
  0xc3   :  { %v9018_v12 = vpop.eup %9017  ;;  %v4490_v58 = vmul.f32 1.442695, %v4460_v9  ;;  %v4492_v37 = vmul.f32 1.442695, %v4461_v29 }
  0xc4   :  { %8331 = vmatmul.mubr.f32.gmra.mrb[6].mxu1 %v9016_v53  ;;  %v9020_v34 = vpop.eup %9019 }
  0xc5   :  { %9029 = vpow2.f32 %v4490_v58  ;;  %8333 = vmatprep.mubr.f32.mxu1 %v9018_v12  ;;  %8760 = vmatpush3.bf16.msra.mxu1 %v9948_v25  ;;  %v4756_v12 = vpop.permute.xlu1 %4755 }
  0xc6   :  { %8762 = vmatprep.subr.bf16.mxu1 %v9952_v26  ;;  %9031 = vpow2.f32 %v4492_v37  ;;  %vm4800_vm1 = vcmp.eq.s32.totalorder %v4756_v12, 1 }
  0xc7   :  { %v9022_v31 = vpop.eup %9021 }
  0xc8   :  { %8334 = vmatmul.mubr.f32.gmra.mrb[8].mxu1 %v9020_v34  ;;  %v9024_v63 = vpop.eup %9023 }
  0xc9   :  { %8336 = vmatprep.mubr.f32.mxu1 %v9022_v31  ;;  %8764 = vmatpush3.bf16.msra.mxu1 %v9952_v26  ;;  %v10162_v58 = vpop.permute.xlu1 %4758 }
  0xca   :  { %8766 = vmatprep.subr.bf16.mxu1 %v9956_v35  ;;  %vm4801_vm3 = vcmp.eq.s32.totalorder %v10162_v58, 1 }
  0xcb   :  { %v9026_v51 = vpop.eup %9025 }
  0xcc   :  { %8337 = vmatmul.mubr.f32.gmra.mrb[10].mxu1 %v9024_v63  ;;  %v9028_v29 = vpop.eup %9027 }
  0xcd   :  { %8339 = vmatprep.mubr.f32.mxu1 %v9026_v51  ;;  %8768 = vmatpush3.bf16.msra.mxu1 %v9956_v35  ;;  %v10164_v37 = vpop.permute.xlu1 %4761 }
  0xce   :  { %8770 = vmatprep.subr.bf16.mxu1 %v9972_v20  ;;  %vm4802_vm2 = vcmp.eq.s32.totalorder %v10164_v37, 1 }
  0xcf   :  { %v9030_v53 = vpop.eup %9029 }
  0xd0   :  { %8340 = vmatmul.mubr.f32.gmra.mrb[12].mxu1 %v9028_v29  ;;  %v9032_v9 = vpop.eup %9031 }
  0xd1   :  { %8342 = vmatprep.mubr.f32.mxu1 %v9030_v53  ;;  %8772 = vmatpush3.bf16.msra.mxu1 %v9972_v20  ;;  %v10166_v63 = vpop.permute.xlu1 %4764 }
  0xd2   :  { %8774 = vmatprep.subr.bf16.mxu1 %v9992_v23  ;;  %vm4803_vm5 = vcmp.eq.s32.totalorder %v10166_v63, 1 }
  0xd4   :  { %8343 = vmatmul.mubr.f32.gmra.mrb[14].mxu1 %v9032_v9 }
  0xd5   :  { %8776 = vmatpush3.bf16.msra.mxu1 %v9992_v23  ;;  %v10168_v9 = vpop.permute.xlu1 %4767 }
  0xd6   :  { %8778 = vmatprep.subr.bf16.mxu1 %v9933_v57  ;;  %vm4804_vm4 = vcmp.eq.s32.totalorder %v10168_v9, 1 }
 0x18b   :  { %v8323_v34 = vpop.f32.mrb[0].mxu1 }
 0x18c   :  { %9033 = vlog2.f32 %v8323_v34  ;;  %v4560_v31 = vpop.f32.mrb[1].mxu1 }
 0x18d   :  { %9035 = vlog2.f32 %v4560_v31 }
 0x18f   :  { %v8326_v51 = vpop.f32.mrb[2].mxu1 }
 0x190   :  { %9037 = vlog2.f32 %v8326_v51  ;;  %v4570_v29 = vpop.f32.mrb[3].mxu1  ;;  %v10171_v51 = vpop.permute.xlu1 %4770 }
 0x191   :  { %9039 = vlog2.f32 %v4570_v29  ;;  %vm4805_vm7 = vcmp.eq.s32.totalorder %v10171_v51, 1 }
 0x193   :  { %v8329_v53 = vpop.f32.mrb[4].mxu1 }
 0x194   :  { %9041 = vlog2.f32 %v8329_v53  ;;  %v4580_v23 = vpop.f32.mrb[5].mxu1  ;;  %v10182_v22 = vpop.permute.xlu1 %4773 }
 0x195   :  { %9043 = vlog2.f32 %v4580_v23  ;;  %vm4806_vm6 = vcmp.eq.s32.totalorder %v10182_v22, 1 }
 0x196   :  { %v9034_v20 = vpop.eup %9033 }
 0x197   :  { %v9036_v35 = vpop.eup %9035  ;;  %v4642_v26 = vmul.f32 0.6931472, %v9034_v20  ;;  %v8332_v25 = vpop.f32.mrb[6].mxu1 }
 0x198   :  { %v4640_v2 = vmul.f32 0.6931472, %v9036_v35  ;;  %9045 = vlog2.f32 %v8332_v25  ;;  %v4590_v34 = vpop.f32.mrb[7].mxu1  ;;  %v4753_v35 = vpop.permute.xlu0 %4752 }
 0x199   :  { %v4672_v31 = vadd.f32 %v4642_v26, %v10090_v46  ;;  %9047 = vlog2.f32 %v4590_v34  ;;  %vm4799_vm0 = vcmp.eq.s32.totalorder %v4753_v35, 1 }
 0x19a   :  { %v9038_v57 = vpop.eup %9037  ;;  %v4671_v29 = vadd.f32 %v4640_v2, %v10082_v40 }
 0x19b   :  { %v9040_v1 = vpop.eup %9039  ;;  %v4688_v53 = vadd.f32 %v4672_v31, %v9901_v10  ;;  %v4646_v23 = vmul.f32 0.6931472, %v9038_v57  ;;  %v8335_v33 = vpop.f32.mrb[8].mxu1  ;;  %v60_v31 = vld [vmem:[#allocation2 + $0x98] sm:$0xff] }
 0x19c   :  { %v4687_v20 = vadd.f32 %v4671_v29, %v9901_v10  ;;  %v4644_v25 = vmul.f32 0.6931472, %v9040_v1  ;;  %9049 = vlog2.f32 %v8335_v33  ;;  %v4600_v62 = vpop.f32.mrb[9].mxu1  ;;  %v59_v33 = vld [vmem:[#allocation2 + $0x90] sm:$0xff] }
 0x19d   :  { %v4674_v26 = vadd.f32 %v4646_v23, %v10092_v47  ;;  %9051 = vlog2.f32 %v4600_v62  ;;  %v4704_v46 = vadd.f32 %v4688_v53, %v58_v24 }
 0x19e   :  { %v9042_v34 = vpop.eup %9041  ;;  %v4673_v2 = vadd.f32 %v4644_v25, %v10084_v41  ;;  %v4703_v40 = vadd.f32 %v4687_v20, %v57_v0  ;;  %v62_v20 = vld [vmem:[#allocation2 + $0xa8] sm:$0xff] }
 0x19f   :  { %v9044_v57 = vpop.eup %9043  ;;  %v4690_v28 = vadd.f32 %v4674_v26, %v9901_v10  ;;  %v4650_v52 = vmul.f32 0.6931472, %v9042_v34  ;;  %v8338_v29 = vpop.f32.mrb[10].mxu1  ;;  %v10180_v1 = vsel %vm4800_vm1, %v4704_v46, %v9752_v7 }
 0x1a0   :  { %v4689_v62 = vadd.f32 %v4673_v2, %v9901_v10  ;;  %v4648_v24 = vmul.f32 0.6931472, %v9044_v57  ;;  %9053 = vlog2.f32 %v8338_v29  ;;  %4833 = vmax.xlane.f32.xlu0 %v10180_v1  ;;  %v4610_v41 = vpop.f32.mrb[11].mxu1  ;;  %v10188_v0 = vsel %vm4799_vm0, %v4703_v40, %v9744_v3  ;;  %v4780_v34 = vpop.permute.xlu0 %4779  ;;  %v64_v29 = vld [vmem:[#allocation2 + $0xb8] sm:$0xff] }
 0x1a1   :  { %v4676_v47 = vadd.f32 %v4650_v52, %v10100_v32  ;;  %9055 = vlog2.f32 %v4610_v41  ;;  %4831 = vmax.xlane.f32.xlu1 %v10188_v0  ;;  %v4706_v7 = vadd.f32 %v4690_v28, %v60_v31  ;;  %v61_v32 = vld [vmem:[#allocation2 + $0xa0] sm:$0xff]  ;;  %v4777_v40 = vpop.permute.xlu1 %4776  ;;  %v63_v41 = vld [vmem:[#allocation2 + $0xb0] sm:$0xff]  ;;  %vm4808_vm8 = vcmp.eq.s32.totalorder %v4780_v34, 1 }
 0x1a2   :  { %v9046_v12 = vpop.eup %9045  ;;  %v4675_v53 = vadd.f32 %v4648_v24, %v10098_v30  ;;  %v4705_v23 = vadd.f32 %v4689_v62, %v59_v33  ;;  %vm4807_vm9 = vcmp.eq.s32.totalorder %v4777_v40, 1 }
 0x1a3   :  { %v9048_v25 = vpop.eup %9047  ;;  %v4692_v35 = vadd.f32 %v4676_v47, %v9901_v10  ;;  %v4654_v3 = vmul.f32 0.6931472, %v9046_v12  ;;  %v8341_v26 = vpop.f32.mrb[12].mxu1  ;;  %v10197_v52 = vsel %vm4802_vm2, %v4706_v7, %v9755_v8 }
 0x1a4   :  { %v4691_v28 = vadd.f32 %v4675_v53, %v9901_v10  ;;  %v4652_v46 = vmul.f32 0.6931472, %v9048_v25  ;;  %9057 = vlog2.f32 %v8341_v26  ;;  %v4620_v37 = vpop.f32.mrb[13].mxu1  ;;  %v10201_v30 = vsel %vm4801_vm3, %v4705_v23, %v9747_v4  ;;  %v65_v26 = vld [vmem:[#allocation2 + $0xc0] sm:$0xff] }
 0x1a5   :  { %v4678_v2 = vadd.f32 %v4654_v3, %v10108_v19  ;;  %9059 = vlog2.f32 %v4620_v37  ;;  %4835 = vmax.xlane.f32.xlu0 %v10201_v30  ;;  %4837 = vmax.xlane.f32.xlu1 %v10197_v52  ;;  %v4708_v58 = vadd.f32 %v4692_v35, %v62_v20  ;;  %v66_v20 = vld [vmem:[#allocation2 + $0xc8] sm:$0xff] }
 0x1a6   :  { %v9050_v8 = vpop.eup %9049  ;;  %v4677_v31 = vadd.f32 %v4652_v46, %v10106_v44  ;;  %v4707_v57 = vadd.f32 %v4691_v28, %v61_v32  ;;  %v4783_v32 = vpop.permute.xlu1 %4782 }
 0x1a7   :  { %v9052_v33 = vpop.eup %9051  ;;  %v4694_v4 = vadd.f32 %v4678_v2, %v9901_v10  ;;  %v4658_v19 = vmul.f32 0.6931472, %v9050_v8  ;;  %v8344_v62 = vpop.f32.mrb[14].mxu1  ;;  %v10211_v24 = vsel %vm4804_vm4, %v4708_v58, %v9783_v18  ;;  %v68_v58 = vld [vmem:[#allocation2 + $0xd8] sm:$0xff]  ;;  %vm4809_vm11 = vcmp.eq.s32.totalorder %v4783_v32, 1 }
 0x1a8   :  { %v4693_v47 = vadd.f32 %v4677_v31, %v9901_v10  ;;  %v4656_v7 = vmul.f32 0.6931472, %v9052_v33  ;;  %9061 = vlog2.f32 %v8344_v62  ;;  %v4630_v9 = vpop.f32.mrb[15].mxu1  ;;  %v10215_v44 = vsel %vm4803_vm5, %v4707_v57, %v9780_v17  ;;  %v4786_v17 = vpop.permute.xlu0 %4785 }
 0x1a9   :  { %v4680_v12 = vadd.f32 %v4658_v19, %v10116_v59  ;;  %9063 = vlog2.f32 %v4630_v9  ;;  %4839 = vmax.xlane.f32.xlu0 %v10215_v44  ;;  %4841 = vmax.xlane.f32.xlu1 %v10211_v24  ;;  %v4710_v63 = vadd.f32 %v4694_v4, %v64_v29  ;;  %vm4810_vm10 = vcmp.eq.s32.totalorder %v4786_v17, 1  ;;  %v69_v9 = vld [vmem:[#allocation2 + $0xe0] sm:$0xff] }
 0x1aa   :  { %v9054_v53 = vpop.eup %9053  ;;  %v4679_v18 = vadd.f32 %v4656_v7, %v10114_v42  ;;  %v4709_v23 = vadd.f32 %v4693_v47, %v63_v41  ;;  %v4789_v62 = vpop.permute.xlu1 %4788  ;;  %v70_v7 = vld [vmem:[#allocation2 + $0xe8] sm:$0xff] }
 0x1ab   :  { %v9056_v25 = vpop.eup %9055  ;;  %v4696_v35 = vadd.f32 %v4680_v12, %v9901_v10  ;;  %v4662_v59 = vmul.f32 0.6931472, %v9054_v53  ;;  %v10225_v3 = vsel %vm4806_vm6, %v4710_v63, %v9862_v39  ;;  %vm4811_vm13 = vcmp.eq.s32.totalorder %v4789_v62, 1 }
 0x1ac   :  { %v4695_v28 = vadd.f32 %v4679_v18, %v9901_v10  ;;  %v4660_v46 = vmul.f32 0.6931472, %v9056_v25  ;;  %v10229_v22 = vsel %vm4805_vm7, %v4709_v23, %v9859_v38  ;;  %v4792_v34 = vpop.permute.xlu0 %4791  ;;  %v72_v25 = vld [vmem:[#allocation2 + $0xf8] sm:$0xff] }
 0x1ad   :  { %v4682_v42 = vadd.f32 %v4662_v59, %v10124_v21  ;;  %4843 = vmax.xlane.f32.xlu0 %v10229_v22  ;;  %4845 = vmax.xlane.f32.xlu1 %v10225_v3  ;;  %v4712_v51 = vadd.f32 %v4696_v35, %v66_v20  ;;  %v67_v21 = vld [vmem:[#allocation2 + $0xd0] sm:$0xff]  ;;  %vm4812_vm12 = vcmp.eq.s32.totalorder %v4792_v34, 1 }
 0x1ae   :  { %v9058_v37 = vpop.eup %9057  ;;  %v4681_v39 = vadd.f32 %v4660_v46, %v10122_v45  ;;  %v4711_v2 = vadd.f32 %v4695_v28, %v65_v26  ;;  %v8681_v45 = vpack.c.bf16 %v9765_v14, %v9760_v11  ;;  %v9514_v26 = vld [vmem:[%s16033_s6 + $0x28] sm:$0xff] }
 0x1af   :  { %v9060_v8 = vpop.eup %9059  ;;  %v4698_v31 = vadd.f32 %v4682_v42, %v9901_v10  ;;  %v4666_v57 = vmul.f32 0.6931472, %v9058_v37  ;;  %v10237_v38 = vsel %vm4808_vm8, %v4712_v51, %v9875_v49  ;;  %v9515_v42 = vld [vmem:[%s16033_s6 + $0x30] sm:$0xff]  ;;  %v9516_v51 = vld [vmem:[%s16033_s6 + $0x38] sm:$0xff] }
 0x1b0   :  { %v4697_v29 = vadd.f32 %v4681_v39, %v9901_v10  ;;  %v4664_v33 = vmul.f32 0.6931472, %v9060_v8  ;;  %v10241_v4 = vsel %vm4807_vm9, %v4711_v2, %v9872_v48  ;;  %8682 = vmatprep.subr.bf16.mxu0 %v8681_v45  ;;  %v4798_v17 = vpop.permute.xlu0 %4797  ;;  %v8693_v37 = vpack.c.bf16 %v9516_v51, %v9515_v42  ;;  %v9519_v8 = vld [vmem:[%s16033_s6 + $0x50] sm:$0xff] }
 0x1b1   :  { %v4684_v19 = vadd.f32 %v4666_v57, %v10134_v36  ;;  %4847 = vmax.xlane.f32.xlu0 %v10241_v4  ;;  %4849 = vmax.xlane.f32.xlu1 %v10237_v38  ;;  %v4714_v40 = vadd.f32 %v4698_v31, %v68_v58  ;;  %vm4814_vm14 = vcmp.eq.s32.totalorder %v4798_v17, 1  ;;  %v16083_v39 = vlaneseq  ;;  %v9520_v31 = vld [vmem:[%s16033_s6 + $0x58] sm:$0xff]  ;;  %v16698_v17 = vld [vmem:[#allocation32_spill] sm:$0xff] }
 0x1b2   :  { %v9062_v49 = vpop.eup %9061  ;;  %v4683_v41 = vadd.f32 %v4664_v33, %v10132_v13  ;;  %v4713_v47 = vadd.f32 %v4697_v29, %v67_v21  ;;  %8684 = vmatpush3.bf16.msra.mxu0 %v8681_v45  ;;  %v8685_v13 = vpack.c.bf16 %v9775_v16, %v9770_v15  ;;  %v71_v15 = vld [vmem:[#allocation2 + $0xf0] sm:$0xff]  ;;  %v4795_v16 = vpop.permute.xlu1 %4794  ;;  %v8701_v57 = vpack.c.bf16 %v9520_v31, %v9519_v8  ;;  %v10312_v29 = vld [vmem:[%s16028_s1] sm:$0xff]  ;;  %v9522_v45 = vld [vmem:[%s16033_s6 + $0x68] sm:$0xff] }
 0x1b3   :  { %v9064_v48 = vpop.eup %9063  ;;  %v4700_v11 = vadd.f32 %v4684_v19, %v9901_v10  ;;  %v4670_v14 = vmul.f32 0.6931472, %v9062_v49  ;;  %v10251_v36 = vsel %vm4810_vm10, %v4714_v40, %v9883_v55  ;;  %vm4813_vm15 = vcmp.eq.s32.totalorder %v4795_v16, 1  ;;  %16685 = vst [vmem:[#allocation35_spill] sm:$0xff] %v10312_v29  ;;  %v9521_v33 = vld [vmem:[%s16033_s6 + $0x60] sm:$0xff]  ;;  %v9523_v40 = vld [vmem:[%s16033_s6 + $0x70] sm:$0xff] }
 0x1b4   :  { %v4699_v12 = vadd.f32 %v4683_v41, %v9901_v10  ;;  %v4668_v63 = vmul.f32 0.6931472, %v9064_v48  ;;  %v10255_v53 = vsel %vm4809_vm11, %v4713_v47, %v9880_v54  ;;  %8686 = vmatprep.subr.bf16.mxu0 %v8685_v13  ;;  %v10300_v58 = vshrl.u32 %v16083_v39, 7  ;;  %v9524_v49 = vld [vmem:[%s16033_s6 + $0x78] sm:$0xff]  ;;  %v16686_v48 = vld [vmem:[#allocation17_spill] sm:$0xff] }
 0x1b5   :  { %v4686_v18 = vadd.f32 %v4670_v14, %v10144_v27  ;;  %4851 = vmax.xlane.f32.xlu0 %v10255_v53  ;;  %4853 = vmax.xlane.f32.xlu1 %v10251_v36  ;;  %v4716_v23 = vadd.f32 %v4700_v11, %v70_v7  ;;  %v8705_v34 = vpack.c.bf16 %v9522_v45, %v9521_v33  ;;  %v9677_v41 = vmov 2   ;;  %v16687_v11 = vld [vmem:[#allocation20_spill] sm:$0xff]  ;;  %v16688_v14 = vld [vmem:[#allocation22_spill] sm:$0xff] }
 0x1b6   :  { %v4685_v55 = vadd.f32 %v4668_v63, %v10142_v56  ;;  %v4715_v20 = vadd.f32 %v4699_v12, %v69_v9  ;;  %8688 = vmatpush3.bf16.msra.mxu0 %v8685_v13  ;;  %v9513_v56 = vld [vmem:[%s16033_s6 + $0x20] sm:$0xff]  ;;  %16684 = vst [vmem:[#allocation34_spill] sm:$0xff] %v10300_v58  ;;  %v16082_v21 = vsub.s32 0, %v10300_v58  ;;  %v8709_v62 = vpack.c.bf16 %v9524_v49, %v9523_v40  ;;  %v16690_v12 = vld [vmem:[#allocation26_spill] sm:$0xff]  ;;  %v16692_v13 = vld [vmem:[#allocation29_spill] sm:$0xff] }
 0x1b7   :  { %v4702_v54 = vadd.f32 %v4686_v18, %v9901_v10  ;;  %v10265_v35 = vsel %vm4812_vm12, %v4716_v23, %v9891_v61  ;;  %v8689_v32 = vpack.c.bf16 %v9514_v26, %v9513_v56  ;;  %8955 = vset.pattern.permute.xlu0 %v9677_v41  ;;  %8956 = vset.pattern.permute.xlu1 %v9677_v41  ;;  %v16081_v47 = vsub.s32 1, %v10300_v58  ;;  %v16689_v9 = vld [vmem:[#allocation24_spill] sm:$0xff]  ;;  %v16693_v18 = vld [vmem:[#allocation21_spill] sm:$0xff]  ;;  %v16694_v23 = vld [vmem:[#allocation30_spill] sm:$0xff] }
 0x1b8   :  { %v4701_v27 = vadd.f32 %v4685_v55, %v9901_v10  ;;  %v10269_v59 = vsel %vm4811_vm13, %v4715_v20, %v9888_v60  ;;  %v210_v19 = vrot.slane %v10312_v29, %v16082_v21  ;;  %v16691_v63 = vld [vmem:[#allocation28_spill] sm:$0xff]  ;;  %v16695_v55 = vld [vmem:[#allocation23_spill] sm:$0xff] }
 0x1b9   :  { %4855 = vmax.xlane.f32.xlu0 %v10269_v59  ;;  %4857 = vmax.xlane.f32.xlu1 %v10265_v35  ;;  %v4718_v61 = vadd.f32 %v4702_v54, %v72_v25  ;;  %v277_v7 = vrot.slane %v10312_v29, %v16081_v47  ;;  %v16696_v20 = vld [vmem:[#allocation31_spill] sm:$0xff]  ;;  %v16697_v25 = vld [vmem:[#allocation25_spill] sm:$0xff] }
 0x1ba   :  { %v4717_v28 = vadd.f32 %v4701_v27, %v71_v15  ;;  %8690 = vmatprep.subr.bf16.mxu0 %v8689_v32  ;;  %v16699_v54 = vld [vmem:[#allocation27_spill] sm:$0xff] }
 0x1bb   :  { %v10280_v60 = vsel %vm4814_vm14, %v4718_v61, %v9899_v6  ;;  %8692 = vmatpush3.bf16.msra.mxu0 %v8689_v32  ;;  %v9518_v6 = vld [vmem:[%s16033_s6 + $0x48] sm:$0xff] }
 0x1bc   :  { %v10283_v46 = vsel %vm4813_vm15, %v4717_v28, %v9896_v5  ;;  %8694 = vmatprep.subr.bf16.mxu0 %v8693_v37  ;;  %v9517_v5 = vld [vmem:[%s16033_s6 + $0x40] sm:$0xff] }
 0x1bd   :  { %16683 = vst [vmem:[#allocation33_spill] sm:$0xff] %v10283_v46  ;;  %4859 = vmax.xlane.f32.xlu0 %v10283_v46  ;;  %4861 = vmax.xlane.f32.xlu1 %v10280_v60  ;;  %v8697_v2 = vpack.c.bf16 %v9518_v6, %v9517_v5 }
 0x1bf   :  { %8696 = vmatpush3.bf16.msra.mxu0 %v8693_v37 }
 0x1c0   :  { %8698 = vmatprep.subr.bf16.mxu0 %v8697_v2 }
 0x1c3   :  { %8700 = vmatpush3.bf16.msra.mxu0 %v8697_v2 }
 0x1c4   :  { %8702 = vmatprep.subr.bf16.mxu0 %v8701_v57 }
 0x1c7   :  { %8704 = vmatpush3.bf16.msra.mxu0 %v8701_v57 }
 0x1c8   :  { %8706 = vmatprep.subr.bf16.mxu0 %v8705_v34 }
 0x1cb   :  { %8708 = vmatpush3.bf16.msra.mxu0 %v8705_v34 }
 0x1cc   :  { %8710 = vmatprep.subr.bf16.mxu0 %v8709_v62 }
 0x1ce   :  { %216 = vbcast.lane.b32.xlu1 %v210_v19, 264 }
 0x1cf   :  { %8712 = vmatpush3.bf16.msra.mxu0 %v8709_v62 }
 0x1d2   :  { %220 = vbcast.lane.b32.xlu1 %v210_v19, 272 }
 0x1d3   :  { %212 = vbcast.lane.b32.xlu0 %v210_v19, 256 }
 0x1d6   :  { %228 = vbcast.lane.b32.xlu1 %v210_v19, 288 }
 0x1d7   :  { %224 = vbcast.lane.b32.xlu0 %v210_v19, 280 }
 0x1da   :  { %236 = vbcast.lane.b32.xlu1 %v210_v19, 304 }
 0x1db   :  { %232 = vbcast.lane.b32.xlu0 %v210_v19, 296 }
 0x1de   :  { %244 = vbcast.lane.b32.xlu1 %v210_v19, 320 }
 0x1df   :  { %240 = vbcast.lane.b32.xlu0 %v210_v19, 312 }
 0x1e2   :  { %252 = vbcast.lane.b32.xlu1 %v210_v19, 336 }
 0x1e3   :  { %248 = vbcast.lane.b32.xlu0 %v210_v19, 328 }
 0x1e6   :  { %260 = vbcast.lane.b32.xlu1 %v210_v19, 352 }
 0x1e7   :  { %256 = vbcast.lane.b32.xlu0 %v210_v19, 344 }
 0x1ea   :  { %268 = vbcast.lane.b32.xlu1 %v210_v19, 368 }
 0x1eb   :  { %264 = vbcast.lane.b32.xlu0 %v210_v19, 360 }
 0x1ee   :  { %279 = vbcast.lane.b32.xlu1 %v277_v7, 256 }
 0x1ef   :  { %272 = vbcast.lane.b32.xlu0 %v210_v19, 376 }
 0x1f2   :  { %287 = vbcast.lane.b32.xlu1 %v277_v7, 272 }
 0x1f3   :  { %283 = vbcast.lane.b32.xlu0 %v277_v7, 264 }
 0x1f6   :  { %295 = vbcast.lane.b32.xlu1 %v277_v7, 288 }
 0x1f7   :  { %291 = vbcast.lane.b32.xlu0 %v277_v7, 280 }
 0x1fa   :  { %303 = vbcast.lane.b32.xlu1 %v277_v7, 304 }
 0x1fb   :  { %299 = vbcast.lane.b32.xlu0 %v277_v7, 296 }
 0x1fe   :  { %311 = vbcast.lane.b32.xlu1 %v277_v7, 320 }
 0x1ff   :  { %307 = vbcast.lane.b32.xlu0 %v277_v7, 312 }
 0x202   :  { %5140 = vperm.xlu1 %8956, %v9966_v43  }
 0x203   :  { %5137 = vperm.xlu0 %8955, %v9989_v50  }
 0x206   :  { %5143 = vperm.xlu1 %8956, %v16686_v48   ;;  %v16737_v48 = vmov 1.0  }
 0x207   :  { %5146 = vperm.xlu0 %8955, %v16687_v11  }
 0x20a   :  { %5149 = vperm.xlu1 %8956, %v16688_v14  }
 0x20b   :  { %5152 = vperm.xlu0 %8955, %v16689_v9  }
 0x20e   :  { %5155 = vperm.xlu1 %8956, %v16690_v12  }
 0x20f   :  { %5158 = vperm.xlu0 %8955, %v16691_v63  }
 0x212   :  { %5161 = vperm.xlu1 %8956, %v16692_v13  }
 0x213   :  { %5164 = vperm.xlu0 %8955, %v16693_v18  }
 0x216   :  { %5167 = vperm.xlu1 %8956, %v16694_v23  }
 0x217   :  { %5170 = vperm.xlu0 %8955, %v16695_v55  }
 0x21a   :  { %5173 = vperm.xlu1 %8956, %v16696_v20  }
 0x21b   :  { %5176 = vperm.xlu0 %8955, %v16697_v25  }
 0x21e   :  { %5179 = vperm.xlu1 %8956, %v16698_v17  }
 0x21f   :  { %5182 = vperm.xlu0 %8955, %v16699_v54   ;;  %v16704_v54 = vlaneseq }
 0x221   :  { %v10416_v25 = vand.u32 127, %v16704_v54 }
 0x222   :  { %315 = vbcast.lane.b32.xlu1 %v277_v7, 328 }
 0x223   :  { %319 = vbcast.lane.b32.xlu0 %v277_v7, 336  ;;  %16705 = vst [vmem:[#allocation36_spill] sm:$0xff] %v10416_v25 }
 0x226   :  { %327 = vbcast.lane.b32.xlu1 %v277_v7, 352 }
 0x227   :  { %323 = vbcast.lane.b32.xlu0 %v277_v7, 344 }
 0x22a   :  { %331 = vbcast.lane.b32.xlu1 %v277_v7, 360 }
 0x22b   :  { %335 = vbcast.lane.b32.xlu0 %v277_v7, 368 }
 0x22d   :  { %v10349_v15 = vpop.xlane.xlu0 %4833 }
 0x22e   :  { %v4864_v16 = vsub.f32 %v10180_v1, %v10349_v15  ;;  %v10353_v27 = vpop.xlane.xlu1 %4831  ;;  %339 = vbcast.lane.b32.xlu1 %v277_v7, 376 }
 0x22f   :  { %v4863_v56 = vsub.f32 %v10188_v0, %v10353_v27 }
 0x230   :  { %v4881_v26 = vmul.f32 1.442695, %v4864_v16 }
 0x231   :  { %v4879_v32 = vmul.f32 1.442695, %v4863_v56 }
 0x232   :  { %v10357_v61 = vpop.xlane.xlu1 %4837  ;;  %v10359_v28 = vpop.xlane.xlu0 %4835 }
 0x233   :  { %9065 = vpow2.f32 %v4879_v32  ;;  %v4866_v42 = vsub.f32 %v10197_v52, %v10357_v61  ;;  %v4865_v51 = vsub.f32 %v10201_v30, %v10359_v28 }
 0x234   :  { %9067 = vpow2.f32 %v4881_v26 }
 0x235   :  { %v4885_v37 = vmul.f32 1.442695, %v4866_v42  ;;  %v4883_v5 = vmul.f32 1.442695, %v4865_v51  ;;  %v16700_v42 = vld [vmem:[#allocation9_spill] sm:$0xff] }
 0x236   :  { %v10365_v6 = vpop.xlane.xlu1 %4841  ;;  %v10367_v2 = vpop.xlane.xlu0 %4839 }
 0x237   :  { %9069 = vpow2.f32 %v4885_v37  ;;  %v4868_v8 = vsub.f32 %v10211_v24, %v10365_v6  ;;  %v4867_v31 = vsub.f32 %v10215_v44, %v10367_v2 }
 0x238   :  { %9071 = vpow2.f32 %v4883_v5 }
 0x239   :  { %v4889_v57 = vmul.f32 1.442695, %v4868_v8  ;;  %v4887_v33 = vmul.f32 1.442695, %v4867_v31  ;;  %v16701_v8 = vld [vmem:[#allocation10_spill] sm:$0xff] }
 0x23a   :  { %v10373_v45 = vpop.xlane.xlu1 %4845  ;;  %v10375_v34 = vpop.xlane.xlu0 %4843 }
 0x23b   :  { %9073 = vpow2.f32 %v4889_v57  ;;  %v4870_v19 = vsub.f32 %v10225_v3, %v10373_v45  ;;  %v4869_v40 = vsub.f32 %v10229_v22, %v10375_v34 }
 0x23c   :  { %9075 = vpow2.f32 %v4887_v33 }
 0x23d   :  { %v9066_v49 = vpop.eup %9065  ;;  %v4893_v62 = vmul.f32 1.442695, %v4870_v19  ;;  %v4891_v41 = vmul.f32 1.442695, %v4869_v40 }
 0x23e   :  { %v9068_v7 = vpop.eup %9067  ;;  %8377 = vmatprep.mubr.f32.mxu1 %v9066_v49  ;;  %v10381_v16 = vpop.xlane.xlu1 %4849 }
 0x23f   :  { %v10383_v56 = vpop.xlane.xlu0 %4847  ;;  %9077 = vpow2.f32 %v4893_v62  ;;  %v4872_v26 = vsub.f32 %v10237_v38, %v10381_v16  ;;  %8378 = vmatmul.mubr.f32.vlgmr.msra.gmra.mrb[16].mxu1 %v9068_v7 }
 0x240   :  { %v4871_v32 = vsub.f32 %v10241_v4, %v10383_v56  ;;  %9079 = vpow2.f32 %v4891_v41  ;;  %8780 = vmatpush3.bf16.msra.mxu1 %v16700_v42 }
 0x241   :  { %v9070_v51 = vpop.eup %9069  ;;  %v4897_v37 = vmul.f32 1.442695, %v4872_v26  ;;  %8782 = vmatprep.subr.bf16.mxu1 %v16701_v8 }
 0x242   :  { %v4895_v5 = vmul.f32 1.442695, %v4871_v32  ;;  %v9072_v31 = vpop.eup %9071  ;;  %v10391_v57 = vpop.xlane.xlu1 %4853 }
 0x243   :  { %v10393_v33 = vpop.xlane.xlu0 %4851  ;;  %9081 = vpow2.f32 %v4897_v37  ;;  %v4874_v19 = vsub.f32 %v10251_v36, %v10391_v57  ;;  %8380 = vmatprep.mubr.f32.mxu1 %v9072_v31  ;;  %v16702_v37 = vld [vmem:[#allocation11_spill] sm:$0xff] }
 0x244   :  { %v4873_v40 = vsub.f32 %v10255_v53, %v10393_v33  ;;  %9083 = vpow2.f32 %v4895_v5  ;;  %8381 = vmatmul.mubr.f32.gmra.mrb[18].mxu1 %v9070_v51 }
 0x245   :  { %v9074_v49 = vpop.eup %9073  ;;  %v4901_v62 = vmul.f32 1.442695, %v4874_v19  ;;  %8784 = vmatpush3.bf16.msra.mxu1 %v16701_v8 }
 0x246   :  { %v4899_v41 = vmul.f32 1.442695, %v4873_v40  ;;  %v9076_v7 = vpop.eup %9075  ;;  %v10400_v26 = vpop.xlane.xlu1 %4857  ;;  %8786 = vmatprep.subr.bf16.mxu1 %v16702_v37 }
 0x247   :  { %v10402_v32 = vpop.xlane.xlu0 %4855  ;;  %9085 = vpow2.f32 %v4901_v62  ;;  %v4876_v31 = vsub.f32 %v10265_v35, %v10400_v26  ;;  %8383 = vmatprep.mubr.f32.mxu1 %v9076_v7  ;;  %v16703_v62 = vld [vmem:[#allocation12_spill] sm:$0xff] }
 0x248   :  { %v4875_v51 = vsub.f32 %v10269_v59, %v10402_v32  ;;  %9087 = vpow2.f32 %v4899_v41  ;;  %8384 = vmatmul.mubr.f32.gmra.mrb[20].mxu1 %v9074_v49 }
 0x249   :  { %v9078_v5 = vpop.eup %9077  ;;  %v4905_v19 = vmul.f32 1.442695, %v4876_v31  ;;  %8788 = vmatpush3.bf16.msra.mxu1 %v16702_v37 }
 0x24a   :  { %v4903_v40 = vmul.f32 1.442695, %v4875_v51  ;;  %v9080_v47 = vpop.eup %9079  ;;  %v10410_v21 = vpop.xlane.xlu1 %4861  ;;  %8790 = vmatprep.subr.bf16.mxu1 %v16703_v62 }
 0x24b   :  { %v10412_v39 = vpop.xlane.xlu0 %4859  ;;  %9089 = vpow2.f32 %v4905_v19  ;;  %v4878_v41 = vsub.f32 %v10280_v60, %v10410_v21  ;;  %8386 = vmatprep.mubr.f32.mxu1 %v9080_v47  ;;  %v16708_v19 = vld [vmem:[#allocation13_spill] sm:$0xff]  ;;  %v16118_v47 = vmov 1.0  }
 0x24c   :  { %v4877_v49 = vsub.f32 %v10283_v46, %v10412_v39  ;;  %9091 = vpow2.f32 %v4903_v40  ;;  %8387 = vmatmul.mubr.f32.gmra.mrb[22].mxu1 %v9078_v5 }
 0x24d   :  { %v9082_v7 = vpop.eup %9081  ;;  %v4909_v31 = vmul.f32 1.442695, %v4878_v41  ;;  %8792 = vmatpush3.bf16.msra.mxu1 %v16703_v62 }
 0x24e   :  { %v4907_v51 = vmul.f32 1.442695, %v4877_v49  ;;  %v9084_v17 = vpop.eup %9083  ;;  %v10423_v55 = vpop.permute.xlu1 %216  ;;  %8794 = vmatprep.subr.bf16.mxu1 %v16708_v19  ;;  %v16711_v49 = vld [vmem:[#allocation14_spill] sm:$0xff] }
 0x24f   :  { %16706 = vst [vmem:[#allocation37_spill] sm:$0xff] %v10423_v55  ;;  %v10425_v54 = vpop.permute.xlu0 %212  ;;  %9093 = vpow2.f32 %v4909_v31  ;;  %vm744_vm0 = vcmp.eq.s32.totalorder %v10416_v25, %v10423_v55  ;;  %8389 = vmatprep.mubr.f32.mxu1 %v9084_v17  ;;  %v16717_v55 = vld [vmem:[#allocation19_spill] sm:$0xff] }
 0x250   :  { %16707 = vst [vmem:[#allocation38_spill] sm:$0xff] %v10425_v54  ;;  %vm743_vm1 = vcmp.eq.s32.totalorder %v10416_v25, %v10425_v54  ;;  %9095 = vpow2.f32 %v4907_v51  ;;  %8390 = vmatmul.mubr.f32.gmra.mrb[24].mxu1 %v9082_v7  ;;  %v16714_v54 = vld [vmem:[#allocation16_spill] sm:$0xff] }
 0x251   :  { %8121 = vmatprep.mubr.msk.f32.mxu0 %vm743_vm1, %v16118_v47  ;;  %v9086_v5 = vpop.eup %9085  ;;  %8796 = vmatpush3.bf16.msra.mxu1 %v16708_v19 }
 0x252   :  { %8122 = vmatmul.mubr.msk.f32.vlgmr.msra.gmra.mrb[0].mxu0 %vm744_vm0, %v16118_v47  ;;  %v9088_v17 = vpop.eup %9087  ;;  %v10441_v40 = vpop.permute.xlu1 %220  ;;  %8798 = vmatprep.subr.bf16.mxu1 %v16711_v49 }
 0x253   :  { %16709 = vst [vmem:[#allocation39_spill] sm:$0xff] %v10441_v40  ;;  %v10443_v41 = vpop.permute.xlu0 %224  ;;  %vm745_vm2 = vcmp.eq.s32.totalorder %v10416_v25, %v10441_v40  ;;  %8392 = vmatprep.mubr.f32.mxu1 %v9088_v17 }
 0x254   :  { %16710 = vst [vmem:[#allocation40_spill] sm:$0xff] %v10443_v41  ;;  %vm746_vm3 = vcmp.eq.s32.totalorder %v10416_v25, %v10443_v41  ;;  %8393 = vmatmul.mubr.f32.gmra.mrb[26].mxu1 %v9086_v5  ;;  %8124 = vmatprep.mubr.msk.f32.mxu0 %vm745_vm2, %v16118_v47 }
 0x255   :  { %v9090_v7 = vpop.eup %9089  ;;  %8800 = vmatpush3.bf16.msra.mxu1 %v16711_v49 }
 0x256   :  { %8125 = vmatmul.mubr.msk.f32.gmra.mrb[2].mxu0 %vm746_vm3, %v16118_v47  ;;  %v9092_v31 = vpop.eup %9091  ;;  %v10459_v51 = vpop.permute.xlu1 %228  ;;  %8802 = vmatprep.subr.bf16.mxu1 %v16714_v54 }
 0x257   :  { %16712 = vst [vmem:[#allocation41_spill] sm:$0xff] %v10459_v51  ;;  %v10461_v17 = vpop.permute.xlu0 %232  ;;  %vm747_vm4 = vcmp.eq.s32.totalorder %v10416_v25, %v10459_v51  ;;  %8395 = vmatprep.mubr.f32.mxu1 %v9092_v31 }
 0x258   :  { %16713 = vst [vmem:[#allocation42_spill] sm:$0xff] %v10461_v17  ;;  %vm748_vm5 = vcmp.eq.s32.totalorder %v10416_v25, %v10461_v17  ;;  %8396 = vmatmul.mubr.f32.gmra.mrb[28].mxu1 %v9090_v7  ;;  %8127 = vmatprep.mubr.msk.f32.mxu0 %vm747_vm4, %v16118_v47 }
 0x259   :  { %v9094_v5 = vpop.eup %9093  ;;  %8804 = vmatpush3.bf16.msra.mxu1 %v16714_v54 }
 0x25a   :  { %8128 = vmatmul.mubr.msk.f32.gmra.mrb[4].mxu0 %vm748_vm5, %v16118_v47  ;;  %v9096_v40 = vpop.eup %9095  ;;  %v10477_v41 = vpop.permute.xlu1 %236  ;;  %8806 = vmatprep.subr.bf16.mxu1 %v16717_v55 }
 0x25b   :  { %16715 = vst [vmem:[#allocation43_spill] sm:$0xff] %v10477_v41  ;;  %v10479_v31 = vpop.permute.xlu0 %240  ;;  %vm749_vm6 = vcmp.eq.s32.totalorder %v10416_v25, %v10477_v41  ;;  %8398 = vmatprep.mubr.f32.mxu1 %v9096_v40 }
 0x25c   :  { %16716 = vst [vmem:[#allocation44_spill] sm:$0xff] %v10479_v31  ;;  %vm750_vm7 = vcmp.eq.s32.totalorder %v10416_v25, %v10479_v31  ;;  %8399 = vmatmul.mubr.f32.gmra.mrb[30].mxu1 %v9094_v5  ;;  %8130 = vmatprep.mubr.msk.f32.mxu0 %vm749_vm6, %v16118_v47 }
 0x25d   :  { %8808 = vmatpush3.bf16.msra.mxu1 %v16717_v55 }
 0x25e   :  { %8131 = vmatmul.mubr.msk.f32.gmra.mrb[6].mxu0 %vm750_vm7, %v16118_v47  ;;  %v10495_v7 = vpop.permute.xlu1 %244  ;;  %8810 = vmatprep.subr.bf16.mxu1 %v16700_v42 }
 0x25f   :  { %16718 = vst [vmem:[#allocation45_spill] sm:$0xff] %v10495_v7  ;;  %v10497_v51 = vpop.permute.xlu0 %248  ;;  %vm751_vm8 = vcmp.eq.s32.totalorder %v10416_v25, %v10495_v7 }
 0x260   :  { %16719 = vst [vmem:[#allocation46_spill] sm:$0xff] %v10497_v51  ;;  %vm752_vm9 = vcmp.eq.s32.totalorder %v10416_v25, %v10497_v51  ;;  %8133 = vmatprep.mubr.msk.f32.mxu0 %vm751_vm8, %v16118_v47 }
 0x262   :  { %8134 = vmatmul.mubr.msk.f32.gmra.mrb[8].mxu0 %vm752_vm9, %v16118_v47  ;;  %v10512_v40 = vpop.permute.xlu1 %252 }
 0x263   :  { %16720 = vst [vmem:[#allocation47_spill] sm:$0xff] %v10512_v40  ;;  %v10514_v5 = vpop.permute.xlu0 %256  ;;  %vm753_vm10 = vcmp.eq.s32.totalorder %v10416_v25, %v10512_v40 }
 0x264   :  { %16721 = vst [vmem:[#allocation48_spill] sm:$0xff] %v10514_v5  ;;  %vm754_vm11 = vcmp.eq.s32.totalorder %v10416_v25, %v10514_v5  ;;  %8136 = vmatprep.mubr.msk.f32.mxu0 %vm753_vm10, %v16118_v47 }
 0x266   :  { %8137 = vmatmul.mubr.msk.f32.gmra.mrb[10].mxu0 %vm754_vm11, %v16118_v47  ;;  %v10528_v51 = vpop.permute.xlu1 %260 }
 0x267   :  { %16722 = vst [vmem:[#allocation49_spill] sm:$0xff] %v10528_v51  ;;  %v10530_v7 = vpop.permute.xlu0 %264  ;;  %vm16096_vm12 = vcmp.eq.s32.totalorder %v10416_v25, %v10528_v51 }
 0x268   :  { %16723 = vst [vmem:[#allocation50_spill] sm:$0xff] %v10530_v7  ;;  %vm16095_vm13 = vcmp.eq.s32.totalorder %v10416_v25, %v10530_v7  ;;  %8139 = vmatprep.mubr.msk.f32.mxu0 %vm16096_vm12, %v16118_v47 }
 0x26a   :  { %8140 = vmatmul.mubr.msk.f32.gmra.mrb[12].mxu0 %vm16095_vm13, %v16118_v47  ;;  %v10544_v5 = vpop.permute.xlu1 %268 }
 0x26b   :  { %16724 = vst [vmem:[#allocation51_spill] sm:$0xff] %v10544_v5  ;;  %v10546_v40 = vpop.permute.xlu0 %272  ;;  %vm16100_vm14 = vcmp.eq.s32.totalorder %v10416_v25, %v10544_v5 }
 0x26c   :  { %16725 = vst [vmem:[#allocation52_spill] sm:$0xff] %v10546_v40  ;;  %vm16099_vm15 = vcmp.eq.s32.totalorder %v10416_v25, %v10546_v40  ;;  %8142 = vmatprep.mubr.msk.f32.mxu0 %vm16100_vm14, %v16118_v47 }
 0x26e   :  { %8143 = vmatmul.mubr.msk.f32.gmra.mrb[14].mxu0 %vm16099_vm15, %v16118_v47  ;;  %v10560_v7 = vpop.permute.xlu1 %279 }
 0x26f   :  { %16726 = vst [vmem:[#allocation53_spill] sm:$0xff] %v10560_v7  ;;  %v10562_v51 = vpop.permute.xlu0 %283  ;;  %vm16103_vm13 = vcmp.eq.s32.totalorder %v10416_v25, %v10560_v7 }
 0x270   :  { %16727 = vst [vmem:[#allocation54_spill] sm:$0xff] %v10562_v51  ;;  %vm16104_vm12 = vcmp.eq.s32.totalorder %v10416_v25, %v10562_v51  ;;  %8145 = vmatprep.mubr.msk.f32.mxu0 %vm16103_vm13, %v16118_v47 }
 0x272   :  { %8146 = vmatmul.mubr.msk.f32.gmra.mrb[16].mxu0 %vm16104_vm12, %v16118_v47  ;;  %v10576_v40 = vpop.permute.xlu1 %287 }
 0x273   :  { %16728 = vst [vmem:[#allocation55_spill] sm:$0xff] %v10576_v40  ;;  %v10578_v5 = vpop.permute.xlu0 %291  ;;  %vm16107_vm15 = vcmp.eq.s32.totalorder %v10416_v25, %v10576_v40 }
 0x274   :  { %16729 = vst [vmem:[#allocation56_spill] sm:$0xff] %v10578_v5  ;;  %vm16108_vm14 = vcmp.eq.s32.totalorder %v10416_v25, %v10578_v5  ;;  %8148 = vmatprep.mubr.msk.f32.mxu0 %vm16107_vm15, %v16118_v47 }
 0x276   :  { %8149 = vmatmul.mubr.msk.f32.gmra.mrb[18].mxu0 %vm16108_vm14, %v16118_v47  ;;  %v10592_v7 = vpop.permute.xlu1 %295 }
 0x277   :  { %16730 = vst [vmem:[#allocation57_spill] sm:$0xff] %v10592_v7  ;;  %v10594_v51 = vpop.permute.xlu0 %299  ;;  %vm16110_vm13 = vcmp.eq.s32.totalorder %v10416_v25, %v10592_v7 }
 0x278   :  { %16731 = vst [vmem:[#allocation58_spill] sm:$0xff] %v10594_v51  ;;  %vm16128_vm12 = vcmp.eq.s32.totalorder %v10416_v25, %v10594_v51  ;;  %8151 = vmatprep.mubr.msk.f32.mxu0 %vm16110_vm13, %v16118_v47 }
 0x27a   :  { %8152 = vmatmul.mubr.msk.f32.gmra.mrb[20].mxu0 %vm16128_vm12, %v16118_v47  ;;  %v10608_v40 = vpop.permute.xlu1 %303 }
 0x27b   :  { %16732 = vst [vmem:[#allocation59_spill] sm:$0xff] %v10608_v40  ;;  %v10610_v5 = vpop.permute.xlu0 %307  ;;  %vm16123_vm15 = vcmp.eq.s32.totalorder %v10416_v25, %v10608_v40 }
 0x27c   :  { %16733 = vst [vmem:[#allocation60_spill] sm:$0xff] %v10610_v5  ;;  %vm16127_vm14 = vcmp.eq.s32.totalorder %v10416_v25, %v10610_v5  ;;  %8154 = vmatprep.mubr.msk.f32.mxu0 %vm16123_vm15, %v16118_v47 }
 0x27e   :  { %8155 = vmatmul.mubr.msk.f32.gmra.mrb[22].mxu0 %vm16127_vm14, %v16118_v47  ;;  %v10624_v7 = vpop.permute.xlu1 %311 }
 0x27f   :  { %16734 = vst [vmem:[#allocation61_spill] sm:$0xff] %v10624_v7  ;;  %vm16122_vm13 = vcmp.eq.s32.totalorder %v10416_v25, %v10624_v7 }
 0x280   :  { %8157 = vmatprep.mubr.msk.f32.mxu0 %vm16122_vm13, %v16118_v47 }
 0x282   :  { %v10632_v51 = vpop.permute.xlu1 %5140  ;;  %v10634_v41 = vpop.permute.xlu0 %5137 }
 0x286   :  { %v10636_v40 = vpop.permute.xlu1 %5143  ;;  %v10638_v31 = vpop.permute.xlu0 %5146 }
 0x28a   :  { %v10640_v5 = vpop.permute.xlu1 %5149  ;;  %v10642_v17 = vpop.permute.xlu0 %5152 }
 0x28e   :  { %v10644_v20 = vpop.permute.xlu1 %5155  ;;  %v10646_v18 = vpop.permute.xlu0 %5158 }
 0x292   :  { %v10648_v23 = vpop.permute.xlu1 %5161  ;;  %v10650_v7 = vpop.permute.xlu0 %5164 }
 0x296   :  { %v10652_v47 = vpop.permute.xlu1 %5167  ;;  %v10654_v63 = vpop.permute.xlu0 %5170 }
 0x29a   :  { %v10656_v13 = vpop.permute.xlu1 %5173  ;;  %v10658_v9 = vpop.permute.xlu0 %5176 }
 0x29e   :  { %v10660_v12 = vpop.permute.xlu1 %5179  ;;  %v10662_v11 = vpop.permute.xlu0 %5182 }
 0x2a2   :  { %v10664_v14 = vpop.permute.xlu1 %315  ;;  %v10666_v50 = vpop.permute.xlu0 %319 }
 0x2a3   :  { %16735 = vst [vmem:[#allocation62_spill] sm:$0xff] %v10664_v14  ;;  %16736 = vst [vmem:[#allocation63_spill] sm:$0xff] %v10666_v50  ;;  %vm16132_vm13 = vcmp.eq.s32.totalorder %v10416_v25, %v10664_v14  ;;  %vm16130_vm15 = vcmp.eq.s32.totalorder %v10416_v25, %v10666_v50 }
 0x2a4   :  { %8158 = vmatmul.mubr.msk.f32.gmra.mrb[24].mxu0 %vm16132_vm13, %v16737_v48 }
 0x2a5   :  { %8160 = vmatprep.mubr.msk.f32.mxu0 %vm16130_vm15, %v16737_v48 }
 0x2a6   :  { %v10680_v43 = vpop.permute.xlu1 %327  ;;  %v10682_v55 = vpop.permute.xlu0 %323 }
 0x2a7   :  { %16738 = vst [vmem:[#allocation64_spill] sm:$0xff] %v10680_v43  ;;  %16739 = vst [vmem:[#allocation65_spill] sm:$0xff] %v10682_v55  ;;  %vm16134_vm14 = vcmp.eq.s32.totalorder %v10416_v25, %v10680_v43  ;;  %vm16169_vm12 = vcmp.eq.s32.totalorder %v10416_v25, %v10682_v55 }
 0x2a8   :  { %8161 = vmatmul.mubr.msk.f32.gmra.mrb[26].mxu0 %vm16169_vm12, %v16737_v48 }
 0x2a9   :  { %8163 = vmatprep.mubr.msk.f32.mxu0 %vm16134_vm14, %v16737_v48 }
 0x2aa   :  { %v10692_v14 = vpop.permute.xlu1 %331  ;;  %v10700_v50 = vpop.permute.xlu0 %335 }
 0x2ab   :  { %16740 = vst [vmem:[#allocation66_spill] sm:$0xff] %v10692_v14  ;;  %vm16156_vm15 = vcmp.eq.s32.totalorder %v10416_v25, %v10692_v14  ;;  %16741 = vst [vmem:[#allocation67_spill] sm:$0xff] %v10700_v50  ;;  %vm16151_vm13 = vcmp.eq.s32.totalorder %v10416_v25, %v10700_v50 }
 0x2ac   :  { %8164 = vmatmul.mubr.msk.f32.gmra.mrb[28].mxu0 %vm16156_vm15, %v16737_v48  ;;  %vm5199_vm15 = vcmp.eq.s32.totalorder %v10662_v11, 1 }
 0x2ad   :  { %8166 = vmatprep.mubr.msk.f32.mxu0 %vm16151_vm13, %v16737_v48  ;;  %vm5185_vm13 = vcmp.eq.s32.totalorder %v10632_v51, 1 }
 0x2ae   :  { %v10708_v55 = vpop.permute.xlu1 %339 }
 0x2af   :  { %16742 = vst [vmem:[#allocation68_spill] sm:$0xff] %v10708_v55  ;;  %vm16152_vm14 = vcmp.eq.s32.totalorder %v10416_v25, %v10708_v55  ;;  %v73_v25 = vld [vmem:[#allocation2 + $0x100] sm:$0xff] }
 0x2b0   :  { %8167 = vmatmul.mubr.msk.f32.gmra.mrb[30].mxu0 %vm16152_vm14, %v16737_v48  ;;  %vm5184_vm14 = vcmp.eq.s32.totalorder %v10634_v41, 1 }
 0x312   :  { %v8379_v43 = vpop.f32.mrb[16].mxu1 }
 0x313   :  { %9097 = vlog2.f32 %v8379_v43  ;;  %v4977_v54 = vpop.f32.mrb[17].mxu1 }
 0x314   :  { %9099 = vlog2.f32 %v4977_v54  ;;  %v74_v54 = vld [vmem:[#allocation2 + $0x108] sm:$0xff] }
 0x317   :  { %v8382_v14 = vpop.f32.mrb[18].mxu1 }
 0x318   :  { %9101 = vlog2.f32 %v8382_v14  ;;  %v4987_v49 = vpop.f32.mrb[19].mxu1 }
 0x319   :  { %9103 = vlog2.f32 %v4987_v49 }
 0x31b   :  { %v8385_v19 = vpop.f32.mrb[20].mxu1 }
 0x31c   :  { %9105 = vlog2.f32 %v8385_v19  ;;  %v4997_v50 = vpop.f32.mrb[21].mxu1 }
 0x31d   :  { %v9098_v62 = vpop.eup %9097  ;;  %9107 = vlog2.f32 %v4997_v50 }
 0x31e   :  { %v9100_v37 = vpop.eup %9099  ;;  %v5059_v8 = vmul.f32 0.6931472, %v9098_v62 }
 0x31f   :  { %v5057_v42 = vmul.f32 0.6931472, %v9100_v37  ;;  %v8388_v29 = vpop.f32.mrb[22].mxu1 }
 0x320   :  { %v5089_v55 = vadd.f32 %v5059_v8, %v10349_v15  ;;  %9109 = vlog2.f32 %v8388_v29  ;;  %v5007_v48 = vpop.f32.mrb[23].mxu1 }
 0x321   :  { %v5088_v43 = vadd.f32 %v5057_v42, %v10353_v27  ;;  %9111 = vlog2.f32 %v5007_v48 }
 0x322   :  { %v9102_v14 = vpop.eup %9101  ;;  %v5105_v49 = vadd.f32 %v5089_v55, %v9901_v10 }
 0x323   :  { %v9104_v19 = vpop.eup %9103  ;;  %v5104_v50 = vadd.f32 %v5088_v43, %v9901_v10  ;;  %v5063_v62 = vmul.f32 0.6931472, %v9102_v14  ;;  %v8391_v37 = vpop.f32.mrb[24].mxu1  ;;  %v76_v14 = vld [vmem:[#allocation2 + $0x118] sm:$0xff] }
 0x324   :  { %v5061_v15 = vmul.f32 0.6931472, %v9104_v19  ;;  %9113 = vlog2.f32 %v8391_v37  ;;  %v5017_v29 = vpop.f32.mrb[25].mxu1  ;;  %v5121_v48 = vadd.f32 %v5105_v49, %v74_v54 }
 0x325   :  { %v10726_v8 = vpop.f32.mrb[0].mxu0  ;;  %v5091_v27 = vadd.f32 %v5063_v62, %v10357_v61  ;;  %9115 = vlog2.f32 %v5017_v29  ;;  %v5120_v42 = vadd.f32 %v5104_v50, %v73_v25  ;;  %v75_v61 = vld [vmem:[#allocation2 + $0x110] sm:$0xff] }
 0x326   :  { %16743 = vst [vmem:[#allocation69_spill] sm:$0xff] %v10726_v8  ;;  %v10729_v55 = vpop.f32.mrb[1].mxu0  ;;  %v9106_v58 = vpop.eup %9105  ;;  %v5090_v46 = vadd.f32 %v5061_v15, %v10359_v28  ;;  %v10735_v43 = vsel %vm5185_vm13, %v5121_v48, %v10180_v1  ;;  %vm5187_vm13 = vcmp.eq.s32.totalorder %v10638_v31, 1 }
 0x327   :  { %16744 = vst [vmem:[#allocation70_spill] sm:$0xff] %v10729_v55  ;;  %v9108_v19 = vpop.eup %9107  ;;  %v5107_v37 = vadd.f32 %v5091_v27, %v9901_v10  ;;  %v5067_v8 = vmul.f32 0.6931472, %v9106_v58  ;;  %v8394_v54 = vpop.f32.mrb[26].mxu1  ;;  %5218 = vmax.xlane.f32.xlu0 %v10735_v43  ;;  %v10742_v25 = vsel %vm5184_vm14, %v5120_v42, %v10188_v0  ;;  %vm5186_vm14 = vcmp.eq.s32.totalorder %v10636_v40, 1 }
 0x328   :  { %v5106_v28 = vadd.f32 %v5090_v46, %v9901_v10  ;;  %v5065_v49 = vmul.f32 0.6931472, %v9108_v19  ;;  %9117 = vlog2.f32 %v8394_v54  ;;  %v5027_v1 = vpop.f32.mrb[27].mxu1  ;;  %5216 = vmax.xlane.f32.xlu1 %v10742_v25  ;;  %v78_v46 = vld [vmem:[#allocation2 + $0x128] sm:$0xff] }
 0x329   :  { %v10745_v51 = vpop.f32.mrb[2].mxu0  ;;  %v5093_v58 = vadd.f32 %v5067_v8, %v10365_v6  ;;  %9119 = vlog2.f32 %v5027_v1  ;;  %v5123_v62 = vadd.f32 %v5107_v37, %v76_v14  ;;  %v77_v8 = vld [vmem:[#allocation2 + $0x120] sm:$0xff] }
 0x32a   :  { %16745 = vst [vmem:[#allocation71_spill] sm:$0xff] %v10745_v51  ;;  %v10749_v50 = vpop.f32.mrb[3].mxu0  ;;  %v9110_v15 = vpop.eup %9109  ;;  %v5092_v0 = vadd.f32 %v5065_v49, %v10367_v2  ;;  %v5122_v41 = vadd.f32 %v5106_v28, %v75_v61 }
 0x32b   :  { %16746 = vst [vmem:[#allocation72_spill] sm:$0xff] %v10749_v50  ;;  %v9112_v29 = vpop.eup %9111  ;;  %v5109_v48 = vadd.f32 %v5093_v58, %v9901_v10  ;;  %v5071_v27 = vmul.f32 0.6931472, %v9110_v15  ;;  %v8397_v42 = vpop.f32.mrb[28].mxu1  ;;  %v10756_v6 = vsel %vm5187_vm13, %v5123_v62, %v10197_v52  ;;  %vm5189_vm13 = vcmp.eq.s32.totalorder %v10642_v17, 1 }
 0x32c   :  { %v5108_v14 = vadd.f32 %v5092_v0, %v9901_v10  ;;  %v5069_v19 = vmul.f32 0.6931472, %v9112_v29  ;;  %9121 = vlog2.f32 %v8397_v42  ;;  %v5037_v31 = vpop.f32.mrb[29].mxu1  ;;  %v10760_v2 = vsel %vm5186_vm14, %v5122_v41, %v10201_v30  ;;  %5222 = vmax.xlane.f32.xlu1 %v10756_v6  ;;  %v80_v30 = vld [vmem:[#allocation2 + $0x138] sm:$0xff]  ;;  %v79_v0 = vld [vmem:[#allocation2 + $0x130] sm:$0xff] }
 0x32d   :  { %v10762_v37 = vpop.f32.mrb[4].mxu0  ;;  %v5095_v40 = vadd.f32 %v5071_v27, %v10373_v45  ;;  %9123 = vlog2.f32 %v5037_v31  ;;  %5220 = vmax.xlane.f32.xlu0 %v10760_v2  ;;  %v5125_v54 = vadd.f32 %v5109_v48, %v78_v46  ;;  %vm5188_vm14 = vcmp.eq.s32.totalorder %v10640_v5, 1 }
 0x32e   :  { %16747 = vst [vmem:[#allocation73_spill] sm:$0xff] %v10762_v37  ;;  %v10767_v52 = vpop.f32.mrb[5].mxu0  ;;  %v9114_v61 = vpop.eup %9113  ;;  %v5094_v28 = vadd.f32 %v5069_v19, %v10375_v34  ;;  %v5124_v49 = vadd.f32 %v5108_v14, %v77_v8 }
 0x32f   :  { %16748 = vst [vmem:[#allocation74_spill] sm:$0xff] %v10767_v52  ;;  %v9116_v1 = vpop.eup %9115  ;;  %v5111_v58 = vadd.f32 %v5095_v40, %v9901_v10  ;;  %v5075_v62 = vmul.f32 0.6931472, %v9114_v61  ;;  %v8400_v45 = vpop.f32.mrb[30].mxu1  ;;  %v10774_v15 = vsel %vm5189_vm13, %v5125_v54, %v10211_v24  ;;  %vm5191_vm13 = vcmp.eq.s32.totalorder %v10646_v18, 1  ;;  %v81_v40 = vld [vmem:[#allocation2 + $0x140] sm:$0xff] }
 0x330   :  { %v5110_v41 = vadd.f32 %v5094_v28, %v9901_v10  ;;  %v5073_v46 = vmul.f32 0.6931472, %v9116_v1  ;;  %9125 = vlog2.f32 %v8400_v45  ;;  %v5047_v17 = vpop.f32.mrb[31].mxu1  ;;  %v10778_v34 = vsel %vm5188_vm14, %v5124_v49, %v10215_v44  ;;  %5226 = vmax.xlane.f32.xlu1 %v10774_v15  ;;  %v82_v44 = vld [vmem:[#allocation2 + $0x148] sm:$0xff] }
 0x331   :  { %v10780_v29 = vpop.f32.mrb[6].mxu0  ;;  %v5097_v5 = vadd.f32 %v5075_v62, %v10381_v16  ;;  %9127 = vlog2.f32 %v5047_v17  ;;  %5224 = vmax.xlane.f32.xlu0 %v10778_v34  ;;  %v5127_v48 = vadd.f32 %v5111_v58, %v80_v30  ;;  %vm5190_vm14 = vcmp.eq.s32.totalorder %v10644_v20, 1  ;;  %v84_v58 = vld [vmem:[#allocation2 + $0x158] sm:$0xff] }
 0x332   :  { %16749 = vst [vmem:[#allocation75_spill] sm:$0xff] %v10780_v29  ;;  %v10785_v24 = vpop.f32.mrb[7].mxu0  ;;  %v9118_v27 = vpop.eup %9117  ;;  %v5096_v42 = vadd.f32 %v5073_v46, %v10383_v56  ;;  %v5126_v8 = vadd.f32 %v5110_v41, %v79_v0  ;;  %v83_v0 = vld [vmem:[#allocation2 + $0x150] sm:$0xff] }
 0x333   :  { %16750 = vst [vmem:[#allocation76_spill] sm:$0xff] %v10785_v24  ;;  %v9120_v14 = vpop.eup %9119  ;;  %v5113_v19 = vadd.f32 %v5097_v5, %v9901_v10  ;;  %v5079_v31 = vmul.f32 0.6931472, %v9118_v27  ;;  %v10792_v16 = vsel %vm5191_vm13, %v5127_v48, %v10225_v3  ;;  %vm5193_vm13 = vcmp.eq.s32.totalorder %v10650_v7, 1 }
 0x334   :  { %v5112_v54 = vadd.f32 %v5096_v42, %v9901_v10  ;;  %v5077_v61 = vmul.f32 0.6931472, %v9120_v14  ;;  %v10796_v28 = vsel %vm5190_vm14, %v5126_v8, %v10229_v22  ;;  %5230 = vmax.xlane.f32.xlu1 %v10792_v16  ;;  %vm5192_vm14 = vcmp.eq.s32.totalorder %v10648_v23, 1  ;;  %v86_v42 = vld [vmem:[#allocation2 + $0x168] sm:$0xff]  ;;  %v85_v14 = vld [vmem:[#allocation2 + $0x160] sm:$0xff] }
 0x335   :  { %v10798_v18 = vpop.f32.mrb[8].mxu0  ;;  %v5099_v56 = vadd.f32 %v5079_v31, %v10391_v57  ;;  %5228 = vmax.xlane.f32.xlu0 %v10796_v28  ;;  %v5129_v49 = vadd.f32 %v5113_v19, %v82_v44 }
 0x336   :  { %16751 = vst [vmem:[#allocation77_spill] sm:$0xff] %v10798_v18  ;;  %v10803_v20 = vpop.f32.mrb[9].mxu0  ;;  %v9122_v3 = vpop.eup %9121  ;;  %v5098_v30 = vadd.f32 %v5077_v61, %v10393_v33  ;;  %v5128_v1 = vadd.f32 %v5112_v54, %v81_v40 }
 0x337   :  { %16752 = vst [vmem:[#allocation78_spill] sm:$0xff] %v10803_v20  ;;  %v9124_v22 = vpop.eup %9123  ;;  %v5115_v62 = vadd.f32 %v5099_v56, %v9901_v10  ;;  %v5083_v45 = vmul.f32 0.6931472, %v9122_v3  ;;  %v10810_v57 = vsel %vm5193_vm13, %v5129_v49, %v10237_v38  ;;  %vm5195_vm13 = vcmp.eq.s32.totalorder %v10654_v63, 1  ;;  %v88_v56 = vld [vmem:[#allocation2 + $0x178] sm:$0xff]  ;;  %v87_v3 = vld [vmem:[#allocation2 + $0x170] sm:$0xff] }
 0x338   :  { %v5114_v41 = vadd.f32 %v5098_v30, %v9901_v10  ;;  %v5081_v46 = vmul.f32 0.6931472, %v9124_v22  ;;  %v10814_v17 = vsel %vm5192_vm14, %v5128_v1, %v10241_v4  ;;  %5234 = vmax.xlane.f32.xlu1 %v10810_v57  ;;  %vm5194_vm14 = vcmp.eq.s32.totalorder %v10652_v47, 1  ;;  %v16760_v22 = vld [vmem:[#allocation34_spill] sm:$0xff] }
 0x339   :  { %v10817_v33 = vpop.f32.mrb[10].mxu0  ;;  %v5101_v7 = vadd.f32 %v5083_v45, %v10400_v26  ;;  %5232 = vmax.xlane.f32.xlu0 %v10814_v17  ;;  %v5131_v23 = vadd.f32 %v5115_v62, %v84_v58  ;;  %v16759_v58 = vld [vmem:[#allocation33_spill] sm:$0xff]  ;;  %v16160_v62 = vsub.s32 2, %v16760_v22  ;;  %v16761_v45 = vld [vmem:[#allocation35_spill] sm:$0xff]  ;;  %v16795_v52 = vsub.s32 7, %v16760_v22 }
 0x33a   :  { %16753 = vst [vmem:[#allocation79_spill] sm:$0xff] %v10817_v33  ;;  %v10821_v5 = vpop.f32.mrb[11].mxu0  ;;  %v9126_v38 = vpop.eup %9125  ;;  %v5100_v48 = vadd.f32 %v5081_v46, %v10402_v32  ;;  %v5130_v27 = vadd.f32 %v5114_v41, %v83_v0  ;;  %v16787_v33 = vld [vmem:[#allocation16_spill] sm:$0xff] }
 0x33b   :  { %16754 = vst [vmem:[#allocation80_spill] sm:$0xff] %v10821_v5  ;;  %v9128_v4 = vpop.eup %9127  ;;  %v5117_v8 = vadd.f32 %v5101_v7, %v9901_v10  ;;  %v5087_v44 = vmul.f32 0.6931472, %v9126_v38  ;;  %v10828_v26 = vsel %vm5195_vm13, %v5131_v23, %v10251_v36  ;;  %vm5197_vm13 = vcmp.eq.s32.totalorder %v10658_v9, 1  ;;  %v16788_v5 = vld [vmem:[#allocation19_spill] sm:$0xff] }
 0x33c   :  { %v5116_v19 = vadd.f32 %v5100_v48, %v9901_v10  ;;  %v5085_v31 = vmul.f32 0.6931472, %v9128_v4  ;;  %v10832_v40 = vsel %vm5194_vm14, %v5130_v27, %v10255_v53  ;;  %5238 = vmax.xlane.f32.xlu1 %v10828_v26  ;;  %vm5196_vm14 = vcmp.eq.s32.totalorder %v10656_v13, 1 }
 0x33d   :  { %v10835_v63 = vpop.f32.mrb[12].mxu0  ;;  %v5103_v32 = vadd.f32 %v5087_v44, %v10410_v21  ;;  %5236 = vmax.xlane.f32.xlu0 %v10832_v40  ;;  %v5133_v47 = vadd.f32 %v5117_v8, %v86_v42  ;;  %v344_v0 = vrot.slane %v16761_v45, %v16160_v62  ;;  %v16159_v48 = vsub.s32 3, %v16760_v22 }
 0x33e   :  { %16755 = vst [vmem:[#allocation81_spill] sm:$0xff] %v10835_v63  ;;  %v10839_v54 = vpop.f32.mrb[13].mxu0  ;;  %v5102_v36 = vadd.f32 %v5085_v31, %v10412_v39  ;;  %v5132_v61 = vadd.f32 %v5116_v19, %v85_v14 }
 0x33f   :  { %16756 = vst [vmem:[#allocation82_spill] sm:$0xff] %v10839_v54  ;;  %v5119_v53 = vadd.f32 %v5103_v32, %v9901_v10  ;;  %v10846_v49 = vsel %vm5197_vm13, %v5133_v47, %v10265_v35  ;;  %vm5198_vm13 = vcmp.eq.s32.totalorder %v10660_v12, 1  ;;  %v411_v27 = vrot.slane %v16761_v45, %v16159_v48 }
 0x340   :  { %v5118_v21 = vadd.f32 %v5102_v36, %v9901_v10  ;;  %v10850_v30 = vsel %vm5196_vm14, %v5132_v61, %v10269_v59  ;;  %5242 = vmax.xlane.f32.xlu1 %v10846_v49  ;;  %v16158_v47 = vsub.s32 4, %v16760_v22  ;;  %v10912_v36 = vld [vmem:[%s16028_s1] sm:$0xff] }
 0x341   :  { %v10853_v9 = vpop.f32.mrb[14].mxu0  ;;  %5240 = vmax.xlane.f32.xlu0 %v10850_v30  ;;  %v5135_v39 = vadd.f32 %v5119_v53, %v88_v56  ;;  %v9679_v56 = vmov 3   ;;  %v16157_v53 = vsub.s32 5, %v16760_v22  ;;  %v11157_v50 = vrot.slane %v10912_v36, %v16795_v52 }
 0x342   :  { %16757 = vst [vmem:[#allocation83_spill] sm:$0xff] %v10853_v9  ;;  %v10856_v1 = vpop.f32.mrb[15].mxu0  ;;  %v5134_v13 = vadd.f32 %v5118_v21, %v87_v3  ;;  %v478_v61 = vrot.slane %v10912_v36, %v16158_v47  ;;  %8957 = vset.pattern.permute.xlu0 %v9679_v56  ;;  %8958 = vset.pattern.permute.xlu1 %v9679_v56 }
 0x343   :  { %16758 = vst [vmem:[#allocation84_spill] sm:$0xff] %v10856_v1  ;;  %v10861_v35 = vsel %vm5199_vm15, %v5135_v39, %v10280_v60  ;;  %v10921_v3 = vrot.slane %v10912_v36, %v16157_v53 }
 0x344   :  { %v10864_v59 = vsel %vm5198_vm13, %v5134_v13, %v16759_v58  ;;  %5246 = vmax.xlane.f32.xlu1 %v10861_v35 }
 0x345   :  { %5244 = vmax.xlane.f32.xlu0 %v10864_v59  ;;  %v10872_v11 = vpop.f32.mrb[16].mxu0 }
 0x346   :  { %16762 = vst [vmem:[#allocation33_spill] sm:$0xff] %v10872_v11  ;;  %v10874_v60 = vpop.f32.mrb[17].mxu0 }
 0x347   :  { %16763 = vst [vmem:[#allocation35_spill] sm:$0xff] %v10874_v60 }
 0x349   :  { %v10876_v12 = vpop.f32.mrb[18].mxu0 }
 0x34a   :  { %16764 = vst [vmem:[#allocation85_spill] sm:$0xff] %v10876_v12  ;;  %v10878_v41 = vpop.f32.mrb[19].mxu0  ;;  %v16780_v12 = vld [vmem:[#allocation11_spill] sm:$0xff] }
 0x34b   :  { %16765 = vst [vmem:[#allocation86_spill] sm:$0xff] %v10878_v41  ;;  %v16782_v41 = vld [vmem:[#allocation12_spill] sm:$0xff] }
 0x34d   :  { %v10880_v46 = vpop.f32.mrb[20].mxu0 }
 0x34e   :  { %16766 = vst [vmem:[#allocation87_spill] sm:$0xff] %v10880_v46  ;;  %v10882_v7 = vpop.f32.mrb[21].mxu0 }
 0x34f   :  { %16767 = vst [vmem:[#allocation88_spill] sm:$0xff] %v10882_v7 }
 0x351   :  { %v10884_v23 = vpop.f32.mrb[22].mxu0 }
 0x352   :  { %16768 = vst [vmem:[#allocation89_spill] sm:$0xff] %v10884_v23  ;;  %v10886_v38 = vpop.f32.mrb[23].mxu0 }
 0x353   :  { %16769 = vst [vmem:[#allocation90_spill] sm:$0xff] %v10886_v38 }
 0x355   :  { %350 = vbcast.lane.b32.xlu1 %v344_v0, 264 }
 0x359   :  { %358 = vbcast.lane.b32.xlu1 %v344_v0, 280 }
 0x35b   :  { %346 = vbcast.lane.b32.xlu0 %v344_v0, 256 }
 0x35d   :  { %366 = vbcast.lane.b32.xlu1 %v344_v0, 296 }
 0x35f   :  { %354 = vbcast.lane.b32.xlu0 %v344_v0, 272 }
 0x361   :  { %374 = vbcast.lane.b32.xlu1 %v344_v0, 312 }
 0x363   :  { %362 = vbcast.lane.b32.xlu0 %v344_v0, 288 }
 0x365   :  { %382 = vbcast.lane.b32.xlu1 %v344_v0, 328 }
 0x367   :  { %370 = vbcast.lane.b32.xlu0 %v344_v0, 304 }
 0x369   :  { %390 = vbcast.lane.b32.xlu1 %v344_v0, 344 }
 0x36b   :  { %378 = vbcast.lane.b32.xlu0 %v344_v0, 320 }
 0x36d   :  { %398 = vbcast.lane.b32.xlu1 %v344_v0, 360 }
 0x36f   :  { %386 = vbcast.lane.b32.xlu0 %v344_v0, 336 }
 0x371   :  { %406 = vbcast.lane.b32.xlu1 %v344_v0, 376 }
 0x373   :  { %394 = vbcast.lane.b32.xlu0 %v344_v0, 352 }
 0x375   :  { %417 = vbcast.lane.b32.xlu1 %v411_v27, 264 }
 0x377   :  { %402 = vbcast.lane.b32.xlu0 %v344_v0, 368  ;;  %v10892_v42 = vpop.f32.mrb[24].mxu0 }
 0x378   :  { %16770 = vst [vmem:[#allocation91_spill] sm:$0xff] %v10892_v42  ;;  %v10894_v4 = vpop.f32.mrb[25].mxu0  ;;  %v16779_v42 = vld [vmem:[#allocation10_spill] sm:$0xff] }
 0x379   :  { %16771 = vst [vmem:[#allocation92_spill] sm:$0xff] %v10894_v4  ;;  %425 = vbcast.lane.b32.xlu1 %v411_v27, 280 }
 0x37b   :  { %413 = vbcast.lane.b32.xlu0 %v411_v27, 256  ;;  %v10896_v8 = vpop.f32.mrb[26].mxu0 }
 0x37c   :  { %16772 = vst [vmem:[#allocation93_spill] sm:$0xff] %v10896_v8  ;;  %v10898_v44 = vpop.f32.mrb[27].mxu0 }
 0x37d   :  { %433 = vbcast.lane.b32.xlu1 %v411_v27, 296  ;;  %16773 = vst [vmem:[#allocation94_spill] sm:$0xff] %v10898_v44 }
 0x37f   :  { %421 = vbcast.lane.b32.xlu0 %v411_v27, 272  ;;  %v10900_v14 = vpop.f32.mrb[28].mxu0 }
 0x380   :  { %16774 = vst [vmem:[#allocation95_spill] sm:$0xff] %v10900_v14  ;;  %v10902_v19 = vpop.f32.mrb[29].mxu0 }
 0x381   :  { %441 = vbcast.lane.b32.xlu1 %v411_v27, 312  ;;  %16775 = vst [vmem:[#allocation96_spill] sm:$0xff] %v10902_v19 }
 0x383   :  { %429 = vbcast.lane.b32.xlu0 %v411_v27, 288  ;;  %v10904_v31 = vpop.f32.mrb[30].mxu0 }
 0x384   :  { %16776 = vst [vmem:[#allocation97_spill] sm:$0xff] %v10904_v31  ;;  %v10906_v32 = vpop.f32.mrb[31].mxu0 }
 0x385   :  { %449 = vbcast.lane.b32.xlu1 %v411_v27, 328  ;;  %16777 = vst [vmem:[#allocation98_spill] sm:$0xff] %v10906_v32 }
 0x387   :  { %437 = vbcast.lane.b32.xlu0 %v411_v27, 304 }
 0x389   :  { %457 = vbcast.lane.b32.xlu1 %v411_v27, 344 }
 0x38b   :  { %445 = vbcast.lane.b32.xlu0 %v411_v27, 320 }
 0x38d   :  { %465 = vbcast.lane.b32.xlu1 %v411_v27, 360 }
 0x38f   :  { %453 = vbcast.lane.b32.xlu0 %v411_v27, 336 }
 0x391   :  { %473 = vbcast.lane.b32.xlu1 %v411_v27, 376 }
 0x393   :  { %461 = vbcast.lane.b32.xlu0 %v411_v27, 352 }
 0x395   :  { %484 = vbcast.lane.b32.xlu1 %v478_v61, 264 }
 0x397   :  { %469 = vbcast.lane.b32.xlu0 %v411_v27, 368 }
 0x399   :  { %492 = vbcast.lane.b32.xlu1 %v478_v61, 280 }
 0x39b   :  { %480 = vbcast.lane.b32.xlu0 %v478_v61, 256 }
 0x39d   :  { %500 = vbcast.lane.b32.xlu1 %v478_v61, 296 }
 0x39f   :  { %488 = vbcast.lane.b32.xlu0 %v478_v61, 272 }
 0x3a1   :  { %508 = vbcast.lane.b32.xlu1 %v478_v61, 312 }
 0x3a3   :  { %496 = vbcast.lane.b32.xlu0 %v478_v61, 288 }
 0x3a5   :  { %516 = vbcast.lane.b32.xlu1 %v478_v61, 328 }
 0x3a7   :  { %504 = vbcast.lane.b32.xlu0 %v478_v61, 304 }
 0x3a9   :  { %524 = vbcast.lane.b32.xlu1 %v478_v61, 344 }
 0x3ab   :  { %512 = vbcast.lane.b32.xlu0 %v478_v61, 320 }
 0x3ad   :  { %532 = vbcast.lane.b32.xlu1 %v478_v61, 360 }
 0x3af   :  { %520 = vbcast.lane.b32.xlu0 %v478_v61, 336 }
 0x3b1   :  { %540 = vbcast.lane.b32.xlu1 %v478_v61, 376 }
 0x3b3   :  { %528 = vbcast.lane.b32.xlu0 %v478_v61, 352 }
 0x3b4   :  { %v10923_v21 = vpop.xlane.xlu0 %5218 }
 0x3b5   :  { %v5249_v39 = vsub.f32 %v10735_v43, %v10923_v21  ;;  %v10927_v13 = vpop.xlane.xlu1 %5216  ;;  %551 = vbcast.lane.b32.xlu1 %v10921_v3, 264 }
 0x3b6   :  { %v5248_v58 = vsub.f32 %v10742_v25, %v10927_v13 }
 0x3b7   :  { %v5266_v45 = vmul.f32 1.442695, %v5249_v39  ;;  %536 = vbcast.lane.b32.xlu0 %v478_v61, 368 }
 0x3b8   :  { %v5264_v0 = vmul.f32 1.442695, %v5248_v58 }
 0x3b9   :  { %v10932_v27 = vpop.xlane.xlu1 %5222  ;;  %559 = vbcast.lane.b32.xlu1 %v10921_v3, 280 }
 0x3ba   :  { %9129 = vpow2.f32 %v5264_v0  ;;  %v5251_v56 = vsub.f32 %v10756_v6, %v10932_v27  ;;  %v10937_v53 = vpop.xlane.xlu0 %5220 }
 0x3bb   :  { %9131 = vpow2.f32 %v5266_v45  ;;  %v5250_v47 = vsub.f32 %v10760_v2, %v10937_v53  ;;  %547 = vbcast.lane.b32.xlu0 %v10921_v3, 256 }
 0x3bc   :  { %v5270_v48 = vmul.f32 1.442695, %v5251_v56 }
 0x3bd   :  { %v5268_v39 = vmul.f32 1.442695, %v5250_v47  ;;  %v10942_v61 = vpop.xlane.xlu1 %5226  ;;  %567 = vbcast.lane.b32.xlu1 %v10921_v3, 296 }
 0x3be   :  { %9133 = vpow2.f32 %v5270_v48  ;;  %v5253_v58 = vsub.f32 %v10774_v15, %v10942_v61  ;;  %v10947_v0 = vpop.xlane.xlu0 %5224 }
 0x3bf   :  { %9135 = vpow2.f32 %v5268_v39  ;;  %v5252_v45 = vsub.f32 %v10778_v34, %v10947_v0  ;;  %555 = vbcast.lane.b32.xlu0 %v10921_v3, 272 }
 0x3c0   :  { %v5274_v62 = vmul.f32 1.442695, %v5253_v58 }
 0x3c1   :  { %v5272_v31 = vmul.f32 1.442695, %v5252_v45  ;;  %v10952_v56 = vpop.xlane.xlu1 %5230  ;;  %575 = vbcast.lane.b32.xlu1 %v10921_v3, 312 }
 0x3c2   :  { %9137 = vpow2.f32 %v5274_v62  ;;  %v5255_v48 = vsub.f32 %v10792_v16, %v10952_v56  ;;  %v10957_v47 = vpop.xlane.xlu0 %5228 }
 0x3c3   :  { %9139 = vpow2.f32 %v5272_v31  ;;  %v5254_v39 = vsub.f32 %v10796_v28, %v10957_v47  ;;  %563 = vbcast.lane.b32.xlu0 %v10921_v3, 288 }
 0x3c4   :  { %v9130_v14 = vpop.eup %9129  ;;  %v5278_v32 = vmul.f32 1.442695, %v5255_v48  ;;  %v16778_v48 = vld [vmem:[#allocation9_spill] sm:$0xff] }
 0x3c5   :  { %v9132_v58 = vpop.eup %9131  ;;  %v5276_v45 = vmul.f32 1.442695, %v5254_v39  ;;  %8433 = vmatprep.mubr.f32.mxu1 %v9130_v14  ;;  %v10962_v8 = vpop.xlane.xlu1 %5234  ;;  %583 = vbcast.lane.b32.xlu1 %v10921_v3, 328 }
 0x3c6   :  { %9141 = vpow2.f32 %v5278_v32  ;;  %v5257_v62 = vsub.f32 %v10810_v57, %v10962_v8  ;;  %v10967_v19 = vpop.xlane.xlu0 %5232  ;;  %8434 = vmatmul.mubr.f32.vlgmr.msra.gmra.mrb[32].mxu1 %v9132_v58 }
 0x3c7   :  { %9143 = vpow2.f32 %v5276_v45  ;;  %v5256_v31 = vsub.f32 %v10814_v17, %v10967_v19  ;;  %571 = vbcast.lane.b32.xlu0 %v10921_v3, 304  ;;  %8812 = vmatpush3.bf16.msra.mxu1 %v16778_v48 }
 0x3c8   :  { %v9134_v14 = vpop.eup %9133  ;;  %v5282_v39 = vmul.f32 1.442695, %v5257_v62  ;;  %8814 = vmatprep.subr.bf16.mxu1 %v16779_v42 }
 0x3c9   :  { %v9136_v44 = vpop.eup %9135  ;;  %v5280_v32 = vmul.f32 1.442695, %v5256_v31  ;;  %v10974_v23 = vpop.xlane.xlu1 %5238  ;;  %591 = vbcast.lane.b32.xlu1 %v10921_v3, 344 }
 0x3ca   :  { %9145 = vpow2.f32 %v5282_v39  ;;  %v5259_v58 = vsub.f32 %v10828_v26, %v10974_v23  ;;  %8436 = vmatprep.mubr.f32.mxu1 %v9136_v44  ;;  %v10979_v45 = vpop.xlane.xlu0 %5236 }
 0x3cb   :  { %9147 = vpow2.f32 %v5280_v32  ;;  %v5258_v4 = vsub.f32 %v10832_v40, %v10979_v45  ;;  %579 = vbcast.lane.b32.xlu0 %v10921_v3, 320  ;;  %8437 = vmatmul.mubr.f32.gmra.mrb[34].mxu1 %v9134_v14 }
 0x3cc   :  { %v9138_v62 = vpop.eup %9137  ;;  %v5286_v31 = vmul.f32 1.442695, %v5259_v58  ;;  %8816 = vmatpush3.bf16.msra.mxu1 %v16779_v42 }
 0x3cd   :  { %v9140_v46 = vpop.eup %9139  ;;  %v5284_v38 = vmul.f32 1.442695, %v5258_v4  ;;  %v10985_v39 = vpop.xlane.xlu1 %5242  ;;  %599 = vbcast.lane.b32.xlu1 %v10921_v3, 360  ;;  %8818 = vmatprep.subr.bf16.mxu1 %v16780_v12 }
 0x3ce   :  { %9149 = vpow2.f32 %v5286_v31  ;;  %v5261_v32 = vsub.f32 %v10846_v49, %v10985_v39  ;;  %8439 = vmatprep.mubr.f32.mxu1 %v9140_v46  ;;  %v10992_v14 = vpop.xlane.xlu0 %5240  ;;  %v16781_v46 = vsub.s32 6, %v16760_v22 }
 0x3cf   :  { %9151 = vpow2.f32 %v5284_v38  ;;  %v5260_v58 = vsub.f32 %v10850_v30, %v10992_v14  ;;  %587 = vbcast.lane.b32.xlu0 %v10921_v3, 336  ;;  %8440 = vmatmul.mubr.f32.gmra.mrb[36].mxu1 %v9138_v62 }
 0x3d0   :  { %v9142_v4 = vpop.eup %9141  ;;  %v5290_v7 = vmul.f32 1.442695, %v5261_v32  ;;  %8820 = vmatpush3.bf16.msra.mxu1 %v16780_v12  ;;  %v11004_v38 = vrot.slane %v10912_v36, %v16781_v46 }
 0x3d1   :  { %v9144_v44 = vpop.eup %9143  ;;  %v5288_v11 = vmul.f32 1.442695, %v5260_v58  ;;  %607 = vbcast.lane.b32.xlu1 %v10921_v3, 376  ;;  %v10999_v31 = vpop.xlane.xlu1 %5246  ;;  %8822 = vmatprep.subr.bf16.mxu1 %v16782_v41 }
 0x3d2   :  { %9153 = vpow2.f32 %v5290_v7  ;;  %v5263_v62 = vsub.f32 %v10861_v35, %v10999_v31  ;;  %8442 = vmatprep.mubr.f32.mxu1 %v9144_v44  ;;  %v11009_v32 = vpop.xlane.xlu0 %5244  ;;  %v16783_v44 = vld [vmem:[#allocation13_spill] sm:$0xff] }
 0x3d3   :  { %9155 = vpow2.f32 %v5288_v11  ;;  %v5262_v58 = vsub.f32 %v10864_v59, %v11009_v32  ;;  %595 = vbcast.lane.b32.xlu0 %v10921_v3, 352  ;;  %8443 = vmatmul.mubr.f32.gmra.mrb[38].mxu1 %v9142_v4  ;;  %v16784_v11 = vld [vmem:[#allocation36_spill] sm:$0xff] }
 0x3d4   :  { %v9146_v9 = vpop.eup %9145  ;;  %v5294_v60 = vmul.f32 1.442695, %v5263_v62  ;;  %8824 = vmatpush3.bf16.msra.mxu1 %v16782_v41  ;;  %v16785_v62 = vmov 1.0  }
 0x3d5   :  { %v9148_v46 = vpop.eup %9147  ;;  %v5292_v63 = vmul.f32 1.442695, %v5262_v58  ;;  %618 = vbcast.lane.b32.xlu1 %v11004_v38, 264  ;;  %v11016_v7 = vpop.permute.xlu1 %350  ;;  %8826 = vmatprep.subr.bf16.mxu1 %v16783_v44 }
 0x3d6   :  { %9157 = vpow2.f32 %v5294_v60  ;;  %vm16162_vm15 = vcmp.eq.s32.totalorder %v16784_v11, %v11016_v7  ;;  %8445 = vmatprep.mubr.f32.mxu1 %v9148_v46  ;;  %v11021_v1 = vpop.permute.xlu0 %346 }
 0x3d7   :  { %9159 = vpow2.f32 %v5292_v63  ;;  %vm16161_vm14 = vcmp.eq.s32.totalorder %v16784_v11, %v11021_v1  ;;  %603 = vbcast.lane.b32.xlu0 %v10921_v3, 368  ;;  %8446 = vmatmul.mubr.f32.gmra.mrb[40].mxu1 %v9146_v9  ;;  %v16786_v3 = vld [vmem:[#allocation14_spill] sm:$0xff] }
 0x3d8   :  { %v9150_v4 = vpop.eup %9149  ;;  %8169 = vmatprep.mubr.msk.f32.mxu0 %vm16161_vm14, %v16785_v62  ;;  %8828 = vmatpush3.bf16.msra.mxu1 %v16783_v44 }
 0x3d9   :  { %v9152_v60 = vpop.eup %9151  ;;  %8170 = vmatmul.mubr.msk.f32.gmra.mrb[32].mxu0 %vm16162_vm15, %v16785_v62  ;;  %626 = vbcast.lane.b32.xlu1 %v11004_v38, 280  ;;  %v11036_v63 = vpop.permute.xlu1 %358 }
 0x3da   :  { %vm16164_vm13 = vcmp.eq.s32.totalorder %v16784_v11, %v11036_v63  ;;  %8448 = vmatprep.mubr.f32.mxu1 %v9152_v60  ;;  %v11040_v9 = vpop.permute.xlu0 %354  ;;  %8830 = vmatprep.subr.bf16.mxu1 %v16786_v3 }
 0x3db   :  { %vm16163_vm14 = vcmp.eq.s32.totalorder %v16784_v11, %v11040_v9  ;;  %614 = vbcast.lane.b32.xlu0 %v11004_v38, 256  ;;  %8449 = vmatmul.mubr.f32.gmra.mrb[42].mxu1 %v9150_v4 }
 0x3dc   :  { %v9154_v58 = vpop.eup %9153  ;;  %8172 = vmatprep.mubr.msk.f32.mxu0 %vm16163_vm14, %v16785_v62  ;;  %8832 = vmatpush3.bf16.msra.mxu1 %v16786_v3 }
 0x3dd   :  { %v9156_v46 = vpop.eup %9155  ;;  %8173 = vmatmul.mubr.msk.f32.gmra.mrb[34].mxu0 %vm16164_vm13, %v16785_v62  ;;  %634 = vbcast.lane.b32.xlu1 %v11004_v38, 296  ;;  %v11056_v60 = vpop.permute.xlu1 %366 }
 0x3de   :  { %vm16166_vm15 = vcmp.eq.s32.totalorder %v16784_v11, %v11056_v60  ;;  %8451 = vmatprep.mubr.f32.mxu1 %v9156_v46  ;;  %v11060_v4 = vpop.permute.xlu0 %362  ;;  %8834 = vmatprep.subr.bf16.mxu1 %v16787_v33 }
 0x3df   :  { %vm16165_vm14 = vcmp.eq.s32.totalorder %v16784_v11, %v11060_v4  ;;  %622 = vbcast.lane.b32.xlu0 %v11004_v38, 272  ;;  %8452 = vmatmul.mubr.f32.gmra.mrb[44].mxu1 %v9154_v58 }
 0x3e0   :  { %v9158_v54 = vpop.eup %9157  ;;  %8175 = vmatprep.mubr.msk.f32.mxu0 %vm16165_vm14, %v16785_v62  ;;  %8836 = vmatpush3.bf16.msra.mxu1 %v16787_v33 }
 0x3e1   :  { %v9160_v18 = vpop.eup %9159  ;;  %8176 = vmatmul.mubr.msk.f32.gmra.mrb[36].mxu0 %vm16166_vm15, %v16785_v62  ;;  %642 = vbcast.lane.b32.xlu1 %v11004_v38, 312  ;;  %v11076_v46 = vpop.permute.xlu1 %374 }
 0x3e2   :  { %vm16168_vm13 = vcmp.eq.s32.totalorder %v16784_v11, %v11076_v46  ;;  %8454 = vmatprep.mubr.f32.mxu1 %v9160_v18  ;;  %v11080_v58 = vpop.permute.xlu0 %370  ;;  %8838 = vmatprep.subr.bf16.mxu1 %v16788_v5 }
 0x3e3   :  { %vm16167_vm14 = vcmp.eq.s32.totalorder %v16784_v11, %v11080_v58  ;;  %630 = vbcast.lane.b32.xlu0 %v11004_v38, 288  ;;  %8455 = vmatmul.mubr.f32.gmra.mrb[46].mxu1 %v9158_v54 }
 0x3e4   :  { %8178 = vmatprep.mubr.msk.f32.mxu0 %vm16167_vm14, %v16785_v62  ;;  %8840 = vmatpush3.bf16.msra.mxu1 %v16788_v5 }
 0x3e5   :  { %8179 = vmatmul.mubr.msk.f32.gmra.mrb[38].mxu0 %vm16168_vm13, %v16785_v62  ;;  %650 = vbcast.lane.b32.xlu1 %v11004_v38, 328  ;;  %v11096_v18 = vpop.permute.xlu1 %382 }
 0x3e6   :  { %vm16171_vm15 = vcmp.eq.s32.totalorder %v16784_v11, %v11096_v18  ;;  %v11100_v54 = vpop.permute.xlu0 %378  ;;  %8842 = vmatprep.subr.bf16.mxu1 %v16778_v48 }
 0x3e7   :  { %16789 = vst [vmem:[#allocation99_spill] sm:$0xff] %v11100_v54  ;;  %vm16170_vm14 = vcmp.eq.s32.totalorder %v16784_v11, %v11100_v54  ;;  %638 = vbcast.lane.b32.xlu0 %v11004_v38, 304 }
 0x3e8   :  { %8181 = vmatprep.mubr.msk.f32.mxu0 %vm16170_vm14, %v16785_v62 }
 0x3e9   :  { %8182 = vmatmul.mubr.msk.f32.gmra.mrb[40].mxu0 %vm16171_vm15, %v16785_v62  ;;  %658 = vbcast.lane.b32.xlu1 %v11004_v38, 344  ;;  %v11115_v29 = vpop.permute.xlu1 %390 }
 0x3ea   :  { %16790 = vst [vmem:[#allocation100_spill] sm:$0xff] %v11115_v29  ;;  %vm16175_vm13 = vcmp.eq.s32.totalorder %v16784_v11, %v11115_v29  ;;  %v11119_v20 = vpop.permute.xlu0 %386  ;;  %v11817_v29 = vld [vmem:[#allocation2 + $0x188] sm:$0xff] }
 0x3eb   :  { %16791 = vst [vmem:[#allocation101_spill] sm:$0xff] %v11119_v20  ;;  %vm16172_vm12 = vcmp.eq.s32.totalorder %v16784_v11, %v11119_v20  ;;  %646 = vbcast.lane.b32.xlu0 %v11004_v38, 320 }
 0x3ec   :  { %8184 = vmatprep.mubr.msk.f32.mxu0 %vm16172_vm12, %v16785_v62 }
 0x3ed   :  { %8185 = vmatmul.mubr.msk.f32.gmra.mrb[42].mxu0 %vm16175_vm13, %v16785_v62  ;;  %666 = vbcast.lane.b32.xlu1 %v11004_v38, 360  ;;  %v11133_v37 = vpop.permute.xlu1 %398 }
 0x3ee   :  { %16792 = vst [vmem:[#allocation102_spill] sm:$0xff] %v11133_v37  ;;  %vm16174_vm14 = vcmp.eq.s32.totalorder %v16784_v11, %v11133_v37  ;;  %v11138_v51 = vpop.permute.xlu0 %394 }
 0x3ef   :  { %16793 = vst [vmem:[#allocation103_spill] sm:$0xff] %v11138_v51  ;;  %vm16173_vm15 = vcmp.eq.s32.totalorder %v16784_v11, %v11138_v51  ;;  %654 = vbcast.lane.b32.xlu0 %v11004_v38, 336 }
 0x3f0   :  { %8187 = vmatprep.mubr.msk.f32.mxu0 %vm16173_vm15, %v16785_v62 }
 0x3f1   :  { %8188 = vmatmul.mubr.msk.f32.gmra.mrb[44].mxu0 %vm16174_vm14, %v16785_v62  ;;  %674 = vbcast.lane.b32.xlu1 %v11004_v38, 376  ;;  %v11152_v24 = vpop.permute.xlu1 %406 }
 0x3f2   :  { %16794 = vst [vmem:[#allocation104_spill] sm:$0xff] %v11152_v24  ;;  %vm16179_vm12 = vcmp.eq.s32.totalorder %v16784_v11, %v11152_v24  ;;  %v11161_v55 = vpop.permute.xlu0 %402 }
 0x3f3   :  { %16796 = vst [vmem:[#allocation105_spill] sm:$0xff] %v11161_v55  ;;  %vm16177_vm15 = vcmp.eq.s32.totalorder %v16784_v11, %v11161_v55  ;;  %662 = vbcast.lane.b32.xlu0 %v11004_v38, 352 }
 0x3f4   :  { %8190 = vmatprep.mubr.msk.f32.mxu0 %vm16177_vm15, %v16785_v62 }
 0x3f5   :  { %8191 = vmatmul.mubr.msk.f32.gmra.mrb[46].mxu0 %vm16179_vm12, %v16785_v62  ;;  %685 = vbcast.lane.b32.xlu1 %v11157_v50, 264  ;;  %v11175_v52 = vpop.permute.xlu1 %417 }
 0x3f6   :  { %16797 = vst [vmem:[#allocation106_spill] sm:$0xff] %v11175_v52  ;;  %vm16182_vm14 = vcmp.eq.s32.totalorder %v16784_v11, %v11175_v52  ;;  %v11179_v36 = vpop.permute.xlu0 %413 }
 0x3f7   :  { %16798 = vst [vmem:[#allocation107_spill] sm:$0xff] %v11179_v36  ;;  %vm16180_vm13 = vcmp.eq.s32.totalorder %v16784_v11, %v11179_v36  ;;  %670 = vbcast.lane.b32.xlu0 %v11004_v38, 368  ;;  %v9528_v36 = vld [vmem:[#allocation2 + $0x18] sm:$0xff] }
 0x3f8   :  { %8193 = vmatprep.mubr.msk.f32.mxu0 %vm16180_vm13, %v16785_v62 }
 0x3f9   :  { %8194 = vmatmul.mubr.msk.f32.gmra.mrb[48].mxu0 %vm16182_vm14, %v16785_v62  ;;  %693 = vbcast.lane.b32.xlu1 %v11157_v50, 280  ;;  %v11193_v22 = vpop.permute.xlu1 %425 }
 0x3fa   :  { %16799 = vst [vmem:[#allocation108_spill] sm:$0xff] %v11193_v22  ;;  %vm16186_vm15 = vcmp.eq.s32.totalorder %v16784_v11, %v11193_v22  ;;  %v11197_v5 = vpop.permute.xlu0 %421 }
 0x3fb   :  { %16800 = vst [vmem:[#allocation109_spill] sm:$0xff] %v11197_v5  ;;  %vm16184_vm12 = vcmp.eq.s32.totalorder %v16784_v11, %v11197_v5  ;;  %681 = vbcast.lane.b32.xlu0 %v11157_v50, 256  ;;  %v16865_v5 = vmov 0.0  }
 0x3fc   :  { %8196 = vmatprep.mubr.msk.f32.mxu0 %vm16184_vm12, %v16785_v62  ;;  %v11601_v22 = vsel %vm746_vm3, 1.0, %v16865_v5  ;;  %v11611_v52 = vsel %vm745_vm2, 1.0, %v16865_v5 }
 0x3fd   :  { %8197 = vmatmul.mubr.msk.f32.gmra.mrb[50].mxu0 %vm16186_vm15, %v16785_v62  ;;  %701 = vbcast.lane.b32.xlu1 %v11157_v50, 296  ;;  %v11211_v38 = vpop.permute.xlu1 %433  ;;  %16867 = vst [vmem:[#allocation40_spill] sm:$0xff] %v11601_v22  ;;  %16869 = vst [vmem:[#allocation39_spill] sm:$0xff] %v11611_v52 }
 0x3fe   :  { %16801 = vst [vmem:[#allocation110_spill] sm:$0xff] %v11211_v38  ;;  %vm16190_vm13 = vcmp.eq.s32.totalorder %v16784_v11, %v11211_v38  ;;  %v11215_v33 = vpop.permute.xlu0 %429 }
 0x3ff   :  { %16802 = vst [vmem:[#allocation111_spill] sm:$0xff] %v11215_v33  ;;  %vm16188_vm14 = vcmp.eq.s32.totalorder %v16784_v11, %v11215_v33  ;;  %689 = vbcast.lane.b32.xlu0 %v11157_v50, 272 }
 0x400   :  { %8199 = vmatprep.mubr.msk.f32.mxu0 %vm16188_vm14, %v16785_v62 }
 0x401   :  { %8200 = vmatmul.mubr.msk.f32.gmra.mrb[52].mxu0 %vm16190_vm13, %v16785_v62  ;;  %709 = vbcast.lane.b32.xlu1 %v11157_v50, 312  ;;  %v11229_v3 = vpop.permute.xlu1 %441 }
 0x402   :  { %16803 = vst [vmem:[#allocation112_spill] sm:$0xff] %v11229_v3  ;;  %vm16194_vm12 = vcmp.eq.s32.totalorder %v16784_v11, %v11229_v3  ;;  %v11233_v44 = vpop.permute.xlu0 %437  ;;  %v16817_v3 = vld [vmem:[#allocation18_spill] sm:$0xff] }
 0x403   :  { %16804 = vst [vmem:[#allocation113_spill] sm:$0xff] %v11233_v44  ;;  %vm16192_vm15 = vcmp.eq.s32.totalorder %v16784_v11, %v11233_v44  ;;  %697 = vbcast.lane.b32.xlu0 %v11157_v50, 288 }
 0x404   :  { %8202 = vmatprep.mubr.msk.f32.mxu0 %vm16192_vm15, %v16785_v62 }
 0x405   :  { %8203 = vmatmul.mubr.msk.f32.gmra.mrb[54].mxu0 %vm16194_vm12, %v16785_v62  ;;  %717 = vbcast.lane.b32.xlu1 %v11157_v50, 328  ;;  %v11247_v41 = vpop.permute.xlu1 %449 }
 0x406   :  { %16805 = vst [vmem:[#allocation114_spill] sm:$0xff] %v11247_v41  ;;  %vm16198_vm14 = vcmp.eq.s32.totalorder %v16784_v11, %v11247_v41  ;;  %v11251_v12 = vpop.permute.xlu0 %445 }
 0x407   :  { %16806 = vst [vmem:[#allocation115_spill] sm:$0xff] %v11251_v12  ;;  %vm16196_vm13 = vcmp.eq.s32.totalorder %v16784_v11, %v11251_v12  ;;  %705 = vbcast.lane.b32.xlu0 %v11157_v50, 304 }
 0x408   :  { %8205 = vmatprep.mubr.msk.f32.mxu0 %vm16196_vm13, %v16785_v62 }
 0x409   :  { %8206 = vmatmul.mubr.msk.f32.gmra.mrb[56].mxu0 %vm16198_vm14, %v16785_v62  ;;  %725 = vbcast.lane.b32.xlu1 %v11157_v50, 344  ;;  %v11265_v42 = vpop.permute.xlu1 %457 }
 0x40a   :  { %16807 = vst [vmem:[#allocation116_spill] sm:$0xff] %v11265_v42  ;;  %vm16203_vm15 = vcmp.eq.s32.totalorder %v16784_v11, %v11265_v42  ;;  %v11269_v48 = vpop.permute.xlu0 %453 }
 0x40b   :  { %16808 = vst [vmem:[#allocation117_spill] sm:$0xff] %v11269_v48  ;;  %vm16201_vm12 = vcmp.eq.s32.totalorder %v16784_v11, %v11269_v48  ;;  %713 = vbcast.lane.b32.xlu0 %v11157_v50, 320  ;;  %v16811_v48 = vld [vmem:[#allocation15_spill] sm:$0xff] }
 0x40c   :  { %8208 = vmatprep.mubr.msk.f32.mxu0 %vm16201_vm12, %v16785_v62 }
 0x40d   :  { %8209 = vmatmul.mubr.msk.f32.gmra.mrb[58].mxu0 %vm16203_vm15, %v16785_v62  ;;  %733 = vbcast.lane.b32.xlu1 %v11157_v50, 360  ;;  %v11283_v12 = vpop.permute.xlu1 %465 }
 0x40e   :  { %16809 = vst [vmem:[#allocation118_spill] sm:$0xff] %v11283_v12  ;;  %vm16207_vm13 = vcmp.eq.s32.totalorder %v16784_v11, %v11283_v12  ;;  %v11287_v41 = vpop.permute.xlu0 %461 }
 0x40f   :  { %16810 = vst [vmem:[#allocation119_spill] sm:$0xff] %v11287_v41  ;;  %vm16205_vm14 = vcmp.eq.s32.totalorder %v16784_v11, %v11287_v41  ;;  %721 = vbcast.lane.b32.xlu0 %v11157_v50, 336 }
 0x410   :  { %8211 = vmatprep.mubr.msk.f32.mxu0 %vm16205_vm14, %v16785_v62 }
 0x411   :  { %8212 = vmatmul.mubr.msk.f32.gmra.mrb[60].mxu0 %vm16207_vm13, %v16785_v62  ;;  %5525 = vperm.xlu1 %8958, %v16811_v48   ;;  %v11301_v42 = vpop.permute.xlu1 %473  ;;  %v16814_v48 = vld [vmem:[#allocation17_spill] sm:$0xff] }
 0x412   :  { %16812 = vst [vmem:[#allocation120_spill] sm:$0xff] %v11301_v42  ;;  %vm16212_vm12 = vcmp.eq.s32.totalorder %v16784_v11, %v11301_v42  ;;  %v11305_v44 = vpop.permute.xlu0 %469 }
 0x413   :  { %16813 = vst [vmem:[#allocation121_spill] sm:$0xff] %v11305_v44  ;;  %vm16210_vm15 = vcmp.eq.s32.totalorder %v16784_v11, %v11305_v44  ;;  %729 = vbcast.lane.b32.xlu0 %v11157_v50, 352 }
 0x414   :  { %8214 = vmatprep.mubr.msk.f32.mxu0 %vm16210_vm15, %v16785_v62 }
 0x415   :  { %8215 = vmatmul.mubr.msk.f32.gmra.mrb[62].mxu0 %vm16212_vm12, %v16785_v62  ;;  %5528 = vperm.xlu1 %8958, %v16814_v48   ;;  %v11319_v41 = vpop.permute.xlu1 %484  ;;  %v16818_v48 = vld [vmem:[#allocation22_spill] sm:$0xff] }
 0x416   :  { %16815 = vst [vmem:[#allocation122_spill] sm:$0xff] %v11319_v41  ;;  %vm16216_vm14 = vcmp.eq.s32.totalorder %v16784_v11, %v11319_v41  ;;  %v11323_v12 = vpop.permute.xlu0 %480 }
 0x417   :  { %16816 = vst [vmem:[#allocation123_spill] sm:$0xff] %v11323_v12  ;;  %vm16214_vm13 = vcmp.eq.s32.totalorder %v16784_v11, %v11323_v12  ;;  %5522 = vperm.xlu0 %8957, %v16817_v3   ;;  %v16821_v3 = vld [vmem:[#allocation20_spill] sm:$0xff] }
 0x418   :  { %8217 = vmatprep.mubr.msk.f32.mxu0 %vm16214_vm13, %v16785_v62 }
 0x419   :  { %8218 = vmatmul.mubr.msk.f32.gmra.mrb[64].mxu0 %vm16216_vm14, %v16785_v62  ;;  %5534 = vperm.xlu1 %8958, %v16818_v48   ;;  %v11337_v44 = vpop.permute.xlu1 %492  ;;  %v16822_v48 = vld [vmem:[#allocation26_spill] sm:$0xff] }
 0x41a   :  { %16819 = vst [vmem:[#allocation124_spill] sm:$0xff] %v11337_v44  ;;  %vm16220_vm15 = vcmp.eq.s32.totalorder %v16784_v11, %v11337_v44  ;;  %v11341_v42 = vpop.permute.xlu0 %488 }
 0x41b   :  { %16820 = vst [vmem:[#allocation125_spill] sm:$0xff] %v11341_v42  ;;  %vm16218_vm12 = vcmp.eq.s32.totalorder %v16784_v11, %v11341_v42  ;;  %5531 = vperm.xlu0 %8957, %v16821_v3   ;;  %v16825_v3 = vld [vmem:[#allocation24_spill] sm:$0xff] }
 0x41c   :  { %8220 = vmatprep.mubr.msk.f32.mxu0 %vm16218_vm12, %v16785_v62 }
 0x41d   :  { %8221 = vmatmul.mubr.msk.f32.gmra.mrb[66].mxu0 %vm16220_vm15, %v16785_v62  ;;  %5540 = vperm.xlu1 %8958, %v16822_v48   ;;  %v11355_v12 = vpop.permute.xlu1 %500  ;;  %v16826_v48 = vld [vmem:[#allocation29_spill] sm:$0xff] }
 0x41e   :  { %16823 = vst [vmem:[#allocation126_spill] sm:$0xff] %v11355_v12  ;;  %vm16224_vm13 = vcmp.eq.s32.totalorder %v16784_v11, %v11355_v12  ;;  %v11359_v41 = vpop.permute.xlu0 %496 }
 0x41f   :  { %16824 = vst [vmem:[#allocation127_spill] sm:$0xff] %v11359_v41  ;;  %vm16222_vm14 = vcmp.eq.s32.totalorder %v16784_v11, %v11359_v41  ;;  %5537 = vperm.xlu0 %8957, %v16825_v3   ;;  %v16829_v3 = vld [vmem:[#allocation28_spill] sm:$0xff] }
 0x420   :  { %8223 = vmatprep.mubr.msk.f32.mxu0 %vm16222_vm14, %v16785_v62 }
 0x421   :  { %8224 = vmatmul.mubr.msk.f32.gmra.mrb[68].mxu0 %vm16224_vm13, %v16785_v62  ;;  %5546 = vperm.xlu1 %8958, %v16826_v48   ;;  %v11373_v42 = vpop.permute.xlu1 %508  ;;  %v16830_v48 = vld [vmem:[#allocation30_spill] sm:$0xff] }
 0x422   :  { %16827 = vst [vmem:[#allocation128_spill] sm:$0xff] %v11373_v42  ;;  %vm16228_vm12 = vcmp.eq.s32.totalorder %v16784_v11, %v11373_v42  ;;  %v11377_v44 = vpop.permute.xlu0 %504 }
 0x423   :  { %16828 = vst [vmem:[#allocation129_spill] sm:$0xff] %v11377_v44  ;;  %vm16226_vm15 = vcmp.eq.s32.totalorder %v16784_v11, %v11377_v44  ;;  %5543 = vperm.xlu0 %8957, %v16829_v3   ;;  %v16833_v3 = vld [vmem:[#allocation21_spill] sm:$0xff] }
 0x424   :  { %8226 = vmatprep.mubr.msk.f32.mxu0 %vm16226_vm15, %v16785_v62 }
 0x425   :  { %8227 = vmatmul.mubr.msk.f32.gmra.mrb[70].mxu0 %vm16228_vm12, %v16785_v62  ;;  %5552 = vperm.xlu1 %8958, %v16830_v48   ;;  %v11391_v41 = vpop.permute.xlu1 %516  ;;  %v16834_v48 = vld [vmem:[#allocation31_spill] sm:$0xff] }
 0x426   :  { %16831 = vst [vmem:[#allocation130_spill] sm:$0xff] %v11391_v41  ;;  %vm16232_vm14 = vcmp.eq.s32.totalorder %v16784_v11, %v11391_v41  ;;  %v11395_v12 = vpop.permute.xlu0 %512 }
 0x427   :  { %16832 = vst [vmem:[#allocation131_spill] sm:$0xff] %v11395_v12  ;;  %vm16230_vm13 = vcmp.eq.s32.totalorder %v16784_v11, %v11395_v12  ;;  %5549 = vperm.xlu0 %8957, %v16833_v3   ;;  %v16837_v3 = vld [vmem:[#allocation23_spill] sm:$0xff] }
 0x428   :  { %8229 = vmatprep.mubr.msk.f32.mxu0 %vm16230_vm13, %v16785_v62 }
 0x429   :  { %8230 = vmatmul.mubr.msk.f32.gmra.mrb[72].mxu0 %vm16232_vm14, %v16785_v62  ;;  %5558 = vperm.xlu1 %8958, %v16834_v48   ;;  %v11409_v44 = vpop.permute.xlu1 %524  ;;  %v16838_v48 = vld [vmem:[#allocation32_spill] sm:$0xff] }
 0x42a   :  { %16835 = vst [vmem:[#allocation132_spill] sm:$0xff] %v11409_v44  ;;  %vm16235_vm15 = vcmp.eq.s32.totalorder %v16784_v11, %v11409_v44  ;;  %v11413_v42 = vpop.permute.xlu0 %520 }
 0x42b   :  { %16836 = vst [vmem:[#allocation133_spill] sm:$0xff] %v11413_v42  ;;  %vm16233_vm12 = vcmp.eq.s32.totalorder %v16784_v11, %v11413_v42  ;;  %5555 = vperm.xlu0 %8957, %v16837_v3   ;;  %v16841_v3 = vld [vmem:[#allocation25_spill] sm:$0xff] }
 0x42c   :  { %8232 = vmatprep.mubr.msk.f32.mxu0 %vm16233_vm12, %v16785_v62 }
 0x42d   :  { %8233 = vmatmul.mubr.msk.f32.gmra.mrb[74].mxu0 %vm16235_vm15, %v16785_v62  ;;  %5564 = vperm.xlu1 %8958, %v16838_v48   ;;  %v11427_v12 = vpop.permute.xlu1 %532 }
 0x42e   :  { %16839 = vst [vmem:[#allocation134_spill] sm:$0xff] %v11427_v12  ;;  %vm16239_vm13 = vcmp.eq.s32.totalorder %v16784_v11, %v11427_v12  ;;  %v11431_v41 = vpop.permute.xlu0 %528 }
 0x42f   :  { %16840 = vst [vmem:[#allocation135_spill] sm:$0xff] %v11431_v41  ;;  %vm16237_vm14 = vcmp.eq.s32.totalorder %v16784_v11, %v11431_v41  ;;  %5561 = vperm.xlu0 %8957, %v16841_v3   ;;  %v16844_v3 = vld [vmem:[#allocation27_spill] sm:$0xff] }
 0x430   :  { %8235 = vmatprep.mubr.msk.f32.mxu0 %vm16237_vm14, %v16785_v62 }
 0x431   :  { %8236 = vmatmul.mubr.msk.f32.gmra.mrb[76].mxu0 %vm16239_vm13, %v16785_v62  ;;  %737 = vbcast.lane.b32.xlu1 %v11157_v50, 368  ;;  %v11445_v48 = vpop.permute.xlu1 %540 }
 0x432   :  { %16842 = vst [vmem:[#allocation136_spill] sm:$0xff] %v11445_v48  ;;  %vm16242_vm12 = vcmp.eq.s32.totalorder %v16784_v11, %v11445_v48  ;;  %v11449_v42 = vpop.permute.xlu0 %536 }
 0x433   :  { %16843 = vst [vmem:[#allocation137_spill] sm:$0xff] %v11449_v42  ;;  %vm16240_vm15 = vcmp.eq.s32.totalorder %v16784_v11, %v11449_v42  ;;  %5567 = vperm.xlu0 %8957, %v16844_v3  }
 0x434   :  { %8238 = vmatprep.mubr.msk.f32.mxu0 %vm16240_vm15, %v16785_v62 }
 0x435   :  { %8239 = vmatmul.mubr.msk.f32.gmra.mrb[78].mxu0 %vm16242_vm12, %v16785_v62  ;;  %v11462_v41 = vpop.permute.xlu1 %551 }
 0x436   :  { %16845 = vst [vmem:[#allocation138_spill] sm:$0xff] %v11462_v41  ;;  %vm16245_vm14 = vcmp.eq.s32.totalorder %v16784_v11, %v11462_v41  ;;  %v11466_v12 = vpop.permute.xlu0 %547  ;;  %v16270_v41 = vmov 0.0  }
 0x437   :  { %16846 = vst [vmem:[#allocation139_spill] sm:$0xff] %v11466_v12  ;;  %vm16243_vm13 = vcmp.eq.s32.totalorder %v16784_v11, %v11466_v12  ;;  %741 = vbcast.lane.b32.xlu0 %v11157_v50, 376  ;;  %v11571_v48 = vsel %vm744_vm0, 1.0, %v16270_v41  ;;  %v11581_v44 = vsel %vm743_vm1, 1.0, %v16270_v41  ;;  %v9527_v41 = vld [vmem:[#allocation2] sm:$0xff] }
 0x438   :  { %8241 = vmatprep.mubr.msk.f32.mxu0 %vm16243_vm13, %v16785_v62  ;;  %16860 = vst [vmem:[#allocation37_spill] sm:$0xff] %v11571_v48  ;;  %16862 = vst [vmem:[#allocation38_spill] sm:$0xff] %v11581_v44  ;;  %v1127_v38 = vmul.f32 %v9527_v41, %v11581_v44  ;;  %v11630_v44 = vsel %vm748_vm5, 1.0, %v16865_v5 }
 0x439   :  { %8242 = vmatmul.mubr.msk.f32.gmra.mrb[80].mxu0 %vm16245_vm14, %v16785_v62  ;;  %v11479_v3 = vpop.permute.xlu1 %559  ;;  %16873 = vst [vmem:[#allocation42_spill] sm:$0xff] %v11630_v44 }
 0x43a   :  { %16847 = vst [vmem:[#allocation140_spill] sm:$0xff] %v11479_v3  ;;  %vm16249_vm15 = vcmp.eq.s32.totalorder %v16784_v11, %v11479_v3  ;;  %v11483_v42 = vpop.permute.xlu0 %555 }
 0x43b   :  { %16848 = vst [vmem:[#allocation141_spill] sm:$0xff] %v11483_v42  ;;  %vm16247_vm12 = vcmp.eq.s32.totalorder %v16784_v11, %v11483_v42 }
 0x43c   :  { %8244 = vmatprep.mubr.msk.f32.mxu0 %vm16247_vm12, %v16785_v62 }
 0x43d   :  { %8245 = vmatmul.mubr.msk.f32.gmra.mrb[82].mxu0 %vm16249_vm15, %v16785_v62  ;;  %v11495_v50 = vpop.permute.xlu1 %567 }
 0x43e   :  { %16849 = vst [vmem:[#allocation142_spill] sm:$0xff] %v11495_v50  ;;  %vm16253_vm13 = vcmp.eq.s32.totalorder %v16784_v11, %v11495_v50  ;;  %v11499_v12 = vpop.permute.xlu0 %563 }
 0x43f   :  { %16850 = vst [vmem:[#allocation143_spill] sm:$0xff] %v11499_v12  ;;  %vm16251_vm14 = vcmp.eq.s32.totalorder %v16784_v11, %v11499_v12 }
 0x440   :  { %8247 = vmatprep.mubr.msk.f32.mxu0 %vm16251_vm14, %v16785_v62 }
 0x441   :  { %8248 = vmatmul.mubr.msk.f32.gmra.mrb[84].mxu0 %vm16253_vm13, %v16785_v62  ;;  %v11511_v42 = vpop.permute.xlu1 %575 }
 0x442   :  { %16851 = vst [vmem:[#allocation144_spill] sm:$0xff] %v11511_v42  ;;  %vm16257_vm12 = vcmp.eq.s32.totalorder %v16784_v11, %v11511_v42  ;;  %v11515_v3 = vpop.permute.xlu0 %571 }
 0x443   :  { %16852 = vst [vmem:[#allocation145_spill] sm:$0xff] %v11515_v3  ;;  %vm16255_vm15 = vcmp.eq.s32.totalorder %v16784_v11, %v11515_v3 }
 0x444   :  { %8250 = vmatprep.mubr.msk.f32.mxu0 %vm16255_vm15, %v16785_v62 }
 0x445   :  { %8251 = vmatmul.mubr.msk.f32.gmra.mrb[86].mxu0 %vm16257_vm12, %v16785_v62  ;;  %v11527_v12 = vpop.permute.xlu1 %583 }
 0x446   :  { %16853 = vst [vmem:[#allocation146_spill] sm:$0xff] %v11527_v12  ;;  %vm16261_vm14 = vcmp.eq.s32.totalorder %v16784_v11, %v11527_v12  ;;  %v11531_v50 = vpop.permute.xlu0 %579 }
 0x447   :  { %16854 = vst [vmem:[#allocation147_spill] sm:$0xff] %v11531_v50  ;;  %vm16259_vm13 = vcmp.eq.s32.totalorder %v16784_v11, %v11531_v50 }
 0x448   :  { %8253 = vmatprep.mubr.msk.f32.mxu0 %vm16259_vm13, %v16785_v62 }
 0x449   :  { %8254 = vmatmul.mubr.msk.f32.gmra.mrb[88].mxu0 %vm16261_vm14, %v16785_v62  ;;  %v11543_v3 = vpop.permute.xlu1 %591 }
 0x44a   :  { %16855 = vst [vmem:[#allocation148_spill] sm:$0xff] %v11543_v3  ;;  %vm834_vm15 = vcmp.eq.s32.totalorder %v16784_v11, %v11543_v3  ;;  %v11547_v42 = vpop.permute.xlu0 %587 }
 0x44b   :  { %16856 = vst [vmem:[#allocation149_spill] sm:$0xff] %v11547_v42  ;;  %vm833_vm12 = vcmp.eq.s32.totalorder %v16784_v11, %v11547_v42 }
 0x44c   :  { %8256 = vmatprep.mubr.msk.f32.mxu0 %vm833_vm12, %v16785_v62 }
 0x44d   :  { %8257 = vmatmul.mubr.msk.f32.gmra.mrb[90].mxu0 %vm834_vm15, %v16785_v62  ;;  %v11559_v50 = vpop.permute.xlu1 %599 }
 0x44e   :  { %16857 = vst [vmem:[#allocation150_spill] sm:$0xff] %v11559_v50  ;;  %vm836_vm13 = vcmp.eq.s32.totalorder %v16784_v11, %v11559_v50  ;;  %v11563_v12 = vpop.permute.xlu0 %595  ;;  %v1130_v50 = vmul.f32 %v9528_v36, %v11601_v22 }
 0x44f   :  { %16858 = vst [vmem:[#allocation151_spill] sm:$0xff] %v11563_v12  ;;  %vm16268_vm14 = vcmp.eq.s32.totalorder %v16784_v11, %v11563_v12  ;;  %v9526_v12 = vld [vmem:[#allocation2 + $0x8] sm:$0xff] }
 0x450   :  { %8259 = vmatprep.mubr.msk.f32.mxu0 %vm16268_vm14, %v16785_v62  ;;  %v1128_v3 = vmul.f32 %v9526_v12, %v11571_v48 }
 0x451   :  { %8260 = vmatmul.mubr.msk.f32.gmra.mrb[92].mxu0 %vm836_vm13, %v16785_v62  ;;  %v11587_v33 = vpop.permute.xlu1 %607 }
 0x452   :  { %16863 = vst [vmem:[#allocation152_spill] sm:$0xff] %v11587_v33  ;;  %vm838_vm0 = vcmp.eq.s32.totalorder %v16784_v11, %v11587_v33  ;;  %v11591_v42 = vpop.permute.xlu0 %603  ;;  %v11641_v33 = vsel %vm747_vm4, 1.0, %v16865_v5 }
 0x453   :  { %16864 = vst [vmem:[#allocation153_spill] sm:$0xff] %v11591_v42  ;;  %vm837_vm14 = vcmp.eq.s32.totalorder %v16784_v11, %v11591_v42  ;;  %16875 = vst [vmem:[#allocation41_spill] sm:$0xff] %v11641_v33  ;;  %v9530_v42 = vld [vmem:[#allocation2 + $0x28] sm:$0xff] }
 0x454   :  { %8262 = vmatprep.mubr.msk.f32.mxu0 %vm837_vm14, %v16785_v62 }
 0x455   :  { %8263 = vmatmul.mubr.msk.f32.gmra.mrb[94].mxu0 %vm838_vm0, %v16785_v62  ;;  %1257 = vadd.xlane.f32.xlu1 %v1128_v3  ;;  %v11617_v12 = vpop.permute.xlu1 %618 }
 0x456   :  { %16870 = vst [vmem:[#allocation154_spill] sm:$0xff] %v11617_v12  ;;  %vm840_vm1 = vcmp.eq.s32.totalorder %v16784_v11, %v11617_v12  ;;  %1255 = vadd.xlane.f32.xlu0 %v1127_v38  ;;  %v11621_v41 = vpop.permute.xlu0 %614  ;;  %v9529_v38 = vld [vmem:[#allocation2 + $0x10] sm:$0xff]  ;;  %v11671_v12 = vsel %vm749_vm6, 1.0, %v16865_v5 }
 0x457   :  { %16871 = vst [vmem:[#allocation155_spill] sm:$0xff] %v11621_v41  ;;  %vm839_vm3 = vcmp.eq.s32.totalorder %v16784_v11, %v11621_v41  ;;  %v1129_v3 = vmul.f32 %v9529_v38, %v11611_v52  ;;  %v1132_v38 = vmul.f32 %v9530_v42, %v11630_v44  ;;  %v11660_v52 = vsel %vm750_vm7, 1.0, %v16865_v5  ;;  %16881 = vst [vmem:[#allocation43_spill] sm:$0xff] %v11671_v12  ;;  %v9532_v41 = vld [vmem:[#allocation2 + $0x38] sm:$0xff] }
 0x458   :  { %8265 = vmatprep.mubr.msk.f32.mxu0 %vm839_vm3, %v16785_v62  ;;  %16879 = vst [vmem:[#allocation44_spill] sm:$0xff] %v11660_v52 }
 0x459   :  { %8266 = vmatmul.mubr.msk.f32.gmra.mrb[96].mxu0 %vm840_vm1, %v16785_v62  ;;  %1261 = vadd.xlane.f32.xlu1 %v1130_v50  ;;  %v11647_v48 = vpop.permute.xlu1 %626  ;;  %v9531_v50 = vld [vmem:[#allocation2 + $0x20] sm:$0xff] }
 0x45a   :  { %16876 = vst [vmem:[#allocation156_spill] sm:$0xff] %v11647_v48  ;;  %vm842_vm2 = vcmp.eq.s32.totalorder %v16784_v11, %v11647_v48  ;;  %1259 = vadd.xlane.f32.xlu0 %v1129_v3  ;;  %v11651_v36 = vpop.permute.xlu0 %622  ;;  %v1131_v3 = vmul.f32 %v9531_v50, %v11641_v33  ;;  %v1134_v50 = vmul.f32 %v9532_v41, %v11660_v52 }
 0x45b   :  { %16877 = vst [vmem:[#allocation157_spill] sm:$0xff] %v11651_v36  ;;  %vm16294_vm5 = vcmp.eq.s32.totalorder %v16784_v11, %v11651_v36 }
 0x45c   :  { %8268 = vmatprep.mubr.msk.f32.mxu0 %vm16294_vm5, %v16785_v62 }
 0x45d   :  { %8269 = vmatmul.mubr.msk.f32.gmra.mrb[98].mxu0 %vm842_vm2, %v16785_v62  ;;  %1265 = vadd.xlane.f32.xlu1 %v1132_v38  ;;  %v11677_v22 = vpop.permute.xlu1 %634  ;;  %v9533_v38 = vld [vmem:[#allocation2 + $0x30] sm:$0xff] }
 0x45e   :  { %16882 = vst [vmem:[#allocation158_spill] sm:$0xff] %v11677_v22  ;;  %vm16293_vm4 = vcmp.eq.s32.totalorder %v16784_v11, %v11677_v22  ;;  %1263 = vadd.xlane.f32.xlu0 %v1131_v3  ;;  %v11681_v42 = vpop.permute.xlu0 %630  ;;  %v1133_v44 = vmul.f32 %v9533_v38, %v11671_v12 }
 0x45f   :  { %16883 = vst [vmem:[#allocation159_spill] sm:$0xff] %v11681_v42  ;;  %vm16292_vm7 = vcmp.eq.s32.totalorder %v16784_v11, %v11681_v42 }
 0x460   :  { %8271 = vmatprep.mubr.msk.f32.mxu0 %vm16292_vm7, %v16785_v62 }
 0x461   :  { %8272 = vmatmul.mubr.msk.f32.gmra.mrb[100].mxu0 %vm16293_vm4, %v16785_v62  ;;  %1269 = vadd.xlane.f32.xlu1 %v1134_v50  ;;  %v11695_v3 = vpop.permute.xlu1 %642 }
 0x462   :  { %16884 = vst [vmem:[#allocation160_spill] sm:$0xff] %v11695_v3  ;;  %vm16298_vm6 = vcmp.eq.s32.totalorder %v16784_v11, %v11695_v3  ;;  %1267 = vadd.xlane.f32.xlu0 %v1133_v44  ;;  %v11699_v41 = vpop.permute.xlu0 %638 }
 0x463   :  { %16885 = vst [vmem:[#allocation161_spill] sm:$0xff] %v11699_v41  ;;  %vm16295_vm7 = vcmp.eq.s32.totalorder %v16784_v11, %v11699_v41 }
 0x464   :  { %8274 = vmatprep.mubr.msk.f32.mxu0 %vm16295_vm7, %v16785_v62 }
 0x465   :  { %8275 = vmatmul.mubr.msk.f32.gmra.mrb[102].mxu0 %vm16298_vm6, %v16785_v62  ;;  %v11711_v50 = vpop.permute.xlu1 %650 }
 0x466   :  { %16886 = vst [vmem:[#allocation162_spill] sm:$0xff] %v11711_v50  ;;  %vm16304_vm4 = vcmp.eq.s32.totalorder %v16784_v11, %v11711_v50  ;;  %v11715_v44 = vpop.permute.xlu0 %646 }
 0x467   :  { %16887 = vst [vmem:[#allocation163_spill] sm:$0xff] %v11715_v44  ;;  %vm16301_vm5 = vcmp.eq.s32.totalorder %v16784_v11, %v11715_v44 }
 0x468   :  { %8277 = vmatprep.mubr.msk.f32.mxu0 %vm16301_vm5, %v16785_v62 }
 0x469   :  { %8278 = vmatmul.mubr.msk.f32.gmra.mrb[104].mxu0 %vm16304_vm4, %v16785_v62  ;;  %v11727_v38 = vpop.permute.xlu1 %658 }
 0x46a   :  { %16888 = vst [vmem:[#allocation164_spill] sm:$0xff] %v11727_v38  ;;  %vm16308_vm7 = vcmp.eq.s32.totalorder %v16784_v11, %v11727_v38  ;;  %v11731_v52 = vpop.permute.xlu0 %654 }
 0x46b   :  { %16889 = vst [vmem:[#allocation165_spill] sm:$0xff] %v11731_v52  ;;  %vm16306_vm6 = vcmp.eq.s32.totalorder %v16784_v11, %v11731_v52 }
 0x46c   :  { %8280 = vmatprep.mubr.msk.f32.mxu0 %vm16306_vm6, %v16785_v62 }
 0x46d   :  { %8281 = vmatmul.mubr.msk.f32.gmra.mrb[106].mxu0 %vm16308_vm7, %v16785_v62  ;;  %v11743_v12 = vpop.permute.xlu1 %666 }
 0x46e   :  { %16890 = vst [vmem:[#allocation166_spill] sm:$0xff] %v11743_v12  ;;  %vm16329_vm5 = vcmp.eq.s32.totalorder %v16784_v11, %v11743_v12  ;;  %v11747_v33 = vpop.permute.xlu0 %662 }
 0x46f   :  { %16891 = vst [vmem:[#allocation167_spill] sm:$0xff] %v11747_v33  ;;  %vm851_vm4 = vcmp.eq.s32.totalorder %v16784_v11, %v11747_v33 }
 0x470   :  { %8283 = vmatprep.mubr.msk.f32.mxu0 %vm851_vm4, %v16785_v62 }
 0x471   :  { %8284 = vmatmul.mubr.msk.f32.gmra.mrb[108].mxu0 %vm16329_vm5, %v16785_v62  ;;  %v11759_v52 = vpop.permute.xlu1 %674 }
 0x472   :  { %16892 = vst [vmem:[#allocation168_spill] sm:$0xff] %v11759_v52  ;;  %vm16326_vm6 = vcmp.eq.s32.totalorder %v16784_v11, %v11759_v52  ;;  %v11763_v44 = vpop.permute.xlu0 %670 }
 0x473   :  { %16893 = vst [vmem:[#allocation169_spill] sm:$0xff] %v11763_v44  ;;  %vm16330_vm7 = vcmp.eq.s32.totalorder %v16784_v11, %v11763_v44 }
 0x474   :  { %8286 = vmatprep.mubr.msk.f32.mxu0 %vm16330_vm7, %v16785_v62 }
 0x475   :  { %8287 = vmatmul.mubr.msk.f32.gmra.mrb[110].mxu0 %vm16326_vm6, %v16785_v62  ;;  %v11775_v12 = vpop.permute.xlu1 %685 }
 0x476   :  { %16894 = vst [vmem:[#allocation170_spill] sm:$0xff] %v11775_v12  ;;  %v11777_v33 = vpop.permute.xlu0 %681 }
 0x477   :  { %16895 = vst [vmem:[#allocation171_spill] sm:$0xff] %v11777_v33 }
 0x479   :  { %v11779_v38 = vpop.permute.xlu1 %693 }
 0x47a   :  { %16896 = vst [vmem:[#allocation172_spill] sm:$0xff] %v11779_v38  ;;  %v11781_v50 = vpop.permute.xlu0 %689 }
 0x47b   :  { %16897 = vst [vmem:[#allocation173_spill] sm:$0xff] %v11781_v50 }
 0x47d   :  { %v11785_v3 = vpop.permute.xlu1 %701 }
 0x47e   :  { %v11783_v41 = vpop.permute.xlu0 %697  ;;  %16899 = vst [vmem:[#allocation175_spill] sm:$0xff] %v11785_v3 }
 0x47f   :  { %16898 = vst [vmem:[#allocation174_spill] sm:$0xff] %v11783_v41 }
 0x481   :  { %v11789_v44 = vpop.permute.xlu1 %709 }
 0x482   :  { %v11787_v42 = vpop.permute.xlu0 %705  ;;  %16901 = vst [vmem:[#allocation177_spill] sm:$0xff] %v11789_v44 }
 0x483   :  { %16900 = vst [vmem:[#allocation176_spill] sm:$0xff] %v11787_v42 }
 0x485   :  { %v11793_v52 = vpop.permute.xlu1 %717 }
 0x486   :  { %v11791_v22 = vpop.permute.xlu0 %713  ;;  %16903 = vst [vmem:[#allocation179_spill] sm:$0xff] %v11793_v52 }
 0x487   :  { %16902 = vst [vmem:[#allocation178_spill] sm:$0xff] %v11791_v22 }
 0x489   :  { %v11797_v12 = vpop.permute.xlu1 %725 }
 0x48a   :  { %v11795_v62 = vpop.permute.xlu0 %721  ;;  %16905 = vst [vmem:[#allocation181_spill] sm:$0xff] %v11797_v12 }
 0x48b   :  { %16904 = vst [vmem:[#allocation180_spill] sm:$0xff] %v11795_v62 }
 0x48d   :  { %v11801_v38 = vpop.permute.xlu1 %733 }
 0x48e   :  { %v11799_v33 = vpop.permute.xlu0 %729  ;;  %16907 = vst [vmem:[#allocation183_spill] sm:$0xff] %v11801_v38 }
 0x48f   :  { %16906 = vst [vmem:[#allocation182_spill] sm:$0xff] %v11799_v33 }
 0x491   :  { %v5526_v42 = vpop.permute.xlu1 %5525 }
 0x492   :  { %vm5570_vm6 = vcmp.eq.s32.totalorder %v5526_v42, 1 }
 0x495   :  { %v11807_v36 = vpop.permute.xlu1 %5528 }
 0x496   :  { %v11803_v3 = vpop.permute.xlu0 %5522 }
 0x497   :  { %vm5569_vm5 = vcmp.eq.s32.totalorder %v11803_v3, 1 }
 0x499   :  { %v8435_v50 = vpop.f32.mrb[32].mxu1  ;;  %v11813_v37 = vpop.permute.xlu1 %5534 }
 0x49a   :  { %9161 = vlog2.f32 %v8435_v50  ;;  %v5362_v41 = vpop.f32.mrb[33].mxu1  ;;  %v11805_v52 = vpop.permute.xlu0 %5531 }
 0x49b   :  { %9163 = vlog2.f32 %v5362_v41 }
 0x49e   :  { %v8438_v44 = vpop.f32.mrb[34].mxu1 }
 0x49f   :  { %9165 = vlog2.f32 %v8438_v44  ;;  %v5372_v22 = vpop.f32.mrb[35].mxu1 }
 0x4a0   :  { %9167 = vlog2.f32 %v5372_v22  ;;  %v11811_v22 = vpop.permute.xlu0 %5537 }
 0x4a2   :  { %v8441_v62 = vpop.f32.mrb[36].mxu1 }
 0x4a3   :  { %9169 = vlog2.f32 %v8441_v62  ;;  %v5382_v12 = vpop.f32.mrb[37].mxu1 }
 0x4a4   :  { %v9162_v33 = vpop.eup %9161  ;;  %9171 = vlog2.f32 %v5382_v12 }
 0x4a5   :  { %v9164_v38 = vpop.eup %9163  ;;  %v5444_v50 = vmul.f32 0.6931472, %v9162_v33 }
 0x4a6   :  { %v5442_v48 = vmul.f32 0.6931472, %v9164_v38  ;;  %v8444_v41 = vpop.f32.mrb[38].mxu1 }
 0x4a7   :  { %v5474_v55 = vadd.f32 %v5444_v50, %v10923_v21  ;;  %9173 = vlog2.f32 %v8444_v41  ;;  %v5392_v24 = vpop.f32.mrb[39].mxu1 }
 0x4a8   :  { %v5473_v44 = vadd.f32 %v5442_v48, %v10927_v13  ;;  %9175 = vlog2.f32 %v5392_v24  ;;  %v11820_v48 = vld [vmem:[#allocation2 + $0x180] sm:$0xff] }
 0x4a9   :  { %v9166_v51 = vpop.eup %9165  ;;  %v5490_v62 = vadd.f32 %v5474_v55, %v9901_v10 }
 0x4aa   :  { %v9168_v20 = vpop.eup %9167  ;;  %v5489_v33 = vadd.f32 %v5473_v44, %v9901_v10  ;;  %v5448_v12 = vmul.f32 0.6931472, %v9166_v51  ;;  %v8447_v38 = vpop.f32.mrb[40].mxu1 }
 0x4ab   :  { %v5446_v21 = vmul.f32 0.6931472, %v9168_v20  ;;  %9177 = vlog2.f32 %v8447_v38  ;;  %v5402_v50 = vpop.f32.mrb[41].mxu1  ;;  %v5506_v13 = vadd.f32 %v5490_v62, %v11817_v29 }
 0x4ac   :  { %v5476_v24 = vadd.f32 %v5448_v12, %v10932_v27  ;;  %9179 = vlog2.f32 %v5402_v50  ;;  %v11823_v41 = vpop.f32.mrb[32].mxu0  ;;  %v5505_v55 = vadd.f32 %v5489_v33, %v11820_v48  ;;  %v11835_v12 = vpop.permute.xlu0 %5543 }
 0x4ad   :  { %16908 = vst [vmem:[#allocation184_spill] sm:$0xff] %v11823_v41  ;;  %v9170_v54 = vpop.eup %9169  ;;  %v5475_v51 = vadd.f32 %v5446_v21, %v10937_v53  ;;  %v11828_v44 = vpop.f32.mrb[33].mxu0  ;;  %v11832_v20 = vsel %vm5570_vm6, %v5506_v13, %v10735_v43  ;;  %v11851_v13 = vld [vmem:[#allocation2 + $0x190] sm:$0xff]  ;;  %vm5572_vm6 = vcmp.eq.s32.totalorder %v11805_v52, 1 }
 0x4ae   :  { %16909 = vst [vmem:[#allocation185_spill] sm:$0xff] %v11828_v44  ;;  %v9172_v62 = vpop.eup %9171  ;;  %v5492_v38 = vadd.f32 %v5476_v24, %v9901_v10  ;;  %v5452_v27 = vmul.f32 0.6931472, %v9170_v54  ;;  %v8450_v50 = vpop.f32.mrb[42].mxu1  ;;  %5603 = vmax.xlane.f32.xlu0 %v11832_v20  ;;  %v11841_v44 = vld [vmem:[#allocation2 + $0x198] sm:$0xff]  ;;  %v11849_v54 = vsel %vm5569_vm5, %v5505_v55, %v10742_v25  ;;  %vm5571_vm5 = vcmp.eq.s32.totalorder %v11807_v36, 1 }
 0x4af   :  { %v11838_v33 = vpop.permute.xlu1 %5540  ;;  %v5491_v41 = vadd.f32 %v5475_v51, %v9901_v10  ;;  %v5450_v53 = vmul.f32 0.6931472, %v9172_v62  ;;  %9181 = vlog2.f32 %v8450_v50  ;;  %v5412_v21 = vpop.f32.mrb[43].mxu1  ;;  %5601 = vmax.xlane.f32.xlu1 %v11849_v54 }
 0x4b0   :  { %v5478_v43 = vadd.f32 %v5452_v27, %v10942_v61  ;;  %9183 = vlog2.f32 %v5412_v21  ;;  %v11844_v42 = vpop.f32.mrb[34].mxu0  ;;  %v5508_v24 = vadd.f32 %v5492_v38, %v11841_v44 }
 0x4b1   :  { %16910 = vst [vmem:[#allocation186_spill] sm:$0xff] %v11844_v42  ;;  %v9174_v51 = vpop.eup %9173  ;;  %v5477_v62 = vadd.f32 %v5450_v53, %v10947_v0  ;;  %v11857_v61 = vpop.f32.mrb[35].mxu0  ;;  %v5507_v27 = vadd.f32 %v5491_v41, %v11851_v13  ;;  %v11866_v53 = vld [vmem:[#allocation2 + $0x1a8] sm:$0xff] }
 0x4b2   :  { %16911 = vst [vmem:[#allocation187_spill] sm:$0xff] %v11857_v61  ;;  %v9176_v50 = vpop.eup %9175  ;;  %v5494_v3 = vadd.f32 %v5478_v43, %v9901_v10  ;;  %v5456_v25 = vmul.f32 0.6931472, %v9174_v51  ;;  %v8453_v55 = vpop.f32.mrb[44].mxu1  ;;  %v11862_v21 = vsel %vm5572_vm6, %v5508_v24, %v10756_v6  ;;  %v11876_v6 = vld [vmem:[#allocation2 + $0x1a0] sm:$0xff]  ;;  %vm5574_vm6 = vcmp.eq.s32.totalorder %v11811_v22, 1 }
 0x4b3   :  { %v5493_v52 = vadd.f32 %v5477_v62, %v9901_v10  ;;  %v5454_v38 = vmul.f32 0.6931472, %v9176_v50  ;;  %9185 = vlog2.f32 %v8453_v55  ;;  %v5422_v0 = vpop.f32.mrb[45].mxu1  ;;  %v11869_v41 = vpop.permute.xlu0 %5549  ;;  %v11874_v51 = vsel %vm5571_vm5, %v5507_v27, %v10760_v2  ;;  %5607 = vmax.xlane.f32.xlu1 %v11862_v21  ;;  %v16964_v61 = vld [vmem:[#allocation56_spill] sm:$0xff] }
 0x4b4   :  { %v5480_v42 = vadd.f32 %v5456_v25, %v10952_v56  ;;  %9187 = vlog2.f32 %v5422_v0  ;;  %v11871_v43 = vpop.f32.mrb[36].mxu0  ;;  %v5510_v36 = vadd.f32 %v5494_v3, %v11866_v53  ;;  %v5547_v62 = vpop.permute.xlu1 %5546  ;;  %5605 = vmax.xlane.f32.xlu0 %v11874_v51  ;;  %vm5573_vm5 = vcmp.eq.s32.totalorder %v11813_v37, 1 }
 0x4b5   :  { %16912 = vst [vmem:[#allocation188_spill] sm:$0xff] %v11871_v43  ;;  %v9178_v24 = vpop.eup %9177  ;;  %v5479_v50 = vadd.f32 %v5454_v38, %v10957_v47  ;;  %v11883_v56 = vpop.f32.mrb[37].mxu0  ;;  %v5509_v25 = vadd.f32 %v5493_v52, %v11876_v6 }
 0x4b6   :  { %16913 = vst [vmem:[#allocation189_spill] sm:$0xff] %v11883_v56  ;;  %v9180_v2 = vpop.eup %9179  ;;  %v5496_v27 = vadd.f32 %v5480_v42, %v9901_v10  ;;  %v5460_v3 = vmul.f32 0.6931472, %v9178_v24  ;;  %v8456_v55 = vpop.f32.mrb[46].mxu1  ;;  %v11889_v22 = vsel %vm5574_vm6, %v5510_v36, %v10774_v15  ;;  %v11895_v56 = vld [vmem:[#allocation2 + $0x1b8] sm:$0xff]  ;;  %v11900_v42 = vld [vmem:[#allocation2 + $0x1b0] sm:$0xff] }
 0x4b7   :  { %v5495_v47 = vadd.f32 %v5479_v50, %v9901_v10  ;;  %v5458_v38 = vmul.f32 0.6931472, %v9180_v2  ;;  %9189 = vlog2.f32 %v8456_v55  ;;  %v5432_v0 = vpop.f32.mrb[47].mxu1  ;;  %v11893_v43 = vsel %vm5573_vm5, %v5509_v25, %v10778_v34  ;;  %5611 = vmax.xlane.f32.xlu1 %v11889_v22  ;;  %v5556_v2 = vpop.permute.xlu0 %5555 }
 0x4b8   :  { %v5482_v52 = vadd.f32 %v5460_v3, %v10962_v8  ;;  %9191 = vlog2.f32 %v5432_v0  ;;  %v11898_v37 = vpop.f32.mrb[38].mxu0  ;;  %v5512_v15 = vadd.f32 %v5496_v27, %v11895_v56  ;;  %vm5576_vm6 = vcmp.eq.s32.totalorder %v11835_v12, 1  ;;  %5609 = vmax.xlane.f32.xlu0 %v11893_v43  ;;  %v5553_v12 = vpop.permute.xlu1 %5552  ;;  %v11919_v0 = vld [vmem:[#allocation2 + $0x1c8] sm:$0xff] }
 0x4b9   :  { %16914 = vst [vmem:[#allocation190_spill] sm:$0xff] %v11898_v37  ;;  %v9182_v36 = vpop.eup %9181  ;;  %v5481_v24 = vadd.f32 %v5458_v38, %v10967_v19  ;;  %v11907_v34 = vpop.f32.mrb[39].mxu0  ;;  %v5511_v8 = vadd.f32 %v5495_v47, %v11900_v42  ;;  %vm5575_vm5 = vcmp.eq.s32.totalorder %v11838_v33, 1  ;;  %v11924_v33 = vld [vmem:[#allocation2 + $0x1c0] sm:$0xff] }
 0x4ba   :  { %16915 = vst [vmem:[#allocation191_spill] sm:$0xff] %v11907_v34  ;;  %v9184_v50 = vpop.eup %9183  ;;  %v5498_v25 = vadd.f32 %v5482_v52, %v9901_v10  ;;  %v5464_v27 = vmul.f32 0.6931472, %v9182_v36  ;;  %v11913_v3 = vsel %vm5576_vm6, %v5512_v15, %v10792_v16  ;;  %vm5578_vm6 = vcmp.eq.s32.totalorder %v11869_v41, 1 }
 0x4bb   :  { %v5497_v19 = vadd.f32 %v5481_v24, %v9901_v10  ;;  %v5462_v55 = vmul.f32 0.6931472, %v9184_v50  ;;  %v11917_v38 = vsel %vm5575_vm5, %v5511_v8, %v10796_v28  ;;  %5615 = vmax.xlane.f32.xlu1 %v11913_v3  ;;  %vm5577_vm5 = vcmp.eq.s32.totalorder %v5547_v62, 1  ;;  %v11947_v62 = vld [vmem:[#allocation2 + $0x1d0] sm:$0xff] }
 0x4bc   :  { %v5484_v47 = vadd.f32 %v5464_v27, %v10974_v23  ;;  %v11922_v37 = vpop.f32.mrb[40].mxu0  ;;  %v5514_v52 = vadd.f32 %v5498_v25, %v11919_v0  ;;  %5613 = vmax.xlane.f32.xlu0 %v11917_v38  ;;  %v11942_v27 = vld [vmem:[#allocation2 + $0x1d8] sm:$0xff] }
 0x4bd   :  { %16916 = vst [vmem:[#allocation192_spill] sm:$0xff] %v11922_v37  ;;  %v9186_v36 = vpop.eup %9185  ;;  %v5483_v16 = vadd.f32 %v5462_v55, %v10979_v45  ;;  %v11931_v28 = vpop.f32.mrb[41].mxu0  ;;  %v5513_v15 = vadd.f32 %v5497_v19, %v11924_v33 }
 0x4be   :  { %16917 = vst [vmem:[#allocation193_spill] sm:$0xff] %v11931_v28  ;;  %v9188_v23 = vpop.eup %9187  ;;  %v5500_v24 = vadd.f32 %v5484_v47, %v9901_v10  ;;  %v5468_v8 = vmul.f32 0.6931472, %v9186_v36  ;;  %v11936_v50 = vsel %vm5578_vm6, %v5514_v52, %v10810_v57  ;;  %v5562_v55 = vpop.permute.xlu0 %5561  ;;  %vm5580_vm6 = vcmp.eq.s32.totalorder %v5556_v2, 1  ;;  %v16956_v28 = vld [vmem:[#allocation54_spill] sm:$0xff] }
 0x4bf   :  { %v5499_v41 = vadd.f32 %v5483_v16, %v9901_v10  ;;  %v5466_v25 = vmul.f32 0.6931472, %v9188_v23  ;;  %v11940_v45 = vsel %vm5577_vm5, %v5513_v15, %v10814_v17  ;;  %v5559_v57 = vpop.permute.xlu1 %5558  ;;  %5619 = vmax.xlane.f32.xlu1 %v11936_v50  ;;  %vm5579_vm5 = vcmp.eq.s32.totalorder %v5553_v12, 1 }
 0x4c0   :  { %v5486_v37 = vadd.f32 %v5468_v8, %v10985_v39  ;;  %v11945_v19 = vpop.f32.mrb[42].mxu0  ;;  %v5516_v47 = vadd.f32 %v5500_v24, %v11942_v27  ;;  %5617 = vmax.xlane.f32.xlu0 %v11940_v45  ;;  %vm5582_vm7 = vcmp.eq.s32.totalorder %v5562_v55, 1 }
 0x4c1   :  { %16918 = vst [vmem:[#allocation194_spill] sm:$0xff] %v11945_v19  ;;  %v9190_v36 = vpop.eup %9189  ;;  %v5485_v52 = vadd.f32 %v5466_v25, %v10992_v14  ;;  %v11953_v17 = vpop.f32.mrb[43].mxu0  ;;  %v5515_v16 = vadd.f32 %v5499_v41, %v11947_v62  ;;  %v11964_v25 = vld [vmem:[#allocation2 + $0x1e8] sm:$0xff]  ;;  %v11969_v41 = vld [vmem:[#allocation2 + $0x1e0] sm:$0xff] }
 0x4c2   :  { %16919 = vst [vmem:[#allocation195_spill] sm:$0xff] %v11953_v17  ;;  %v9192_v39 = vpop.eup %9191  ;;  %v5502_v15 = vadd.f32 %v5486_v37, %v9901_v10  ;;  %v5472_v23 = vmul.f32 0.6931472, %v9190_v36  ;;  %v11958_v24 = vsel %vm5580_vm6, %v5516_v47, %v10828_v26  ;;  %vm5581_vm6 = vcmp.eq.s32.totalorder %v5559_v57, 1  ;;  %v5568_v47 = vpop.permute.xlu0 %5567 }
 0x4c3   :  { %v5501_v2 = vadd.f32 %v5485_v52, %v9901_v10  ;;  %v5470_v8 = vmul.f32 0.6931472, %v9192_v39  ;;  %v11962_v14 = vsel %vm5579_vm5, %v5515_v16, %v10832_v40  ;;  %5623 = vmax.xlane.f32.xlu1 %v11958_v24  ;;  %v5565_v52 = vpop.permute.xlu1 %5564  ;;  %v11986_v16 = vld [vmem:[#allocation2 + $0x1f8] sm:$0xff]  ;;  %vm5584_vm5 = vcmp.eq.s32.totalorder %v5568_v47, 1 }
 0x4c4   :  { %v5488_v19 = vadd.f32 %v5472_v23, %v10999_v31  ;;  %v11967_v17 = vpop.f32.mrb[44].mxu0  ;;  %v5518_v37 = vadd.f32 %v5502_v15, %v11964_v25  ;;  %5621 = vmax.xlane.f32.xlu0 %v11962_v14  ;;  %v11990_v15 = vld [vmem:[#allocation2 + $0x1f0] sm:$0xff] }
 0x4c5   :  { %16920 = vst [vmem:[#allocation196_spill] sm:$0xff] %v11967_v17  ;;  %v5487_v26 = vadd.f32 %v5470_v8, %v11009_v32  ;;  %v11975_v12 = vpop.f32.mrb[45].mxu0  ;;  %v5517_v40 = vadd.f32 %v5501_v2, %v11969_v41  ;;  %v12008_v8 = vsel %vm751_vm8, 1.0, %v16865_v5  ;;  %v12034_v2 = vsel %vm754_vm11, 1.0, %v16865_v5 }
 0x4c6   :  { %16921 = vst [vmem:[#allocation197_spill] sm:$0xff] %v11975_v12  ;;  %v5504_v31 = vadd.f32 %v5488_v19, %v9901_v10  ;;  %v11980_v36 = vsel %vm5582_vm7, %v5518_v37, %v10846_v49  ;;  %vm5583_vm7 = vcmp.eq.s32.totalorder %v5565_v52, 1  ;;  %16929 = vst [vmem:[#allocation45_spill] sm:$0xff] %v12008_v8 }
 0x4c7   :  { %16922 = vst [vmem:[#allocation198_spill] sm:$0xff] %v11980_v36  ;;  %v5503_v55 = vadd.f32 %v5487_v26, %v9901_v10  ;;  %v11984_v32 = vsel %vm5581_vm6, %v5517_v40, %v10850_v30  ;;  %5627 = vmax.xlane.f32.xlu1 %v11980_v36  ;;  %v12014_v26 = vsel %vm752_vm9, 1.0, %v16865_v5  ;;  %16937 = vst [vmem:[#allocation48_spill] sm:$0xff] %v12034_v2 }
 0x4c8   :  { %16923 = vst [vmem:[#allocation199_spill] sm:$0xff] %v11984_v32  ;;  %v11988_v39 = vpop.f32.mrb[46].mxu0  ;;  %v5520_v57 = vadd.f32 %v5504_v31, %v11986_v16  ;;  %5625 = vmax.xlane.f32.xlu0 %v11984_v32  ;;  %16931 = vst [vmem:[#allocation46_spill] sm:$0xff] %v12014_v26  ;;  %v9535_v31 = vld [vmem:[#allocation2 + $0x48] sm:$0xff]  ;;  %vm16957_vm6 = vcmp.eq.s32.totalorder %v16784_v11, %v16956_v28 }
 0x4c9   :  { %16924 = vst [vmem:[#allocation200_spill] sm:$0xff] %v11988_v39  ;;  %v11995_v49 = vpop.f32.mrb[47].mxu0  ;;  %v5519_v19 = vadd.f32 %v5503_v55, %v11990_v15  ;;  %v1136_v52 = vmul.f32 %v9535_v31, %v12014_v26  ;;  %v9537_v39 = vld [vmem:[#allocation2 + $0x58] sm:$0xff]  ;;  %v12082_v34 = vsel %vm16957_vm6, 1.0, %v16865_v5 }
 0x4ca   :  { %16925 = vst [vmem:[#allocation201_spill] sm:$0xff] %v11995_v49  ;;  %v11999_v30 = vsel %vm5584_vm5, %v5520_v57, %v10861_v35  ;;  %v12028_v57 = vsel %vm753_vm10, 1.0, %v16865_v5  ;;  %v1138_v55 = vmul.f32 %v9537_v39, %v12034_v2  ;;  %v16948_v49 = vld [vmem:[#allocation51_spill] sm:$0xff]  ;;  %16958 = vst [vmem:[#allocation54_spill] sm:$0xff] %v12082_v34 }
 0x4cb   :  { %16926 = vst [vmem:[#allocation202_spill] sm:$0xff] %v11999_v30  ;;  %v12002_v23 = vsel %vm5583_vm7, %v5519_v19, %v10864_v59  ;;  %5631 = vmax.xlane.f32.xlu1 %v11999_v30  ;;  %v9534_v59 = vld [vmem:[#allocation2 + $0x40] sm:$0xff]  ;;  %16935 = vst [vmem:[#allocation47_spill] sm:$0xff] %v12028_v57  ;;  %v16943_v19 = vld [vmem:[#allocation50_spill] sm:$0xff]  ;;  %vm16949_vm10 = vcmp.eq.s32.totalorder %v16784_v11, %v16948_v49  ;;  %vm16965_vm7 = vcmp.eq.s32.totalorder %v16784_v11, %v16964_v61 }
 0x4cc   :  { %16927 = vst [vmem:[#allocation203_spill] sm:$0xff] %v12002_v23  ;;  %v12016_v40 = vpop.f32.mrb[48].mxu0  ;;  %5629 = vmax.xlane.f32.xlu0 %v12002_v23  ;;  %v1135_v47 = vmul.f32 %v9534_v59, %v12008_v8  ;;  %vm16944_vm9 = vcmp.eq.s32.totalorder %v16784_v11, %v16943_v19  ;;  %v12064_v12 = vsel %vm16949_vm10, 1.0, %v16865_v5  ;;  %v16951_v19 = vld [vmem:[#allocation52_spill] sm:$0xff] }
 0x4cd   :  { %16932 = vst [vmem:[#allocation204_spill] sm:$0xff] %v12016_v40  ;;  %v12020_v35 = vpop.f32.mrb[49].mxu0  ;;  %v9536_v40 = vld [vmem:[#allocation2 + $0x50] sm:$0xff]  ;;  %16950 = vst [vmem:[#allocation51_spill] sm:$0xff] %v12064_v12  ;;  %vm16952_vm11 = vcmp.eq.s32.totalorder %v16784_v11, %v16951_v19 }
 0x4ce   :  { %16933 = vst [vmem:[#allocation205_spill] sm:$0xff] %v12020_v35  ;;  %v1137_v31 = vmul.f32 %v9536_v40, %v12028_v57  ;;  %v16940_v35 = vld [vmem:[#allocation49_spill] sm:$0xff] }
 0x4cf   :  { %1273 = vadd.xlane.f32.xlu1 %v1136_v52  ;;  %vm16941_vm8 = vcmp.eq.s32.totalorder %v16784_v11, %v16940_v35  ;;  %v16959_v19 = vld [vmem:[#allocation53_spill] sm:$0xff] }
 0x4d0   :  { %v12036_v37 = vpop.f32.mrb[50].mxu0  ;;  %1271 = vadd.xlane.f32.xlu0 %v1135_v47  ;;  %v12046_v17 = vsel %vm16941_vm8, 1.0, %v16865_v5  ;;  %v12052_v47 = vsel %vm16944_vm9, 1.0, %v16865_v5  ;;  %vm16960_vm5 = vcmp.eq.s32.totalorder %v16784_v11, %v16959_v19  ;;  %v16967_v19 = vld [vmem:[#allocation55_spill] sm:$0xff] }
 0x4d1   :  { %16938 = vst [vmem:[#allocation206_spill] sm:$0xff] %v12036_v37  ;;  %v12038_v59 = vpop.f32.mrb[51].mxu0  ;;  %16942 = vst [vmem:[#allocation49_spill] sm:$0xff] %v12046_v17  ;;  %v9538_v37 = vld [vmem:[#allocation2 + $0x60] sm:$0xff]  ;;  %vm16968_vm8 = vcmp.eq.s32.totalorder %v16784_v11, %v16967_v19  ;;  %v16975_v19 = vld [vmem:[#allocation57_spill] sm:$0xff] }
 0x4d2   :  { %16939 = vst [vmem:[#allocation207_spill] sm:$0xff] %v12038_v59  ;;  %16945 = vst [vmem:[#allocation50_spill] sm:$0xff] %v12052_v47  ;;  %v1139_v39 = vmul.f32 %v9538_v37, %v12046_v17  ;;  %v9539_v59 = vld [vmem:[#allocation2 + $0x68] sm:$0xff]  ;;  %vm16976_vm10 = vcmp.eq.s32.totalorder %v16784_v11, %v16975_v19  ;;  %v16983_v19 = vld [vmem:[#allocation59_spill] sm:$0xff] }
 0x4d3   :  { %1277 = vadd.xlane.f32.xlu1 %v1138_v55  ;;  %v1140_v35 = vmul.f32 %v9539_v59, %v12052_v47  ;;  %vm16984_vm6 = vcmp.eq.s32.totalorder %v16784_v11, %v16983_v19  ;;  %v16991_v19 = vld [vmem:[#allocation61_spill] sm:$0xff] }
 0x4d4   :  { %v12054_v52 = vpop.f32.mrb[52].mxu0  ;;  %1275 = vadd.xlane.f32.xlu0 %v1137_v31  ;;  %v12070_v31 = vsel %vm16952_vm11, 1.0, %v16865_v5  ;;  %v12746_v17 = vld [vmem:[#allocation2 + $0x268] sm:$0xff] }
 0x4d5   :  { %16946 = vst [vmem:[#allocation208_spill] sm:$0xff] %v12054_v52  ;;  %v12056_v40 = vpop.f32.mrb[53].mxu0  ;;  %16953 = vst [vmem:[#allocation52_spill] sm:$0xff] %v12070_v31  ;;  %v9540_v52 = vld [vmem:[#allocation2 + $0x70] sm:$0xff] }
 0x4d6   :  { %16947 = vst [vmem:[#allocation209_spill] sm:$0xff] %v12056_v40  ;;  %v1141_v59 = vmul.f32 %v9540_v52, %v12064_v12  ;;  %v9541_v40 = vld [vmem:[#allocation2 + $0x78] sm:$0xff]  ;;  %17201 = vst [vmem:[#allocation287_spill] sm:$0xff] %v12746_v17 }
 0x4d7   :  { %1281 = vadd.xlane.f32.xlu1 %v1140_v35  ;;  %v1142_v49 = vmul.f32 %v9541_v40, %v12070_v31  ;;  %v12100_v31 = vsel %vm16965_vm7, 1.0, %v16865_v5  ;;  %vm16992_vm7 = vcmp.eq.s32.totalorder %v16784_v11, %v16991_v19  ;;  %v16999_v19 = vld [vmem:[#allocation63_spill] sm:$0xff] }
 0x4d8   :  { %v12072_v55 = vpop.f32.mrb[54].mxu0  ;;  %1279 = vadd.xlane.f32.xlu0 %v1139_v39  ;;  %v12088_v39 = vsel %vm16960_vm5, 1.0, %v16865_v5  ;;  %16966 = vst [vmem:[#allocation56_spill] sm:$0xff] %v12100_v31 }
 0x4d9   :  { %16954 = vst [vmem:[#allocation210_spill] sm:$0xff] %v12072_v55  ;;  %v12074_v37 = vpop.f32.mrb[55].mxu0  ;;  %16961 = vst [vmem:[#allocation53_spill] sm:$0xff] %v12088_v39  ;;  %v9542_v55 = vld [vmem:[#allocation2 + $0x80] sm:$0xff] }
 0x4da   :  { %16955 = vst [vmem:[#allocation211_spill] sm:$0xff] %v12074_v37  ;;  %v1143_v40 = vmul.f32 %v9542_v55, %v12088_v39  ;;  %v9543_v37 = vld [vmem:[#allocation2 + $0x88] sm:$0xff] }
 0x4db   :  { %1285 = vadd.xlane.f32.xlu1 %v1142_v49  ;;  %v1144_v28 = vmul.f32 %v9543_v37, %v12082_v34  ;;  %v16972_v34 = vld [vmem:[#allocation58_spill] sm:$0xff] }
 0x4dc   :  { %v12090_v35 = vpop.f32.mrb[56].mxu0  ;;  %1283 = vadd.xlane.f32.xlu0 %v1141_v59  ;;  %v12106_v59 = vsel %vm16968_vm8, 1.0, %v16865_v5  ;;  %vm16973_vm9 = vcmp.eq.s32.totalorder %v16784_v11, %v16972_v34 }
 0x4dd   :  { %16962 = vst [vmem:[#allocation212_spill] sm:$0xff] %v12090_v35  ;;  %v12092_v52 = vpop.f32.mrb[57].mxu0  ;;  %16969 = vst [vmem:[#allocation55_spill] sm:$0xff] %v12106_v59  ;;  %v9545_v35 = vld [vmem:[#allocation2 + $0x98] sm:$0xff]  ;;  %v12118_v39 = vsel %vm16973_vm9, 1.0, %v16865_v5  ;;  %vm17000_vm9 = vcmp.eq.s32.totalorder %v16784_v11, %v16999_v19  ;;  %v17007_v19 = vld [vmem:[#allocation64_spill] sm:$0xff] }
 0x4de   :  { %16963 = vst [vmem:[#allocation213_spill] sm:$0xff] %v12092_v52  ;;  %v9544_v52 = vld [vmem:[#allocation2 + $0x90] sm:$0xff]  ;;  %v1146_v61 = vmul.f32 %v9545_v35, %v12100_v31  ;;  %16974 = vst [vmem:[#allocation58_spill] sm:$0xff] %v12118_v39  ;;  %v16980_v31 = vld [vmem:[#allocation60_spill] sm:$0xff] }
 0x4df   :  { %1289 = vadd.xlane.f32.xlu1 %v1144_v28  ;;  %v1145_v37 = vmul.f32 %v9544_v52, %v12106_v59  ;;  %vm16981_vm11 = vcmp.eq.s32.totalorder %v16784_v11, %v16980_v31 }
 0x4e0   :  { %v12108_v49 = vpop.f32.mrb[58].mxu0  ;;  %1287 = vadd.xlane.f32.xlu0 %v1143_v40  ;;  %v12124_v40 = vsel %vm16976_vm10, 1.0, %v16865_v5  ;;  %v12136_v59 = vsel %vm16981_vm11, 1.0, %v16865_v5  ;;  %vm17008_vm11 = vcmp.eq.s32.totalorder %v16784_v11, %v17007_v19  ;;  %v17015_v19 = vld [vmem:[#allocation67_spill] sm:$0xff] }
 0x4e1   :  { %16970 = vst [vmem:[#allocation214_spill] sm:$0xff] %v12108_v49  ;;  %v12110_v55 = vpop.f32.mrb[59].mxu0  ;;  %16977 = vst [vmem:[#allocation57_spill] sm:$0xff] %v12124_v40  ;;  %v9547_v49 = vld [vmem:[#allocation2 + $0xa8] sm:$0xff] }
 0x4e2   :  { %16971 = vst [vmem:[#allocation215_spill] sm:$0xff] %v12110_v55  ;;  %v9546_v55 = vld [vmem:[#allocation2 + $0xa0] sm:$0xff]  ;;  %v1148_v34 = vmul.f32 %v9547_v49, %v12118_v39  ;;  %16982 = vst [vmem:[#allocation60_spill] sm:$0xff] %v12136_v59  ;;  %v16988_v39 = vld [vmem:[#allocation62_spill] sm:$0xff] }
 0x4e3   :  { %1293 = vadd.xlane.f32.xlu1 %v1146_v61  ;;  %v1147_v35 = vmul.f32 %v9546_v55, %v12124_v40  ;;  %vm16989_vm5 = vcmp.eq.s32.totalorder %v16784_v11, %v16988_v39 }
 0x4e4   :  { %v12126_v28 = vpop.f32.mrb[60].mxu0  ;;  %1291 = vadd.xlane.f32.xlu0 %v1145_v37  ;;  %v12142_v37 = vsel %vm16984_vm6, 1.0, %v16865_v5  ;;  %v12154_v40 = vsel %vm16989_vm5, 1.0, %v16865_v5  ;;  %vm17016_vm5 = vcmp.eq.s32.totalorder %v16784_v11, %v17015_v19  ;;  %v9559_v19 = vld [vmem:[#allocation2 + $0x108] sm:$0xff] }
 0x4e5   :  { %16978 = vst [vmem:[#allocation216_spill] sm:$0xff] %v12126_v28  ;;  %v12128_v52 = vpop.f32.mrb[61].mxu0  ;;  %16985 = vst [vmem:[#allocation59_spill] sm:$0xff] %v12142_v37  ;;  %v9549_v28 = vld [vmem:[#allocation2 + $0xb8] sm:$0xff] }
 0x4e6   :  { %16979 = vst [vmem:[#allocation217_spill] sm:$0xff] %v12128_v52  ;;  %v9548_v52 = vld [vmem:[#allocation2 + $0xb0] sm:$0xff]  ;;  %v1150_v31 = vmul.f32 %v9549_v28, %v12136_v59  ;;  %16990 = vst [vmem:[#allocation62_spill] sm:$0xff] %v12154_v40 }
 0x4e7   :  { %1297 = vadd.xlane.f32.xlu1 %v1148_v34  ;;  %v1149_v49 = vmul.f32 %v9548_v52, %v12142_v37  ;;  %v16996_v59 = vld [vmem:[#allocation65_spill] sm:$0xff] }
 0x4e8   :  { %v12144_v61 = vpop.f32.mrb[62].mxu0  ;;  %1295 = vadd.xlane.f32.xlu0 %v1147_v35  ;;  %v12160_v35 = vsel %vm16992_vm7, 1.0, %v16865_v5  ;;  %vm16997_vm8 = vcmp.eq.s32.totalorder %v16784_v11, %v16996_v59  ;;  %vm17022_vm7 = vcmp.eq.s32.totalorder %v16784_v11, %v11016_v7 }
 0x4e9   :  { %16986 = vst [vmem:[#allocation218_spill] sm:$0xff] %v12144_v61  ;;  %v12146_v55 = vpop.f32.mrb[63].mxu0  ;;  %16993 = vst [vmem:[#allocation61_spill] sm:$0xff] %v12160_v35  ;;  %v9551_v61 = vld [vmem:[#allocation2 + $0xc8] sm:$0xff]  ;;  %v12172_v37 = vsel %vm16997_vm8, 1.0, %v16865_v5  ;;  %vm17024_vm8 = vcmp.eq.s32.totalorder %v16784_v11, %v11021_v1 }
 0x4ea   :  { %16987 = vst [vmem:[#allocation219_spill] sm:$0xff] %v12146_v55  ;;  %v9550_v55 = vld [vmem:[#allocation2 + $0xc0] sm:$0xff]  ;;  %v1152_v39 = vmul.f32 %v9551_v61, %v12154_v40  ;;  %16998 = vst [vmem:[#allocation65_spill] sm:$0xff] %v12172_v37  ;;  %v17004_v40 = vld [vmem:[#allocation66_spill] sm:$0xff] }
 0x4eb   :  { %1301 = vadd.xlane.f32.xlu1 %v1150_v31  ;;  %v1151_v28 = vmul.f32 %v9550_v55, %v12160_v35  ;;  %vm17005_vm10 = vcmp.eq.s32.totalorder %v16784_v11, %v17004_v40 }
 0x4ec   :  { %v12162_v34 = vpop.f32.mrb[64].mxu0  ;;  %1299 = vadd.xlane.f32.xlu0 %v1149_v49  ;;  %v12178_v49 = vsel %vm17000_vm9, 1.0, %v16865_v5  ;;  %v12190_v35 = vsel %vm17005_vm10, 1.0, %v16865_v5  ;;  %vm17028_vm9 = vcmp.eq.s32.totalorder %v16784_v11, %v11036_v63  ;;  %vm17030_vm10 = vcmp.eq.s32.totalorder %v16784_v11, %v11040_v9 }
 0x4ed   :  { %16994 = vst [vmem:[#allocation220_spill] sm:$0xff] %v12162_v34  ;;  %v12164_v52 = vpop.f32.mrb[65].mxu0  ;;  %17001 = vst [vmem:[#allocation63_spill] sm:$0xff] %v12178_v49  ;;  %v9552_v34 = vld [vmem:[#allocation2 + $0xd0] sm:$0xff]  ;;  %v12248_v7 = vsel %vm17028_vm9, 1.0, %v16865_v5  ;;  %v12254_v1 = vsel %vm17030_vm10, 1.0, %v16865_v5 }
 0x4ee   :  { %16995 = vst [vmem:[#allocation221_spill] sm:$0xff] %v12164_v52  ;;  %v1153_v61 = vmul.f32 %v9552_v34, %v12178_v49  ;;  %v9553_v52 = vld [vmem:[#allocation2 + $0xd8] sm:$0xff]  ;;  %17006 = vst [vmem:[#allocation66_spill] sm:$0xff] %v12190_v35 }
 0x4ef   :  { %1305 = vadd.xlane.f32.xlu1 %v1152_v39  ;;  %v1154_v59 = vmul.f32 %v9553_v52, %v12172_v37  ;;  %v17012_v37 = vld [vmem:[#allocation68_spill] sm:$0xff]  ;;  %17029 = vst [vmem:[#allocation234_spill] sm:$0xff] %v12248_v7  ;;  %17031 = vst [vmem:[#allocation235_spill] sm:$0xff] %v12254_v1 }
 0x4f0   :  { %v12180_v31 = vpop.f32.mrb[66].mxu0  ;;  %1303 = vadd.xlane.f32.xlu0 %v1151_v28  ;;  %v12196_v28 = vsel %vm17008_vm11, 1.0, %v16865_v5  ;;  %vm17013_vm6 = vcmp.eq.s32.totalorder %v16784_v11, %v17012_v37  ;;  %vm17034_vm11 = vcmp.eq.s32.totalorder %v16784_v11, %v11056_v60 }
 0x4f1   :  { %17002 = vst [vmem:[#allocation222_spill] sm:$0xff] %v12180_v31  ;;  %v12182_v55 = vpop.f32.mrb[67].mxu0  ;;  %17009 = vst [vmem:[#allocation64_spill] sm:$0xff] %v12196_v28  ;;  %v9554_v31 = vld [vmem:[#allocation2 + $0xe0] sm:$0xff]  ;;  %v12208_v49 = vsel %vm17013_vm6, 1.0, %v16865_v5  ;;  %v12266_v63 = vsel %vm17034_vm11, 1.0, %v16865_v5  ;;  %vm17036_vm6 = vcmp.eq.s32.totalorder %v16784_v11, %v11060_v4 }
 0x4f2   :  { %17003 = vst [vmem:[#allocation223_spill] sm:$0xff] %v12182_v55  ;;  %v1155_v52 = vmul.f32 %v9554_v31, %v12196_v28  ;;  %v9555_v55 = vld [vmem:[#allocation2 + $0xe8] sm:$0xff]  ;;  %17014 = vst [vmem:[#allocation68_spill] sm:$0xff] %v12208_v49  ;;  %v12272_v9 = vsel %vm17036_vm6, 1.0, %v16865_v5 }
 0x4f3   :  { %1309 = vadd.xlane.f32.xlu1 %v1154_v59  ;;  %v1156_v40 = vmul.f32 %v9555_v55, %v12190_v35  ;;  %17035 = vst [vmem:[#allocation238_spill] sm:$0xff] %v12266_v63  ;;  %17037 = vst [vmem:[#allocation239_spill] sm:$0xff] %v12272_v9 }
 0x4f4   :  { %v12198_v39 = vpop.f32.mrb[68].mxu0  ;;  %1307 = vadd.xlane.f32.xlu0 %v1153_v61  ;;  %v12214_v61 = vsel %vm17016_vm5, 1.0, %v16865_v5  ;;  %vm17040_vm5 = vcmp.eq.s32.totalorder %v16784_v11, %v11076_v46  ;;  %v17046_v46 = vld [vmem:[#allocation99_spill] sm:$0xff] }
 0x4f5   :  { %17010 = vst [vmem:[#allocation224_spill] sm:$0xff] %v12198_v39  ;;  %v12200_v34 = vpop.f32.mrb[69].mxu0  ;;  %17017 = vst [vmem:[#allocation67_spill] sm:$0xff] %v12214_v61  ;;  %v9556_v39 = vld [vmem:[#allocation2 + $0xf0] sm:$0xff]  ;;  %v12284_v60 = vsel %vm17040_vm5, 1.0, %v16865_v5  ;;  %vm17047_vm9 = vcmp.eq.s32.totalorder %v16784_v11, %v17046_v46 }
 0x4f6   :  { %17011 = vst [vmem:[#allocation225_spill] sm:$0xff] %v12200_v34  ;;  %v1157_v55 = vmul.f32 %v9556_v39, %v12214_v61  ;;  %v9557_v34 = vld [vmem:[#allocation2 + $0xf8] sm:$0xff]  ;;  %v12236_v39 = vsel %vm17024_vm8, 1.0, %v16865_v5  ;;  %17041 = vst [vmem:[#allocation242_spill] sm:$0xff] %v12284_v60  ;;  %vm17044_vm8 = vcmp.eq.s32.totalorder %v16784_v11, %v11096_v18  ;;  %v17054_v46 = vld [vmem:[#allocation101_spill] sm:$0xff] }
 0x4f7   :  { %1313 = vadd.xlane.f32.xlu1 %v1156_v40  ;;  %v1158_v37 = vmul.f32 %v9557_v34, %v12208_v49  ;;  %17025 = vst [vmem:[#allocation231_spill] sm:$0xff] %v12236_v39  ;;  %v9558_v40 = vld [vmem:[#allocation2 + $0x100] sm:$0xff]  ;;  %vm17055_vm11 = vcmp.eq.s32.totalorder %v16784_v11, %v17054_v46  ;;  %v17194_v61 = vld [vmem:[#allocation134_spill] sm:$0xff] }
 0x4f8   :  { %v12216_v59 = vpop.f32.mrb[70].mxu0  ;;  %1311 = vadd.xlane.f32.xlu0 %v1155_v52  ;;  %v12230_v52 = vsel %vm17022_vm7, 1.0, %v16865_v5  ;;  %v1159_v34 = vmul.f32 %v9558_v40, %v12236_v39  ;;  %v9560_v40 = vld [vmem:[#allocation2 + $0x110] sm:$0xff]  ;;  %vm17042_vm7 = vcmp.eq.s32.totalorder %v16784_v11, %v11080_v58  ;;  %v17062_v46 = vld [vmem:[#allocation103_spill] sm:$0xff] }
 0x4f9   :  { %17018 = vst [vmem:[#allocation226_spill] sm:$0xff] %v12216_v59  ;;  %v12218_v31 = vpop.f32.mrb[71].mxu0  ;;  %17023 = vst [vmem:[#allocation230_spill] sm:$0xff] %v12230_v52  ;;  %v12290_v4 = vsel %vm17042_vm7, 1.0, %v16865_v5  ;;  %vm17063_vm5 = vcmp.eq.s32.totalorder %v16784_v11, %v17062_v46  ;;  %v17070_v46 = vld [vmem:[#allocation105_spill] sm:$0xff] }
 0x4fa   :  { %17019 = vst [vmem:[#allocation227_spill] sm:$0xff] %v12218_v31  ;;  %17043 = vst [vmem:[#allocation243_spill] sm:$0xff] %v12290_v4  ;;  %v17051_v31 = vld [vmem:[#allocation100_spill] sm:$0xff] }
 0x4fb   :  { %1317 = vadd.xlane.f32.xlu1 %v1158_v37  ;;  %vm17052_vm10 = vcmp.eq.s32.totalorder %v16784_v11, %v17051_v31 }
 0x4fc   :  { %v12222_v35 = vpop.f32.mrb[72].mxu0  ;;  %1315 = vadd.xlane.f32.xlu0 %v1157_v55  ;;  %v1160_v55 = vmul.f32 %v9559_v19, %v12230_v52  ;;  %v1161_v19 = vmul.f32 %v9560_v40, %v12254_v1  ;;  %v9562_v40 = vld [vmem:[#allocation2 + $0x120] sm:$0xff] }
 0x4fd   :  { %17020 = vst [vmem:[#allocation228_spill] sm:$0xff] %v12222_v35  ;;  %v12224_v28 = vpop.f32.mrb[73].mxu0 }
 0x4fe   :  { %17021 = vst [vmem:[#allocation229_spill] sm:$0xff] %v12224_v28  ;;  %v9567_v28 = vld [vmem:[#allocation2 + $0x148] sm:$0xff] }
 0x4ff   :  { %1321 = vadd.xlane.f32.xlu1 %v1160_v55 }
 0x500   :  { %v12240_v37 = vpop.f32.mrb[74].mxu0  ;;  %1319 = vadd.xlane.f32.xlu0 %v1159_v34 }
 0x501   :  { %17026 = vst [vmem:[#allocation232_spill] sm:$0xff] %v12240_v37  ;;  %v12242_v35 = vpop.f32.mrb[75].mxu0  ;;  %v9561_v37 = vld [vmem:[#allocation2 + $0x118] sm:$0xff] }
 0x502   :  { %17027 = vst [vmem:[#allocation233_spill] sm:$0xff] %v12242_v35  ;;  %v1162_v34 = vmul.f32 %v9561_v37, %v12248_v7  ;;  %v1163_v37 = vmul.f32 %v9562_v40, %v12272_v9  ;;  %v9564_v40 = vld [vmem:[#allocation2 + $0x130] sm:$0xff]  ;;  %v9566_v35 = vld [vmem:[#allocation2 + $0x140] sm:$0xff] }
 0x504   :  { %v12258_v55 = vpop.f32.mrb[76].mxu0  ;;  %1323 = vadd.xlane.f32.xlu0 %v1161_v19  ;;  %1325 = vadd.xlane.f32.xlu1 %v1162_v34 }
 0x505   :  { %17032 = vst [vmem:[#allocation236_spill] sm:$0xff] %v12258_v55  ;;  %v12260_v59 = vpop.f32.mrb[77].mxu0  ;;  %v9563_v55 = vld [vmem:[#allocation2 + $0x128] sm:$0xff] }
 0x506   :  { %17033 = vst [vmem:[#allocation237_spill] sm:$0xff] %v12260_v59  ;;  %v1164_v19 = vmul.f32 %v9563_v55, %v12266_v63  ;;  %v1165_v55 = vmul.f32 %v9564_v40, %v12290_v4 }
 0x508   :  { %v12276_v34 = vpop.f32.mrb[78].mxu0  ;;  %1327 = vadd.xlane.f32.xlu0 %v1163_v37  ;;  %1329 = vadd.xlane.f32.xlu1 %v1164_v19  ;;  %v12298_v19 = vsel %vm17044_vm8, 1.0, %v16865_v5  ;;  %vm17071_vm8 = vcmp.eq.s32.totalorder %v16784_v11, %v17070_v46  ;;  %v17075_v46 = vld [vmem:[#allocation106_spill] sm:$0xff] }
 0x509   :  { %17038 = vst [vmem:[#allocation240_spill] sm:$0xff] %v12276_v34  ;;  %v12278_v59 = vpop.f32.mrb[79].mxu0  ;;  %v9565_v34 = vld [vmem:[#allocation2 + $0x138] sm:$0xff]  ;;  %17045 = vst [vmem:[#allocation244_spill] sm:$0xff] %v12298_v19  ;;  %v1168_v18 = vmul.f32 %v9567_v28, %v12298_v19 }
 0x50a   :  { %17039 = vst [vmem:[#allocation241_spill] sm:$0xff] %v12278_v59  ;;  %v1166_v37 = vmul.f32 %v9565_v34, %v12284_v60  ;;  %v12304_v59 = vsel %vm17047_vm9, 1.0, %v16865_v5  ;;  %v12316_v60 = vsel %vm17052_vm10, 1.0, %v16865_v5  ;;  %v17059_v19 = vld [vmem:[#allocation102_spill] sm:$0xff]  ;;  %vm17076_vm9 = vcmp.eq.s32.totalorder %v16784_v11, %v17075_v46 }
 0x50b   :  { %17048 = vst [vmem:[#allocation99_spill] sm:$0xff] %v12304_v59  ;;  %v1167_v34 = vmul.f32 %v9566_v35, %v12304_v59  ;;  %17053 = vst [vmem:[#allocation100_spill] sm:$0xff] %v12316_v60  ;;  %vm17060_vm6 = vcmp.eq.s32.totalorder %v16784_v11, %v17059_v19 }
 0x50c   :  { %v12306_v58 = vpop.f32.mrb[80].mxu0  ;;  %1331 = vadd.xlane.f32.xlu0 %v1165_v55  ;;  %1333 = vadd.xlane.f32.xlu1 %v1166_v37  ;;  %v12322_v55 = vsel %vm17055_vm11, 1.0, %v16865_v5  ;;  %v12334_v59 = vsel %vm17060_vm6, 1.0, %v16865_v5 }
 0x50d   :  { %17049 = vst [vmem:[#allocation245_spill] sm:$0xff] %v12306_v58  ;;  %v12308_v40 = vpop.f32.mrb[81].mxu0  ;;  %17056 = vst [vmem:[#allocation101_spill] sm:$0xff] %v12322_v55  ;;  %v9568_v58 = vld [vmem:[#allocation2 + $0x150] sm:$0xff] }
 0x50e   :  { %17050 = vst [vmem:[#allocation246_spill] sm:$0xff] %v12308_v40  ;;  %v1169_v28 = vmul.f32 %v9568_v58, %v12322_v55  ;;  %v9569_v40 = vld [vmem:[#allocation2 + $0x158] sm:$0xff]  ;;  %17061 = vst [vmem:[#allocation102_spill] sm:$0xff] %v12334_v59 }
 0x50f   :  { %v1170_v31 = vmul.f32 %v9569_v40, %v12316_v60  ;;  %v17067_v60 = vld [vmem:[#allocation104_spill] sm:$0xff] }
 0x510   :  { %v12324_v37 = vpop.f32.mrb[82].mxu0  ;;  %1335 = vadd.xlane.f32.xlu0 %v1167_v34  ;;  %1337 = vadd.xlane.f32.xlu1 %v1168_v18  ;;  %v12340_v34 = vsel %vm17063_vm5, 1.0, %v16865_v5  ;;  %vm17068_vm7 = vcmp.eq.s32.totalorder %v16784_v11, %v17067_v60 }
 0x511   :  { %17057 = vst [vmem:[#allocation247_spill] sm:$0xff] %v12324_v37  ;;  %v12326_v35 = vpop.f32.mrb[83].mxu0  ;;  %17064 = vst [vmem:[#allocation103_spill] sm:$0xff] %v12340_v34  ;;  %v9570_v37 = vld [vmem:[#allocation2 + $0x160] sm:$0xff]  ;;  %v12352_v55 = vsel %vm17068_vm7, 1.0, %v16865_v5 }
 0x512   :  { %17058 = vst [vmem:[#allocation248_spill] sm:$0xff] %v12326_v35  ;;  %v1171_v40 = vmul.f32 %v9570_v37, %v12340_v34  ;;  %v9571_v35 = vld [vmem:[#allocation2 + $0x168] sm:$0xff]  ;;  %17069 = vst [vmem:[#allocation104_spill] sm:$0xff] %v12352_v55  ;;  %v12370_v34 = vsel %vm17076_vm9, 1.0, %v16865_v5 }
 0x513   :  { %v1172_v19 = vmul.f32 %v9571_v35, %v12334_v59  ;;  %v9681_v59 = vmov 4   ;;  %17077 = vst [vmem:[#allocation106_spill] sm:$0xff] %v12370_v34  ;;  %v1176_v46 = vmul.f32 %v12370_v34, %v11817_v29  ;;  %v17093_v34 = vld [vmem:[#allocation110_spill] sm:$0xff] }
 0x514   :  { %v12342_v18 = vpop.f32.mrb[84].mxu0  ;;  %1339 = vadd.xlane.f32.xlu0 %v1169_v28  ;;  %1341 = vadd.xlane.f32.xlu1 %v1170_v31  ;;  %v12358_v28 = vsel %vm17071_vm8, 1.0, %v16865_v5  ;;  %vm17094_vm5 = vcmp.eq.s32.totalorder %v16784_v11, %v17093_v34 }
 0x515   :  { %17065 = vst [vmem:[#allocation249_spill] sm:$0xff] %v12342_v18  ;;  %v12344_v58 = vpop.f32.mrb[85].mxu0  ;;  %17072 = vst [vmem:[#allocation105_spill] sm:$0xff] %v12358_v28  ;;  %v9572_v18 = vld [vmem:[#allocation2 + $0x170] sm:$0xff]  ;;  %8960 = vset.pattern.permute.xlu1 %v9681_v59  ;;  %8959 = vset.pattern.permute.xlu0 %v9681_v59 }
 0x516   :  { %17066 = vst [vmem:[#allocation250_spill] sm:$0xff] %v12344_v58  ;;  %v1173_v35 = vmul.f32 %v9572_v18, %v12358_v28  ;;  %v9573_v58 = vld [vmem:[#allocation2 + $0x178] sm:$0xff] }
 0x517   :  { %v1174_v60 = vmul.f32 %v9573_v58, %v12352_v55  ;;  %v12382_v58 = vpop.permute.xlu0 %741 }
 0x518   :  { %v12360_v31 = vpop.f32.mrb[86].mxu0  ;;  %1343 = vadd.xlane.f32.xlu0 %v1171_v40  ;;  %1345 = vadd.xlane.f32.xlu1 %v1172_v19  ;;  %v17078_v40 = vld [vmem:[#allocation107_spill] sm:$0xff]  ;;  %17083 = vst [vmem:[#allocation255_spill] sm:$0xff] %v12382_v58 }
 0x519   :  { %17073 = vst [vmem:[#allocation251_spill] sm:$0xff] %v12360_v31  ;;  %v12362_v37 = vpop.f32.mrb[87].mxu0  ;;  %vm17079_vm10 = vcmp.eq.s32.totalorder %v16784_v11, %v17078_v40 }
 0x51a   :  { %17074 = vst [vmem:[#allocation252_spill] sm:$0xff] %v12362_v37  ;;  %v12376_v19 = vsel %vm17079_vm10, 1.0, %v16865_v5  ;;  %v17084_v37 = vld [vmem:[#allocation108_spill] sm:$0xff] }
 0x51b   :  { %17080 = vst [vmem:[#allocation107_spill] sm:$0xff] %v12376_v19  ;;  %v1175_v59 = vmul.f32 %v12376_v19, %v11820_v48  ;;  %vm17085_vm11 = vcmp.eq.s32.totalorder %v16784_v11, %v17084_v37 }
 0x51c   :  { %v12378_v31 = vpop.f32.mrb[88].mxu0  ;;  %1347 = vadd.xlane.f32.xlu0 %v1173_v35  ;;  %1349 = vadd.xlane.f32.xlu1 %v1174_v60  ;;  %v12392_v40 = vsel %vm17085_vm11, 1.0, %v16865_v5  ;;  %v17087_v35 = vld [vmem:[#allocation109_spill] sm:$0xff] }
 0x51d   :  { %17081 = vst [vmem:[#allocation253_spill] sm:$0xff] %v12378_v31  ;;  %v12380_v18 = vpop.f32.mrb[89].mxu0  ;;  %17086 = vst [vmem:[#allocation108_spill] sm:$0xff] %v12392_v40  ;;  %vm17088_vm6 = vcmp.eq.s32.totalorder %v16784_v11, %v17087_v35  ;;  %v1178_v37 = vmul.f32 %v12392_v40, %v11841_v44  ;;  %v12414_v35 = vsel %vm17094_vm5, 1.0, %v16865_v5  ;;  %v17102_v40 = vld [vmem:[#allocation112_spill] sm:$0xff] }
 0x51e   :  { %17082 = vst [vmem:[#allocation254_spill] sm:$0xff] %v12380_v18  ;;  %v12398_v60 = vsel %vm17088_vm6, 1.0, %v16865_v5  ;;  %v12404_v18 = vpop.permute.xlu1 %737  ;;  %17095 = vst [vmem:[#allocation110_spill] sm:$0xff] %v12414_v35  ;;  %v1180_v34 = vmul.f32 %v12414_v35, %v11866_v53  ;;  %vm17103_vm8 = vcmp.eq.s32.totalorder %v16784_v11, %v17102_v40 }
 0x51f   :  { %17089 = vst [vmem:[#allocation109_spill] sm:$0xff] %v12398_v60  ;;  %17092 = vst [vmem:[#allocation258_spill] sm:$0xff] %v12404_v18  ;;  %v1177_v29 = vmul.f32 %v12398_v60, %v11851_v13 }
 0x520   :  { %v12400_v31 = vpop.f32.mrb[90].mxu0  ;;  %1351 = vadd.xlane.f32.xlu0 %v1175_v59  ;;  %1353 = vadd.xlane.f32.xlu1 %v1176_v46  ;;  %v17096_v59 = vld [vmem:[#allocation111_spill] sm:$0xff] }
 0x521   :  { %17090 = vst [vmem:[#allocation256_spill] sm:$0xff] %v12400_v31  ;;  %v12402_v48 = vpop.f32.mrb[91].mxu0  ;;  %vm17097_vm7 = vcmp.eq.s32.totalorder %v16784_v11, %v17096_v59  ;;  %v12436_v59 = vsel %vm17103_vm8, 1.0, %v16865_v5 }
 0x522   :  { %17091 = vst [vmem:[#allocation257_spill] sm:$0xff] %v12402_v48  ;;  %v12420_v46 = vsel %vm17097_vm7, 1.0, %v16865_v5  ;;  %v12424_v48 = vpop.xlane.xlu0 %1255  ;;  %17104 = vst [vmem:[#allocation112_spill] sm:$0xff] %v12436_v59 }
 0x523   :  { %17098 = vst [vmem:[#allocation111_spill] sm:$0xff] %v12420_v46  ;;  %17100 = vst [vmem:[#allocation260_spill] sm:$0xff] %v12424_v48  ;;  %v1179_v44 = vmul.f32 %v12420_v46, %v11876_v6 }
 0x524   :  { %v12422_v31 = vpop.f32.mrb[92].mxu0  ;;  %1355 = vadd.xlane.f32.xlu0 %v1177_v29  ;;  %1357 = vadd.xlane.f32.xlu1 %v1178_v37  ;;  %v12444_v37 = vpop.xlane.xlu1 %1257 }
 0x525   :  { %17099 = vst [vmem:[#allocation259_spill] sm:$0xff] %v12422_v31  ;;  %v12426_v13 = vpop.f32.mrb[93].mxu0  ;;  %v17105_v31 = vld [vmem:[#allocation113_spill] sm:$0xff]  ;;  %17108 = vst [vmem:[#allocation262_spill] sm:$0xff] %v12444_v37 }
 0x526   :  { %17101 = vst [vmem:[#allocation261_spill] sm:$0xff] %v12426_v13  ;;  %vm17106_vm9 = vcmp.eq.s32.totalorder %v16784_v11, %v17105_v31  ;;  %v12450_v53 = vpop.xlane.xlu0 %1259  ;;  %v1182_v13 = vmul.f32 %v12436_v59, %v11895_v56  ;;  %v17112_v31 = vld [vmem:[#allocation114_spill] sm:$0xff] }
 0x527   :  { %v12442_v29 = vsel %vm17106_vm9, 1.0, %v16865_v5  ;;  %17111 = vst [vmem:[#allocation265_spill] sm:$0xff] %v12450_v53  ;;  %vm17113_vm10 = vcmp.eq.s32.totalorder %v16784_v11, %v17112_v31 }
 0x528   :  { %17107 = vst [vmem:[#allocation113_spill] sm:$0xff] %v12442_v29  ;;  %v12446_v48 = vpop.f32.mrb[94].mxu0  ;;  %1359 = vadd.xlane.f32.xlu0 %v1179_v44  ;;  %1361 = vadd.xlane.f32.xlu1 %v1180_v34  ;;  %v1181_v40 = vmul.f32 %v12442_v29, %v11900_v42  ;;  %v12460_v35 = vsel %vm17113_vm10, 1.0, %v16865_v5  ;;  %v17115_v44 = vld [vmem:[#allocation115_spill] sm:$0xff]  ;;  %v12472_v53 = vpop.xlane.xlu1 %1261 }
 0x529   :  { %17109 = vst [vmem:[#allocation263_spill] sm:$0xff] %v12446_v48  ;;  %v12448_v6 = vpop.f32.mrb[95].mxu0  ;;  %17114 = vst [vmem:[#allocation114_spill] sm:$0xff] %v12460_v35  ;;  %vm17116_vm11 = vcmp.eq.s32.totalorder %v16784_v11, %v17115_v44  ;;  %v1184_v31 = vmul.f32 %v12460_v35, %v11919_v0  ;;  %v17121_v48 = vld [vmem:[#allocation116_spill] sm:$0xff] }
 0x52a   :  { %17110 = vst [vmem:[#allocation264_spill] sm:$0xff] %v12448_v6  ;;  %v12466_v34 = vsel %vm17116_vm11, 1.0, %v16865_v5  ;;  %17120 = vst [vmem:[#allocation268_spill] sm:$0xff] %v12472_v53  ;;  %vm17122_vm6 = vcmp.eq.s32.totalorder %v16784_v11, %v17121_v48  ;;  %v12492_v53 = vpop.xlane.xlu0 %1263 }
 0x52b   :  { %17117 = vst [vmem:[#allocation115_spill] sm:$0xff] %v12466_v34  ;;  %v1183_v56 = vmul.f32 %v12466_v34, %v11924_v33  ;;  %v12482_v44 = vsel %vm17122_vm6, 1.0, %v16865_v5  ;;  %17128 = vst [vmem:[#allocation270_spill] sm:$0xff] %v12492_v53  ;;  %v12624_v34 = vld [vmem:[#allocation2 + $0x228] sm:$0xff] }
 0x52c   :  { %v12468_v37 = vpop.f32.mrb[96].mxu0  ;;  %1363 = vadd.xlane.f32.xlu0 %v1181_v40  ;;  %1365 = vadd.xlane.f32.xlu1 %v1182_v13  ;;  %17123 = vst [vmem:[#allocation116_spill] sm:$0xff] %v12482_v44  ;;  %v17124_v40 = vld [vmem:[#allocation117_spill] sm:$0xff]  ;;  %v1186_v48 = vmul.f32 %v12482_v44, %v11942_v27 }
 0x52d   :  { %17118 = vst [vmem:[#allocation266_spill] sm:$0xff] %v12468_v37  ;;  %v12470_v42 = vpop.f32.mrb[97].mxu0  ;;  %vm17125_vm5 = vcmp.eq.s32.totalorder %v16784_v11, %v17124_v40 }
 0x52e   :  { %17119 = vst [vmem:[#allocation267_spill] sm:$0xff] %v12470_v42  ;;  %v12488_v13 = vsel %vm17125_vm5, 1.0, %v16865_v5  ;;  %v17130_v42 = vld [vmem:[#allocation118_spill] sm:$0xff]  ;;  %v12518_v27 = vpop.xlane.xlu0 %1267 }
 0x52f   :  { %17126 = vst [vmem:[#allocation117_spill] sm:$0xff] %v12488_v13  ;;  %v1185_v0 = vmul.f32 %v12488_v13, %v11947_v62  ;;  %vm17131_vm7 = vcmp.eq.s32.totalorder %v16784_v11, %v17130_v42  ;;  %17139 = vst [vmem:[#allocation275_spill] sm:$0xff] %v12518_v27 }
 0x530   :  { %v12490_v37 = vpop.f32.mrb[98].mxu0  ;;  %1367 = vadd.xlane.f32.xlu0 %v1183_v56  ;;  %1369 = vadd.xlane.f32.xlu1 %v1184_v31  ;;  %v12504_v40 = vsel %vm17131_vm7, 1.0, %v16865_v5  ;;  %v12512_v31 = vpop.xlane.xlu1 %1265 }
 0x531   :  { %17127 = vst [vmem:[#allocation269_spill] sm:$0xff] %v12490_v37  ;;  %v12494_v33 = vpop.f32.mrb[99].mxu0  ;;  %17132 = vst [vmem:[#allocation118_spill] sm:$0xff] %v12504_v40  ;;  %v17133_v37 = vld [vmem:[#allocation119_spill] sm:$0xff] }
 0x532   :  { %17129 = vst [vmem:[#allocation271_spill] sm:$0xff] %v12494_v33  ;;  %vm17134_vm8 = vcmp.eq.s32.totalorder %v16784_v11, %v17133_v37  ;;  %17136 = vst [vmem:[#allocation272_spill] sm:$0xff] %v12512_v31  ;;  %v1188_v33 = vmul.f32 %v12504_v40, %v11964_v25  ;;  %v17140_v37 = vld [vmem:[#allocation120_spill] sm:$0xff]  ;;  %v17149_v25 = vld [vmem:[#allocation122_spill] sm:$0xff] }
 0x533   :  { %v12510_v56 = vsel %vm17134_vm8, 1.0, %v16865_v5  ;;  %vm17141_vm9 = vcmp.eq.s32.totalorder %v16784_v11, %v17140_v37  ;;  %vm17150_vm11 = vcmp.eq.s32.totalorder %v16784_v11, %v17149_v25 }
 0x534   :  { %17135 = vst [vmem:[#allocation119_spill] sm:$0xff] %v12510_v56  ;;  %v12514_v53 = vpop.f32.mrb[100].mxu0  ;;  %1371 = vadd.xlane.f32.xlu0 %v1185_v0  ;;  %1373 = vadd.xlane.f32.xlu1 %v1186_v48  ;;  %v1187_v42 = vmul.f32 %v12510_v56, %v11969_v41  ;;  %v12528_v6 = vsel %vm17141_vm9, 1.0, %v16865_v5  ;;  %v17143_v0 = vld [vmem:[#allocation121_spill] sm:$0xff]  ;;  %v12540_v27 = vpop.xlane.xlu1 %1269  ;;  %v12546_v37 = vsel %vm17150_vm11, 1.0, %v16865_v5 }
 0x535   :  { %17137 = vst [vmem:[#allocation273_spill] sm:$0xff] %v12514_v53  ;;  %v12516_v62 = vpop.f32.mrb[101].mxu0  ;;  %17142 = vst [vmem:[#allocation120_spill] sm:$0xff] %v12528_v6  ;;  %vm17144_vm10 = vcmp.eq.s32.totalorder %v16784_v11, %v17143_v0  ;;  %v1190_v0 = vmul.f32 %v12528_v6, %v11986_v16 }
 0x536   :  { %17138 = vst [vmem:[#allocation274_spill] sm:$0xff] %v12516_v62  ;;  %v12534_v48 = vsel %vm17144_vm10, 1.0, %v16865_v5  ;;  %17148 = vst [vmem:[#allocation278_spill] sm:$0xff] %v12540_v27 }
 0x537   :  { %17145 = vst [vmem:[#allocation121_spill] sm:$0xff] %v12534_v48  ;;  %17151 = vst [vmem:[#allocation122_spill] sm:$0xff] %v12546_v37  ;;  %v1189_v53 = vmul.f32 %v12534_v48, %v11990_v15 }
 0x538   :  { %v12536_v31 = vpop.f32.mrb[102].mxu0  ;;  %1375 = vadd.xlane.f32.xlu0 %v1187_v42  ;;  %1377 = vadd.xlane.f32.xlu1 %v1188_v33  ;;  %v12554_v42 = vld [vmem:[#allocation2 + $0x208] sm:$0xff]  ;;  %v17152_v33 = vld [vmem:[#allocation123_spill] sm:$0xff] }
 0x539   :  { %17146 = vst [vmem:[#allocation276_spill] sm:$0xff] %v12536_v31  ;;  %v12538_v41 = vpop.f32.mrb[103].mxu0  ;;  %vm17153_vm6 = vcmp.eq.s32.totalorder %v16784_v11, %v17152_v33  ;;  %v1192_v6 = vmul.f32 %v12546_v37, %v12554_v42  ;;  %v17157_v33 = vld [vmem:[#allocation124_spill] sm:$0xff]  ;;  %v12592_v37 = vld [vmem:[#allocation2 + $0x218] sm:$0xff] }
 0x53a   :  { %17147 = vst [vmem:[#allocation277_spill] sm:$0xff] %v12538_v41  ;;  %v12560_v27 = vsel %vm17153_vm6, 1.0, %v16865_v5  ;;  %v12566_v41 = vld [vmem:[#allocation2 + $0x200] sm:$0xff]  ;;  %vm17158_vm5 = vcmp.eq.s32.totalorder %v16784_v11, %v17157_v33 }
 0x53b   :  { %v12552_v62 = vpop.xlane.xlu0 %5603  ;;  %17154 = vst [vmem:[#allocation123_spill] sm:$0xff] %v12560_v27  ;;  %v12578_v40 = vsel %vm17158_vm5, 1.0, %v16865_v5 }
 0x53c   :  { %v12562_v31 = vpop.f32.mrb[104].mxu0  ;;  %v5634_v25 = vsub.f32 %v11832_v20, %v12552_v62  ;;  %1379 = vadd.xlane.f32.xlu0 %v1189_v53  ;;  %1381 = vadd.xlane.f32.xlu1 %v1190_v0  ;;  %v12570_v15 = vpop.xlane.xlu1 %5601  ;;  %17159 = vst [vmem:[#allocation124_spill] sm:$0xff] %v12578_v40  ;;  %v1191_v0 = vmul.f32 %v12560_v27, %v12566_v41 }
 0x53d   :  { %17155 = vst [vmem:[#allocation279_spill] sm:$0xff] %v12562_v31  ;;  %v12568_v16 = vpop.f32.mrb[105].mxu0  ;;  %v17160_v31 = vld [vmem:[#allocation125_spill] sm:$0xff]  ;;  %v5633_v53 = vsub.f32 %v11849_v54, %v12570_v15 }
 0x53e   :  { %17156 = vst [vmem:[#allocation280_spill] sm:$0xff] %v12568_v16  ;;  %vm17161_vm7 = vcmp.eq.s32.totalorder %v16784_v11, %v17160_v31  ;;  %v12590_v16 = vld [vmem:[#allocation2 + $0x210] sm:$0xff]  ;;  %v5651_v44 = vmul.f32 1.442695, %v5634_v25 }
 0x53f   :  { %v12584_v48 = vsel %vm17161_vm7, 1.0, %v16865_v5  ;;  %v5649_v56 = vmul.f32 1.442695, %v5633_v53  ;;  %v17165_v31 = vld [vmem:[#allocation126_spill] sm:$0xff]  ;;  %v1194_v53 = vmul.f32 %v12578_v40, %v12592_v37 }
 0x540   :  { %17162 = vst [vmem:[#allocation125_spill] sm:$0xff] %v12584_v48  ;;  %v12594_v33 = vpop.f32.mrb[106].mxu0  ;;  %1383 = vadd.xlane.f32.xlu0 %v1191_v0  ;;  %1385 = vadd.xlane.f32.xlu1 %v1192_v6  ;;  %vm17166_vm8 = vcmp.eq.s32.totalorder %v16784_v11, %v17165_v31  ;;  %v12604_v59 = vpop.xlane.xlu1 %5607  ;;  %v1193_v25 = vmul.f32 %v12584_v48, %v12590_v16  ;;  %v17168_v6 = vld [vmem:[#allocation127_spill] sm:$0xff] }
 0x541   :  { %17163 = vst [vmem:[#allocation281_spill] sm:$0xff] %v12594_v33  ;;  %v12596_v35 = vpop.f32.mrb[107].mxu0  ;;  %v12602_v13 = vsel %vm17166_vm8, 1.0, %v16865_v5  ;;  %v12606_v27 = vpop.xlane.xlu0 %5605  ;;  %vm17169_vm9 = vcmp.eq.s32.totalorder %v16784_v11, %v17168_v6  ;;  %9193 = vpow2.f32 %v5649_v56  ;;  %v5636_v31 = vsub.f32 %v11862_v21, %v12604_v59  ;;  %v17173_v56 = vld [vmem:[#allocation128_spill] sm:$0xff] }
 0x542   :  { %17164 = vst [vmem:[#allocation282_spill] sm:$0xff] %v12596_v35  ;;  %17167 = vst [vmem:[#allocation126_spill] sm:$0xff] %v12602_v13  ;;  %v12616_v0 = vsel %vm17169_vm9, 1.0, %v16865_v5  ;;  %v5635_v33 = vsub.f32 %v11874_v51, %v12606_v27  ;;  %v12622_v35 = vld [vmem:[#allocation2 + $0x220] sm:$0xff]  ;;  %9195 = vpow2.f32 %v5651_v44  ;;  %vm17174_vm10 = vcmp.eq.s32.totalorder %v16784_v11, %v17173_v56 }
 0x543   :  { %17170 = vst [vmem:[#allocation127_spill] sm:$0xff] %v12616_v0  ;;  %v5655_v40 = vmul.f32 1.442695, %v5636_v31  ;;  %v12634_v46 = vsel %vm17174_vm10, 1.0, %v16865_v5  ;;  %v1195_v44 = vmul.f32 %v12616_v0, %v12622_v35  ;;  %vm17195_vm9 = vcmp.eq.s32.totalorder %v16784_v11, %v17194_v61 }
 0x544   :  { %v12626_v48 = vpop.f32.mrb[108].mxu0  ;;  %v5653_v29 = vmul.f32 1.442695, %v5635_v33  ;;  %1387 = vadd.xlane.f32.xlu0 %v1193_v25  ;;  %1389 = vadd.xlane.f32.xlu1 %v1194_v53  ;;  %17175 = vst [vmem:[#allocation128_spill] sm:$0xff] %v12634_v46  ;;  %v12636_v60 = vpop.xlane.xlu1 %5611  ;;  %v1196_v33 = vmul.f32 %v12602_v13, %v12624_v34  ;;  %v17176_v25 = vld [vmem:[#allocation129_spill] sm:$0xff]  ;;  %v12723_v47 = vsel %vm17195_vm9, 1.0, %v16865_v5 }
 0x545   :  { %17171 = vst [vmem:[#allocation283_spill] sm:$0xff] %v12626_v48  ;;  %v12628_v6 = vpop.f32.mrb[109].mxu0  ;;  %v12638_v55 = vpop.xlane.xlu0 %5609  ;;  %vm17177_vm11 = vcmp.eq.s32.totalorder %v16784_v11, %v17176_v25  ;;  %9197 = vpow2.f32 %v5655_v40  ;;  %v5638_v31 = vsub.f32 %v11889_v22, %v12636_v60  ;;  %v12654_v48 = vld [vmem:[#allocation2 + $0x230] sm:$0xff]  ;;  %17196 = vst [vmem:[#allocation134_spill] sm:$0xff] %v12723_v47  ;;  %v1204_v58 = vmul.f32 %v12723_v47, %v12746_v17 }
 0x546   :  { %17172 = vst [vmem:[#allocation284_spill] sm:$0xff] %v12628_v6  ;;  %v12648_v53 = vsel %vm17177_vm11, 1.0, %v16865_v5  ;;  %v5637_v56 = vsub.f32 %v11893_v43, %v12638_v55  ;;  %v12656_v6 = vld [vmem:[#allocation2 + $0x238] sm:$0xff]  ;;  %9199 = vpow2.f32 %v5653_v29 }
 0x547   :  { %17178 = vst [vmem:[#allocation129_spill] sm:$0xff] %v12648_v53  ;;  %v5659_v13 = vmul.f32 1.442695, %v5638_v31  ;;  %v17181_v40 = vld [vmem:[#allocation130_spill] sm:$0xff]  ;;  %v1197_v29 = vmul.f32 %v12648_v53, %v12654_v48  ;;  %v1198_v31 = vmul.f32 %v12634_v46, %v12656_v6 }
 0x548   :  { %v12658_v0 = vpop.f32.mrb[110].mxu0  ;;  %v5657_v19 = vmul.f32 1.442695, %v5637_v56  ;;  %1391 = vadd.xlane.f32.xlu0 %v1195_v44  ;;  %1393 = vadd.xlane.f32.xlu1 %v1196_v33  ;;  %vm17182_vm6 = vcmp.eq.s32.totalorder %v16784_v11, %v17181_v40  ;;  %v12668_v63 = vpop.xlane.xlu1 %5615  ;;  %v17184_v44 = vld [vmem:[#allocation131_spill] sm:$0xff] }
 0x549   :  { %17179 = vst [vmem:[#allocation285_spill] sm:$0xff] %v12658_v0  ;;  %v12660_v25 = vpop.f32.mrb[111].mxu0  ;;  %v12666_v28 = vsel %vm17182_vm6, 1.0, %v16865_v5  ;;  %v12670_v4 = vpop.xlane.xlu0 %5613  ;;  %vm17185_vm5 = vcmp.eq.s32.totalorder %v16784_v11, %v17184_v44  ;;  %9201 = vpow2.f32 %v5659_v13  ;;  %v5640_v56 = vsub.f32 %v11913_v3, %v12668_v63  ;;  %v12686_v0 = vld [vmem:[#allocation2 + $0x240] sm:$0xff] }
 0x54a   :  { %17180 = vst [vmem:[#allocation286_spill] sm:$0xff] %v12660_v25  ;;  %17183 = vst [vmem:[#allocation130_spill] sm:$0xff] %v12666_v28  ;;  %v12680_v33 = vsel %vm17185_vm5, 1.0, %v16865_v5  ;;  %v5639_v40 = vsub.f32 %v11917_v38, %v12670_v4  ;;  %v12688_v25 = vld [vmem:[#allocation2 + $0x248] sm:$0xff]  ;;  %9203 = vpow2.f32 %v5657_v19 }
 0x54b   :  { %17186 = vst [vmem:[#allocation131_spill] sm:$0xff] %v12680_v33  ;;  %v9194_v53 = vpop.eup %9193  ;;  %v5663_v46 = vmul.f32 1.442695, %v5640_v56  ;;  %v17187_v13 = vld [vmem:[#allocation132_spill] sm:$0xff]  ;;  %v1199_v19 = vmul.f32 %v12680_v33, %v12686_v0  ;;  %v1200_v56 = vmul.f32 %v12666_v28, %v12688_v25  ;;  %v12716_v33 = vld [vmem:[#allocation2 + $0x258] sm:$0xff]  ;;  %v17193_v28 = vld [vmem:[#allocation9_spill] sm:$0xff] }
 0x54c   :  { %v5661_v7 = vmul.f32 1.442695, %v5639_v40  ;;  %1395 = vadd.xlane.f32.xlu0 %v1197_v29  ;;  %1397 = vadd.xlane.f32.xlu1 %v1198_v31  ;;  %v9196_v44 = vpop.eup %9195  ;;  %vm17188_vm7 = vcmp.eq.s32.totalorder %v16784_v11, %v17187_v13  ;;  %v12696_v52 = vpop.xlane.xlu1 %5619  ;;  %v17190_v29 = vld [vmem:[#allocation133_spill] sm:$0xff] }
 0x54d   :  { %v12694_v9 = vsel %vm17188_vm7, 1.0, %v16865_v5  ;;  %8489 = vmatprep.mubr.f32.mxu1 %v9194_v53  ;;  %v12698_v1 = vpop.xlane.xlu0 %5617  ;;  %vm17191_vm8 = vcmp.eq.s32.totalorder %v16784_v11, %v17190_v29  ;;  %9205 = vpow2.f32 %v5663_v46  ;;  %v5642_v53 = vsub.f32 %v11936_v50, %v12696_v52  ;;  %v12714_v13 = vld [vmem:[#allocation2 + $0x250] sm:$0xff] }
 0x54e   :  { %17189 = vst [vmem:[#allocation132_spill] sm:$0xff] %v12694_v9  ;;  %v12708_v31 = vsel %vm17191_vm8, 1.0, %v16865_v5  ;;  %v5641_v40 = vsub.f32 %v11940_v45, %v12698_v1  ;;  %8490 = vmatmul.mubr.f32.vlgmr.msra.gmra.mrb[48].mxu1 %v9196_v44  ;;  %9207 = vpow2.f32 %v5661_v7 }
 0x54f   :  { %17192 = vst [vmem:[#allocation133_spill] sm:$0xff] %v12708_v31  ;;  %8844 = vmatpush3.bf16.msra.mxu1 %v17193_v28  ;;  %v9198_v49 = vpop.eup %9197  ;;  %v5667_v39 = vmul.f32 1.442695, %v5642_v53  ;;  %v1201_v7 = vmul.f32 %v12708_v31, %v12714_v13  ;;  %v1202_v53 = vmul.f32 %v12694_v9, %v12716_v33  ;;  %v12744_v31 = vld [vmem:[#allocation2 + $0x260] sm:$0xff] }
 0x550   :  { %v5665_v29 = vmul.f32 1.442695, %v5641_v40  ;;  %1399 = vadd.xlane.f32.xlu0 %v1199_v19  ;;  %1401 = vadd.xlane.f32.xlu1 %v1200_v56  ;;  %v9200_v46 = vpop.eup %9199  ;;  %v12725_v44 = vpop.xlane.xlu1 %5623  ;;  %v17197_v40 = vld [vmem:[#allocation10_spill] sm:$0xff]  ;;  %v17198_v19 = vld [vmem:[#allocation135_spill] sm:$0xff] }
 0x551   :  { %v12727_v12 = vpop.xlane.xlu0 %5621  ;;  %8846 = vmatprep.subr.bf16.mxu1 %v17197_v40  ;;  %vm17199_vm10 = vcmp.eq.s32.totalorder %v16784_v11, %v17198_v19  ;;  %9209 = vpow2.f32 %v5667_v39  ;;  %v5644_v61 = vsub.f32 %v11958_v24, %v12725_v44  ;;  %8492 = vmatprep.mubr.f32.mxu1 %v9200_v46 }
 0x552   :  { %v12738_v56 = vsel %vm17199_vm10, 1.0, %v16865_v5  ;;  %v5643_v2 = vsub.f32 %v11962_v14, %v12727_v12  ;;  %9211 = vpow2.f32 %v5665_v29  ;;  %8493 = vmatmul.mubr.f32.gmra.mrb[50].mxu1 %v9198_v49  ;;  %v17202_v49 = vld [vmem:[#allocation136_spill] sm:$0xff] }
 0x553   :  { %17200 = vst [vmem:[#allocation135_spill] sm:$0xff] %v12738_v56  ;;  %v9202_v9 = vpop.eup %9201  ;;  %v5671_v26 = vmul.f32 1.442695, %v5644_v61  ;;  %v1203_v46 = vmul.f32 %v12738_v56, %v12744_v31  ;;  %8848 = vmatpush3.bf16.msra.mxu1 %v17197_v40  ;;  %vm17203_vm11 = vcmp.eq.s32.totalorder %v16784_v11, %v17202_v49  ;;  %v17206_v61 = vld [vmem:[#allocation11_spill] sm:$0xff]  ;;  %v17207_v56 = vld [vmem:[#allocation137_spill] sm:$0xff] }
 0x554   :  { %v5669_v57 = vmul.f32 1.442695, %v5643_v2  ;;  %1403 = vadd.xlane.f32.xlu0 %v1201_v7  ;;  %1405 = vadd.xlane.f32.xlu1 %v1202_v53  ;;  %v9204_v19 = vpop.eup %9203  ;;  %v12748_v39 = vpop.xlane.xlu1 %5627  ;;  %v12761_v2 = vsel %vm17203_vm11, 1.0, %v16865_v5  ;;  %v12767_v53 = vld [vmem:[#allocation2 + $0x278] sm:$0xff]  ;;  %vm17208_vm6 = vcmp.eq.s32.totalorder %v16784_v11, %v17207_v56  ;;  %v17212_v56 = vld [vmem:[#allocation12_spill] sm:$0xff] }
 0x555   :  { %v12750_v8 = vpop.xlane.xlu0 %5625  ;;  %17204 = vst [vmem:[#allocation136_spill] sm:$0xff] %v12761_v2  ;;  %9213 = vpow2.f32 %v5671_v26  ;;  %v5646_v29 = vsub.f32 %v11980_v36, %v12748_v39  ;;  %8495 = vmatprep.mubr.f32.mxu1 %v9204_v19  ;;  %17205 = vst [vmem:[#allocation288_spill] sm:$0xff] %v12767_v53  ;;  %8850 = vmatprep.subr.bf16.mxu1 %v17206_v61  ;;  %v12774_v47 = vsel %vm17208_vm6, 1.0, %v16865_v5  ;;  %v12776_v26 = vld [vmem:[#allocation2 + $0x270] sm:$0xff] }
 0x556   :  { %v5645_v7 = vsub.f32 %v11984_v32, %v12750_v8  ;;  %17209 = vst [vmem:[#allocation137_spill] sm:$0xff] %v12774_v47  ;;  %9215 = vpow2.f32 %v5669_v57  ;;  %8496 = vmatmul.mubr.f32.gmra.mrb[52].mxu1 %v9202_v9  ;;  %17210 = vst [vmem:[#allocation289_spill] sm:$0xff] %v12776_v26  ;;  %v1206_v17 = vmul.f32 %v12761_v2, %v12767_v53  ;;  %v121_v2 = vld [vmem:[#allocation2 + $0x280] sm:$0xff] }
 0x557   :  { %v9206_v49 = vpop.eup %9205  ;;  %v5675_v40 = vmul.f32 1.442695, %v5646_v29  ;;  %8852 = vmatpush3.bf16.msra.mxu1 %v17206_v61 }
 0x558   :  { %v5673_v19 = vmul.f32 1.442695, %v5645_v7  ;;  %1407 = vadd.xlane.f32.xlu0 %v1203_v46  ;;  %1409 = vadd.xlane.f32.xlu1 %v1204_v58  ;;  %v9208_v18 = vpop.eup %9207  ;;  %v12778_v36 = vpop.xlane.xlu1 %5631  ;;  %v1205_v58 = vmul.f32 %v12774_v47, %v12776_v26  ;;  %v17213_v46 = vld [vmem:[#allocation138_spill] sm:$0xff] }
 0x559   :  { %v12780_v32 = vpop.xlane.xlu0 %5629  ;;  %9217 = vpow2.f32 %v5675_v40  ;;  %v5648_v57 = vsub.f32 %v11999_v30, %v12778_v36  ;;  %8498 = vmatprep.mubr.f32.mxu1 %v9208_v18  ;;  %8854 = vmatprep.subr.bf16.mxu1 %v17212_v56  ;;  %vm17214_vm5 = vcmp.eq.s32.totalorder %v16784_v11, %v17213_v46  ;;  %v17216_v40 = vld [vmem:[#allocation139_spill] sm:$0xff]  ;;  %v122_v18 = vld [vmem:[#allocation2 + $0x288] sm:$0xff] }
 0x55a   :  { %17211 = vst [vmem:[#allocation290_spill] sm:$0xff] %v12780_v32  ;;  %v5647_v9 = vsub.f32 %v12002_v23, %v12780_v32  ;;  %v12796_v29 = vsel %vm17214_vm5, 1.0, %v16865_v5  ;;  %vm17217_vm7 = vcmp.eq.s32.totalorder %v16784_v11, %v17216_v40  ;;  %9219 = vpow2.f32 %v5673_v19  ;;  %8499 = vmatmul.mubr.f32.gmra.mrb[54].mxu1 %v9206_v49  ;;  %v17221_v19 = vld [vmem:[#allocation13_spill] sm:$0xff] }
 0x55b   :  { %17215 = vst [vmem:[#allocation138_spill] sm:$0xff] %v12796_v29  ;;  %v12802_v7 = vsel %vm17217_vm7, 1.0, %v16865_v5  ;;  %v9210_v61 = vpop.eup %9209  ;;  %v5679_v47 = vmul.f32 1.442695, %v5648_v57  ;;  %8856 = vmatpush3.bf16.msra.mxu1 %v17212_v56  ;;  %v1208_v40 = vmul.f32 %v12796_v29, %v122_v18  ;;  %v17222_v57 = vld [vmem:[#allocation140_spill] sm:$0xff]  ;;  %v17230_v29 = vld [vmem:[#allocation14_spill] sm:$0xff] }
 0x55c   :  { %17218 = vst [vmem:[#allocation139_spill] sm:$0xff] %v12802_v7  ;;  %v5677_v23 = vmul.f32 1.442695, %v5647_v9  ;;  %1413 = vadd.xlane.f32.xlu1 %v1206_v17  ;;  %1411 = vadd.xlane.f32.xlu0 %v1205_v58  ;;  %v9212_v26 = vpop.eup %9211  ;;  %v12804_v30 = vpop.xlane.xlu1 %1273  ;;  %v1207_v49 = vmul.f32 %v12802_v7, %v121_v2  ;;  %vm17223_vm8 = vcmp.eq.s32.totalorder %v16784_v11, %v17222_v57  ;;  %v17225_v9 = vld [vmem:[#allocation141_spill] sm:$0xff]  ;;  %v17248_v7 = vld [vmem:[#allocation19_spill] sm:$0xff] }
 0x55d   :  { %17219 = vst [vmem:[#allocation291_spill] sm:$0xff] %v12804_v30  ;;  %v12806_v46 = vpop.xlane.xlu0 %1271  ;;  %9221 = vpow2.f32 %v5679_v47  ;;  %8501 = vmatprep.mubr.f32.mxu1 %v9212_v26  ;;  %8858 = vmatprep.subr.bf16.mxu1 %v17221_v19  ;;  %v12816_v17 = vsel %vm17223_vm8, 1.0, %v16865_v5  ;;  %vm17226_vm9 = vcmp.eq.s32.totalorder %v16784_v11, %v17225_v9  ;;  %v124_v47 = vld [vmem:[#allocation2 + $0x298] sm:$0xff]  ;;  %v123_v26 = vld [vmem:[#allocation2 + $0x290] sm:$0xff] }
 0x55e   :  { %17220 = vst [vmem:[#allocation292_spill] sm:$0xff] %v12806_v46  ;;  %17224 = vst [vmem:[#allocation140_spill] sm:$0xff] %v12816_v17  ;;  %v12822_v58 = vsel %vm17226_vm9, 1.0, %v16865_v5  ;;  %9223 = vpow2.f32 %v5677_v23  ;;  %8502 = vmatmul.mubr.f32.gmra.mrb[56].mxu1 %v9210_v61  ;;  %v1210_v57 = vmul.f32 %v12816_v17, %v124_v47  ;;  %v17231_v23 = vld [vmem:[#allocation142_spill] sm:$0xff] }
 0x55f   :  { %17227 = vst [vmem:[#allocation141_spill] sm:$0xff] %v12822_v58  ;;  %v9214_v18 = vpop.eup %9213  ;;  %8860 = vmatpush3.bf16.msra.mxu1 %v17221_v19  ;;  %v1209_v9 = vmul.f32 %v12822_v58, %v123_v26  ;;  %vm17232_vm10 = vcmp.eq.s32.totalorder %v16784_v11, %v17231_v23  ;;  %v17239_v58 = vld [vmem:[#allocation16_spill] sm:$0xff] }
 0x560   :  { %1417 = vadd.xlane.f32.xlu1 %v1208_v40  ;;  %1415 = vadd.xlane.f32.xlu0 %v1207_v49  ;;  %v9216_v2 = vpop.eup %9215  ;;  %v12824_v46 = vpop.xlane.xlu1 %1277  ;;  %v12836_v61 = vsel %vm17232_vm10, 1.0, %v16865_v5  ;;  %v17234_v40 = vld [vmem:[#allocation143_spill] sm:$0xff] }
 0x561   :  { %17228 = vst [vmem:[#allocation293_spill] sm:$0xff] %v12824_v46  ;;  %v12826_v30 = vpop.xlane.xlu0 %1275  ;;  %8504 = vmatprep.mubr.f32.mxu1 %v9216_v2  ;;  %8862 = vmatprep.subr.bf16.mxu1 %v17230_v29  ;;  %17233 = vst [vmem:[#allocation142_spill] sm:$0xff] %v12836_v61  ;;  %vm17235_vm11 = vcmp.eq.s32.totalorder %v16784_v11, %v17234_v40  ;;  %v126_v2 = vld [vmem:[#allocation2 + $0x2a8] sm:$0xff] }
 0x562   :  { %17229 = vst [vmem:[#allocation294_spill] sm:$0xff] %v12826_v30  ;;  %v12842_v49 = vsel %vm17235_vm11, 1.0, %v16865_v5  ;;  %8505 = vmatmul.mubr.f32.gmra.mrb[58].mxu1 %v9214_v18  ;;  %v125_v30 = vld [vmem:[#allocation2 + $0x2a0] sm:$0xff]  ;;  %v1212_v23 = vmul.f32 %v12836_v61, %v126_v2 }
 0x563   :  { %17236 = vst [vmem:[#allocation143_spill] sm:$0xff] %v12842_v49  ;;  %v9218_v47 = vpop.eup %9217  ;;  %8864 = vmatpush3.bf16.msra.mxu1 %v17230_v29  ;;  %v1211_v40 = vmul.f32 %v12842_v49, %v125_v30  ;;  %v17240_v18 = vld [vmem:[#allocation144_spill] sm:$0xff] }
 0x564   :  { %1421 = vadd.xlane.f32.xlu1 %v1210_v57  ;;  %1419 = vadd.xlane.f32.xlu0 %v1209_v9  ;;  %v9220_v26 = vpop.eup %9219  ;;  %v12844_v46 = vpop.xlane.xlu1 %1281  ;;  %vm17241_vm6 = vcmp.eq.s32.totalorder %v16784_v11, %v17240_v18  ;;  %v17243_v9 = vld [vmem:[#allocation145_spill] sm:$0xff] }
 0x565   :  { %17237 = vst [vmem:[#allocation295_spill] sm:$0xff] %v12844_v46  ;;  %v12846_v17 = vpop.xlane.xlu0 %1279  ;;  %8507 = vmatprep.mubr.f32.mxu1 %v9220_v26  ;;  %8866 = vmatprep.subr.bf16.mxu1 %v17239_v58  ;;  %v12856_v57 = vsel %vm17241_vm6, 1.0, %v16865_v5  ;;  %vm17244_vm5 = vcmp.eq.s32.totalorder %v16784_v11, %v17243_v9  ;;  %v128_v26 = vld [vmem:[#allocation2 + $0x2b8] sm:$0xff]  ;;  %v127_v46 = vld [vmem:[#allocation2 + $0x2b0] sm:$0xff] }
 0x566   :  { %17238 = vst [vmem:[#allocation296_spill] sm:$0xff] %v12846_v17  ;;  %17242 = vst [vmem:[#allocation144_spill] sm:$0xff] %v12856_v57  ;;  %v12862_v17 = vsel %vm17244_vm5, 1.0, %v16865_v5  ;;  %8508 = vmatmul.mubr.f32.gmra.mrb[60].mxu1 %v9218_v47  ;;  %v1214_v18 = vmul.f32 %v12856_v57, %v128_v26  ;;  %v17249_v47 = vld [vmem:[#allocation146_spill] sm:$0xff] }
 0x567   :  { %17245 = vst [vmem:[#allocation145_spill] sm:$0xff] %v12862_v17  ;;  %v9222_v2 = vpop.eup %9221  ;;  %8868 = vmatpush3.bf16.msra.mxu1 %v17239_v58  ;;  %v1213_v9 = vmul.f32 %v12862_v17, %v127_v46  ;;  %vm17250_vm7 = vcmp.eq.s32.totalorder %v16784_v11, %v17249_v47  ;;  %v12914_v17 = vsel %vm836_vm13, 1.0, %v16865_v5 }
 0x568   :  { %1425 = vadd.xlane.f32.xlu1 %v1212_v23  ;;  %1423 = vadd.xlane.f32.xlu0 %v1211_v40  ;;  %v9224_v30 = vpop.eup %9223  ;;  %v12864_v61 = vpop.xlane.xlu1 %1285  ;;  %v12876_v23 = vsel %vm17250_vm7, 1.0, %v16865_v5  ;;  %v17252_v40 = vld [vmem:[#allocation147_spill] sm:$0xff]  ;;  %17264 = vst [vmem:[#allocation150_spill] sm:$0xff] %v12914_v17 }
 0x569   :  { %17246 = vst [vmem:[#allocation297_spill] sm:$0xff] %v12864_v61  ;;  %v12866_v49 = vpop.xlane.xlu0 %1283  ;;  %8510 = vmatprep.mubr.f32.mxu1 %v9224_v30  ;;  %8870 = vmatprep.subr.bf16.mxu1 %v17248_v7  ;;  %17251 = vst [vmem:[#allocation146_spill] sm:$0xff] %v12876_v23  ;;  %vm17253_vm8 = vcmp.eq.s32.totalorder %v16784_v11, %v17252_v40  ;;  %v130_v30 = vld [vmem:[#allocation2 + $0x2c8] sm:$0xff]  ;;  %v129_v61 = vld [vmem:[#allocation2 + $0x2c0] sm:$0xff] }
 0x56a   :  { %17247 = vst [vmem:[#allocation298_spill] sm:$0xff] %v12866_v49  ;;  %v12882_v49 = vsel %vm17253_vm8, 1.0, %v16865_v5  ;;  %8511 = vmatmul.mubr.f32.gmra.mrb[62].mxu1 %v9222_v2  ;;  %v1216_v47 = vmul.f32 %v12876_v23, %v130_v30  ;;  %v12896_v2 = vsel %vm834_vm15, 1.0, %v16865_v5 }
 0x56b   :  { %17254 = vst [vmem:[#allocation147_spill] sm:$0xff] %v12882_v49  ;;  %8872 = vmatpush3.bf16.msra.mxu1 %v17248_v7  ;;  %v1215_v57 = vmul.f32 %v12882_v49, %v129_v61  ;;  %17258 = vst [vmem:[#allocation148_spill] sm:$0xff] %v12896_v2 }
 0x56c   :  { %1429 = vadd.xlane.f32.xlu1 %v1214_v18  ;;  %1427 = vadd.xlane.f32.xlu0 %v1213_v9  ;;  %v12884_v46 = vpop.xlane.xlu1 %1289  ;;  %v12902_v9 = vsel %vm833_vm12, 1.0, %v16865_v5  ;;  %v17265_v18 = vld [vmem:[#allocation151_spill] sm:$0xff] }
 0x56d   :  { %17255 = vst [vmem:[#allocation299_spill] sm:$0xff] %v12884_v46  ;;  %v12886_v26 = vpop.xlane.xlu0 %1287  ;;  %8874 = vmatprep.subr.bf16.mxu1 %v17193_v28  ;;  %17260 = vst [vmem:[#allocation149_spill] sm:$0xff] %v12902_v9  ;;  %v131_v46 = vld [vmem:[#allocation2 + $0x2d0] sm:$0xff]  ;;  %vm17266_vm12 = vcmp.eq.s32.totalorder %v16784_v11, %v17265_v18 }
 0x56e   :  { %17256 = vst [vmem:[#allocation300_spill] sm:$0xff] %v12886_v26  ;;  %v132_v26 = vld [vmem:[#allocation2 + $0x2d8] sm:$0xff]  ;;  %v1217_v40 = vmul.f32 %v12902_v9, %v131_v46  ;;  %v12932_v9 = vsel %vm838_vm0, 1.0, %v16865_v5  ;;  %v17284_v18 = vld [vmem:[#allocation157_spill] sm:$0xff] }
 0x56f   :  { %v1218_v23 = vmul.f32 %v12896_v2, %v132_v26  ;;  %17271 = vst [vmem:[#allocation152_spill] sm:$0xff] %v12932_v9  ;;  %vm17285_vm15 = vcmp.eq.s32.totalorder %v16784_v11, %v17284_v18  ;;  %v17292_v18 = vld [vmem:[#allocation159_spill] sm:$0xff] }
 0x570   :  { %1433 = vadd.xlane.f32.xlu1 %v1216_v47  ;;  %1431 = vadd.xlane.f32.xlu0 %v1215_v57  ;;  %v12904_v30 = vpop.xlane.xlu1 %1293  ;;  %v12920_v47 = vsel %vm17266_vm12, 1.0, %v16865_v5  ;;  %v134_v57 = vld [vmem:[#allocation2 + $0x2e8] sm:$0xff]  ;;  %vm17293_vm13 = vcmp.eq.s32.totalorder %v16784_v11, %v17292_v18 }
 0x571   :  { %17261 = vst [vmem:[#allocation301_spill] sm:$0xff] %v12904_v30  ;;  %v12906_v61 = vpop.xlane.xlu0 %1291  ;;  %17267 = vst [vmem:[#allocation151_spill] sm:$0xff] %v12920_v47  ;;  %v133_v30 = vld [vmem:[#allocation2 + $0x2e0] sm:$0xff]  ;;  %v1220_v46 = vmul.f32 %v12914_v17, %v134_v57  ;;  %v17300_v18 = vld [vmem:[#allocation161_spill] sm:$0xff] }
 0x572   :  { %17262 = vst [vmem:[#allocation302_spill] sm:$0xff] %v12906_v61  ;;  %v1219_v49 = vmul.f32 %v12920_v47, %v133_v30  ;;  %v12950_v47 = vsel %vm840_vm1, 1.0, %v16865_v5  ;;  %vm17301_vm1 = vcmp.eq.s32.totalorder %v16784_v11, %v17300_v18 }
 0x573   :  { %17277 = vst [vmem:[#allocation154_spill] sm:$0xff] %v12950_v47 }
 0x574   :  { %1437 = vadd.xlane.f32.xlu1 %v1218_v23  ;;  %1435 = vadd.xlane.f32.xlu0 %v1217_v40  ;;  %v12922_v61 = vpop.xlane.xlu1 %1297  ;;  %v12938_v23 = vsel %vm837_vm14, 1.0, %v16865_v5  ;;  %v136_v40 = vld [vmem:[#allocation2 + $0x2f8] sm:$0xff] }
 0x575   :  { %17268 = vst [vmem:[#allocation303_spill] sm:$0xff] %v12922_v61  ;;  %v12924_v26 = vpop.xlane.xlu0 %1295  ;;  %17273 = vst [vmem:[#allocation153_spill] sm:$0xff] %v12938_v23  ;;  %v135_v61 = vld [vmem:[#allocation2 + $0x2f0] sm:$0xff]  ;;  %v1222_v30 = vmul.f32 %v12932_v9, %v136_v40 }
 0x576   :  { %17269 = vst [vmem:[#allocation304_spill] sm:$0xff] %v12924_v26  ;;  %v1221_v2 = vmul.f32 %v12938_v23, %v135_v61  ;;  %v12968_v23 = vsel %vm842_vm2, 1.0, %v16865_v5 }
 0x577   :  { %17283 = vst [vmem:[#allocation156_spill] sm:$0xff] %v12968_v23 }
 0x578   :  { %1441 = vadd.xlane.f32.xlu1 %v1220_v46  ;;  %1439 = vadd.xlane.f32.xlu0 %v1219_v49  ;;  %v12940_v26 = vpop.xlane.xlu1 %1301  ;;  %v12956_v46 = vsel %vm839_vm3, 1.0, %v16865_v5  ;;  %v138_v49 = vld [vmem:[#allocation2 + $0x308] sm:$0xff] }
 0x579   :  { %17274 = vst [vmem:[#allocation305_spill] sm:$0xff] %v12940_v26  ;;  %v12942_v57 = vpop.xlane.xlu0 %1299  ;;  %17279 = vst [vmem:[#allocation155_spill] sm:$0xff] %v12956_v46  ;;  %v137_v26 = vld [vmem:[#allocation2 + $0x300] sm:$0xff]  ;;  %v1224_v61 = vmul.f32 %v12950_v47, %v138_v49  ;;  %v17289_v47 = vld [vmem:[#allocation158_spill] sm:$0xff] }
 0x57a   :  { %17275 = vst [vmem:[#allocation306_spill] sm:$0xff] %v12942_v57  ;;  %v1223_v17 = vmul.f32 %v12956_v46, %v137_v26  ;;  %vm17290_vm14 = vcmp.eq.s32.totalorder %v16784_v11, %v17289_v47 }
 0x57b   :  { %v12986_v46 = vsel %vm17290_vm14, 1.0, %v16865_v5 }
 0x57c   :  { %1445 = vadd.xlane.f32.xlu1 %v1222_v30  ;;  %1443 = vadd.xlane.f32.xlu0 %v1221_v2  ;;  %v12958_v57 = vpop.xlane.xlu1 %1305  ;;  %v12974_v30 = vsel %vm17285_vm15, 1.0, %v16865_v5  ;;  %v140_v2 = vld [vmem:[#allocation2 + $0x318] sm:$0xff]  ;;  %17291 = vst [vmem:[#allocation158_spill] sm:$0xff] %v12986_v46 }
 0x57d   :  { %17280 = vst [vmem:[#allocation307_spill] sm:$0xff] %v12958_v57  ;;  %v12960_v40 = vpop.xlane.xlu0 %1303  ;;  %17286 = vst [vmem:[#allocation157_spill] sm:$0xff] %v12974_v30  ;;  %v139_v57 = vld [vmem:[#allocation2 + $0x310] sm:$0xff]  ;;  %v1226_v26 = vmul.f32 %v12968_v23, %v140_v2  ;;  %v17297_v23 = vld [vmem:[#allocation160_spill] sm:$0xff] }
 0x57e   :  { %17281 = vst [vmem:[#allocation308_spill] sm:$0xff] %v12960_v40  ;;  %v1225_v9 = vmul.f32 %v12974_v30, %v139_v57  ;;  %vm17298_vm0 = vcmp.eq.s32.totalorder %v16784_v11, %v17297_v23 }
 0x57f   :  { %v13004_v30 = vsel %vm17298_vm0, 1.0, %v16865_v5 }
 0x580   :  { %1449 = vadd.xlane.f32.xlu1 %v1224_v61  ;;  %1447 = vadd.xlane.f32.xlu0 %v1223_v17  ;;  %v12976_v40 = vpop.xlane.xlu1 %1309  ;;  %v12992_v61 = vsel %vm17293_vm13, 1.0, %v16865_v5  ;;  %v142_v17 = vld [vmem:[#allocation2 + $0x328] sm:$0xff]  ;;  %17299 = vst [vmem:[#allocation160_spill] sm:$0xff] %v13004_v30 }
 0x581   :  { %17287 = vst [vmem:[#allocation309_spill] sm:$0xff] %v12976_v40  ;;  %v12978_v49 = vpop.xlane.xlu0 %1307  ;;  %17294 = vst [vmem:[#allocation159_spill] sm:$0xff] %v12992_v61  ;;  %v141_v40 = vld [vmem:[#allocation2 + $0x320] sm:$0xff]  ;;  %v1228_v57 = vmul.f32 %v12986_v46, %v142_v17 }
 0x582   :  { %17288 = vst [vmem:[#allocation310_spill] sm:$0xff] %v12978_v49  ;;  %v1227_v47 = vmul.f32 %v12992_v61, %v141_v40 }
 0x584   :  { %1453 = vadd.xlane.f32.xlu1 %v1226_v26  ;;  %1451 = vadd.xlane.f32.xlu0 %v1225_v9  ;;  %v12994_v49 = vpop.xlane.xlu1 %1313  ;;  %v13010_v26 = vsel %vm17301_vm1, 1.0, %v16865_v5  ;;  %v144_v9 = vld [vmem:[#allocation2 + $0x338] sm:$0xff] }
 0x585   :  { %17295 = vst [vmem:[#allocation311_spill] sm:$0xff] %v12994_v49  ;;  %v12996_v2 = vpop.xlane.xlu0 %1311  ;;  %17302 = vst [vmem:[#allocation161_spill] sm:$0xff] %v13010_v26  ;;  %v143_v49 = vld [vmem:[#allocation2 + $0x330] sm:$0xff]  ;;  %v1230_v40 = vmul.f32 %v13004_v30, %v144_v9  ;;  %v17313_v9 = vld [vmem:[#allocation15_spill] sm:$0xff] }
 0x586   :  { %17296 = vst [vmem:[#allocation312_spill] sm:$0xff] %v12996_v2  ;;  %v1229_v23 = vmul.f32 %v13010_v26, %v143_v49  ;;  %v17327_v30 = vld [vmem:[#allocation23_spill] sm:$0xff] }
 0x588   :  { %1457 = vadd.xlane.f32.xlu1 %v1228_v57  ;;  %1455 = vadd.xlane.f32.xlu0 %v1227_v47  ;;  %v13012_v2 = vpop.xlane.xlu1 %1317 }
 0x589   :  { %17303 = vst [vmem:[#allocation313_spill] sm:$0xff] %v13012_v2  ;;  %v13014_v17 = vpop.xlane.xlu0 %1315 }
 0x58a   :  { %17304 = vst [vmem:[#allocation314_spill] sm:$0xff] %v13014_v17 }
 0x58c   :  { %1461 = vadd.xlane.f32.xlu1 %v1230_v40  ;;  %1459 = vadd.xlane.f32.xlu0 %v1229_v23  ;;  %v13018_v46 = vpop.xlane.xlu1 %1321  ;;  %v17316_v23 = vld [vmem:[#allocation17_spill] sm:$0xff] }
 0x58d   :  { %17305 = vst [vmem:[#allocation315_spill] sm:$0xff] %v13018_v46  ;;  %v13020_v61 = vpop.xlane.xlu0 %1319  ;;  %v17324_v46 = vld [vmem:[#allocation22_spill] sm:$0xff] }
 0x58e   :  { %17306 = vst [vmem:[#allocation316_spill] sm:$0xff] %v13020_v61 }
 0x591   :  { %v13022_v18 = vpop.xlane.xlu1 %1325  ;;  %v13024_v7 = vpop.xlane.xlu0 %1323 }
 0x592   :  { %17307 = vst [vmem:[#allocation317_spill] sm:$0xff] %v13022_v18  ;;  %17308 = vst [vmem:[#allocation318_spill] sm:$0xff] %v13024_v7  ;;  %v17319_v7 = vld [vmem:[#allocation18_spill] sm:$0xff] }
 0x595   :  { %v13026_v57 = vpop.xlane.xlu1 %1329  ;;  %v13028_v47 = vpop.xlane.xlu0 %1327 }
 0x596   :  { %17309 = vst [vmem:[#allocation319_spill] sm:$0xff] %v13026_v57  ;;  %17310 = vst [vmem:[#allocation320_spill] sm:$0xff] %v13028_v47  ;;  %v17320_v57 = vld [vmem:[#allocation20_spill] sm:$0xff] }
 0x599   :  { %v13030_v2 = vpop.xlane.xlu1 %1333  ;;  %v13032_v17 = vpop.xlane.xlu0 %1331 }
 0x59a   :  { %17311 = vst [vmem:[#allocation321_spill] sm:$0xff] %v13030_v2  ;;  %17312 = vst [vmem:[#allocation322_spill] sm:$0xff] %v13032_v17  ;;  %v17323_v17 = vld [vmem:[#allocation21_spill] sm:$0xff] }
 0x59d   :  { %5910 = vperm.xlu1 %8960, %v17313_v9   ;;  %v13035_v49 = vpop.xlane.xlu1 %1337  ;;  %v13037_v40 = vpop.xlane.xlu0 %1335  ;;  %v17331_v9 = vld [vmem:[#allocation25_spill] sm:$0xff] }
 0x59e   :  { %17314 = vst [vmem:[#allocation323_spill] sm:$0xff] %v13035_v49  ;;  %17315 = vst [vmem:[#allocation324_spill] sm:$0xff] %v13037_v40 }
 0x5a1   :  { %5913 = vperm.xlu1 %8960, %v17316_v23   ;;  %v13040_v61 = vpop.xlane.xlu1 %1341  ;;  %v13042_v18 = vpop.xlane.xlu0 %1339 }
 0x5a2   :  { %17317 = vst [vmem:[#allocation325_spill] sm:$0xff] %v13040_v61  ;;  %17318 = vst [vmem:[#allocation326_spill] sm:$0xff] %v13042_v18  ;;  %5907 = vperm.xlu0 %8959, %v17319_v7   ;;  %v17328_v61 = vld [vmem:[#allocation24_spill] sm:$0xff] }
 0x5a5   :  { %5916 = vperm.xlu1 %8960, %v17320_v57   ;;  %v13046_v47 = vpop.xlane.xlu1 %1345  ;;  %v13048_v2 = vpop.xlane.xlu0 %1343 }
 0x5a6   :  { %17321 = vst [vmem:[#allocation327_spill] sm:$0xff] %v13046_v47  ;;  %17322 = vst [vmem:[#allocation328_spill] sm:$0xff] %v13048_v2  ;;  %5934 = vperm.xlu0 %8959, %v17323_v17   ;;  %v17332_v47 = vld [vmem:[#allocation26_spill] sm:$0xff] }
 0x5a9   :  { %5919 = vperm.xlu1 %8960, %v17324_v46   ;;  %v13052_v49 = vpop.xlane.xlu1 %1349  ;;  %v13054_v40 = vpop.xlane.xlu0 %1347  ;;  %v17335_v46 = vld [vmem:[#allocation27_spill] sm:$0xff] }
 0x5aa   :  { %17325 = vst [vmem:[#allocation329_spill] sm:$0xff] %v13052_v49  ;;  %17326 = vst [vmem:[#allocation330_spill] sm:$0xff] %v13054_v40  ;;  %5940 = vperm.xlu0 %8959, %v17327_v30   ;;  %v17336_v49 = vld [vmem:[#allocation28_spill] sm:$0xff] }
 0x5ad   :  { %5922 = vperm.xlu1 %8960, %v17328_v61   ;;  %v13058_v18 = vpop.xlane.xlu1 %1353  ;;  %v13060_v26 = vpop.xlane.xlu0 %1351  ;;  %v17339_v61 = vld [vmem:[#allocation29_spill] sm:$0xff] }
 0x5ae   :  { %17329 = vst [vmem:[#allocation331_spill] sm:$0xff] %v13058_v18  ;;  %17330 = vst [vmem:[#allocation332_spill] sm:$0xff] %v13060_v26  ;;  %5946 = vperm.xlu0 %8959, %v17331_v9   ;;  %v17342_v9 = vld [vmem:[#allocation30_spill] sm:$0xff] }
 0x5b1   :  { %5925 = vperm.xlu1 %8960, %v17332_v47   ;;  %v13064_v2 = vpop.xlane.xlu1 %1357  ;;  %v13066_v17 = vpop.xlane.xlu0 %1355 }
 0x5b2   :  { %17333 = vst [vmem:[#allocation333_spill] sm:$0xff] %v13064_v2  ;;  %17334 = vst [vmem:[#allocation334_spill] sm:$0xff] %v13066_v17  ;;  %5952 = vperm.xlu0 %8959, %v17335_v46   ;;  %v17345_v17 = vld [vmem:[#allocation31_spill] sm:$0xff] }
 0x5b5   :  { %5928 = vperm.xlu1 %8960, %v17336_v49   ;;  %v13070_v40 = vpop.xlane.xlu1 %1361  ;;  %v13072_v30 = vpop.xlane.xlu0 %1359 }
 0x5b6   :  { %17337 = vst [vmem:[#allocation335_spill] sm:$0xff] %v13070_v40  ;;  %17338 = vst [vmem:[#allocation336_spill] sm:$0xff] %v13072_v30  ;;  %v17348_v40 = vld [vmem:[#allocation32_spill] sm:$0xff] }
 0x5b9   :  { %5931 = vperm.xlu1 %8960, %v17339_v61   ;;  %v13075_v18 = vpop.xlane.xlu1 %1365  ;;  %v13077_v26 = vpop.xlane.xlu0 %1363 }
 0x5ba   :  { %17340 = vst [vmem:[#allocation337_spill] sm:$0xff] %v13075_v18  ;;  %17341 = vst [vmem:[#allocation338_spill] sm:$0xff] %v13077_v26 }
 0x5bd   :  { %5937 = vperm.xlu1 %8960, %v17342_v9   ;;  %v13080_v47 = vpop.xlane.xlu1 %1369  ;;  %v13082_v2 = vpop.xlane.xlu0 %1367 }
 0x5be   :  { %17343 = vst [vmem:[#allocation339_spill] sm:$0xff] %v13080_v47  ;;  %17344 = vst [vmem:[#allocation340_spill] sm:$0xff] %v13082_v2  ;;  %v17353_v47 = vld [vmem:[#allocation162_spill] sm:$0xff] }
 0x5bf   :  { %vm17354_vm3 = vcmp.eq.s32.totalorder %v16784_v11, %v17353_v47 }
 0x5c0   :  { %v13102_v2 = vsel %vm17354_vm3, 1.0, %v16865_v5 }
 0x5c1   :  { %5943 = vperm.xlu1 %8960, %v17345_v17   ;;  %v13085_v46 = vpop.xlane.xlu1 %1373  ;;  %v13087_v49 = vpop.xlane.xlu0 %1371  ;;  %17355 = vst [vmem:[#allocation162_spill] sm:$0xff] %v13102_v2  ;;  %v146_v17 = vld [vmem:[#allocation2 + $0x348] sm:$0xff] }
 0x5c2   :  { %17346 = vst [vmem:[#allocation341_spill] sm:$0xff] %v13085_v46  ;;  %17347 = vst [vmem:[#allocation342_spill] sm:$0xff] %v13087_v49 }
 0x5c5   :  { %5949 = vperm.xlu1 %8960, %v17348_v40   ;;  %v13090_v30 = vpop.xlane.xlu1 %1377  ;;  %v13092_v61 = vpop.xlane.xlu0 %1375  ;;  %v1232_v40 = vmul.f32 %v13102_v2, %v146_v17 }
 0x5c6   :  { %17349 = vst [vmem:[#allocation343_spill] sm:$0xff] %v13090_v30  ;;  %17350 = vst [vmem:[#allocation344_spill] sm:$0xff] %v13092_v61  ;;  %v17358_v61 = vld [vmem:[#allocation164_spill] sm:$0xff] }
 0x5c7   :  { %vm17359_vm2 = vcmp.eq.s32.totalorder %v16784_v11, %v17358_v61 }
 0x5c9   :  { %v13094_v18 = vpop.xlane.xlu1 %1381  ;;  %v13096_v26 = vpop.xlane.xlu0 %1379 }
 0x5ca   :  { %17351 = vst [vmem:[#allocation345_spill] sm:$0xff] %v13094_v18  ;;  %17352 = vst [vmem:[#allocation346_spill] sm:$0xff] %v13096_v26  ;;  %v13113_v18 = vsel %vm17359_vm2, 1.0, %v16865_v5  ;;  %v148_v26 = vld [vmem:[#allocation2 + $0x358] sm:$0xff] }
 0x5cb   :  { %17360 = vst [vmem:[#allocation164_spill] sm:$0xff] %v13113_v18  ;;  %v1234_v9 = vmul.f32 %v13113_v18, %v148_v26  ;;  %v17371_v26 = vld [vmem:[#allocation163_spill] sm:$0xff] }
 0x5cc   :  { %vm17372_vm9 = vcmp.eq.s32.totalorder %v16784_v11, %v17371_v26 }
 0x5cd   :  { %v13104_v46 = vpop.xlane.xlu1 %1385  ;;  %v13106_v49 = vpop.xlane.xlu0 %1383 }
 0x5ce   :  { %17356 = vst [vmem:[#allocation347_spill] sm:$0xff] %v13104_v46  ;;  %17357 = vst [vmem:[#allocation348_spill] sm:$0xff] %v13106_v49 }
 0x5d1   :  { %v13115_v30 = vpop.xlane.xlu1 %1389  ;;  %1465 = vadd.xlane.f32.xlu0 %v1232_v40  ;;  %v13117_v47 = vpop.xlane.xlu0 %1387 }
 0x5d2   :  { %17361 = vst [vmem:[#allocation349_spill] sm:$0xff] %v13115_v30  ;;  %17362 = vst [vmem:[#allocation350_spill] sm:$0xff] %v13117_v47 }
 0x5d5   :  { %v13120_v57 = vpop.xlane.xlu1 %1393  ;;  %1469 = vadd.xlane.f32.xlu0 %v1234_v9  ;;  %v13122_v49 = vpop.xlane.xlu0 %1391  ;;  %v145_v9 = vld [vmem:[#allocation2 + $0x340] sm:$0xff] }
 0x5d6   :  { %17363 = vst [vmem:[#allocation351_spill] sm:$0xff] %v13120_v57  ;;  %17364 = vst [vmem:[#allocation352_spill] sm:$0xff] %v13122_v49  ;;  %v13140_v57 = vsel %vm17372_vm9, 1.0, %v16865_v5 }
 0x5d7   :  { %17373 = vst [vmem:[#allocation163_spill] sm:$0xff] %v13140_v57 }
 0x5d9   :  { %v13124_v17 = vpop.xlane.xlu1 %1397  ;;  %v13126_v46 = vpop.xlane.xlu0 %1395 }
 0x5da   :  { %17365 = vst [vmem:[#allocation353_spill] sm:$0xff] %v13124_v17  ;;  %17366 = vst [vmem:[#allocation354_spill] sm:$0xff] %v13126_v46  ;;  %v1231_v46 = vmul.f32 %v13140_v57, %v145_v9  ;;  %v149_v9 = vld [vmem:[#allocation2 + $0x360] sm:$0xff] }
 0x5dd   :  { %v13128_v61 = vpop.xlane.xlu1 %1401  ;;  %v13130_v2 = vpop.xlane.xlu0 %1399 }
 0x5de   :  { %17367 = vst [vmem:[#allocation355_spill] sm:$0xff] %v13128_v61  ;;  %17368 = vst [vmem:[#allocation356_spill] sm:$0xff] %v13130_v2  ;;  %v17376_v61 = vld [vmem:[#allocation165_spill] sm:$0xff] }
 0x5df   :  { %vm17377_vm10 = vcmp.eq.s32.totalorder %v16784_v11, %v17376_v61 }
 0x5e1   :  { %v13132_v23 = vpop.xlane.xlu1 %1405  ;;  %v13134_v40 = vpop.xlane.xlu0 %1403 }
 0x5e2   :  { %17369 = vst [vmem:[#allocation357_spill] sm:$0xff] %v13132_v23  ;;  %17370 = vst [vmem:[#allocation358_spill] sm:$0xff] %v13134_v40  ;;  %v13151_v23 = vsel %vm17377_vm10, 1.0, %v16865_v5  ;;  %v147_v40 = vld [vmem:[#allocation2 + $0x350] sm:$0xff] }
 0x5e3   :  { %17378 = vst [vmem:[#allocation165_spill] sm:$0xff] %v13151_v23  ;;  %v1233_v47 = vmul.f32 %v13151_v23, %v147_v40 }
 0x5e5   :  { %v13142_v49 = vpop.xlane.xlu1 %1409  ;;  %v13144_v17 = vpop.xlane.xlu0 %1407 }
 0x5e6   :  { %17374 = vst [vmem:[#allocation359_spill] sm:$0xff] %v13142_v49  ;;  %17375 = vst [vmem:[#allocation360_spill] sm:$0xff] %v13144_v17  ;;  %v13162_v17 = vsel %vm851_vm4, 1.0, %v16865_v5 }
 0x5e7   :  { %17382 = vst [vmem:[#allocation167_spill] sm:$0xff] %v13162_v17 }
 0x5e9   :  { %1463 = vadd.xlane.f32.xlu1 %v1231_v46  ;;  %v13153_v2 = vpop.xlane.xlu1 %1413  ;;  %v13155_v26 = vpop.xlane.xlu0 %1411  ;;  %v1235_v46 = vmul.f32 %v13162_v17, %v149_v9 }
 0x5ea   :  { %17379 = vst [vmem:[#allocation361_spill] sm:$0xff] %v13153_v2  ;;  %17380 = vst [vmem:[#allocation362_spill] sm:$0xff] %v13155_v26 }
 0x5ed   :  { %1467 = vadd.xlane.f32.xlu1 %v1233_v47  ;;  %v13164_v30 = vpop.xlane.xlu1 %1417  ;;  %v13166_v61 = vpop.xlane.xlu0 %1415 }
 0x5ee   :  { %17383 = vst [vmem:[#allocation363_spill] sm:$0xff] %v13164_v30  ;;  %17384 = vst [vmem:[#allocation364_spill] sm:$0xff] %v13166_v61 }
 0x5f1   :  { %1471 = vadd.xlane.f32.xlu1 %v1235_v46  ;;  %v13169_v2 = vpop.xlane.xlu1 %1421  ;;  %v13171_v26 = vpop.xlane.xlu0 %1419 }
 0x5f2   :  { %17385 = vst [vmem:[#allocation365_spill] sm:$0xff] %v13169_v2  ;;  %17386 = vst [vmem:[#allocation366_spill] sm:$0xff] %v13171_v26 }
 0x5f5   :  { %v13173_v40 = vpop.xlane.xlu1 %1425  ;;  %v13175_v18 = vpop.xlane.xlu0 %1423 }
 0x5f6   :  { %17387 = vst [vmem:[#allocation367_spill] sm:$0xff] %v13173_v40  ;;  %17388 = vst [vmem:[#allocation368_spill] sm:$0xff] %v13175_v18 }
 0x5f9   :  { %v13177_v49 = vpop.xlane.xlu1 %1429  ;;  %v13181_v47 = vpop.xlane.xlu0 %1427 }
 0x5fa   :  { %17389 = vst [vmem:[#allocation369_spill] sm:$0xff] %v13177_v49  ;;  %17391 = vst [vmem:[#allocation371_spill] sm:$0xff] %v13181_v47 }
 0x5fd   :  { %v13179_v23 = vpop.xlane.xlu1 %1433  ;;  %v13185_v61 = vpop.xlane.xlu0 %1431 }
 0x5fe   :  { %17390 = vst [vmem:[#allocation370_spill] sm:$0xff] %v13179_v23  ;;  %17393 = vst [vmem:[#allocation373_spill] sm:$0xff] %v13185_v61 }
 0x601   :  { %v13183_v30 = vpop.xlane.xlu1 %1437  ;;  %v13191_v2 = vpop.xlane.xlu0 %1435 }
 0x602   :  { %17392 = vst [vmem:[#allocation372_spill] sm:$0xff] %v13183_v30  ;;  %17396 = vst [vmem:[#allocation376_spill] sm:$0xff] %v13191_v2 }
 0x605   :  { %v13187_v9 = vpop.xlane.xlu1 %1441  ;;  %v13195_v40 = vpop.xlane.xlu0 %1439 }
 0x606   :  { %17394 = vst [vmem:[#allocation374_spill] sm:$0xff] %v13187_v9  ;;  %17398 = vst [vmem:[#allocation378_spill] sm:$0xff] %v13195_v40 }
 0x609   :  { %v13189_v46 = vpop.xlane.xlu1 %1445  ;;  %v13201_v23 = vpop.xlane.xlu0 %1443 }
 0x60a   :  { %17395 = vst [vmem:[#allocation375_spill] sm:$0xff] %v13189_v46  ;;  %17401 = vst [vmem:[#allocation381_spill] sm:$0xff] %v13201_v23 }
 0x60d   :  { %v13193_v26 = vpop.xlane.xlu1 %1449  ;;  %v13205_v30 = vpop.xlane.xlu0 %1447 }
 0x60e   :  { %17397 = vst [vmem:[#allocation377_spill] sm:$0xff] %v13193_v26  ;;  %17403 = vst [vmem:[#allocation383_spill] sm:$0xff] %v13205_v30 }
 0x611   :  { %v13197_v18 = vpop.xlane.xlu1 %1453  ;;  %v13209_v17 = vpop.xlane.xlu0 %1451 }
 0x612   :  { %17399 = vst [vmem:[#allocation379_spill] sm:$0xff] %v13197_v18  ;;  %17404 = vst [vmem:[#allocation384_spill] sm:$0xff] %v13209_v17 }
 0x615   :  { %v13199_v49 = vpop.xlane.xlu1 %1457  ;;  %v13213_v26 = vpop.xlane.xlu0 %1455 }
 0x616   :  { %17400 = vst [vmem:[#allocation380_spill] sm:$0xff] %v13199_v49  ;;  %17405 = vst [vmem:[#allocation385_spill] sm:$0xff] %v13213_v26 }
 0x619   :  { %v13203_v47 = vpop.xlane.xlu1 %1461 }
 0x61a   :  { %17402 = vst [vmem:[#allocation382_spill] sm:$0xff] %v13203_v47 }
 0x61d   :  { %v5911_v61 = vpop.permute.xlu1 %5910 }
 0x61e   :  { %vm5955_vm11 = vcmp.eq.s32.totalorder %v5911_v61, 1 }
 0x621   :  { %v13207_v9 = vpop.permute.xlu1 %5913  ;;  %v8491_v46 = vpop.f32.mrb[48].mxu1 }
 0x622   :  { %9225 = vlog2.f32 %v8491_v46  ;;  %v5747_v2 = vpop.f32.mrb[49].mxu1  ;;  %vm5956_vm5 = vcmp.eq.s32.totalorder %v13207_v9, 1 }
 0x623   :  { %9227 = vlog2.f32 %v5747_v2  ;;  %v13219_v2 = vpop.xlane.xlu0 %1459 }
 0x624   :  { %17406 = vst [vmem:[#allocation386_spill] sm:$0xff] %v13219_v2 }
 0x625   :  { %v13211_v40 = vpop.permute.xlu1 %5916  ;;  %v8494_v18 = vpop.f32.mrb[50].mxu1 }
 0x626   :  { %9229 = vlog2.f32 %v8494_v18  ;;  %v5757_v49 = vpop.f32.mrb[51].mxu1  ;;  %vm5957_vm6 = vcmp.eq.s32.totalorder %v13211_v40, 1 }
 0x627   :  { %9231 = vlog2.f32 %v5757_v49  ;;  %v5908_v28 = vpop.permute.xlu0 %5907 }
 0x628   :  { %vm5954_vm4 = vcmp.eq.s32.totalorder %v5908_v28, 1 }
 0x629   :  { %v13215_v23 = vpop.permute.xlu1 %5919  ;;  %v8497_v47 = vpop.f32.mrb[52].mxu1 }
 0x62a   :  { %9233 = vlog2.f32 %v8497_v47  ;;  %v5767_v30 = vpop.f32.mrb[53].mxu1  ;;  %vm5958_vm7 = vcmp.eq.s32.totalorder %v13215_v23, 1 }
 0x62b   :  { %9235 = vlog2.f32 %v5767_v30 }
 0x62c   :  { %v9226_v57 = vpop.eup %9225 }
 0x62d   :  { %v9228_v7 = vpop.eup %9227  ;;  %v5829_v17 = vmul.f32 0.6931472, %v9226_v57  ;;  %v13217_v46 = vpop.permute.xlu1 %5922 }
 0x62e   :  { %v5827_v58 = vmul.f32 0.6931472, %v9228_v7  ;;  %v8500_v29 = vpop.f32.mrb[54].mxu1  ;;  %vm5959_vm8 = vcmp.eq.s32.totalorder %v13217_v46, 1 }
 0x62f   :  { %v5859_v18 = vadd.f32 %v5829_v17, %v12552_v62  ;;  %9237 = vlog2.f32 %v8500_v29  ;;  %v5777_v26 = vpop.f32.mrb[55].mxu1 }
 0x630   :  { %v5858_v49 = vadd.f32 %v5827_v58, %v12570_v15  ;;  %9239 = vlog2.f32 %v5777_v26  ;;  %v9230_v19 = vpop.eup %9229 }
 0x631   :  { %v5875_v47 = vadd.f32 %v5859_v18, %v9901_v10  ;;  %v9232_v56 = vpop.eup %9231  ;;  %v5833_v57 = vmul.f32 0.6931472, %v9230_v19  ;;  %v8503_v53 = vpop.f32.mrb[56].mxu1 }
 0x632   :  { %v5874_v30 = vadd.f32 %v5858_v49, %v9901_v10  ;;  %v5831_v32 = vmul.f32 0.6931472, %v9232_v56  ;;  %v13225_v7 = vpop.permute.xlu1 %5925  ;;  %9241 = vlog2.f32 %v8503_v53  ;;  %v5787_v62 = vpop.f32.mrb[57].mxu1 }
 0x633   :  { %v5891_v29 = vadd.f32 %v5875_v47, %v12554_v42  ;;  %v5861_v15 = vadd.f32 %v5833_v57, %v12604_v59  ;;  %9243 = vlog2.f32 %v5787_v62  ;;  %vm5960_vm12 = vcmp.eq.s32.totalorder %v13225_v7, 1 }
 0x634   :  { %v5890_v58 = vadd.f32 %v5874_v30, %v12566_v41  ;;  %v9234_v17 = vpop.eup %9233  ;;  %v5860_v26 = vadd.f32 %v5831_v32, %v12606_v27 }
 0x635   :  { %v13232_v19 = vsel %vm5955_vm11, %v5891_v29, %v11832_v20  ;;  %v9236_v56 = vpop.eup %9235  ;;  %v5877_v18 = vadd.f32 %v5861_v15, %v9901_v10  ;;  %v5837_v49 = vmul.f32 0.6931472, %v9234_v17  ;;  %v8506_v53 = vpop.f32.mrb[58].mxu1 }
 0x636   :  { %5988 = vmax.xlane.f32.xlu0 %v13232_v19  ;;  %v13238_v42 = vsel %vm5954_vm4, %v5890_v58, %v11849_v54  ;;  %v5876_v59 = vadd.f32 %v5860_v26, %v9901_v10  ;;  %v5835_v41 = vmul.f32 0.6931472, %v9236_v56  ;;  %9245 = vlog2.f32 %v8506_v53  ;;  %v5797_v61 = vpop.f32.mrb[59].mxu1  ;;  %v13246_v28 = vpop.permute.xlu1 %5928 }
 0x637   :  { %5986 = vmax.xlane.f32.xlu1 %v13238_v42  ;;  %v5863_v20 = vadd.f32 %v5837_v49, %v12636_v60  ;;  %9247 = vlog2.f32 %v5797_v61  ;;  %v5893_v32 = vadd.f32 %v5877_v18, %v12592_v37  ;;  %vm5961_vm15 = vcmp.eq.s32.totalorder %v13246_v28, 1 }
 0x638   :  { %v5862_v47 = vadd.f32 %v5835_v41, %v12638_v55  ;;  %v5892_v60 = vadd.f32 %v5876_v59, %v12590_v16 }
 0x639   :  { %v9238_v27 = vpop.eup %9237  ;;  %v5879_v30 = vadd.f32 %v5863_v20, %v9901_v10  ;;  %v8509_v62 = vpop.f32.mrb[60].mxu1  ;;  %v13250_v29 = vsel %vm5957_vm6, %v5893_v32, %v11862_v21 }
 0x63a   :  { %v9240_v54 = vpop.eup %9239  ;;  %v5841_v57 = vmul.f32 0.6931472, %v9238_v27  ;;  %v5878_v15 = vadd.f32 %v5862_v47, %v9901_v10  ;;  %9249 = vlog2.f32 %v8509_v62  ;;  %v5807_v58 = vpop.f32.mrb[61].mxu1  ;;  %5992 = vmax.xlane.f32.xlu0 %v13250_v29  ;;  %v13262_v49 = vsel %vm5956_vm5, %v5892_v60, %v11874_v51 }
 0x63b   :  { %v5839_v37 = vmul.f32 0.6931472, %v9240_v54  ;;  %9251 = vlog2.f32 %v5807_v58  ;;  %v5932_v9 = vpop.permute.xlu1 %5931 }
 0x63c   :  { %v5865_v55 = vadd.f32 %v5841_v57, %v12668_v63  ;;  %v9242_v40 = vpop.eup %9241  ;;  %v5894_v17 = vadd.f32 %v5878_v15, %v12622_v35  ;;  %v5895_v63 = vadd.f32 %v5879_v30, %v12624_v34  ;;  %v5935_v35 = vpop.permute.xlu0 %5934  ;;  %vm5962_vm14 = vcmp.eq.s32.totalorder %v5932_v9, 1  ;;  %v17412_v9 = vld [vmem:[#allocation199_spill] sm:$0xff] }
 0x63d   :  { %v5864_v21 = vadd.f32 %v5839_v37, %v12670_v4  ;;  %v9244_v16 = vpop.eup %9243  ;;  %v5845_v56 = vmul.f32 0.6931472, %v9242_v40  ;;  %v8512_v18 = vpop.f32.mrb[62].mxu1  ;;  %vm5963_vm13 = vcmp.eq.s32.totalorder %v5935_v35, 1  ;;  %v17413_v35 = vld [vmem:[#allocation171_spill] sm:$0xff] }
 0x63e   :  { %v5881_v26 = vadd.f32 %v5865_v55, %v9901_v10  ;;  %v5843_v59 = vmul.f32 0.6931472, %v9244_v16  ;;  %9253 = vlog2.f32 %v8512_v18  ;;  %v5817_v23 = vpop.f32.mrb[63].mxu1  ;;  %5990 = vmax.xlane.f32.xlu0 %v13262_v49  ;;  %v13268_v4 = vsel %vm5958_vm7, %v5894_v17, %v11893_v43  ;;  %v17407_v18 = vld [vmem:[#allocation287_spill] sm:$0xff] }
 0x63f   :  { %v5880_v53 = vadd.f32 %v5864_v21, %v9901_v10  ;;  %v5867_v41 = vadd.f32 %v5845_v56, %v12696_v52  ;;  %9255 = vlog2.f32 %v5817_v23  ;;  %5994 = vmax.xlane.f32.xlu1 %v13268_v4  ;;  %v13278_v27 = vsel %vm5959_vm8, %v5895_v63, %v11889_v22  ;;  %v5938_v7 = vpop.permute.xlu1 %5937  ;;  %v151_v23 = vld [vmem:[#allocation2 + $0x370] sm:$0xff] }
 0x640   :  { %v9246_v51 = vpop.eup %9245  ;;  %v5866_v34 = vadd.f32 %v5843_v59, %v12698_v1  ;;  %v5897_v52 = vadd.f32 %v5881_v26, %v12656_v6  ;;  %v5941_v57 = vpop.permute.xlu0 %5940  ;;  %vm5964_vm0 = vcmp.eq.s32.totalorder %v5938_v7, 1  ;;  %vm855_vm9 = vcmp.eq.s32.totalorder %v16784_v11, %v17413_v35  ;;  %v150_v7 = vld [vmem:[#allocation2 + $0x368] sm:$0xff] }
 0x641   :  { %v5896_v61 = vadd.f32 %v5880_v53, %v12654_v48  ;;  %v9248_v20 = vpop.eup %9247  ;;  %v5883_v32 = vadd.f32 %v5867_v41, %v9901_v10  ;;  %v5849_v43 = vmul.f32 0.6931472, %v9246_v51  ;;  %vm5965_vm1 = vcmp.eq.s32.totalorder %v5941_v57, 1  ;;  %v17414_v41 = vld [vmem:[#allocation198_spill] sm:$0xff] }
 0x642   :  { %v5882_v47 = vadd.f32 %v5866_v34, %v9901_v10  ;;  %v5847_v54 = vmul.f32 0.6931472, %v9248_v20  ;;  %5996 = vmax.xlane.f32.xlu0 %v13278_v27 }
 0x643   :  { %v13284_v46 = vsel %vm5960_vm12, %v5896_v61, %v11917_v38  ;;  %v5869_v1 = vadd.f32 %v5849_v43, %v12725_v44  ;;  %v13293_v38 = vsel %vm5961_vm15, %v5897_v52, %v11913_v3  ;;  %v5899_v44 = vadd.f32 %v5883_v32, %v12688_v25  ;;  %v5944_v16 = vpop.permute.xlu1 %5943  ;;  %v17415_v61 = vld [vmem:[#allocation288_spill] sm:$0xff] }
 0x644   :  { %5998 = vmax.xlane.f32.xlu1 %v13284_v46  ;;  %v9250_v48 = vpop.eup %9249  ;;  %v5868_v22 = vadd.f32 %v5847_v54, %v12727_v12  ;;  %v5898_v6 = vadd.f32 %v5882_v47, %v12686_v0  ;;  %v5947_v26 = vpop.permute.xlu0 %5946  ;;  %vm5966_vm3 = vcmp.eq.s32.totalorder %v5944_v16, 1  ;;  %v13343_v32 = vsel %vm855_vm9, 1.0, %v16865_v5  ;;  %v153_v52 = vld [vmem:[#allocation2 + $0x380] sm:$0xff]  ;;  %v17417_v47 = vld [vmem:[#allocation166_spill] sm:$0xff] }
 0x645   :  { %v9252_v30 = vpop.eup %9251  ;;  %v5885_v62 = vadd.f32 %v5869_v1, %v9901_v10  ;;  %v5853_v60 = vmul.f32 0.6931472, %v9250_v48  ;;  %v13307_v21 = vsel %vm5963_vm13, %v5899_v44, %v11936_v50  ;;  %vm5967_vm10 = vcmp.eq.s32.totalorder %v5947_v26, 1  ;;  %v17420_v1 = vld [vmem:[#allocation202_spill] sm:$0xff]  ;;  %v17423_v44 = vld [vmem:[#allocation168_spill] sm:$0xff] }
 0x646   :  { %v5884_v15 = vadd.f32 %v5868_v22, %v9901_v10  ;;  %v5851_v37 = vmul.f32 0.6931472, %v9252_v30  ;;  %6000 = vmax.xlane.f32.xlu0 %v13293_v38  ;;  %v13299_v12 = vsel %vm5962_vm14, %v5898_v6, %v11940_v45  ;;  %vm17418_vm11 = vcmp.eq.s32.totalorder %v16784_v11, %v17417_v47  ;;  %v17421_v30 = vld [vmem:[#allocation289_spill] sm:$0xff]  ;;  %v17431_v16 = vld [vmem:[#allocation172_spill] sm:$0xff] }
 0x647   :  { %v5871_v0 = vadd.f32 %v5853_v60, %v12748_v39  ;;  %v5901_v45 = vadd.f32 %v5885_v62, %v12716_v33  ;;  %v13351_v54 = vsel %vm17418_vm11, 1.0, %v16865_v5  ;;  %v1239_v22 = vmul.f32 %v13343_v32, %v153_v52  ;;  %v5950_v6 = vpop.permute.xlu1 %5949  ;;  %v17422_v62 = vld [vmem:[#allocation173_spill] sm:$0xff]  ;;  %v17441_v52 = vld [vmem:[#allocation180_spill] sm:$0xff] }
 0x648   :  { %6002 = vmax.xlane.f32.xlu1 %v13299_v12  ;;  %v9254_v28 = vpop.eup %9253  ;;  %v5870_v58 = vadd.f32 %v5851_v37, %v12750_v8  ;;  %v5900_v3 = vadd.f32 %v5884_v15, %v12714_v13  ;;  %vm857_vm6 = vcmp.eq.s32.totalorder %v16784_v11, %v17422_v62  ;;  %v1236_v60 = vmul.f32 %v13351_v54, %v150_v7  ;;  %v152_v37 = vld [vmem:[#allocation2 + $0x378] sm:$0xff] }
 0x649   :  { %v9256_v25 = vpop.eup %9255  ;;  %v5887_v55 = vadd.f32 %v5871_v0, %v9901_v10  ;;  %v5857_v40 = vmul.f32 0.6931472, %v9254_v28  ;;  %v13320_v33 = vsel %vm5965_vm1, %v5901_v45, %v11958_v24  ;;  %v5953_v24 = vpop.permute.xlu0 %5952  ;;  %vm17424_vm5 = vcmp.eq.s32.totalorder %v16784_v11, %v17423_v44  ;;  %v17426_v0 = vld [vmem:[#allocation170_spill] sm:$0xff] }
 0x64a   :  { %v5886_v39 = vadd.f32 %v5870_v58, %v9901_v10  ;;  %v5855_v17 = vmul.f32 0.6931472, %v9256_v25  ;;  %6004 = vmax.xlane.f32.xlu0 %v13307_v21  ;;  %v13313_v8 = vsel %vm5964_vm0, %v5900_v3, %v11962_v14  ;;  %v17408_v14 = vld [vmem:[#allocation169_spill] sm:$0xff]  ;;  %vm5969_vm4 = vcmp.eq.s32.totalorder %v5953_v24, 1  ;;  %v17428_v58 = vld [vmem:[#allocation203_spill] sm:$0xff]  ;;  %v17445_v62 = vld [vmem:[#allocation182_spill] sm:$0xff] }
 0x64b   :  { %v5873_v13 = vadd.f32 %v5857_v40, %v12778_v36  ;;  %v5903_v63 = vadd.f32 %v5887_v55, %v17407_v18  ;;  %vm17409_vm2 = vcmp.eq.s32.totalorder %v16784_v11, %v17408_v14  ;;  %v17411_v36 = vld [vmem:[#allocation290_spill] sm:$0xff]  ;;  %17416 = vst [vmem:[#allocation169_spill] sm:$0xff] %v13343_v32  ;;  %v13366_v15 = vsel %vm17424_vm5, 1.0, %v16865_v5 }
 0x64c   :  { %6006 = vmax.xlane.f32.xlu1 %v13313_v8  ;;  %v5902_v50 = vadd.f32 %v5886_v39, %v12744_v31  ;;  %v13327_v53 = vsel %vm17409_vm2, 1.0, %v16865_v5  ;;  %v5872_v59 = vadd.f32 %v5855_v17, %v17411_v36  ;;  %17419 = vst [vmem:[#allocation290_spill] sm:$0xff] %v13351_v54  ;;  %17425 = vst [vmem:[#allocation199_spill] sm:$0xff] %v13366_v15  ;;  %vm5968_vm7 = vcmp.eq.s32.totalorder %v5950_v6, 1  ;;  %v155_v25 = vld [vmem:[#allocation2 + $0x390] sm:$0xff]  ;;  %v154_v17 = vld [vmem:[#allocation2 + $0x388] sm:$0xff] }
 0x64d   :  { %v5889_v56 = vadd.f32 %v5873_v13, %v9901_v10  ;;  %17410 = vst [vmem:[#allocation287_spill] sm:$0xff] %v13327_v53  ;;  %v13338_v51 = vsel %vm5967_vm10, %v5903_v63, %v17414_v41  ;;  %v1237_v34 = vmul.f32 %v13327_v53, %v151_v23  ;;  %vm856_vm8 = vcmp.eq.s32.totalorder %v16784_v11, %v17426_v0  ;;  %v17429_v55 = vld [vmem:[#allocation174_spill] sm:$0xff]  ;;  %v157_v13 = vld [vmem:[#allocation2 + $0x3a0] sm:$0xff]  ;;  %v162_v0 = vld [vmem:[#allocation2 + $0x3c8] sm:$0xff] }
 0x64e   :  { %6008 = vmax.xlane.f32.xlu0 %v13320_v33  ;;  %v13332_v31 = vsel %vm5966_vm3, %v5902_v50, %v17412_v9  ;;  %v5888_v43 = vadd.f32 %v5872_v59, %v9901_v10  ;;  %v13371_v28 = vsel %vm857_vm6, 1.0, %v16865_v5  ;;  %vm859_vm12 = vcmp.eq.s32.totalorder %v16784_v11, %v17429_v55  ;;  %v17433_v50 = vld [vmem:[#allocation176_spill] sm:$0xff]  ;;  %v156_v14 = vld [vmem:[#allocation2 + $0x398] sm:$0xff]  ;;  %v159_v9 = vld [vmem:[#allocation2 + $0x3b0] sm:$0xff] }
 0x64f   :  { %v5905_v20 = vadd.f32 %v5889_v56, %v17415_v61  ;;  %17427 = vst [vmem:[#allocation171_spill] sm:$0xff] %v13371_v28  ;;  %v1238_v40 = vmul.f32 %v13366_v15, %v152_v37  ;;  %v13381_v45 = vsel %vm856_vm8, 1.0, %v16865_v5  ;;  %v1241_v39 = vmul.f32 %v13371_v28, %v155_v25  ;;  %v17435_v36 = vld [vmem:[#allocation175_spill] sm:$0xff]  ;;  %v17437_v23 = vld [vmem:[#allocation178_spill] sm:$0xff]  ;;  %v17439_v61 = vld [vmem:[#allocation177_spill] sm:$0xff] }
 0x650   :  { %6010 = vmax.xlane.f32.xlu1 %v13332_v31  ;;  %v5904_v57 = vadd.f32 %v5888_v43, %v17421_v30  ;;  %17430 = vst [vmem:[#allocation198_spill] sm:$0xff] %v13381_v45  ;;  %vm858_vm15 = vcmp.eq.s32.totalorder %v16784_v11, %v17431_v16  ;;  %v13387_v26 = vsel %vm859_vm12, 1.0, %v16865_v5  ;;  %vm861_vm14 = vcmp.eq.s32.totalorder %v16784_v11, %v17433_v50  ;;  %v161_v43 = vld [vmem:[#allocation2 + $0x3c0] sm:$0xff]  ;;  %v160_v7 = vld [vmem:[#allocation2 + $0x3b8] sm:$0xff] }
 0x651   :  { %v13354_v48 = vsel %vm5969_vm4, %v5905_v20, %v17420_v1  ;;  %17432 = vst [vmem:[#allocation288_spill] sm:$0xff] %v13387_v26  ;;  %v1240_v56 = vmul.f32 %v13381_v45, %v154_v17  ;;  %v13393_v18 = vsel %vm858_vm15, 1.0, %v16865_v5  ;;  %v1243_v63 = vmul.f32 %v13387_v26, %v157_v13  ;;  %v17443_v6 = vld [vmem:[#allocation179_spill] sm:$0xff] }
 0x652   :  { %6012 = vmax.xlane.f32.xlu0 %v13338_v51  ;;  %v13374_v3 = vsel %vm5968_vm7, %v5904_v57, %v17428_v58  ;;  %17434 = vst [vmem:[#allocation166_spill] sm:$0xff] %v13393_v18  ;;  %vm860_vm13 = vcmp.eq.s32.totalorder %v16784_v11, %v17435_v36  ;;  %v13399_v59 = vsel %vm861_vm14, 1.0, %v16865_v5  ;;  %vm863_vm0 = vcmp.eq.s32.totalorder %v16784_v11, %v17437_v23  ;;  %v163_v57 = vld [vmem:[#allocation2 + $0x3d0] sm:$0xff]  ;;  %v165_v55 = vld [vmem:[#allocation2 + $0x3e0] sm:$0xff]  ;;  %v164_v13 = vld [vmem:[#allocation2 + $0x3d8] sm:$0xff] }
 0x653   :  { %17436 = vst [vmem:[#allocation202_spill] sm:$0xff] %v13399_v59  ;;  %v1242_v35 = vmul.f32 %v13393_v18, %v156_v14  ;;  %v13405_v24 = vsel %vm860_vm13, 1.0, %v16865_v5  ;;  %v1245_v41 = vmul.f32 %v13399_v59, %v159_v9  ;;  %vm862_vm1 = vcmp.eq.s32.totalorder %v16784_v11, %v17439_v61  ;;  %v17447_v58 = vld [vmem:[#allocation181_spill] sm:$0xff]  ;;  %v17451_v50 = vld [vmem:[#allocation183_spill] sm:$0xff]  ;;  %v17455_v61 = vld [vmem:[#allocation38_spill] sm:$0xff] }
 0x654   :  { %1475 = vadd.xlane.f32.xlu1 %v1237_v34  ;;  %17438 = vst [vmem:[#allocation289_spill] sm:$0xff] %v13405_v24  ;;  %v158_v34 = vld [vmem:[#allocation2 + $0x3a8] sm:$0xff]  ;;  %v13411_v20 = vsel %vm863_vm0, 1.0, %v16865_v5  ;;  %vm865_vm3 = vcmp.eq.s32.totalorder %v16784_v11, %v17441_v52  ;;  %v13417_v1 = vsel %vm862_vm1, 1.0, %v16865_v5  ;;  %vm864_vm2 = vcmp.eq.s32.totalorder %v16784_v11, %v17443_v6 }
 0x655   :  { %17440 = vst [vmem:[#allocation173_spill] sm:$0xff] %v13411_v20  ;;  %v1244_v47 = vmul.f32 %v13405_v24, %v158_v34  ;;  %17442 = vst [vmem:[#allocation168_spill] sm:$0xff] %v13417_v1  ;;  %v13423_v30 = vsel %vm865_vm3, 1.0, %v16865_v5  ;;  %vm867_vm9 = vcmp.eq.s32.totalorder %v16784_v11, %v17445_v62  ;;  %v13429_v44 = vsel %vm864_vm2, 1.0, %v16865_v5  ;;  %v166_v23 = vld [vmem:[#allocation2 + $0x3e8] sm:$0xff] }
 0x656   :  { %6016 = vmax.xlane.f32.xlu0 %v13354_v48  ;;  %17444 = vst [vmem:[#allocation170_spill] sm:$0xff] %v13423_v30  ;;  %17446 = vst [vmem:[#allocation203_spill] sm:$0xff] %v13429_v44  ;;  %v1249_v37 = vmul.f32 %v13423_v30, %v163_v57  ;;  %vm866_vm10 = vcmp.eq.s32.totalorder %v16784_v11, %v17447_v58  ;;  %v13435_v25 = vsel %vm867_vm9, 1.0, %v16865_v5  ;;  %v9574_v34 = vld [vmem:[%s16031_s4] ss:$0 sm:$0xff]  ;;  %v17458_v57 = vld [vmem:[#allocation37_spill] sm:$0xff] }
 0x657   :  { %17448 = vst [vmem:[#allocation174_spill] sm:$0xff] %v13435_v25  ;;  %v13441_v17 = vsel %vm866_vm10, 1.0, %v16865_v5  ;;  %v1251_v16 = vmul.f32 %v13435_v25, %v165_v55  ;;  %vm868_vm11 = vcmp.eq.s32.totalorder %v16784_v11, %v17451_v50  ;;  %v1518_v62 = vmul.f32 %v9574_v34, %v17458_v57  ;;  %v17461_v55 = vld [vmem:[#allocation43_spill] sm:$0xff] }
 0x658   :  { %1479 = vadd.xlane.f32.xlu1 %v1239_v22  ;;  %v1247_v22 = vmul.f32 %v13411_v20, %v161_v43  ;;  %17450 = vst [vmem:[#allocation172_spill] sm:$0xff] %v13441_v17  ;;  %v1250_v14 = vmul.f32 %v13441_v17, %v164_v13  ;;  %v13451_v36 = vsel %vm868_vm11, 1.0, %v16865_v5  ;;  %v1517_v43 = vmul.f32 %v9574_v34, %v17455_v61  ;;  %v17463_v13 = vld [vmem:[#allocation45_spill] sm:$0xff]  ;;  %v17508_v57 = vld [vmem:[#allocation83_spill] sm:$0xff]  ;;  %v17550_v17 = vld [vmem:[#allocation184_spill] sm:$0xff] }
 0x659   :  { %17453 = vst [vmem:[#allocation175_spill] sm:$0xff] %v13451_v36  ;;  %v1525_v50 = vmul.f32 %v9574_v34, %v17463_v13 }
 0x65a   :  { %1473 = vadd.xlane.f32.xlu0 %v1236_v60  ;;  %v1246_v60 = vmul.f32 %v13417_v1, %v160_v7  ;;  %v17457_v7 = vld [vmem:[#allocation39_spill] sm:$0xff] }
 0x65b   :  { %v1519_v6 = vmul.f32 %v9574_v34, %v17457_v7  ;;  %v17516_v7 = vld [vmem:[#allocation239_spill] sm:$0xff] }
 0x65c   :  { %6014 = vmax.xlane.f32.xlu1 %v13374_v3 }
 0x65e   :  { %1477 = vadd.xlane.f32.xlu0 %v1238_v40  ;;  %v17449_v40 = vld [vmem:[#allocation258_spill] sm:$0xff] }
 0x65f   :  { %vm869_vm4 = vcmp.eq.s32.totalorder %v16784_v11, %v17449_v40  ;;  %v1523_v40 = vmul.f32 %v9574_v34, %v17461_v55 }
 0x660   :  { %1483 = vadd.xlane.f32.xlu1 %v1241_v39  ;;  %v1248_v39 = vmul.f32 %v13429_v44, %v162_v0  ;;  %v17460_v0 = vld [vmem:[#allocation40_spill] sm:$0xff] }
 0x661   :  { %v1520_v58 = vmul.f32 %v9574_v34, %v17460_v0  ;;  %v17481_v0 = vld [vmem:[#allocation71_spill] sm:$0xff] }
 0x662   :  { %1481 = vadd.xlane.f32.xlu0 %v1240_v56  ;;  %v13447_v56 = vsel %vm869_vm4, 1.0, %v16865_v5 }
 0x663   :  { %17452 = vst [vmem:[#allocation176_spill] sm:$0xff] %v13447_v56 }
 0x664   :  { %1487 = vadd.xlane.f32.xlu1 %v1243_v63  ;;  %v167_v63 = vld [vmem:[#allocation2 + $0x3f0] sm:$0xff] }
 0x665   :  { %v1253_v9 = vmul.f32 %v13447_v56, %v167_v63  ;;  %v17464_v63 = vld [vmem:[#allocation44_spill] sm:$0xff]  ;;  %v17556_v56 = vld [vmem:[#allocation186_spill] sm:$0xff] }
 0x666   :  { %1485 = vadd.xlane.f32.xlu0 %v1242_v35  ;;  %v17454_v35 = vld [vmem:[#allocation255_spill] sm:$0xff] }
 0x667   :  { %vm870_vm6 = vcmp.eq.s32.totalorder %v16784_v11, %v17454_v35  ;;  %v17466_v35 = vld [vmem:[#allocation46_spill] sm:$0xff]  ;;  %v17544_v11 = vld [vmem:[#allocation104_spill] sm:$0xff] }
 0x668   :  { %1491 = vadd.xlane.f32.xlu1 %v1245_v41  ;;  %v1252_v41 = vmul.f32 %v13451_v36, %v166_v23  ;;  %v13462_v52 = vsel %vm870_vm6, 1.0, %v16865_v5 }
 0x669   :  { %17456 = vst [vmem:[#allocation178_spill] sm:$0xff] %v13462_v52 }
 0x66a   :  { %1489 = vadd.xlane.f32.xlu0 %v1244_v47  ;;  %v168_v47 = vld [vmem:[#allocation2 + $0x3f8] sm:$0xff] }
 0x66c   :  { %1495 = vadd.xlane.f32.xlu1 %v1247_v22  ;;  %v1254_v22 = vmul.f32 %v13462_v52, %v168_v47  ;;  %v17545_v52 = vld [vmem:[#allocation97_spill] sm:$0xff] }
 0x66e   :  { %1493 = vadd.xlane.f32.xlu0 %v1246_v60  ;;  %v17459_v60 = vld [vmem:[#allocation41_spill] sm:$0xff] }
 0x670   :  { %1499 = vadd.xlane.f32.xlu1 %v1249_v37  ;;  %v1521_v37 = vmul.f32 %v9574_v34, %v17459_v60  ;;  %v17510_v60 = vld [vmem:[#allocation235_spill] sm:$0xff] }
 0x672   :  { %1497 = vadd.xlane.f32.xlu0 %v1248_v39  ;;  %v17462_v39 = vld [vmem:[#allocation42_spill] sm:$0xff] }
 0x674   :  { %1503 = vadd.xlane.f32.xlu1 %v1251_v16  ;;  %v1522_v16 = vmul.f32 %v9574_v34, %v17462_v39  ;;  %v17478_v39 = vld [vmem:[#allocation74_spill] sm:$0xff] }
 0x676   :  { %1501 = vadd.xlane.f32.xlu0 %v1250_v14  ;;  %v1524_v14 = vmul.f32 %v9574_v34, %v17464_v63 }
 0x678   :  { %1507 = vadd.xlane.f32.xlu1 %v1253_v9  ;;  %v17465_v9 = vld [vmem:[#allocation47_spill] sm:$0xff] }
 0x679   :  { %v1527_v23 = vmul.f32 %v9574_v34, %v17465_v9 }
 0x67a   :  { %1505 = vadd.xlane.f32.xlu0 %v1252_v41  ;;  %v1526_v41 = vmul.f32 %v9574_v34, %v17466_v35  ;;  %v17473_v35 = vld [vmem:[#allocation52_spill] sm:$0xff] }
 0x67b   :  { %v1532_v13 = vmul.f32 %v9574_v34, %v17473_v35  ;;  %v17487_v35 = vld [vmem:[#allocation61_spill] sm:$0xff] }
 0x67c   :  { %1533 = vadd.xlane.f32.xlu1 %v1517_v43  ;;  %v17467_v43 = vld [vmem:[#allocation49_spill] sm:$0xff] }
 0x67d   :  { %v1529_v47 = vmul.f32 %v9574_v34, %v17467_v43 }
 0x67e   :  { %1509 = vadd.xlane.f32.xlu0 %v1254_v22  ;;  %v17468_v22 = vld [vmem:[#allocation48_spill] sm:$0xff] }
 0x680   :  { %1537 = vadd.xlane.f32.xlu1 %v1519_v6  ;;  %v1528_v6 = vmul.f32 %v9574_v34, %v17468_v22 }
 0x682   :  { %1535 = vadd.xlane.f32.xlu0 %v1518_v62  ;;  %v17469_v62 = vld [vmem:[#allocation51_spill] sm:$0xff] }
 0x684   :  { %1541 = vadd.xlane.f32.xlu1 %v1521_v37  ;;  %v1531_v37 = vmul.f32 %v9574_v34, %v17469_v62  ;;  %v17476_v62 = vld [vmem:[#allocation54_spill] sm:$0xff] }
 0x686   :  { %1539 = vadd.xlane.f32.xlu0 %v1520_v58  ;;  %v9682_v58 = vmov 5  }
 0x687   :  { %8961 = vset.pattern.permute.xlu1 %v9682_v58  ;;  %8962 = vset.pattern.permute.xlu0 %v9682_v58 }
 0x688   :  { %1545 = vadd.xlane.f32.xlu1 %v1523_v40  ;;  %v17470_v40 = vld [vmem:[#allocation50_spill] sm:$0xff] }
 0x68a   :  { %1543 = vadd.xlane.f32.xlu0 %v1522_v16  ;;  %v1530_v16 = vmul.f32 %v9574_v34, %v17470_v40  ;;  %v17480_v40 = vld [vmem:[#allocation56_spill] sm:$0xff]  ;;  %v17484_v34 = vld [vmem:[#allocation58_spill] sm:$0xff] }
 0x68c   :  { %1549 = vadd.xlane.f32.xlu1 %v1525_v50  ;;  %v17471_v50 = vld [vmem:[#allocation70_spill] sm:$0xff] }
 0x68e   :  { %1547 = vadd.xlane.f32.xlu0 %v1524_v14  ;;  %v17472_v14 = vld [vmem:[#allocation53_spill] sm:$0xff] }
 0x690   :  { %1553 = vadd.xlane.f32.xlu1 %v1527_v23  ;;  %v2206_v23 = vmul.f32 %v17472_v14, %v17471_v50  ;;  %v2209_v50 = vmul.f32 %v17481_v0, %v17480_v40  ;;  %v17492_v0 = vld [vmem:[#allocation62_spill] sm:$0xff] }
 0x692   :  { %1551 = vadd.xlane.f32.xlu0 %v1526_v41  ;;  %v17474_v41 = vld [vmem:[#allocation72_spill] sm:$0xff] }
 0x694   :  { %1557 = vadd.xlane.f32.xlu1 %v1529_v47  ;;  %v17475_v47 = vld [vmem:[#allocation55_spill] sm:$0xff] }
 0x695   :  { %v2208_v63 = vmul.f32 %v17475_v47, %v17474_v41  ;;  %v17485_v41 = vld [vmem:[#allocation73_spill] sm:$0xff] }
 0x696   :  { %1555 = vadd.xlane.f32.xlu0 %v1528_v6  ;;  %v17477_v6 = vld [vmem:[#allocation69_spill] sm:$0xff] }
 0x697   :  { %v2207_v22 = vmul.f32 %v17477_v6, %v17476_v62  ;;  %v17488_v6 = vld [vmem:[#allocation60_spill] sm:$0xff] }
 0x698   :  { %1561 = vadd.xlane.f32.xlu1 %v1531_v37  ;;  %v17479_v37 = vld [vmem:[#allocation57_spill] sm:$0xff] }
 0x699   :  { %v2210_v58 = vmul.f32 %v17479_v37, %v17478_v39  ;;  %v17489_v39 = vld [vmem:[#allocation75_spill] sm:$0xff] }
 0x69a   :  { %1559 = vadd.xlane.f32.xlu0 %v1530_v16  ;;  %v17482_v16 = vld [vmem:[#allocation76_spill] sm:$0xff]  ;;  %v17491_v37 = vld [vmem:[#allocation63_spill] sm:$0xff] }
 0x69c   :  { %2318 = vadd.xlane.f32.xlu1 %v2206_v23  ;;  %v17483_v23 = vld [vmem:[#allocation59_spill] sm:$0xff] }
 0x69d   :  { %v2212_v55 = vmul.f32 %v17483_v23, %v17482_v16  ;;  %v17493_v16 = vld [vmem:[#allocation77_spill] sm:$0xff]  ;;  %v17495_v23 = vld [vmem:[#allocation64_spill] sm:$0xff] }
 0x69e   :  { %1563 = vadd.xlane.f32.xlu0 %v1532_v13  ;;  %v2211_v13 = vmul.f32 %v17485_v41, %v17484_v34  ;;  %v13504_v41 = vpop.xlane.xlu1 %1463  ;;  %v13512_v34 = vpop.xlane.xlu0 %1465 }
 0x69f   :  { %17496 = vst [vmem:[#allocation177_spill] sm:$0xff] %v13504_v41  ;;  %17503 = vst [vmem:[#allocation180_spill] sm:$0xff] %v13512_v34  ;;  %v17541_v41 = vld [vmem:[#allocation185_spill] sm:$0xff]  ;;  %v17542_v34 = vld [vmem:[#allocation107_spill] sm:$0xff] }
 0x6a0   :  { %2322 = vadd.xlane.f32.xlu1 %v2208_v63  ;;  %v17486_v63 = vld [vmem:[#allocation78_spill] sm:$0xff] }
 0x6a1   :  { %v2214_v47 = vmul.f32 %v17487_v35, %v17486_v63  ;;  %v17499_v35 = vld [vmem:[#allocation84_spill] sm:$0xff] }
 0x6a2   :  { %2320 = vadd.xlane.f32.xlu0 %v2207_v22  ;;  %v2213_v22 = vmul.f32 %v17489_v39, %v17488_v6  ;;  %v17500_v39 = vld [vmem:[#allocation67_spill] sm:$0xff] }
 0x6a3   :  { %v2220_v6 = vmul.f32 %v17500_v39, %v17499_v35  ;;  %v17514_v39 = vld [vmem:[#allocation33_spill] sm:$0xff] }
 0x6a4   :  { %2326 = vadd.xlane.f32.xlu1 %v2210_v58  ;;  %v17490_v58 = vld [vmem:[#allocation80_spill] sm:$0xff] }
 0x6a5   :  { %v2216_v62 = vmul.f32 %v17491_v37, %v17490_v58 }
 0x6a6   :  { %2324 = vadd.xlane.f32.xlu0 %v2209_v50  ;;  %v2215_v50 = vmul.f32 %v17493_v16, %v17492_v0  ;;  %v17504_v16 = vld [vmem:[#allocation35_spill] sm:$0xff] }
 0x6a7   :  { %v17505_v0 = vld [vmem:[#allocation231_spill] sm:$0xff] }
 0x6a8   :  { %2330 = vadd.xlane.f32.xlu1 %v2212_v55  ;;  %v17494_v55 = vld [vmem:[#allocation82_spill] sm:$0xff] }
 0x6a9   :  { %v2218_v40 = vmul.f32 %v17495_v23, %v17494_v55  ;;  %v2222_v55 = vmul.f32 %v17505_v0, %v17504_v16  ;;  %v17515_v16 = vld [vmem:[#allocation88_spill] sm:$0xff] }
 0x6aa   :  { %2328 = vadd.xlane.f32.xlu0 %v2211_v13  ;;  %v17497_v13 = vld [vmem:[#allocation65_spill] sm:$0xff]  ;;  %v2226_v43 = vmul.f32 %v17516_v7, %v17515_v16  ;;  %v17522_v7 = vld [vmem:[#allocation87_spill] sm:$0xff] }
 0x6ac   :  { %2334 = vadd.xlane.f32.xlu1 %v2214_v47  ;;  %v17498_v47 = vld [vmem:[#allocation79_spill] sm:$0xff] }
 0x6ad   :  { %v2217_v63 = vmul.f32 %v17498_v47, %v17497_v13  ;;  %v17509_v13 = vld [vmem:[#allocation86_spill] sm:$0xff] }
 0x6ae   :  { %2332 = vadd.xlane.f32.xlu0 %v2213_v22  ;;  %v17501_v22 = vld [vmem:[#allocation66_spill] sm:$0xff]  ;;  %v2224_v35 = vmul.f32 %v17510_v60, %v17509_v13 }
 0x6af   :  { %v17519_v60 = vld [vmem:[#allocation90_spill] sm:$0xff] }
 0x6b0   :  { %2338 = vadd.xlane.f32.xlu1 %v2216_v62  ;;  %v17502_v62 = vld [vmem:[#allocation81_spill] sm:$0xff] }
 0x6b1   :  { %v2219_v58 = vmul.f32 %v17502_v62, %v17501_v22  ;;  %v17513_v62 = vld [vmem:[#allocation230_spill] sm:$0xff] }
 0x6b2   :  { %2336 = vadd.xlane.f32.xlu0 %v2215_v50  ;;  %v13516_v50 = vpop.xlane.xlu1 %1467  ;;  %v2223_v22 = vmul.f32 %v17514_v39, %v17513_v62  ;;  %v17520_v39 = vld [vmem:[#allocation243_spill] sm:$0xff] }
 0x6b3   :  { %17506 = vst [vmem:[#allocation179_spill] sm:$0xff] %v13516_v50  ;;  %v2228_v62 = vmul.f32 %v17520_v39, %v17519_v60  ;;  %v17528_v39 = vld [vmem:[#allocation101_spill] sm:$0xff] }
 0x6b4   :  { %2342 = vadd.xlane.f32.xlu1 %v2218_v40  ;;  %v17507_v40 = vld [vmem:[#allocation68_spill] sm:$0xff]  ;;  %v17536_v50 = vld [vmem:[#allocation105_spill] sm:$0xff] }
 0x6b5   :  { %v2221_v47 = vmul.f32 %v17508_v57, %v17507_v40 }
 0x6b6   :  { %2340 = vadd.xlane.f32.xlu0 %v2217_v63  ;;  %v13522_v63 = vpop.xlane.xlu0 %1469 }
 0x6b7   :  { %17511 = vst [vmem:[#allocation182_spill] sm:$0xff] %v13522_v63  ;;  %v17540_v63 = vld [vmem:[#allocation95_spill] sm:$0xff] }
 0x6b8   :  { %2346 = vadd.xlane.f32.xlu1 %v2220_v6  ;;  %v13524_v6 = vpop.xlane.xlu1 %1471 }
 0x6b9   :  { %17512 = vst [vmem:[#allocation181_spill] sm:$0xff] %v13524_v6 }
 0x6ba   :  { %2344 = vadd.xlane.f32.xlu0 %v2219_v58 }
 0x6bc   :  { %2350 = vadd.xlane.f32.xlu1 %v2222_v55  ;;  %v17517_v55 = vld [vmem:[#allocation234_spill] sm:$0xff] }
 0x6be   :  { %2348 = vadd.xlane.f32.xlu0 %v2221_v47  ;;  %v17518_v47 = vld [vmem:[#allocation85_spill] sm:$0xff] }
 0x6bf   :  { %v2225_v40 = vmul.f32 %v17518_v47, %v17517_v55  ;;  %v17523_v47 = vld [vmem:[#allocation92_spill] sm:$0xff]  ;;  %v17524_v55 = vld [vmem:[#allocation99_spill] sm:$0xff] }
 0x6c0   :  { %2354 = vadd.xlane.f32.xlu1 %v2224_v35  ;;  %v2230_v0 = vmul.f32 %v17524_v55, %v17523_v47 }
 0x6c2   :  { %2352 = vadd.xlane.f32.xlu0 %v2223_v22 }
 0x6c3   :  { %v13530_v58 = vpop.xlane.xlu0 %5988 }
 0x6c4   :  { %2358 = vadd.xlane.f32.xlu1 %v2226_v43  ;;  %v6019_v57 = vsub.f32 %v13232_v19, %v13530_v58  ;;  %v13534_v13 = vpop.xlane.xlu1 %5986  ;;  %v17521_v43 = vld [vmem:[#allocation238_spill] sm:$0xff] }
 0x6c5   :  { %v6018_v35 = vsub.f32 %v13238_v42, %v13534_v13  ;;  %v2227_v9 = vmul.f32 %v17522_v7, %v17521_v43 }
 0x6c6   :  { %v6036_v23 = vmul.f32 1.442695, %v6019_v57  ;;  %2356 = vadd.xlane.f32.xlu0 %v2225_v40  ;;  %v17525_v40 = vld [vmem:[#allocation242_spill] sm:$0xff] }
 0x6c7   :  { %v6034_v16 = vmul.f32 1.442695, %v6018_v35  ;;  %v13542_v22 = vpop.xlane.xlu0 %5992 }
 0x6c8   :  { %2362 = vadd.xlane.f32.xlu1 %v2228_v62  ;;  %v6021_v37 = vsub.f32 %v13250_v29, %v13542_v22  ;;  %v17526_v62 = vld [vmem:[#allocation89_spill] sm:$0xff] }
 0x6c9   :  { %9257 = vpow2.f32 %v6034_v16  ;;  %v2229_v57 = vmul.f32 %v17526_v62, %v17525_v40  ;;  %v17527_v16 = vld [vmem:[#allocation94_spill] sm:$0xff]  ;;  %v17530_v62 = vld [vmem:[#allocation91_spill] sm:$0xff] }
 0x6ca   :  { %9259 = vpow2.f32 %v6036_v23  ;;  %2360 = vadd.xlane.f32.xlu0 %v2227_v9  ;;  %v6040_v61 = vmul.f32 1.442695, %v6021_v37  ;;  %v2232_v43 = vmul.f32 %v17528_v39, %v17527_v16  ;;  %v17531_v16 = vld [vmem:[#allocation96_spill] sm:$0xff]  ;;  %v17532_v39 = vld [vmem:[#allocation103_spill] sm:$0xff] }
 0x6cb   :  { %v13550_v60 = vpop.xlane.xlu0 %5990  ;;  %v2234_v5 = vmul.f32 %v17532_v39, %v17531_v16  ;;  %v17535_v39 = vld [vmem:[#allocation98_spill] sm:$0xff] }
 0x6cc   :  { %2366 = vadd.xlane.f32.xlu1 %v2230_v0  ;;  %v6020_v35 = vsub.f32 %v13262_v49, %v13550_v60  ;;  %v13556_v7 = vpop.xlane.xlu1 %5994  ;;  %9261 = vpow2.f32 %v6040_v61  ;;  %v17529_v0 = vld [vmem:[#allocation244_spill] sm:$0xff] }
 0x6cd   :  { %v6022_v47 = vsub.f32 %v13268_v4, %v13556_v7  ;;  %v2231_v55 = vmul.f32 %v17530_v62, %v17529_v0  ;;  %v17534_v0 = vld [vmem:[#allocation93_spill] sm:$0xff] }
 0x6ce   :  { %v6038_v23 = vmul.f32 1.442695, %v6020_v35  ;;  %2364 = vadd.xlane.f32.xlu0 %v2229_v57 }
 0x6cf   :  { %v6042_v9 = vmul.f32 1.442695, %v6022_v47  ;;  %v13562_v37 = vpop.xlane.xlu0 %5996 }
 0x6d0   :  { %2370 = vadd.xlane.f32.xlu1 %v2232_v43  ;;  %9263 = vpow2.f32 %v6038_v23  ;;  %v6023_v40 = vsub.f32 %v13278_v27, %v13562_v37  ;;  %v17533_v23 = vld [vmem:[#allocation100_spill] sm:$0xff] }
 0x6d1   :  { %v13568_v14 = vpop.xlane.xlu1 %5998  ;;  %9265 = vpow2.f32 %v6042_v9  ;;  %v2233_v6 = vmul.f32 %v17534_v0, %v17533_v23  ;;  %v17539_v23 = vld [vmem:[#allocation102_spill] sm:$0xff] }
 0x6d2   :  { %v6024_v61 = vsub.f32 %v13284_v46, %v13568_v14  ;;  %v6044_v43 = vmul.f32 1.442695, %v6023_v40  ;;  %2368 = vadd.xlane.f32.xlu0 %v2231_v55  ;;  %v2236_v40 = vmul.f32 %v17536_v50, %v17535_v39  ;;  %v17537_v55 = vld [vmem:[#allocation9_spill] sm:$0xff] }
 0x6d3   :  { %v9258_v57 = vpop.eup %9257  ;;  %v13574_v62 = vpop.xlane.xlu0 %6000 }
 0x6d4   :  { %v9260_v35 = vpop.eup %9259  ;;  %v6046_v47 = vmul.f32 1.442695, %v6024_v61  ;;  %2374 = vadd.xlane.f32.xlu1 %v2234_v5  ;;  %8545 = vmatprep.mubr.f32.mxu1 %v9258_v57  ;;  %9267 = vpow2.f32 %v6044_v43  ;;  %v6025_v16 = vsub.f32 %v13293_v38, %v13574_v62  ;;  %v17538_v57 = vld [vmem:[#allocation10_spill] sm:$0xff] }
 0x6d5   :  { %v13580_v9 = vpop.xlane.xlu1 %6002  ;;  %8546 = vmatmul.mubr.f32.vlgmr.msra.gmra.mrb[64].mxu1 %v9260_v35  ;;  %v2235_v35 = vmul.f32 %v17540_v63, %v17539_v23  ;;  %v17543_v63 = vld [vmem:[#allocation11_spill] sm:$0xff] }
 0x6d6   :  { %9269 = vpow2.f32 %v6046_v47  ;;  %v6026_v5 = vsub.f32 %v13299_v12, %v13580_v9  ;;  %8876 = vmatpush3.bf16.msra.mxu1 %v17537_v55  ;;  %v6048_v61 = vmul.f32 1.442695, %v6025_v16  ;;  %2372 = vadd.xlane.f32.xlu0 %v2233_v6  ;;  %v9262_v50 = vpop.eup %9261  ;;  %v2238_v16 = vmul.f32 %v17542_v34, %v17541_v41 }
 0x6d7   :  { %8878 = vmatprep.subr.bf16.mxu1 %v17538_v57  ;;  %v13588_v43 = vpop.xlane.xlu0 %6004  ;;  %v2237_v41 = vmul.f32 %v17545_v52, %v17544_v11  ;;  %v17548_v52 = vld [vmem:[#allocation12_spill] sm:$0xff] }
 0x6d8   :  { %v6050_v0 = vmul.f32 1.442695, %v6026_v5  ;;  %2378 = vadd.xlane.f32.xlu1 %v2236_v40  ;;  %9271 = vpow2.f32 %v6048_v61  ;;  %v6027_v39 = vsub.f32 %v13307_v21, %v13588_v43 }
 0x6d9   :  { %v13594_v47 = vpop.xlane.xlu1 %6006 }
 0x6da   :  { %9273 = vpow2.f32 %v6050_v0  ;;  %v6028_v6 = vsub.f32 %v13313_v8, %v13594_v47  ;;  %8880 = vmatpush3.bf16.msra.mxu1 %v17538_v57  ;;  %v9264_v40 = vpop.eup %9263  ;;  %v6052_v5 = vmul.f32 1.442695, %v6027_v39  ;;  %2376 = vadd.xlane.f32.xlu0 %v2235_v35  ;;  %v17546_v39 = vld [vmem:[#allocation187_spill] sm:$0xff]  ;;  %v17547_v35 = vld [vmem:[#allocation109_spill] sm:$0xff] }
 0x6db   :  { %8882 = vmatprep.subr.bf16.mxu1 %v17543_v63  ;;  %v9266_v61 = vpop.eup %9265  ;;  %8548 = vmatprep.mubr.f32.mxu1 %v9264_v40  ;;  %v13602_v2 = vpop.xlane.xlu0 %6008  ;;  %v2240_v57 = vmul.f32 %v17547_v35, %v17546_v39  ;;  %v17552_v35 = vld [vmem:[#allocation189_spill] sm:$0xff] }
 0x6dc   :  { %v6054_v23 = vmul.f32 1.442695, %v6028_v6  ;;  %2382 = vadd.xlane.f32.xlu1 %v2238_v16  ;;  %9275 = vpow2.f32 %v6052_v5  ;;  %v6029_v0 = vsub.f32 %v13320_v33, %v13602_v2  ;;  %8549 = vmatmul.mubr.f32.gmra.mrb[66].mxu1 %v9262_v50  ;;  %v17549_v50 = vld [vmem:[#allocation106_spill] sm:$0xff] }
 0x6dd   :  { %v13608_v34 = vpop.xlane.xlu1 %6010  ;;  %8551 = vmatprep.mubr.f32.mxu1 %v9266_v61  ;;  %v2239_v39 = vmul.f32 %v17550_v17, %v17549_v50  ;;  %v17555_v50 = vld [vmem:[#allocation108_spill] sm:$0xff] }
 0x6de   :  { %9277 = vpow2.f32 %v6054_v23  ;;  %v6030_v16 = vsub.f32 %v13332_v31, %v13608_v34  ;;  %8884 = vmatpush3.bf16.msra.mxu1 %v17543_v63  ;;  %v9268_v6 = vpop.eup %9267  ;;  %v6056_v40 = vmul.f32 1.442695, %v6029_v0  ;;  %2380 = vadd.xlane.f32.xlu0 %v2237_v41  ;;  %v17553_v0 = vld [vmem:[#allocation111_spill] sm:$0xff]  ;;  %v17554_v63 = vld [vmem:[#allocation13_spill] sm:$0xff] }
 0x6df   :  { %8886 = vmatprep.subr.bf16.mxu1 %v17548_v52  ;;  %v13616_v36 = vpop.xlane.xlu0 %6012  ;;  %v2242_v41 = vmul.f32 %v17553_v0, %v17552_v35  ;;  %v17559_v35 = vld [vmem:[#allocation113_spill] sm:$0xff] }
 0x6e0   :  { %v9270_v5 = vpop.eup %9269  ;;  %v6058_v11 = vmul.f32 1.442695, %v6030_v16  ;;  %2386 = vadd.xlane.f32.xlu1 %v2240_v57  ;;  %9279 = vpow2.f32 %v6056_v40  ;;  %v6031_v23 = vsub.f32 %v13338_v51, %v13616_v36  ;;  %8552 = vmatmul.mubr.f32.gmra.mrb[68].mxu1 %v9268_v6 }
 0x6e1   :  { %v13622_v61 = vpop.xlane.xlu1 %1475  ;;  %8554 = vmatprep.mubr.f32.mxu1 %v9270_v5 }
 0x6e2   :  { %17551 = vst [vmem:[#allocation258_spill] sm:$0xff] %v13622_v61  ;;  %9281 = vpow2.f32 %v6058_v11  ;;  %8888 = vmatpush3.bf16.msra.mxu1 %v17548_v52  ;;  %v9272_v57 = vpop.eup %9271  ;;  %v6060_v16 = vmul.f32 1.442695, %v6031_v23  ;;  %2384 = vadd.xlane.f32.xlu0 %v2239_v39  ;;  %v2241_v61 = vmul.f32 %v17556_v56, %v17555_v50  ;;  %v17558_v11 = vld [vmem:[#allocation191_spill] sm:$0xff]  ;;  %v17563_v50 = vld [vmem:[#allocation188_spill] sm:$0xff] }
 0x6e3   :  { %8890 = vmatprep.subr.bf16.mxu1 %v17554_v63  ;;  %v13628_v40 = vpop.xlane.xlu0 %6016  ;;  %v2244_v5 = vmul.f32 %v17559_v35, %v17558_v11  ;;  %v17565_v11 = vld [vmem:[#allocation115_spill] sm:$0xff] }
 0x6e4   :  { %v9274_v17 = vpop.eup %9273  ;;  %2390 = vadd.xlane.f32.xlu1 %v2242_v41  ;;  %9283 = vpow2.f32 %v6060_v16  ;;  %8555 = vmatmul.mubr.f32.gmra.mrb[70].mxu1 %v9272_v57  ;;  %v6033_v23 = vsub.f32 %v13354_v48, %v13628_v40  ;;  %v17560_v41 = vld [vmem:[#allocation14_spill] sm:$0xff] }
 0x6e5   :  { %v13632_v6 = vpop.xlane.xlu1 %1479  ;;  %8557 = vmatprep.mubr.f32.mxu1 %v9274_v17  ;;  %v17562_v16 = vld [vmem:[#allocation110_spill] sm:$0xff]  ;;  %v17564_v17 = vld [vmem:[#allocation193_spill] sm:$0xff] }
 0x6e6   :  { %17557 = vst [vmem:[#allocation183_spill] sm:$0xff] %v13632_v6  ;;  %8892 = vmatpush3.bf16.msra.mxu1 %v17554_v63  ;;  %v9276_v39 = vpop.eup %9275  ;;  %2388 = vadd.xlane.f32.xlu0 %v2241_v61  ;;  %v2243_v57 = vmul.f32 %v17563_v50, %v17562_v16  ;;  %v2246_v35 = vmul.f32 %v17565_v11, %v17564_v17  ;;  %v6064_v52 = vmul.f32 1.442695, %v6033_v23  ;;  %v17569_v16 = vld [vmem:[#allocation190_spill] sm:$0xff]  ;;  %v17571_v11 = vld [vmem:[#allocation195_spill] sm:$0xff] }
 0x6e7   :  { %8894 = vmatprep.subr.bf16.mxu1 %v17560_v41  ;;  %v13640_v56 = vpop.xlane.xlu0 %1473 }
 0x6e8   :  { %v9278_v0 = vpop.eup %9277  ;;  %2394 = vadd.xlane.f32.xlu1 %v2244_v5  ;;  %17561 = vst [vmem:[#allocation255_spill] sm:$0xff] %v13640_v56  ;;  %8558 = vmatmul.mubr.f32.gmra.mrb[72].mxu1 %v9276_v39  ;;  %v17566_v5 = vld [vmem:[#allocation16_spill] sm:$0xff] }
 0x6e9   :  { %v13644_v6 = vpop.xlane.xlu1 %6014  ;;  %8560 = vmatprep.mubr.f32.mxu1 %v9278_v0  ;;  %v17568_v39 = vld [vmem:[#allocation112_spill] sm:$0xff]  ;;  %v17572_v0 = vld [vmem:[#allocation117_spill] sm:$0xff] }
 0x6ea   :  { %v6032_v63 = vsub.f32 %v13374_v3, %v13644_v6  ;;  %8896 = vmatpush3.bf16.msra.mxu1 %v17560_v41  ;;  %v9280_v61 = vpop.eup %9279  ;;  %2392 = vadd.xlane.f32.xlu0 %v2243_v57  ;;  %v2245_v25 = vmul.f32 %v17569_v16, %v17568_v39  ;;  %v2248_v1 = vmul.f32 %v17572_v0, %v17571_v11  ;;  %v17575_v57 = vld [vmem:[#allocation114_spill] sm:$0xff]  ;;  %v17576_v16 = vld [vmem:[#allocation192_spill] sm:$0xff]  ;;  %v17579_v11 = vld [vmem:[#allocation119_spill] sm:$0xff] }
 0x6eb   :  { %8898 = vmatprep.subr.bf16.mxu1 %v17566_v5  ;;  %v13652_v50 = vpop.xlane.xlu0 %1477  ;;  %v2247_v39 = vmul.f32 %v17576_v16, %v17575_v57  ;;  %v17584_v16 = vld [vmem:[#allocation201_spill] sm:$0xff] }
 0x6ec   :  { %v9282_v56 = vpop.eup %9281  ;;  %v6062_v44 = vmul.f32 1.442695, %v6032_v63  ;;  %2398 = vadd.xlane.f32.xlu1 %v2246_v35  ;;  %17567 = vst [vmem:[#allocation70_spill] sm:$0xff] %v13652_v50  ;;  %8561 = vmatmul.mubr.f32.gmra.mrb[74].mxu1 %v9280_v61  ;;  %v17573_v63 = vld [vmem:[#allocation19_spill] sm:$0xff]  ;;  %v17578_v61 = vld [vmem:[#allocation197_spill] sm:$0xff] }
 0x6ed   :  { %v13656_v17 = vpop.xlane.xlu1 %1483  ;;  %8563 = vmatprep.mubr.f32.mxu1 %v9282_v56  ;;  %v17585_v57 = vld [vmem:[#allocation121_spill] sm:$0xff] }
 0x6ee   :  { %17570 = vst [vmem:[#allocation72_spill] sm:$0xff] %v13656_v17  ;;  %9285 = vpow2.f32 %v6062_v44  ;;  %8900 = vmatpush3.bf16.msra.mxu1 %v17566_v5  ;;  %v9284_v23 = vpop.eup %9283  ;;  %2396 = vadd.xlane.f32.xlu0 %v2245_v25  ;;  %v2250_v44 = vmul.f32 %v17579_v11, %v17578_v61  ;;  %v17588_v17 = vld [vmem:[#allocation196_spill] sm:$0xff] }
 0x6ef   :  { %9287 = vpow2.f32 %v6064_v52  ;;  %8902 = vmatprep.subr.bf16.mxu1 %v17573_v63  ;;  %v13662_v35 = vpop.xlane.xlu0 %1481  ;;  %v17582_v52 = vld [vmem:[#allocation194_spill] sm:$0xff] }
 0x6f0   :  { %2402 = vadd.xlane.f32.xlu1 %v2248_v1  ;;  %17574 = vst [vmem:[#allocation69_spill] sm:$0xff] %v13662_v35  ;;  %8564 = vmatmul.mubr.f32.gmra.mrb[76].mxu1 %v9284_v23  ;;  %v17581_v1 = vld [vmem:[#allocation116_spill] sm:$0xff] }
 0x6f1   :  { %v13666_v50 = vpop.xlane.xlu1 %1487  ;;  %v2249_v56 = vmul.f32 %v17582_v52, %v17581_v1 }
 0x6f2   :  { %17577 = vst [vmem:[#allocation74_spill] sm:$0xff] %v13666_v50  ;;  %8904 = vmatpush3.bf16.msra.mxu1 %v17573_v63  ;;  %2400 = vadd.xlane.f32.xlu0 %v2247_v39  ;;  %v2252_v50 = vmul.f32 %v17585_v57, %v17584_v16  ;;  %v17587_v39 = vld [vmem:[#allocation118_spill] sm:$0xff]  ;;  %v17591_v63 = vld [vmem:[#allocation123_spill] sm:$0xff]  ;;  %v17594_v16 = vld [vmem:[#allocation200_spill] sm:$0xff] }
 0x6f3   :  { %8906 = vmatprep.subr.bf16.mxu1 %v17537_v55  ;;  %v13672_v25 = vpop.xlane.xlu0 %1485  ;;  %v2251_v35 = vmul.f32 %v17588_v17, %v17587_v39  ;;  %v17600_v39 = vld [vmem:[#allocation204_spill] sm:$0xff] }
 0x6f4   :  { %2406 = vadd.xlane.f32.xlu1 %v2250_v44  ;;  %17580 = vst [vmem:[#allocation71_spill] sm:$0xff] %v13672_v25  ;;  %v17590_v25 = vld [vmem:[#allocation205_spill] sm:$0xff]  ;;  %v9576_v55 = vld [vmem:[#allocation2 + $0x280] sm:$0xff] }
 0x6f5   :  { %v13676_v0 = vpop.xlane.xlu1 %1491  ;;  %v2254_v52 = vmul.f32 %v17591_v63, %v17590_v25 }
 0x6f6   :  { %17583 = vst [vmem:[#allocation76_spill] sm:$0xff] %v13676_v0  ;;  %2404 = vadd.xlane.f32.xlu0 %v2249_v56  ;;  %v17593_v56 = vld [vmem:[#allocation120_spill] sm:$0xff]  ;;  %v17596_v0 = vld [vmem:[#allocation207_spill] sm:$0xff] }
 0x6f7   :  { %v13680_v61 = vpop.xlane.xlu0 %1489 }
 0x6f8   :  { %v9286_v23 = vpop.eup %9285  ;;  %2410 = vadd.xlane.f32.xlu1 %v2252_v50  ;;  %17586 = vst [vmem:[#allocation73_spill] sm:$0xff] %v13680_v61  ;;  %v2253_v50 = vmul.f32 %v17594_v16, %v17593_v56  ;;  %v17597_v61 = vld [vmem:[#allocation125_spill] sm:$0xff]  ;;  %v17605_v56 = vld [vmem:[#allocation124_spill] sm:$0xff] }
 0x6f9   :  { %v9288_v11 = vpop.eup %9287  ;;  %v13684_v44 = vpop.xlane.xlu1 %1495  ;;  %8566 = vmatprep.mubr.f32.mxu1 %v9286_v23  ;;  %v2256_v5 = vmul.f32 %v17597_v61, %v17596_v0  ;;  %v17599_v23 = vld [vmem:[#allocation122_spill] sm:$0xff] }
 0x6fa   :  { %17589 = vst [vmem:[#allocation78_spill] sm:$0xff] %v13684_v44  ;;  %8567 = vmatmul.mubr.f32.gmra.mrb[78].mxu1 %v9288_v11  ;;  %2408 = vadd.xlane.f32.xlu0 %v2251_v35  ;;  %v2255_v25 = vmul.f32 %v17600_v39, %v17599_v23  ;;  %v17602_v35 = vld [vmem:[#allocation209_spill] sm:$0xff]  ;;  %v17611_v23 = vld [vmem:[#allocation126_spill] sm:$0xff] }
 0x6fb   :  { %v13688_v1 = vpop.xlane.xlu0 %1493 }
 0x6fc   :  { %2414 = vadd.xlane.f32.xlu1 %v2254_v52  ;;  %17592 = vst [vmem:[#allocation75_spill] sm:$0xff] %v13688_v1  ;;  %v17603_v52 = vld [vmem:[#allocation127_spill] sm:$0xff] }
 0x6fd   :  { %v13692_v57 = vpop.xlane.xlu1 %1499  ;;  %v2258_v63 = vmul.f32 %v17603_v52, %v17602_v35  ;;  %v17616_v52 = vld [vmem:[#allocation210_spill] sm:$0xff]  ;;  %v17660_v1 = vld [vmem:[#allocation27_spill] sm:$0xff] }
 0x6fe   :  { %17595 = vst [vmem:[#allocation80_spill] sm:$0xff] %v13692_v57  ;;  %2412 = vadd.xlane.f32.xlu0 %v2253_v50  ;;  %v17606_v57 = vld [vmem:[#allocation206_spill] sm:$0xff]  ;;  %v17609_v50 = vld [vmem:[#allocation129_spill] sm:$0xff] }
 0x6ff   :  { %v13696_v17 = vpop.xlane.xlu0 %1497  ;;  %v2257_v44 = vmul.f32 %v17606_v57, %v17605_v56 }
 0x700   :  { %2418 = vadd.xlane.f32.xlu1 %v2256_v5  ;;  %17598 = vst [vmem:[#allocation77_spill] sm:$0xff] %v13696_v17  ;;  %v17608_v5 = vld [vmem:[#allocation211_spill] sm:$0xff] }
 0x701   :  { %v13700_v11 = vpop.xlane.xlu1 %1503  ;;  %v2260_v61 = vmul.f32 %v17609_v50, %v17608_v5 }
 0x702   :  { %17601 = vst [vmem:[#allocation82_spill] sm:$0xff] %v13700_v11  ;;  %2416 = vadd.xlane.f32.xlu0 %v2255_v25  ;;  %v17612_v11 = vld [vmem:[#allocation208_spill] sm:$0xff] }
 0x703   :  { %v13704_v16 = vpop.xlane.xlu0 %1501  ;;  %v2259_v17 = vmul.f32 %v17612_v11, %v17611_v23  ;;  %v17615_v25 = vld [vmem:[#allocation128_spill] sm:$0xff] }
 0x704   :  { %2422 = vadd.xlane.f32.xlu1 %v2258_v63  ;;  %17604 = vst [vmem:[#allocation79_spill] sm:$0xff] %v13704_v16  ;;  %v2261_v57 = vmul.f32 %v17616_v52, %v17615_v25  ;;  %v17626_v52 = vld [vmem:[#allocation17_spill] sm:$0xff]  ;;  %v17634_v25 = vld [vmem:[#allocation15_spill] sm:$0xff] }
 0x705   :  { %v13708_v0 = vpop.xlane.xlu1 %1507 }
 0x706   :  { %17607 = vst [vmem:[#allocation84_spill] sm:$0xff] %v13708_v0  ;;  %2420 = vadd.xlane.f32.xlu0 %v2257_v44 }
 0x707   :  { %v13712_v39 = vpop.xlane.xlu0 %1505 }
 0x708   :  { %2426 = vadd.xlane.f32.xlu1 %v2260_v61  ;;  %17610 = vst [vmem:[#allocation81_spill] sm:$0xff] %v13712_v39 }
 0x709   :  { %v13716_v35 = vpop.xlane.xlu1 %1533 }
 0x70a   :  { %17613 = vst [vmem:[#allocation35_spill] sm:$0xff] %v13716_v35  ;;  %2424 = vadd.xlane.f32.xlu0 %v2259_v17  ;;  %v17623_v35 = vld [vmem:[#allocation18_spill] sm:$0xff] }
 0x70b   :  { %v13718_v63 = vpop.xlane.xlu0 %1509 }
 0x70c   :  { %17614 = vst [vmem:[#allocation83_spill] sm:$0xff] %v13718_v63  ;;  %v17654_v63 = vld [vmem:[#allocation23_spill] sm:$0xff] }
 0x70d   :  { %v13722_v56 = vpop.xlane.xlu1 %1537 }
 0x70e   :  { %17617 = vst [vmem:[#allocation86_spill] sm:$0xff] %v13722_v56  ;;  %2428 = vadd.xlane.f32.xlu0 %v2261_v57 }
 0x70f   :  { %v13724_v0 = vpop.xlane.xlu0 %1535 }
 0x710   :  { %17618 = vst [vmem:[#allocation33_spill] sm:$0xff] %v13724_v0  ;;  %v17629_v0 = vld [vmem:[#allocation20_spill] sm:$0xff] }
 0x711   :  { %v13726_v44 = vpop.xlane.xlu1 %1541 }
 0x712   :  { %17619 = vst [vmem:[#allocation88_spill] sm:$0xff] %v13726_v44 }
 0x713   :  { %v13728_v61 = vpop.xlane.xlu0 %1539 }
 0x714   :  { %17620 = vst [vmem:[#allocation85_spill] sm:$0xff] %v13728_v61 }
 0x715   :  { %v13730_v5 = vpop.xlane.xlu1 %1545 }
 0x716   :  { %17621 = vst [vmem:[#allocation90_spill] sm:$0xff] %v13730_v5  ;;  %v17632_v5 = vld [vmem:[#allocation22_spill] sm:$0xff] }
 0x717   :  { %v13732_v11 = vpop.xlane.xlu0 %1543 }
 0x718   :  { %17622 = vst [vmem:[#allocation87_spill] sm:$0xff] %v13732_v11 }
 0x719   :  { %6292 = vperm.xlu1 %8961, %v17623_v35   ;;  %v13735_v17 = vpop.xlane.xlu1 %1549 }
 0x71a   :  { %17624 = vst [vmem:[#allocation92_spill] sm:$0xff] %v13735_v17 }
 0x71b   :  { %v13737_v23 = vpop.xlane.xlu0 %1547 }
 0x71c   :  { %17625 = vst [vmem:[#allocation89_spill] sm:$0xff] %v13737_v23  ;;  %v17636_v23 = vld [vmem:[#allocation24_spill] sm:$0xff] }
 0x71d   :  { %6298 = vperm.xlu1 %8961, %v17626_v52   ;;  %v13740_v56 = vpop.xlane.xlu1 %1553  ;;  %v17640_v52 = vld [vmem:[#allocation26_spill] sm:$0xff] }
 0x71e   :  { %17627 = vst [vmem:[#allocation94_spill] sm:$0xff] %v13740_v56  ;;  %v17638_v56 = vld [vmem:[#allocation30_spill] sm:$0xff] }
 0x71f   :  { %v13742_v57 = vpop.xlane.xlu0 %1551 }
 0x720   :  { %17628 = vst [vmem:[#allocation91_spill] sm:$0xff] %v13742_v57 }
 0x721   :  { %6301 = vperm.xlu1 %8961, %v17629_v0   ;;  %v13745_v44 = vpop.xlane.xlu1 %1557  ;;  %v17648_v0 = vld [vmem:[#allocation29_spill] sm:$0xff] }
 0x722   :  { %17630 = vst [vmem:[#allocation96_spill] sm:$0xff] %v13745_v44 }
 0x723   :  { %v13747_v61 = vpop.xlane.xlu0 %1555 }
 0x724   :  { %17631 = vst [vmem:[#allocation93_spill] sm:$0xff] %v13747_v61  ;;  %6295 = vperm.xlu0 %8962, %v17634_v25   ;;  %v17642_v61 = vld [vmem:[#allocation31_spill] sm:$0xff] }
 0x725   :  { %6304 = vperm.xlu1 %8961, %v17632_v5   ;;  %v13750_v11 = vpop.xlane.xlu1 %1561 }
 0x726   :  { %17633 = vst [vmem:[#allocation98_spill] sm:$0xff] %v13750_v11  ;;  %v17644_v11 = vld [vmem:[#allocation28_spill] sm:$0xff] }
 0x727   :  { %v13753_v17 = vpop.xlane.xlu0 %1559 }
 0x728   :  { %17635 = vst [vmem:[#allocation95_spill] sm:$0xff] %v13753_v17  ;;  %6322 = vperm.xlu0 %8962, %v17638_v56   ;;  %v17646_v17 = vld [vmem:[#allocation32_spill] sm:$0xff] }
 0x729   :  { %6307 = vperm.xlu1 %8961, %v17636_v23   ;;  %v13756_v50 = vpop.xlane.xlu1 %2318 }
 0x72a   :  { %17637 = vst [vmem:[#allocation185_spill] sm:$0xff] %v13756_v50 }
 0x72b   :  { %v13759_v57 = vpop.xlane.xlu0 %1563 }
 0x72c   :  { %17639 = vst [vmem:[#allocation97_spill] sm:$0xff] %v13759_v57  ;;  %6328 = vperm.xlu0 %8962, %v17642_v61  }
 0x72d   :  { %6310 = vperm.xlu1 %8961, %v17640_v52   ;;  %v13762_v44 = vpop.xlane.xlu1 %2322  ;;  %v17651_v52 = vld [vmem:[#allocation21_spill] sm:$0xff] }
 0x72e   :  { %17641 = vst [vmem:[#allocation187_spill] sm:$0xff] %v13762_v44 }
 0x72f   :  { %v13765_v5 = vpop.xlane.xlu0 %2320 }
 0x730   :  { %17643 = vst [vmem:[#allocation184_spill] sm:$0xff] %v13765_v5  ;;  %6334 = vperm.xlu0 %8962, %v17646_v17   ;;  %v17657_v17 = vld [vmem:[#allocation25_spill] sm:$0xff] }
 0x731   :  { %6313 = vperm.xlu1 %8961, %v17644_v11   ;;  %v13768_v25 = vpop.xlane.xlu1 %2326 }
 0x732   :  { %17645 = vst [vmem:[#allocation189_spill] sm:$0xff] %v13768_v25 }
 0x733   :  { %v13771_v23 = vpop.xlane.xlu0 %2324 }
 0x734   :  { %17647 = vst [vmem:[#allocation186_spill] sm:$0xff] %v13771_v23 }
 0x735   :  { %6316 = vperm.xlu1 %8961, %v17648_v0   ;;  %v13774_v56 = vpop.xlane.xlu1 %2330 }
 0x736   :  { %17649 = vst [vmem:[#allocation191_spill] sm:$0xff] %v13774_v56 }
 0x737   :  { %v13776_v57 = vpop.xlane.xlu0 %2328 }
 0x738   :  { %17650 = vst [vmem:[#allocation188_spill] sm:$0xff] %v13776_v57 }
 0x739   :  { %6319 = vperm.xlu1 %8961, %v17651_v52   ;;  %v13779_v35 = vpop.xlane.xlu1 %2334 }
 0x73a   :  { %17652 = vst [vmem:[#allocation193_spill] sm:$0xff] %v13779_v35 }
 0x73b   :  { %v13781_v61 = vpop.xlane.xlu0 %2332 }
 0x73c   :  { %17653 = vst [vmem:[#allocation190_spill] sm:$0xff] %v13781_v61 }
 0x73d   :  { %6325 = vperm.xlu1 %8961, %v17654_v63   ;;  %v13784_v11 = vpop.xlane.xlu1 %2338 }
 0x73e   :  { %17655 = vst [vmem:[#allocation195_spill] sm:$0xff] %v13784_v11  ;;  %v17666_v11 = vld [vmem:[#allocation130_spill] sm:$0xff] }
 0x73f   :  { %v13786_v39 = vpop.xlane.xlu0 %2336 }
 0x740   :  { %17656 = vst [vmem:[#allocation192_spill] sm:$0xff] %v13786_v39  ;;  %v17667_v39 = vld [vmem:[#allocation212_spill] sm:$0xff] }
 0x741   :  { %6331 = vperm.xlu1 %8961, %v17657_v17   ;;  %v13789_v16 = vpop.xlane.xlu1 %2342  ;;  %v2263_v25 = vmul.f32 %v17667_v39, %v17666_v11  ;;  %v17679_v11 = vld [vmem:[#allocation218_spill] sm:$0xff] }
 0x742   :  { %17658 = vst [vmem:[#allocation197_spill] sm:$0xff] %v13789_v16 }
 0x743   :  { %v13791_v0 = vpop.xlane.xlu0 %2340 }
 0x744   :  { %17659 = vst [vmem:[#allocation194_spill] sm:$0xff] %v13791_v0  ;;  %v17670_v0 = vld [vmem:[#allocation132_spill] sm:$0xff] }
 0x745   :  { %6337 = vperm.xlu1 %8961, %v17660_v1   ;;  %v13794_v56 = vpop.xlane.xlu1 %2346  ;;  %v17671_v1 = vld [vmem:[#allocation214_spill] sm:$0xff] }
 0x746   :  { %17661 = vst [vmem:[#allocation201_spill] sm:$0xff] %v13794_v56  ;;  %v2265_v57 = vmul.f32 %v17671_v1, %v17670_v0 }
 0x747   :  { %v13796_v52 = vpop.xlane.xlu0 %2344 }
 0x748   :  { %17662 = vst [vmem:[#allocation196_spill] sm:$0xff] %v13796_v52 }
 0x749   :  { %v13798_v35 = vpop.xlane.xlu1 %2350 }
 0x74a   :  { %17663 = vst [vmem:[#allocation205_spill] sm:$0xff] %v13798_v35  ;;  %v17674_v35 = vld [vmem:[#allocation134_spill] sm:$0xff] }
 0x74b   :  { %v13800_v61 = vpop.xlane.xlu0 %2348 }
 0x74c   :  { %17664 = vst [vmem:[#allocation200_spill] sm:$0xff] %v13800_v61  ;;  %v17675_v61 = vld [vmem:[#allocation216_spill] sm:$0xff] }
 0x74d   :  { %v13802_v63 = vpop.xlane.xlu1 %2354  ;;  %v2267_v44 = vmul.f32 %v17675_v61, %v17674_v35  ;;  %v17687_v35 = vld [vmem:[#allocation131_spill] sm:$0xff] }
 0x74e   :  { %17665 = vst [vmem:[#allocation207_spill] sm:$0xff] %v13802_v63 }
 0x74f   :  { %2432 = vadd.xlane.f32.xlu0 %v2263_v25  ;;  %v13806_v17 = vpop.xlane.xlu0 %2352  ;;  %v17678_v25 = vld [vmem:[#allocation136_spill] sm:$0xff] }
 0x750   :  { %17668 = vst [vmem:[#allocation204_spill] sm:$0xff] %v13806_v17  ;;  %v2269_v17 = vmul.f32 %v17679_v11, %v17678_v25  ;;  %v17691_v25 = vld [vmem:[#allocation133_spill] sm:$0xff] }
 0x751   :  { %v13808_v16 = vpop.xlane.xlu1 %2358 }
 0x752   :  { %17669 = vst [vmem:[#allocation209_spill] sm:$0xff] %v13808_v16 }
 0x753   :  { %2436 = vadd.xlane.f32.xlu0 %v2265_v57  ;;  %v13812_v56 = vpop.xlane.xlu0 %2356 }
 0x754   :  { %17672 = vst [vmem:[#allocation206_spill] sm:$0xff] %v13812_v56 }
 0x755   :  { %v13814_v52 = vpop.xlane.xlu1 %2362 }
 0x756   :  { %17673 = vst [vmem:[#allocation211_spill] sm:$0xff] %v13814_v52 }
 0x757   :  { %2440 = vadd.xlane.f32.xlu0 %v2267_v44  ;;  %v13818_v63 = vpop.xlane.xlu0 %2360  ;;  %v17686_v44 = vld [vmem:[#allocation213_spill] sm:$0xff] }
 0x758   :  { %17676 = vst [vmem:[#allocation208_spill] sm:$0xff] %v13818_v63  ;;  %v2262_v63 = vmul.f32 %v17687_v35, %v17686_v44  ;;  %v17698_v35 = vld [vmem:[#allocation219_spill] sm:$0xff] }
 0x759   :  { %v13820_v39 = vpop.xlane.xlu1 %2366 }
 0x75a   :  { %17677 = vst [vmem:[#allocation210_spill] sm:$0xff] %v13820_v39 }
 0x75b   :  { %2444 = vadd.xlane.f32.xlu0 %v2269_v17  ;;  %v13824_v16 = vpop.xlane.xlu0 %2364  ;;  %v17690_v17 = vld [vmem:[#allocation215_spill] sm:$0xff] }
 0x75c   :  { %17680 = vst [vmem:[#allocation212_spill] sm:$0xff] %v13824_v16  ;;  %v2264_v16 = vmul.f32 %v17691_v25, %v17690_v17  ;;  %v17702_v25 = vld [vmem:[#allocation221_spill] sm:$0xff] }
 0x75d   :  { %v13826_v1 = vpop.xlane.xlu1 %2370 }
 0x75e   :  { %17681 = vst [vmem:[#allocation214_spill] sm:$0xff] %v13826_v1 }
 0x75f   :  { %v13828_v57 = vpop.xlane.xlu0 %2368 }
 0x760   :  { %17682 = vst [vmem:[#allocation216_spill] sm:$0xff] %v13828_v57 }
 0x761   :  { %v13830_v0 = vpop.xlane.xlu1 %2374 }
 0x762   :  { %17683 = vst [vmem:[#allocation218_spill] sm:$0xff] %v13830_v0  ;;  %v17694_v0 = vld [vmem:[#allocation217_spill] sm:$0xff] }
 0x763   :  { %v13832_v52 = vpop.xlane.xlu0 %2372 }
 0x764   :  { %17684 = vst [vmem:[#allocation387_spill] sm:$0xff] %v13832_v52  ;;  %v17695_v52 = vld [vmem:[#allocation135_spill] sm:$0xff] }
 0x765   :  { %v13834_v61 = vpop.xlane.xlu1 %2378  ;;  %v2266_v56 = vmul.f32 %v17695_v52, %v17694_v0 }
 0x766   :  { %17685 = vst [vmem:[#allocation388_spill] sm:$0xff] %v13834_v61 }
 0x767   :  { %v13838_v39 = vpop.xlane.xlu0 %2376 }
 0x768   :  { %17688 = vst [vmem:[#allocation213_spill] sm:$0xff] %v13838_v39 }
 0x769   :  { %2430 = vadd.xlane.f32.xlu1 %v2262_v63  ;;  %v13840_v11 = vpop.xlane.xlu1 %2382  ;;  %v17699_v63 = vld [vmem:[#allocation137_spill] sm:$0xff] }
 0x76a   :  { %17689 = vst [vmem:[#allocation389_spill] sm:$0xff] %v13840_v11  ;;  %v2268_v39 = vmul.f32 %v17699_v63, %v17698_v35 }
 0x76b   :  { %v13844_v1 = vpop.xlane.xlu0 %2380 }
 0x76c   :  { %17692 = vst [vmem:[#allocation215_spill] sm:$0xff] %v13844_v1 }
 0x76d   :  { %2434 = vadd.xlane.f32.xlu1 %v2264_v16  ;;  %v13846_v57 = vpop.xlane.xlu1 %2386  ;;  %v17703_v16 = vld [vmem:[#allocation139_spill] sm:$0xff] }
 0x76e   :  { %17693 = vst [vmem:[#allocation390_spill] sm:$0xff] %v13846_v57  ;;  %v2270_v1 = vmul.f32 %v17703_v16, %v17702_v25 }
 0x76f   :  { %v13850_v61 = vpop.xlane.xlu0 %2384 }
 0x770   :  { %17696 = vst [vmem:[#allocation217_spill] sm:$0xff] %v13850_v61 }
 0x771   :  { %2438 = vadd.xlane.f32.xlu1 %v2266_v56  ;;  %v13852_v44 = vpop.xlane.xlu1 %2390 }
 0x772   :  { %17697 = vst [vmem:[#allocation391_spill] sm:$0xff] %v13852_v44 }
 0x773   :  { %v13858_v17 = vpop.xlane.xlu0 %2388 }
 0x774   :  { %17701 = vst [vmem:[#allocation392_spill] sm:$0xff] %v13858_v17 }
 0x775   :  { %2442 = vadd.xlane.f32.xlu1 %v2268_v39  ;;  %v13856_v11 = vpop.xlane.xlu1 %2394 }
 0x776   :  { %17700 = vst [vmem:[#allocation219_spill] sm:$0xff] %v13856_v11 }
 0x777   :  { %v13864_v0 = vpop.xlane.xlu0 %2392 }
 0x778   :  { %17705 = vst [vmem:[#allocation393_spill] sm:$0xff] %v13864_v0 }
 0x779   :  { %2446 = vadd.xlane.f32.xlu1 %v2270_v1  ;;  %v13862_v57 = vpop.xlane.xlu1 %2398 }
 0x77a   :  { %17704 = vst [vmem:[#allocation221_spill] sm:$0xff] %v13862_v57 }
 0x77b   :  { %v13870_v44 = vpop.xlane.xlu0 %2396 }
 0x77c   :  { %17708 = vst [vmem:[#allocation396_spill] sm:$0xff] %v13870_v44 }
 0x77d   :  { %v13866_v52 = vpop.xlane.xlu1 %2402 }
 0x77e   :  { %17706 = vst [vmem:[#allocation394_spill] sm:$0xff] %v13866_v52 }
 0x77f   :  { %v13874_v39 = vpop.xlane.xlu0 %2400 }
 0x780   :  { %17710 = vst [vmem:[#allocation398_spill] sm:$0xff] %v13874_v39 }
 0x781   :  { %v13868_v56 = vpop.xlane.xlu1 %2406 }
 0x782   :  { %17707 = vst [vmem:[#allocation395_spill] sm:$0xff] %v13868_v56 }
 0x783   :  { %v13880_v25 = vpop.xlane.xlu0 %2404 }
 0x784   :  { %17713 = vst [vmem:[#allocation401_spill] sm:$0xff] %v13880_v25 }
 0x785   :  { %v13872_v35 = vpop.xlane.xlu1 %2410 }
 0x786   :  { %17709 = vst [vmem:[#allocation397_spill] sm:$0xff] %v13872_v35 }
 0x787   :  { %v13884_v16 = vpop.xlane.xlu0 %2408 }
 0x788   :  { %17715 = vst [vmem:[#allocation403_spill] sm:$0xff] %v13884_v16 }
 0x789   :  { %v13876_v63 = vpop.xlane.xlu1 %2414 }
 0x78a   :  { %17711 = vst [vmem:[#allocation399_spill] sm:$0xff] %v13876_v63 }
 0x78b   :  { %v13888_v52 = vpop.xlane.xlu0 %2412 }
 0x78c   :  { %17717 = vst [vmem:[#allocation405_spill] sm:$0xff] %v13888_v52 }
 0x78d   :  { %v13878_v11 = vpop.xlane.xlu1 %2418 }
 0x78e   :  { %17712 = vst [vmem:[#allocation400_spill] sm:$0xff] %v13878_v11 }
 0x78f   :  { %v13890_v44 = vpop.xlane.xlu0 %2416 }
 0x790   :  { %17718 = vst [vmem:[#allocation406_spill] sm:$0xff] %v13890_v44 }
 0x791   :  { %v13882_v1 = vpop.xlane.xlu1 %2422 }
 0x792   :  { %17714 = vst [vmem:[#allocation402_spill] sm:$0xff] %v13882_v1 }
 0x793   :  { %v13894_v39 = vpop.xlane.xlu0 %2420 }
 0x794   :  { %17719 = vst [vmem:[#allocation407_spill] sm:$0xff] %v13894_v39 }
 0x795   :  { %v13886_v57 = vpop.xlane.xlu1 %2426 }
 0x796   :  { %17716 = vst [vmem:[#allocation404_spill] sm:$0xff] %v13886_v57 }
 0x797   :  { %v13898_v25 = vpop.xlane.xlu0 %2424 }
 0x798   :  { %17720 = vst [vmem:[#allocation408_spill] sm:$0xff] %v13898_v25 }
 0x799   :  { %v6293_v56 = vpop.permute.xlu1 %6292 }
 0x79a   :  { %vm6339_vm7 = vcmp.eq.s32.totalorder %v6293_v56, 1  ;;  %v17724_v56 = vld [vmem:[#allocation223_spill] sm:$0xff] }
 0x79b   :  { %v13902_v1 = vpop.xlane.xlu0 %2428 }
 0x79c   :  { %17721 = vst [vmem:[#allocation409_spill] sm:$0xff] %v13902_v1 }
 0x79d   :  { %v13892_v35 = vpop.permute.xlu1 %6298 }
 0x79e   :  { %vm6341_vm12 = vcmp.eq.s32.totalorder %v13892_v35, 1 }
 0x7a1   :  { %v13896_v0 = vpop.permute.xlu1 %6301 }
 0x7a2   :  { %vm6342_vm8 = vcmp.eq.s32.totalorder %v13896_v0, 1 }
 0x7a3   :  { %v6296_v25 = vpop.permute.xlu0 %6295 }
 0x7a4   :  { %vm6340_vm5 = vcmp.eq.s32.totalorder %v6296_v25, 1 }
 0x7a5   :  { %v13900_v16 = vpop.permute.xlu1 %6304 }
 0x7a6   :  { %vm6343_vm15 = vcmp.eq.s32.totalorder %v13900_v16, 1  ;;  %v17730_v16 = vld [vmem:[#allocation220_spill] sm:$0xff] }
 0x7a8   :  { %v8547_v63 = vpop.f32.mrb[64].mxu1 }
 0x7a9   :  { %9289 = vlog2.f32 %v8547_v63  ;;  %v6132_v11 = vpop.f32.mrb[65].mxu1  ;;  %v13904_v50 = vpop.permute.xlu1 %6307 }
 0x7aa   :  { %9291 = vlog2.f32 %v6132_v11  ;;  %vm6344_vm13 = vcmp.eq.s32.totalorder %v13904_v50, 1 }
 0x7af   :  { %v8550_v57 = vpop.f32.mrb[66].mxu1 }
 0x7b0   :  { %9293 = vlog2.f32 %v8550_v57  ;;  %v6142_v52 = vpop.f32.mrb[67].mxu1 }
 0x7b1   :  { %9295 = vlog2.f32 %v6142_v52 }
 0x7b3   :  { %v9290_v44 = vpop.eup %9289  ;;  %v8553_v39 = vpop.f32.mrb[68].mxu1 }
 0x7b4   :  { %v9292_v17 = vpop.eup %9291  ;;  %v6214_v61 = vmul.f32 0.6931472, %v9290_v44  ;;  %9297 = vlog2.f32 %v8553_v39  ;;  %v6152_v63 = vpop.f32.mrb[69].mxu1  ;;  %v9575_v44 = vld [vmem:[#allocation2 + $0x288] sm:$0xff] }
 0x7b5   :  { %v6212_v23 = vmul.f32 0.6931472, %v9292_v17  ;;  %9299 = vlog2.f32 %v6152_v63 }
 0x7b6   :  { %v6244_v11 = vadd.f32 %v6214_v61, %v13530_v58  ;;  %v13910_v58 = vpop.permute.xlu1 %6310 }
 0x7b7   :  { %v6243_v5 = vadd.f32 %v6212_v23, %v13534_v13  ;;  %v8556_v41 = vpop.f32.mrb[70].mxu1  ;;  %vm6345_vm14 = vcmp.eq.s32.totalorder %v13910_v58, 1 }
 0x7b8   :  { %v6260_v57 = vadd.f32 %v6244_v11, %v9901_v10  ;;  %9301 = vlog2.f32 %v8556_v41  ;;  %v6162_v1 = vpop.f32.mrb[71].mxu1 }
 0x7b9   :  { %v6259_v52 = vadd.f32 %v6243_v5, %v9901_v10  ;;  %9303 = vlog2.f32 %v6162_v1  ;;  %v17725_v1 = vld [vmem:[#allocation141_spill] sm:$0xff] }
 0x7ba   :  { %v6276_v17 = vadd.f32 %v9575_v44, %v6260_v57  ;;  %v9294_v39 = vpop.eup %9293  ;;  %v2272_v11 = vmul.f32 %v17725_v1, %v17724_v56 }
 0x7bb   :  { %v6275_v30 = vadd.f32 %v9576_v55, %v6259_v52  ;;  %v9296_v24 = vpop.eup %9295  ;;  %v6218_v61 = vmul.f32 0.6931472, %v9294_v39  ;;  %v8559_v13 = vpop.f32.mrb[72].mxu1  ;;  %v9577_v39 = vld [vmem:[#allocation2 + $0x298] sm:$0xff] }
 0x7bc   :  { %v13913_v23 = vsel %vm6340_vm5, %v6276_v17, %v13232_v19  ;;  %v6216_v63 = vmul.f32 0.6931472, %v9296_v24  ;;  %9305 = vlog2.f32 %v8559_v13  ;;  %v6172_v41 = vpop.f32.mrb[73].mxu1  ;;  %vm2775_vm5 = vcmask 130112  }
 0x7bd   :  { %17722 = vst [vmem:[#allocation410_spill] sm:$0xff] %v13913_v23  ;;  %6373 = vmax.xlane.f32.xlu1 %v13913_v23  ;;  %v13917_v5 = vsel %vm6339_vm7, %v6275_v30, %v13238_v42  ;;  %v6246_v25 = vadd.f32 %v6218_v61, %v13542_v22  ;;  %9307 = vlog2.f32 %v6172_v41  ;;  %v13926_v22 = vpop.permute.xlu1 %6313  ;;  %vm2782_vm7 = vcmask 195712  }
 0x7be   :  { %17723 = vst [vmem:[#allocation411_spill] sm:$0xff] %v13917_v5  ;;  %6371 = vmax.xlane.f32.xlu0 %v13917_v5  ;;  %v9298_v55 = vpop.eup %9297  ;;  %v6245_v19 = vadd.f32 %v6216_v63, %v13550_v60  ;;  %vm6346_vm1 = vcmp.eq.s32.totalorder %v13926_v22, 1 }
 0x7bf   :  { %v9300_v57 = vpop.eup %9299  ;;  %v6262_v24 = vadd.f32 %v6246_v25, %v9901_v10  ;;  %v6222_v52 = vmul.f32 0.6931472, %v9298_v55  ;;  %v8562_v44 = vpop.f32.mrb[74].mxu1 }
 0x7c0   :  { %v6261_v17 = vadd.f32 %v6245_v19, %v9901_v10  ;;  %v6220_v42 = vmul.f32 0.6931472, %v9300_v57  ;;  %9309 = vlog2.f32 %v8562_v44  ;;  %v6182_v30 = vpop.f32.mrb[75].mxu1  ;;  %v9578_v19 = vld [vmem:[#allocation2 + $0x290] sm:$0xff] }
 0x7c1   :  { %2450 = vadd.xlane.f32.xlu1 %v2272_v11  ;;  %9311 = vlog2.f32 %v6182_v30  ;;  %v6278_v61 = vadd.f32 %v9577_v39, %v6262_v24  ;;  %v6248_v60 = vadd.f32 %v6222_v52, %v13562_v37  ;;  %v9579_v52 = vld [vmem:[#allocation2 + $0x2a0] sm:$0xff] }
 0x7c2   :  { %v9302_v13 = vpop.eup %9301  ;;  %v6247_v63 = vadd.f32 %v6220_v42, %v13556_v7  ;;  %v6277_v11 = vadd.f32 %v9578_v19, %v6261_v17  ;;  %v6317_v17 = vpop.permute.xlu1 %6316 }
 0x7c3   :  { %v9304_v41 = vpop.eup %9303  ;;  %v6226_v25 = vmul.f32 0.6931472, %v9302_v13  ;;  %v8565_v55 = vpop.f32.mrb[76].mxu1  ;;  %v13932_v56 = vsel %vm6342_vm8, %v6278_v61, %v13250_v29  ;;  %v6264_v7 = vadd.f32 %v6248_v60, %v9901_v10  ;;  %v17729_v60 = vld [vmem:[#allocation138_spill] sm:$0xff]  ;;  %vm6347_vm0 = vcmp.eq.s32.totalorder %v6317_v17, 1  ;;  %v9585_v17 = vld [vmem:[#allocation2 + $0x2c8] sm:$0xff] }
 0x7c4   :  { %17726 = vst [vmem:[#allocation223_spill] sm:$0xff] %v13932_v56  ;;  %v6263_v57 = vadd.f32 %v6247_v63, %v9901_v10  ;;  %v6224_v44 = vmul.f32 0.6931472, %v9304_v41  ;;  %9313 = vlog2.f32 %v8565_v55  ;;  %v6192_v24 = vpop.f32.mrb[77].mxu1  ;;  %6377 = vmax.xlane.f32.xlu0 %v13932_v56  ;;  %v13942_v61 = vsel %vm6341_vm12, %v6277_v11, %v13262_v49  ;;  %v9581_v49 = vld [vmem:[#allocation2 + $0x2a8] sm:$0xff] }
 0x7c5   :  { %9315 = vlog2.f32 %v6192_v24  ;;  %v6250_v30 = vadd.f32 %v6226_v25, %v13574_v62  ;;  %17727 = vst [vmem:[#allocation412_spill] sm:$0xff] %v13942_v61  ;;  %v2271_v41 = vmul.f32 %v17730_v16, %v17729_v60  ;;  %v9580_v25 = vld [vmem:[#allocation2 + $0x2b0] sm:$0xff]  ;;  %v6280_v19 = vadd.f32 %v9581_v49, %v6264_v7 }
 0x7c6   :  { %v9306_v0 = vpop.eup %9305  ;;  %v6249_v37 = vadd.f32 %v6224_v44, %v13568_v14  ;;  %v6279_v29 = vadd.f32 %v9579_v52, %v6263_v57  ;;  %vm2789_vm8 = vcmask 261312   ;;  %vm2796_vm12 = vcmask 326912  }
 0x7c7   :  { %v9308_v42 = vpop.eup %9307  ;;  %v6230_v39 = vmul.f32 0.6931472, %v9306_v0  ;;  %v6266_v57 = vadd.f32 %v6250_v30, %v9901_v10 }
 0x7c8   :  { %v6265_v13 = vadd.f32 %v6249_v37, %v9901_v10  ;;  %v6228_v63 = vmul.f32 0.6931472, %v9308_v42  ;;  %6375 = vmax.xlane.f32.xlu0 %v13942_v61  ;;  %v13947_v35 = vsel %vm6343_vm15, %v6279_v29, %v13268_v4  ;;  %v13964_v29 = vsel %vm6344_vm13, %v6280_v19, %v13278_v27  ;;  %v9582_v42 = vld [vmem:[#allocation2 + $0x2c0] sm:$0xff] }
 0x7c9   :  { %17728 = vst [vmem:[#allocation413_spill] sm:$0xff] %v13947_v35  ;;  %6379 = vmax.xlane.f32.xlu1 %v13947_v35  ;;  %v6252_v4 = vadd.f32 %v6230_v39, %v13588_v43  ;;  %17732 = vst [vmem:[#allocation414_spill] sm:$0xff] %v13964_v29  ;;  %vm2803_vm15 = vcmask 392512   ;;  %vm2817_vm13 = vcmask 523712  }
 0x7ca   :  { %v9310_v14 = vpop.eup %9309  ;;  %v6251_v62 = vadd.f32 %v6228_v63, %v13580_v9  ;;  %v6281_v55 = vadd.f32 %v9580_v25, %v6265_v13  ;;  %v6320_v9 = vpop.permute.xlu1 %6319  ;;  %v9583_v63 = vld [vmem:[#allocation2 + $0x2b8] sm:$0xff] }
 0x7cb   :  { %v9312_v11 = vpop.eup %9311  ;;  %v6234_v44 = vmul.f32 0.6931472, %v9310_v14  ;;  %v6282_v14 = vadd.f32 %v9583_v63, %v6266_v57  ;;  %vm6348_vm2 = vcmp.eq.s32.totalorder %v6320_v9, 1 }
 0x7cc   :  { %v6267_v24 = vadd.f32 %v6251_v62, %v9901_v10  ;;  %v6232_v0 = vmul.f32 0.6931472, %v9312_v11  ;;  %2448 = vadd.xlane.f32.xlu0 %v2271_v41  ;;  %v13958_v52 = vsel %vm6345_vm14, %v6281_v55, %v13284_v46  ;;  %v6268_v46 = vadd.f32 %v6252_v4, %v9901_v10  ;;  %v6323_v41 = vpop.permute.xlu0 %6322  ;;  %v9586_v4 = vld [vmem:[#allocation2 + $0x2e0] sm:$0xff] }
 0x7cd   :  { %v8568_v37 = vpop.f32.mrb[78].mxu1  ;;  %17731 = vst [vmem:[#allocation220_spill] sm:$0xff] %v13958_v52  ;;  %6383 = vmax.xlane.f32.xlu1 %v13958_v52  ;;  %v6254_v50 = vadd.f32 %v6234_v44, %v13602_v2  ;;  %vm6349_vm3 = vcmp.eq.s32.totalorder %v6323_v41, 1  ;;  %v13980_v11 = vsel %vm6346_vm1, %v6282_v14, %v13293_v38  ;;  %vm2810_vm14 = vcmask 458112  }
 0x7ce   :  { %9317 = vlog2.f32 %v8568_v37  ;;  %v6202_v7 = vpop.f32.mrb[79].mxu1  ;;  %v9314_v58 = vpop.eup %9313  ;;  %v6253_v43 = vadd.f32 %v6232_v0, %v13594_v47  ;;  %v6283_v30 = vadd.f32 %v9582_v42, %v6267_v24  ;;  %v9584_v47 = vld [vmem:[#allocation2 + $0x2d0] sm:$0xff]  ;;  %17734 = vst [vmem:[#allocation416_spill] sm:$0xff] %v13980_v11  ;;  %v9587_v0 = vld [vmem:[#allocation2 + $0x2d8] sm:$0xff]  ;;  %vm16624_vm1 = vcmask 654912  }
 0x7cf   :  { %9319 = vlog2.f32 %v6202_v7  ;;  %v9316_v39 = vpop.eup %9315  ;;  %v6238_v13 = vmul.f32 0.6931472, %v9314_v58  ;;  %v6326_v55 = vpop.permute.xlu1 %6325  ;;  %v6270_v49 = vadd.f32 %v6254_v50, %v9901_v10 }
 0x7d0   :  { %v6269_v16 = vadd.f32 %v6253_v43, %v9901_v10  ;;  %v6236_v62 = vmul.f32 0.6931472, %v9316_v39  ;;  %6381 = vmax.xlane.f32.xlu0 %v13964_v29  ;;  %v13972_v27 = vsel %vm6347_vm0, %v6283_v30, %v13299_v12  ;;  %v6284_v12 = vadd.f32 %v9585_v17, %v6268_v46  ;;  %v17738_v30 = vld [vmem:[#allocation225_spill] sm:$0xff]  ;;  %v17739_v39 = vld [vmem:[#allocation143_spill] sm:$0xff]  ;;  %v17747_v17 = vld [vmem:[#allocation222_spill] sm:$0xff] }
 0x7d1   :  { %17733 = vst [vmem:[#allocation415_spill] sm:$0xff] %v13972_v27  ;;  %6387 = vmax.xlane.f32.xlu1 %v13972_v27  ;;  %v6256_v19 = vadd.f32 %v6238_v13, %v13616_v36  ;;  %v6286_v37 = vadd.f32 %v9587_v0, %v6270_v49  ;;  %vm6350_vm10 = vcmp.eq.s32.totalorder %v6326_v55, 1  ;;  %v9588_v13 = vld [vmem:[#allocation2 + $0x2e8] sm:$0xff]  ;;  %v17744_v55 = vld [vmem:[#allocation227_spill] sm:$0xff]  ;;  %vm2824_vm0 = vcmask 589312  }
 0x7d2   :  { %v6255_v2 = vadd.f32 %v6236_v62, %v13608_v34  ;;  %v6285_v25 = vadd.f32 %v9584_v47, %v6269_v16  ;;  %v6329_v34 = vpop.permute.xlu0 %6328  ;;  %v13990_v38 = vsel %vm6348_vm2, %v6284_v12, %v13307_v21  ;;  %v2274_v21 = vmul.f32 %v17739_v39, %v17738_v30  ;;  %v9589_v62 = vld [vmem:[#allocation2 + $0x2f0] sm:$0xff] }
 0x7d3   :  { %v6272_v36 = vadd.f32 %v6256_v19, %v9901_v10  ;;  %vm6351_vm9 = vcmp.eq.s32.totalorder %v6329_v34, 1  ;;  %17736 = vst [vmem:[#allocation418_spill] sm:$0xff] %v13990_v38  ;;  %v6332_v9 = vpop.permute.xlu1 %6331  ;;  %v14002_v50 = vsel %vm6350_vm10, %v6286_v37, %v13320_v33  ;;  %v17745_v49 = vld [vmem:[#allocation145_spill] sm:$0xff]  ;;  %v17746_v19 = vld [vmem:[#allocation140_spill] sm:$0xff]  ;;  %v17749_v34 = vld [vmem:[#allocation147_spill] sm:$0xff]  ;;  %vm16623_vm2 = vcmask 786112  }
 0x7d4   :  { %v6271_v57 = vadd.f32 %v6255_v2, %v9901_v10  ;;  %6385 = vmax.xlane.f32.xlu0 %v13980_v11  ;;  %v13985_v22 = vsel %vm6349_vm3, %v6285_v25, %v13313_v8  ;;  %17740 = vst [vmem:[#allocation225_spill] sm:$0xff] %v14002_v50  ;;  %vm6352_vm4 = vcmp.eq.s32.totalorder %v6332_v9, 1  ;;  %v9590_v2 = vld [vmem:[#allocation2 + $0x2f8] sm:$0xff]  ;;  %v2273_v12 = vmul.f32 %v17747_v17, %v17746_v19  ;;  %v17754_v37 = vld [vmem:[#allocation144_spill] sm:$0xff]  ;;  %v17756_v9 = vld [vmem:[#allocation237_spill] sm:$0xff] }
 0x7d5   :  { %17735 = vst [vmem:[#allocation417_spill] sm:$0xff] %v13985_v22  ;;  %6391 = vmax.xlane.f32.xlu1 %v13985_v22  ;;  %v6288_v63 = vadd.f32 %v9588_v13, %v6272_v36  ;;  %v17752_v36 = vld [vmem:[#allocation233_spill] sm:$0xff]  ;;  %v17758_v30 = vld [vmem:[#allocation146_spill] sm:$0xff]  ;;  %v17768_v17 = vld [vmem:[#allocation248_spill] sm:$0xff]  ;;  %vm16622_vm3 = vcmask 720512   ;;  %vm2859_vm10 = vcmask 917312  }
 0x7d6   :  { %v6287_v44 = vadd.f32 %v9586_v4, %v6271_v57  ;;  %v6335_v14 = vpop.permute.xlu0 %6334  ;;  %v17748_v57 = vld [vmem:[#allocation229_spill] sm:$0xff] }
 0x7d7   :  { %v14008_v41 = vsel %vm6352_vm4, %v6288_v63, %v13338_v51  ;;  %vm6353_vm11 = vcmp.eq.s32.totalorder %v6335_v14, 1  ;;  %v2276_v51 = vmul.f32 %v17745_v49, %v17744_v55  ;;  %v2278_v4 = vmul.f32 %v17749_v34, %v17748_v57  ;;  %v17760_v13 = vld [vmem:[#allocation241_spill] sm:$0xff]  ;;  %v17762_v14 = vld [vmem:[#allocation148_spill] sm:$0xff] }
 0x7d8   :  { %v9318_v24 = vpop.eup %9317  ;;  %6389 = vmax.xlane.f32.xlu0 %v13990_v38  ;;  %v13994_v8 = vsel %vm6351_vm9, %v6287_v44, %v13332_v31  ;;  %17741 = vst [vmem:[#allocation420_spill] sm:$0xff] %v14008_v41  ;;  %v17751_v44 = vld [vmem:[#allocation224_spill] sm:$0xff]  ;;  %v17761_v63 = vld [vmem:[#allocation153_spill] sm:$0xff]  ;;  %vm16625_vm9 = vcmask 851712   ;;  %vm2866_vm4 = vcmask 982912  }
 0x7d9   :  { %v9320_v7 = vpop.eup %9319  ;;  %v6242_v58 = vmul.f32 0.6931472, %v9318_v24  ;;  %17737 = vst [vmem:[#allocation419_spill] sm:$0xff] %v13994_v8  ;;  %6395 = vmax.xlane.f32.xlu1 %v13994_v8  ;;  %v17767_v55 = vld [vmem:[#allocation236_spill] sm:$0xff] }
 0x7da   :  { %v6240_v43 = vmul.f32 0.6931472, %v9320_v7  ;;  %v17755_v7 = vld [vmem:[#allocation226_spill] sm:$0xff]  ;;  %v17816_v34 = vld [vmem:[#allocation172_spill] sm:$0xff] }
 0x7db   :  { %v6258_v42 = vadd.f32 %v6242_v58, %v13628_v40  ;;  %v6338_v40 = vpop.permute.xlu1 %6337  ;;  %v2277_v58 = vmul.f32 %v17755_v7, %v17754_v37 }
 0x7dc   :  { %v6257_v46 = vadd.f32 %v6240_v43, %v13644_v6  ;;  %6393 = vmax.xlane.f32.xlu0 %v14002_v50  ;;  %vm6354_vm6 = vcmp.eq.s32.totalorder %v6338_v40, 1  ;;  %v17757_v43 = vld [vmem:[#allocation151_spill] sm:$0xff] }
 0x7dd   :  { %v6274_v31 = vadd.f32 %v6258_v42, %v9901_v10  ;;  %2454 = vadd.xlane.f32.xlu1 %v2274_v21  ;;  %v2282_v42 = vmul.f32 %v17757_v43, %v17756_v9  ;;  %v17759_v21 = vld [vmem:[#allocation228_spill] sm:$0xff]  ;;  %v17775_v9 = vld [vmem:[#allocation245_spill] sm:$0xff] }
 0x7de   :  { %v6273_v16 = vadd.f32 %v6257_v46, %v9901_v10  ;;  %v2279_v46 = vmul.f32 %v17759_v21, %v17758_v30  ;;  %v17776_v21 = vld [vmem:[#allocation252_spill] sm:$0xff] }
 0x7df   :  { %v6290_v33 = vadd.f32 %v9590_v2, %v6274_v31  ;;  %v2284_v31 = vmul.f32 %v17761_v63, %v17760_v13  ;;  %v17789_v63 = vld [vmem:[#allocation167_spill] sm:$0xff]  ;;  %v17917_v10 = vld [vmem:[#allocation196_spill] sm:$0xff] }
 0x7e0   :  { %v6289_v6 = vadd.f32 %v9589_v62, %v6273_v16  ;;  %6397 = vmax.xlane.f32.xlu0 %v14008_v41  ;;  %v17763_v16 = vld [vmem:[#allocation232_spill] sm:$0xff]  ;;  %v17764_v62 = vld [vmem:[#allocation246_spill] sm:$0xff] }
 0x7e1   :  { %v14016_v25 = vsel %vm6354_vm6, %v6290_v33, %v13354_v48  ;;  %v17753_v48 = vld [vmem:[#allocation149_spill] sm:$0xff]  ;;  %v2281_v40 = vmul.f32 %v17763_v16, %v17762_v14  ;;  %v17766_v33 = vld [vmem:[#allocation150_spill] sm:$0xff]  ;;  %v17779_v16 = vld [vmem:[#allocation247_spill] sm:$0xff]  ;;  %vm3349_vm6 = vcmask 1042434  }
 0x7e2   :  { %v14012_v47 = vsel %vm6353_vm11, %v6289_v6, %v13374_v3  ;;  %17743 = vst [vmem:[#allocation422_spill] sm:$0xff] %v14016_v25  ;;  %v17750_v3 = vld [vmem:[#allocation142_spill] sm:$0xff]  ;;  %v2280_v0 = vmul.f32 %v17753_v48, %v17752_v36  ;;  %v17765_v6 = vld [vmem:[#allocation155_spill] sm:$0xff]  ;;  %v17817_v14 = vld [vmem:[#allocation281_spill] sm:$0xff]  ;;  %vm2873_vm11 = vcmask 1048512  }
 0x7e3   :  { %17742 = vst [vmem:[#allocation421_spill] sm:$0xff] %v14012_v47  ;;  %6399 = vmax.xlane.f32.xlu1 %v14012_v47  ;;  %v2275_v24 = vmul.f32 %v17751_v44, %v17750_v3  ;;  %v2286_v2 = vmul.f32 %v17765_v6, %v17764_v62  ;;  %v17771_v44 = vld [vmem:[#allocation240_spill] sm:$0xff]  ;;  %v17772_v36 = vld [vmem:[#allocation250_spill] sm:$0xff]  ;;  %v17829_v3 = vld [vmem:[#allocation9_spill] sm:$0xff] }
 0x7e4   :  { %6401 = vmax.xlane.f32.xlu0 %v14016_v25  ;;  %v17780_v62 = vld [vmem:[#allocation254_spill] sm:$0xff]  ;;  %v17851_v48 = vld [vmem:[#allocation185_spill] sm:$0xff] }
 0x7e7   :  { %2458 = vadd.xlane.f32.xlu1 %v2276_v51  ;;  %v2283_v51 = vmul.f32 %v17767_v55, %v17766_v33 }
 0x7e8   :  { %2452 = vadd.xlane.f32.xlu0 %v2273_v12  ;;  %v17769_v12 = vld [vmem:[#allocation157_spill] sm:$0xff] }
 0x7e9   :  { %v2288_v57 = vmul.f32 %v17769_v12, %v17768_v17  ;;  %v17783_v17 = vld [vmem:[#allocation249_spill] sm:$0xff] }
 0x7eb   :  { %2462 = vadd.xlane.f32.xlu1 %v2278_v4  ;;  %v17770_v4 = vld [vmem:[#allocation152_spill] sm:$0xff] }
 0x7ec   :  { %2456 = vadd.xlane.f32.xlu0 %v2275_v24  ;;  %v2285_v24 = vmul.f32 %v17771_v44, %v17770_v4  ;;  %v17784_v44 = vld [vmem:[#allocation257_spill] sm:$0xff] }
 0x7ed   :  { %v17791_v4 = vld [vmem:[#allocation253_spill] sm:$0xff] }
 0x7ef   :  { %2466 = vadd.xlane.f32.xlu1 %v2280_v0  ;;  %v17773_v0 = vld [vmem:[#allocation159_spill] sm:$0xff] }
 0x7f0   :  { %2460 = vadd.xlane.f32.xlu0 %v2277_v58  ;;  %v2290_v7 = vmul.f32 %v17773_v0, %v17772_v36  ;;  %v17774_v58 = vld [vmem:[#allocation154_spill] sm:$0xff] }
 0x7f3   :  { %2470 = vadd.xlane.f32.xlu1 %v2282_v42  ;;  %v2287_v42 = vmul.f32 %v17775_v9, %v17774_v58  ;;  %v17787_v9 = vld [vmem:[#allocation251_spill] sm:$0xff] }
 0x7f4   :  { %2464 = vadd.xlane.f32.xlu0 %v2279_v46  ;;  %v17777_v46 = vld [vmem:[#allocation161_spill] sm:$0xff] }
 0x7f5   :  { %v2292_v13 = vmul.f32 %v17777_v46, %v17776_v21 }
 0x7f7   :  { %2474 = vadd.xlane.f32.xlu1 %v2284_v31  ;;  %v17778_v31 = vld [vmem:[#allocation156_spill] sm:$0xff] }
 0x7f8   :  { %2468 = vadd.xlane.f32.xlu0 %v2281_v40  ;;  %v2289_v40 = vmul.f32 %v17779_v16, %v17778_v31 }
 0x7fb   :  { %2478 = vadd.xlane.f32.xlu1 %v2286_v2  ;;  %v17781_v2 = vld [vmem:[#allocation163_spill] sm:$0xff] }
 0x7fc   :  { %2472 = vadd.xlane.f32.xlu0 %v2283_v51  ;;  %v2294_v55 = vmul.f32 %v17781_v2, %v17780_v62  ;;  %v17782_v51 = vld [vmem:[#allocation158_spill] sm:$0xff]  ;;  %v17794_v2 = vld [vmem:[#allocation256_spill] sm:$0xff] }
 0x7ff   :  { %2482 = vadd.xlane.f32.xlu1 %v2288_v57  ;;  %v2291_v57 = vmul.f32 %v17783_v17, %v17782_v51 }
 0x800   :  { %2476 = vadd.xlane.f32.xlu0 %v2285_v24  ;;  %v17785_v24 = vld [vmem:[#allocation165_spill] sm:$0xff] }
 0x801   :  { %v2296_v36 = vmul.f32 %v17785_v24, %v17784_v44 }
 0x803   :  { %2486 = vadd.xlane.f32.xlu1 %v2290_v7  ;;  %v17786_v7 = vld [vmem:[#allocation160_spill] sm:$0xff] }
 0x804   :  { %2480 = vadd.xlane.f32.xlu0 %v2287_v42  ;;  %v2293_v21 = vmul.f32 %v17787_v9, %v17786_v7  ;;  %v17788_v42 = vld [vmem:[#allocation261_spill] sm:$0xff] }
 0x805   :  { %v2298_v16 = vmul.f32 %v17789_v63, %v17788_v42 }
 0x807   :  { %2490 = vadd.xlane.f32.xlu1 %v2292_v13  ;;  %v17790_v13 = vld [vmem:[#allocation162_spill] sm:$0xff] }
 0x808   :  { %2484 = vadd.xlane.f32.xlu0 %v2289_v40  ;;  %v2295_v62 = vmul.f32 %v17791_v4, %v17790_v13  ;;  %v17792_v40 = vld [vmem:[#allocation264_spill] sm:$0xff] }
 0x809   :  { %v2300_v17 = vmul.f32 %v13327_v53, %v17792_v40  ;;  %v17805_v53 = vld [vmem:[#allocation273_spill] sm:$0xff] }
 0x80b   :  { %2494 = vadd.xlane.f32.xlu1 %v2294_v55  ;;  %v17793_v55 = vld [vmem:[#allocation164_spill] sm:$0xff] }
 0x80c   :  { %2488 = vadd.xlane.f32.xlu0 %v2291_v57  ;;  %v2297_v44 = vmul.f32 %v17794_v2, %v17793_v55  ;;  %v17795_v57 = vld [vmem:[#allocation267_spill] sm:$0xff]  ;;  %v17815_v55 = vld [vmem:[#allocation176_spill] sm:$0xff] }
 0x80d   :  { %v2302_v9 = vmul.f32 %v13343_v32, %v17795_v57  ;;  %v17854_v32 = vld [vmem:[#allocation16_spill] sm:$0xff] }
 0x80f   :  { %2498 = vadd.xlane.f32.xlu1 %v2296_v36  ;;  %v17796_v36 = vld [vmem:[#allocation259_spill] sm:$0xff] }
 0x810   :  { %2492 = vadd.xlane.f32.xlu0 %v2293_v21  ;;  %v2299_v42 = vmul.f32 %v17796_v36, %v13351_v54  ;;  %v17797_v21 = vld [vmem:[#allocation271_spill] sm:$0xff] }
 0x811   :  { %v2304_v4 = vmul.f32 %v13371_v28, %v17797_v21 }
 0x813   :  { %2502 = vadd.xlane.f32.xlu1 %v2298_v16  ;;  %v17798_v16 = vld [vmem:[#allocation263_spill] sm:$0xff] }
 0x814   :  { %2496 = vadd.xlane.f32.xlu0 %v2295_v62  ;;  %v2301_v40 = vmul.f32 %v17798_v16, %v13366_v15  ;;  %v17799_v62 = vld [vmem:[#allocation274_spill] sm:$0xff] }
 0x815   :  { %v2306_v2 = vmul.f32 %v13387_v26, %v17799_v62  ;;  %v17807_v15 = vld [vmem:[#allocation170_spill] sm:$0xff] }
 0x817   :  { %2506 = vadd.xlane.f32.xlu1 %v2300_v17  ;;  %v17800_v17 = vld [vmem:[#allocation266_spill] sm:$0xff] }
 0x818   :  { %2500 = vadd.xlane.f32.xlu0 %v2297_v44  ;;  %v2303_v57 = vmul.f32 %v17800_v17, %v13381_v45  ;;  %v17801_v44 = vld [vmem:[#allocation277_spill] sm:$0xff] }
 0x819   :  { %v2308_v36 = vmul.f32 %v13399_v59, %v17801_v44  ;;  %v17808_v44 = vld [vmem:[#allocation168_spill] sm:$0xff] }
 0x81b   :  { %2510 = vadd.xlane.f32.xlu1 %v2302_v9  ;;  %v17802_v9 = vld [vmem:[#allocation269_spill] sm:$0xff] }
 0x81c   :  { %2504 = vadd.xlane.f32.xlu0 %v2299_v42  ;;  %v2305_v21 = vmul.f32 %v17802_v9, %v13393_v18  ;;  %v17803_v42 = vld [vmem:[#allocation280_spill] sm:$0xff] }
 0x81d   :  { %v2310_v16 = vmul.f32 %v13411_v20, %v17803_v42  ;;  %v17810_v9 = vld [vmem:[#allocation284_spill] sm:$0xff]  ;;  %v17812_v42 = vld [vmem:[#allocation203_spill] sm:$0xff] }
 0x81f   :  { %2514 = vadd.xlane.f32.xlu1 %v2304_v4  ;;  %v17804_v4 = vld [vmem:[#allocation289_spill] sm:$0xff] }
 0x820   :  { %2508 = vadd.xlane.f32.xlu0 %v2301_v40  ;;  %v2307_v62 = vmul.f32 %v17805_v53, %v17804_v4  ;;  %v17806_v40 = vld [vmem:[#allocation282_spill] sm:$0xff] }
 0x821   :  { %v2312_v17 = vmul.f32 %v17807_v15, %v17806_v40 }
 0x823   :  { %2518 = vadd.xlane.f32.xlu1 %v2306_v2  ;;  %v14093_v2 = vpop.xlane.xlu1 %2430 }
 0x824   :  { %2512 = vadd.xlane.f32.xlu0 %v2303_v57  ;;  %v17809_v57 = vld [vmem:[#allocation276_spill] sm:$0xff] }
 0x825   :  { %v2309_v54 = vmul.f32 %v17809_v57, %v17808_v44  ;;  %v2313_v57 = vmul.f32 %v17817_v14, %v17816_v34 }
 0x827   :  { %2522 = vadd.xlane.f32.xlu1 %v2308_v36  ;;  %v17811_v36 = vld [vmem:[#allocation174_spill] sm:$0xff]  ;;  %v14101_v53 = vpop.xlane.xlu1 %2434 }
 0x828   :  { %2516 = vadd.xlane.f32.xlu0 %v2305_v21  ;;  %v2314_v33 = vmul.f32 %v17811_v36, %v17810_v9  ;;  %v17813_v21 = vld [vmem:[#allocation279_spill] sm:$0xff]  ;;  %v17844_v36 = vld [vmem:[#allocation34_spill] sm:$0xff] }
 0x829   :  { %v2311_v20 = vmul.f32 %v17813_v21, %v17812_v42  ;;  %v17819_v9 = vld [vmem:[#allocation283_spill] sm:$0xff]  ;;  %v17821_v42 = vld [vmem:[#allocation285_spill] sm:$0xff] }
 0x82b   :  { %2526 = vadd.xlane.f32.xlu1 %v2310_v16  ;;  %v17814_v16 = vld [vmem:[#allocation286_spill] sm:$0xff] }
 0x82c   :  { %2520 = vadd.xlane.f32.xlu0 %v2307_v62  ;;  %v2316_v40 = vmul.f32 %v17815_v55, %v17814_v16  ;;  %v14105_v62 = vpop.xlane.xlu0 %2432 }
 0x82f   :  { %2530 = vadd.xlane.f32.xlu1 %v2312_v17  ;;  %v14109_v17 = vpop.xlane.xlu1 %2438 }
 0x830   :  { %2524 = vadd.xlane.f32.xlu0 %v2309_v54  ;;  %v17818_v54 = vld [vmem:[#allocation175_spill] sm:$0xff]  ;;  %v14113_v21 = vpop.xlane.xlu0 %2436 }
 0x831   :  { %v2315_v13 = vmul.f32 %v17819_v9, %v17818_v54 }
 0x833   :  { %2534 = vadd.xlane.f32.xlu1 %v2314_v33  ;;  %v17820_v33 = vld [vmem:[#allocation178_spill] sm:$0xff]  ;;  %v14117_v16 = vpop.xlane.xlu1 %2442 }
 0x834   :  { %2528 = vadd.xlane.f32.xlu0 %v2311_v20  ;;  %v2317_v30 = vmul.f32 %v17821_v42, %v17820_v33  ;;  %17822 = vst [vmem:[#allocation227_spill] sm:$0xff] %v14117_v16  ;;  %v14119_v55 = vpop.xlane.xlu0 %2440 }
 0x837   :  { %2538 = vadd.xlane.f32.xlu1 %v2316_v40  ;;  %v14121_v20 = vpop.xlane.xlu1 %2446 }
 0x838   :  { %2532 = vadd.xlane.f32.xlu0 %v2313_v57  ;;  %v14123_v14 = vpop.xlane.xlu0 %2444 }
 0x83c   :  { %2536 = vadd.xlane.f32.xlu0 %v2315_v13 }
 0x840   :  { %2540 = vadd.xlane.f32.xlu0 %v2317_v30 }
 0x84a   :  { %v14125_v40 = vpop.xlane.xlu1 %6373 }
 0x84b   :  { %17823 = vst [vmem:[#allocation222_spill] sm:$0xff] %v14125_v40  ;;  %v6404_v57 = vsub.f32 %v13913_v23, %v14125_v40  ;;  %v14129_v9 = vpop.xlane.xlu0 %6371  ;;  %v17915_v40 = vld [vmem:[#allocation197_spill] sm:$0xff] }
 0x84c   :  { %17824 = vst [vmem:[#allocation229_spill] sm:$0xff] %v14129_v9  ;;  %v6403_v13 = vsub.f32 %v13917_v5, %v14129_v9  ;;  %v17901_v5 = vld [vmem:[#allocation194_spill] sm:$0xff] }
 0x84d   :  { %v6421_v42 = vmul.f32 1.442695, %v6404_v57 }
 0x84e   :  { %v6419_v33 = vmul.f32 1.442695, %v6403_v13  ;;  %v14135_v30 = vpop.xlane.xlu1 %2450 }
 0x850   :  { %9321 = vpow2.f32 %v6419_v33 }
 0x851   :  { %9323 = vpow2.f32 %v6421_v42  ;;  %v14133_v54 = vpop.xlane.xlu0 %6377 }
 0x852   :  { %17825 = vst [vmem:[#allocation224_spill] sm:$0xff] %v14133_v54  ;;  %v6406_v34 = vsub.f32 %v13932_v56, %v14133_v54  ;;  %v17916_v54 = vld [vmem:[#allocation311_spill] sm:$0xff] }
 0x854   :  { %v6425_v44 = vmul.f32 1.442695, %v6406_v34 }
 0x855   :  { %v14139_v7 = vpop.xlane.xlu0 %6375 }
 0x856   :  { %17826 = vst [vmem:[#allocation233_spill] sm:$0xff] %v14139_v7  ;;  %v6405_v4 = vsub.f32 %v13942_v61, %v14139_v7  ;;  %v14143_v37 = vpop.xlane.xlu1 %6379  ;;  %9325 = vpow2.f32 %v6425_v44 }
 0x857   :  { %17827 = vst [vmem:[#allocation226_spill] sm:$0xff] %v14143_v37  ;;  %v6407_v57 = vsub.f32 %v13947_v35, %v14143_v37  ;;  %v17892_v37 = vld [vmem:[#allocation193_spill] sm:$0xff] }
 0x858   :  { %v6423_v33 = vmul.f32 1.442695, %v6405_v4  ;;  %v17831_v4 = vld [vmem:[#allocation10_spill] sm:$0xff] }
 0x859   :  { %v6427_v42 = vmul.f32 1.442695, %v6407_v57  ;;  %v14147_v51 = vpop.xlane.xlu0 %2448 }
 0x85a   :  { %v9322_v13 = vpop.eup %9321  ;;  %9327 = vpow2.f32 %v6423_v33  ;;  %v14149_v59 = vpop.xlane.xlu1 %6383 }
 0x85b   :  { %v9324_v18 = vpop.eup %9323  ;;  %17828 = vst [vmem:[#allocation237_spill] sm:$0xff] %v14149_v59  ;;  %8601 = vmatprep.mubr.f32.mxu1 %v9322_v13  ;;  %9329 = vpow2.f32 %v6427_v42  ;;  %v6409_v34 = vsub.f32 %v13958_v52, %v14149_v59 }
 0x85c   :  { %8602 = vmatmul.mubr.f32.vlgmr.msra.gmra.mrb[80].mxu1 %v9324_v18  ;;  %v17834_v18 = vld [vmem:[#allocation11_spill] sm:$0xff] }
 0x85d   :  { %8908 = vmatpush3.bf16.msra.mxu1 %v17829_v3  ;;  %v14154_v31 = vpop.xlane.xlu0 %6381  ;;  %v6431_v33 = vmul.f32 1.442695, %v6409_v34 }
 0x85e   :  { %17830 = vst [vmem:[#allocation228_spill] sm:$0xff] %v14154_v31  ;;  %8910 = vmatprep.subr.bf16.mxu1 %v17831_v4  ;;  %v6408_v44 = vsub.f32 %v13964_v29, %v14154_v31  ;;  %v14159_v57 = vpop.xlane.xlu1 %6387  ;;  %v17889_v29 = vld [vmem:[#allocation192_spill] sm:$0xff]  ;;  %v17910_v31 = vld [vmem:[#allocation211_spill] sm:$0xff] }
 0x85f   :  { %17832 = vst [vmem:[#allocation241_spill] sm:$0xff] %v14159_v57  ;;  %v6411_v13 = vsub.f32 %v13972_v27, %v14159_v57  ;;  %v17876_v57 = vld [vmem:[#allocation316_spill] sm:$0xff] }
 0x860   :  { %v6429_v42 = vmul.f32 1.442695, %v6408_v44  ;;  %v9326_v26 = vpop.eup %9325 }
 0x861   :  { %8912 = vmatpush3.bf16.msra.mxu1 %v17831_v4  ;;  %v14164_v46 = vpop.xlane.xlu0 %6385  ;;  %v6435_v19 = vmul.f32 1.442695, %v6411_v13 }
 0x862   :  { %17833 = vst [vmem:[#allocation232_spill] sm:$0xff] %v14164_v46  ;;  %8914 = vmatprep.subr.bf16.mxu1 %v17834_v18  ;;  %9331 = vpow2.f32 %v6429_v42  ;;  %v6410_v3 = vsub.f32 %v13980_v11, %v14164_v46  ;;  %v14169_v45 = vpop.xlane.xlu1 %6391  ;;  %v17837_v42 = vld [vmem:[#allocation12_spill] sm:$0xff] }
 0x863   :  { %17835 = vst [vmem:[#allocation246_spill] sm:$0xff] %v14169_v45  ;;  %9333 = vpow2.f32 %v6431_v33  ;;  %v6413_v34 = vsub.f32 %v13985_v22, %v14169_v45  ;;  %v17869_v45 = vld [vmem:[#allocation189_spill] sm:$0xff] }
 0x864   :  { %v9328_v58 = vpop.eup %9327  ;;  %v6433_v44 = vmul.f32 1.442695, %v6410_v3  ;;  %v17840_v3 = vld [vmem:[#allocation13_spill] sm:$0xff] }
 0x865   :  { %8916 = vmatpush3.bf16.msra.mxu1 %v17834_v18  ;;  %v9330_v4 = vpop.eup %9329  ;;  %8604 = vmatprep.mubr.f32.mxu1 %v9328_v58  ;;  %v14174_v0 = vpop.xlane.xlu0 %6389  ;;  %v6439_v33 = vmul.f32 1.442695, %v6413_v34 }
 0x866   :  { %17836 = vst [vmem:[#allocation236_spill] sm:$0xff] %v14174_v0  ;;  %8918 = vmatprep.subr.bf16.mxu1 %v17837_v42  ;;  %9335 = vpow2.f32 %v6433_v44  ;;  %v6412_v49 = vsub.f32 %v13990_v38, %v14174_v0  ;;  %v14179_v28 = vpop.xlane.xlu1 %6395  ;;  %8605 = vmatmul.mubr.f32.gmra.mrb[82].mxu1 %v9326_v26  ;;  %v17841_v26 = vld [vmem:[#allocation36_spill] sm:$0xff]  ;;  %v17875_v38 = vld [vmem:[#allocation190_spill] sm:$0xff] }
 0x867   :  { %17838 = vst [vmem:[#allocation248_spill] sm:$0xff] %v14179_v28  ;;  %9337 = vpow2.f32 %v6435_v19  ;;  %v6415_v13 = vsub.f32 %v13994_v8, %v14179_v28  ;;  %8607 = vmatprep.mubr.f32.mxu1 %v9330_v4  ;;  %v2770_v19 = vadd.s32 4294967288, %v17841_v26  ;;  %v2777_v4 = vadd.s32 4294967280, %v17841_v26  ;;  %v17857_v8 = vld [vmem:[#allocation186_spill] sm:$0xff]  ;;  %v17862_v28 = vld [vmem:[#allocation19_spill] sm:$0xff] }
 0x868   :  { %v6437_v18 = vmul.f32 1.442695, %v6412_v49  ;;  %v2798_v22 = vadd.s32 4294967256, %v17841_v26 }
 0x869   :  { %8920 = vmatpush3.bf16.msra.mxu1 %v17837_v42  ;;  %v14184_v58 = vpop.xlane.xlu0 %6393  ;;  %v6443_v34 = vmul.f32 1.442695, %v6415_v13  ;;  %v17846_v13 = vld [vmem:[#allocation299_spill] sm:$0xff] }
 0x86a   :  { %17839 = vst [vmem:[#allocation240_spill] sm:$0xff] %v14184_v58  ;;  %8922 = vmatprep.subr.bf16.mxu1 %v17840_v3  ;;  %9339 = vpow2.f32 %v6437_v18  ;;  %v6414_v44 = vsub.f32 %v14002_v50, %v14184_v58  ;;  %v14189_v60 = vpop.xlane.xlu1 %2454  ;;  %v17843_v18 = vld [vmem:[#allocation14_spill] sm:$0xff]  ;;  %v17887_v58 = vld [vmem:[#allocation207_spill] sm:$0xff] }
 0x86b   :  { %9341 = vpow2.f32 %v6439_v33  ;;  %v14200_v33 = vsub.s32 %v2770_v19, %v17844_v36  ;;  %v14212_v19 = vsub.s32 %v17841_v26, %v17844_v36 }
 0x86c   :  { %v9332_v39 = vpop.eup %9331  ;;  %v6441_v12 = vmul.f32 1.442695, %v6414_v44  ;;  %v17847_v44 = vld [vmem:[#allocation184_spill] sm:$0xff] }
 0x86d   :  { %8924 = vmatpush3.bf16.msra.mxu1 %v17840_v3  ;;  %v9334_v49 = vpop.eup %9333  ;;  %v14194_v42 = vpop.xlane.xlu0 %6397  ;;  %17845 = vst [vmem:[#allocation245_spill] sm:$0xff] %v14200_v33  ;;  %v2543_v15 = vadd.f32 %v17847_v44, %v17846_v13  ;;  %v2784_v3 = vadd.s32 4294967272, %v17841_v26  ;;  %17849 = vst [vmem:[#allocation247_spill] sm:$0xff] %v14212_v19  ;;  %v14217_v44 = vsub.s32 %v2777_v4, %v17844_v36 }
 0x86e   :  { %8608 = vmatmul.mubr.f32.gmra.mrb[84].mxu1 %v9332_v39  ;;  %17842 = vst [vmem:[#allocation250_spill] sm:$0xff] %v14194_v42  ;;  %8926 = vmatprep.subr.bf16.mxu1 %v17843_v18  ;;  %9343 = vpow2.f32 %v6441_v12  ;;  %v6416_v1 = vsub.f32 %v14008_v41, %v14194_v42  ;;  %v17859_v41 = vld [vmem:[#allocation302_spill] sm:$0xff] }
 0x86f   :  { %8610 = vmatprep.mubr.f32.mxu1 %v9334_v49  ;;  %9345 = vpow2.f32 %v6443_v34  ;;  %v17850_v49 = vld [vmem:[#allocation300_spill] sm:$0xff]  ;;  %17852 = vst [vmem:[#allocation254_spill] sm:$0xff] %v14217_v44  ;;  %v2791_v34 = vadd.s32 4294967264, %v17841_v26  ;;  %v14228_v4 = vsub.s32 %v2784_v3, %v17844_v36 }
 0x870   :  { %v14205_v63 = vpop.xlane.xlu1 %6399  ;;  %v9336_v39 = vpop.eup %9335  ;;  %v6445_v43 = vmul.f32 1.442695, %v6416_v1  ;;  %v2542_v13 = vadd.f32 %v17851_v48, %v17850_v49  ;;  %v2774_v48 = vrot.slane %v2543_v15, %v14200_v33  ;;  %v17856_v49 = vld [vmem:[#allocation301_spill] sm:$0xff] }
 0x871   :  { %17848 = vst [vmem:[#allocation252_spill] sm:$0xff] %v14205_v63  ;;  %v6417_v12 = vsub.f32 %v14012_v47, %v14205_v63  ;;  %8928 = vmatpush3.bf16.msra.mxu1 %v17843_v18  ;;  %v9338_v24 = vpop.eup %9337  ;;  %v14220_v1 = vpop.xlane.xlu0 %6401  ;;  %v2805_v18 = vadd.s32 4294967248, %v17841_v26  ;;  %17855 = vst [vmem:[#allocation257_spill] sm:$0xff] %v14228_v4  ;;  %v14240_v3 = vsub.s32 %v2791_v34, %v17844_v36  ;;  %v17866_v34 = vld [vmem:[#allocation188_spill] sm:$0xff] }
 0x872   :  { %8611 = vmatmul.mubr.f32.gmra.mrb[86].mxu1 %v9336_v39  ;;  %17853 = vst [vmem:[#allocation249_spill] sm:$0xff] %v14220_v1  ;;  %8930 = vmatprep.subr.bf16.mxu1 %v17854_v32  ;;  %9347 = vpow2.f32 %v6445_v43  ;;  %v6418_v47 = vsub.f32 %v14016_v25, %v14220_v1  ;;  %v2545_v39 = vadd.f32 %v17857_v8, %v17856_v49  ;;  %v17860_v43 = vld [vmem:[#allocation187_spill] sm:$0xff]  ;;  %v2819_v8 = vadd.s32 4294967232, %v17841_v26  ;;  %v17868_v1 = vld [vmem:[#allocation304_spill] sm:$0xff] }
 0x873   :  { %v6447_v6 = vmul.f32 1.442695, %v6417_v12  ;;  %8613 = vmatprep.mubr.f32.mxu1 %v9338_v24  ;;  %v2544_v12 = vadd.f32 %v17860_v43, %v17859_v41  ;;  %v2769_v24 = vrot.slane %v2542_v13, %v14212_v19  ;;  %17861 = vst [vmem:[#allocation261_spill] sm:$0xff] %v14240_v3  ;;  %v14247_v41 = vsub.s32 %v2805_v18, %v17844_v36 }
 0x874   :  { %v14233_v63 = vpop.xlane.xlu1 %2458  ;;  %v9340_v27 = vpop.eup %9339  ;;  %v6449_v25 = vmul.f32 1.442695, %v6418_v47  ;;  %v14253_v13 = vsub.s32 %v2798_v22, %v17844_v36  ;;  %v2546_v35 = vadd.f32 %v17869_v45, %v17868_v1  ;;  %v14265_v22 = vsub.s32 %v2819_v8, %v17844_v36 }
 0x875   :  { %17858 = vst [vmem:[#allocation251_spill] sm:$0xff] %v14233_v63  ;;  %9349 = vpow2.f32 %v6447_v6  ;;  %8932 = vmatpush3.bf16.msra.mxu1 %v17854_v32  ;;  %v9342_v15 = vpop.eup %9341  ;;  %v14243_v49 = vpop.xlane.xlu0 %2452  ;;  %17863 = vst [vmem:[#allocation253_spill] sm:$0xff] %v14247_v41  ;;  %v2812_v32 = vadd.s32 4294967240, %v17841_v26  ;;  %v2776_v47 = vsel %vm2775_vm5, %v2774_v48, %v2769_v24  ;;  %v2788_v6 = vrot.slane %v2545_v39, %v14228_v4  ;;  %v17872_v24 = vld [vmem:[#allocation204_spill] sm:$0xff] }
 0x876   :  { %8614 = vmatmul.mubr.f32.gmra.mrb[88].mxu1 %v9340_v27  ;;  %8934 = vmatprep.subr.bf16.mxu1 %v17862_v28  ;;  %9351 = vpow2.f32 %v6449_v25  ;;  %17864 = vst [vmem:[#allocation264_spill] sm:$0xff] %v14253_v13  ;;  %v17865_v27 = vld [vmem:[#allocation303_spill] sm:$0xff]  ;;  %v2781_v18 = vrot.slane %v2544_v12, %v14217_v44  ;;  %v2833_v25 = vadd.s32 4294967216, %v17841_v26  ;;  %17870 = vst [vmem:[#allocation267_spill] sm:$0xff] %v14265_v22  ;;  %v2826_v39 = vadd.s32 4294967224, %v17841_v26 }
 0x877   :  { %8616 = vmatprep.mubr.f32.mxu1 %v9342_v15  ;;  %v2547_v43 = vadd.f32 %v17866_v34, %v17865_v27  ;;  %v17871_v15 = vld [vmem:[#allocation315_spill] sm:$0xff]  ;;  %v14274_v1 = vsub.s32 %v2812_v32, %v17844_v36  ;;  %v17874_v34 = vld [vmem:[#allocation305_spill] sm:$0xff] }
 0x878   :  { %v14257_v52 = vpop.xlane.xlu1 %2462  ;;  %v9344_v50 = vpop.eup %9343  ;;  %v2559_v27 = vadd.f32 %v17872_v24, %v17871_v15  ;;  %v2783_v45 = vsel %vm2782_vm7, %v2781_v18, %v2776_v47  ;;  %v2549_v42 = vadd.f32 %v17875_v38, %v17874_v34  ;;  %v17877_v15 = vld [vmem:[#allocation205_spill] sm:$0xff]  ;;  %v2795_v47 = vrot.slane %v2546_v35, %v14240_v3  ;;  %v17879_v18 = vld [vmem:[#allocation306_spill] sm:$0xff]  ;;  %v17880_v32 = vld [vmem:[#allocation191_spill] sm:$0xff] }
 0x879   :  { %17867 = vst [vmem:[#allocation256_spill] sm:$0xff] %v14257_v52  ;;  %8936 = vmatpush3.bf16.msra.mxu1 %v17862_v28  ;;  %v9346_v48 = vpop.eup %9345  ;;  %v14270_v12 = vpop.xlane.xlu0 %2456  ;;  %17873 = vst [vmem:[#allocation259_spill] sm:$0xff] %v14274_v1  ;;  %v2790_v28 = vsel %vm2789_vm8, %v2788_v6, %v2783_v45  ;;  %v2802_v8 = vrot.slane %v2547_v43, %v14253_v13  ;;  %v2548_v11 = vadd.f32 %v17880_v32, %v17879_v18  ;;  %v17884_v45 = vld [vmem:[#allocation206_spill] sm:$0xff]  ;;  %v17958_v52 = vld [vmem:[#allocation388_spill] sm:$0xff] }
 0x87a   :  { %8617 = vmatmul.mubr.f32.gmra.mrb[90].mxu1 %v9344_v50  ;;  %v2558_v50 = vadd.f32 %v17877_v15, %v17876_v57  ;;  %v2847_v6 = vadd.s32 4294967200, %v17841_v26  ;;  %v14292_v43 = vsub.s32 %v2826_v39, %v17844_v36  ;;  %v2882_v38 = vrot.slane %v2559_v27, %v14200_v33  ;;  %v17883_v57 = vld [vmem:[#allocation317_spill] sm:$0xff]  ;;  %v17886_v32 = vld [vmem:[#allocation318_spill] sm:$0xff]  ;;  %v17888_v27 = vld [vmem:[#allocation307_spill] sm:$0xff] }
 0x87b   :  { %8619 = vmatprep.mubr.f32.mxu1 %v9346_v48  ;;  %v14288_v48 = vsub.s32 %v2833_v25, %v17844_v36  ;;  %v2561_v34 = vadd.f32 %v17884_v45, %v17883_v57  ;;  %v2797_v18 = vsel %vm2796_vm12, %v2795_v47, %v2790_v28  ;;  %v2840_v25 = vadd.s32 4294967208, %v17841_v26  ;;  %v17891_v47 = vld [vmem:[#allocation308_spill] sm:$0xff] }
 0x87c   :  { %v14282_v24 = vpop.xlane.xlu1 %2466  ;;  %v9348_v61 = vpop.eup %9347  ;;  %17882 = vst [vmem:[#allocation274_spill] sm:$0xff] %v14292_v43  ;;  %v2560_v59 = vadd.f32 %v17887_v58, %v17886_v32  ;;  %v2804_v39 = vsel %vm2803_vm15, %v2802_v8, %v2797_v18  ;;  %v2816_v23 = vrot.slane %v2549_v42, %v14274_v1  ;;  %v2551_v0 = vadd.f32 %v17889_v29, %v17888_v27  ;;  %v17895_v18 = vld [vmem:[#allocation208_spill] sm:$0xff] }
 0x87d   :  { %17878 = vst [vmem:[#allocation271_spill] sm:$0xff] %v14282_v24  ;;  %17881 = vst [vmem:[#allocation263_spill] sm:$0xff] %v14288_v48  ;;  %v14297_v15 = vpop.xlane.xlu0 %2460  ;;  %v2809_v28 = vrot.slane %v2548_v11, %v14247_v41  ;;  %v2550_v56 = vadd.f32 %v17892_v37, %v17891_v47  ;;  %v14314_v58 = vsub.s32 %v2847_v6, %v17844_v36  ;;  %v2861_v8 = vadd.s32 4294967184, %v17841_v26  ;;  %v17898_v27 = vld [vmem:[#allocation320_spill] sm:$0xff]  ;;  %v17899_v47 = vld [vmem:[#allocation209_spill] sm:$0xff] }
 0x87e   :  { %8620 = vmatmul.mubr.f32.gmra.mrb[92].mxu1 %v9348_v61  ;;  %17885 = vst [vmem:[#allocation266_spill] sm:$0xff] %v14297_v15  ;;  %v2878_v61 = vrot.slane %v2558_v50, %v14212_v19  ;;  %v2892_v29 = vrot.slane %v2561_v34, %v14228_v4  ;;  %v17894_v50 = vld [vmem:[#allocation319_spill] sm:$0xff]  ;;  %v14325_v37 = vsub.s32 %v2840_v25, %v17844_v36  ;;  %v17903_v25 = vld [vmem:[#allocation310_spill] sm:$0xff] }
 0x87f   :  { %v9350_v35 = vpop.eup %9349  ;;  %17893 = vst [vmem:[#allocation269_spill] sm:$0xff] %v14314_v58  ;;  %v2563_v32 = vadd.f32 %v17895_v18, %v17894_v50  ;;  %v2811_v11 = vsel %vm2810_vm14, %v2809_v28, %v2804_v39  ;;  %v2887_v6 = vrot.slane %v2560_v59, %v14217_v44  ;;  %v2562_v46 = vadd.f32 %v17899_v47, %v17898_v27  ;;  %v17904_v28 = vld [vmem:[#allocation195_spill] sm:$0xff] }
 0x880   :  { %v14308_v57 = vpop.xlane.xlu1 %2470  ;;  %8622 = vmatprep.mubr.f32.mxu1 %v9350_v35  ;;  %v9352_v45 = vpop.eup %9351  ;;  %v2883_v42 = vsel %vm2775_vm5, %v2882_v38, %v2878_v61  ;;  %17897 = vst [vmem:[#allocation273_spill] sm:$0xff] %v14325_v37  ;;  %v2818_v38 = vsel %vm2817_vm13, %v2816_v23, %v2811_v11  ;;  %v2830_v34 = vrot.slane %v2551_v0, %v14292_v43  ;;  %v17900_v61 = vld [vmem:[#allocation309_spill] sm:$0xff]  ;;  %v17907_v11 = vld [vmem:[#allocation212_spill] sm:$0xff] }
 0x881   :  { %17890 = vst [vmem:[#allocation277_spill] sm:$0xff] %v14308_v57  ;;  %v14321_v35 = vpop.xlane.xlu0 %2464  ;;  %v2553_v50 = vadd.f32 %v17901_v5, %v17900_v61  ;;  %v2823_v39 = vrot.slane %v2550_v56, %v14265_v22  ;;  %v2552_v7 = vadd.f32 %v17904_v28, %v17903_v25  ;;  %v2888_v59 = vsel %vm2782_vm7, %v2887_v6, %v2883_v42  ;;  %v17906_v5 = vld [vmem:[#allocation321_spill] sm:$0xff]  ;;  %v17909_v28 = vld [vmem:[#allocation322_spill] sm:$0xff] }
 0x882   :  { %8623 = vmatmul.mubr.f32.gmra.mrb[94].mxu1 %v9352_v45  ;;  %17896 = vst [vmem:[#allocation280_spill] sm:$0xff] %v14321_v35  ;;  %v2854_v45 = vadd.s32 4294967192, %v17841_v26  ;;  %v14342_v27 = vsub.s32 %v2861_v8, %v17844_v36  ;;  %v2893_v23 = vsel %vm2789_vm8, %v2892_v29, %v2888_v59  ;;  %v2902_v0 = vrot.slane %v2563_v32, %v14253_v13  ;;  %v17912_v32 = vld [vmem:[#allocation331_spill] sm:$0xff]  ;;  %v17913_v59 = vld [vmem:[#allocation217_spill] sm:$0xff] }
 0x883   :  { %v2565_v47 = vadd.f32 %v17907_v11, %v17906_v5  ;;  %v2825_v56 = vsel %vm2824_vm0, %v2823_v39, %v2818_v38  ;;  %v2897_v25 = vrot.slane %v2562_v46, %v14240_v3  ;;  %v2564_v42 = vadd.f32 %v17910_v31, %v17909_v28  ;;  %v17914_v39 = vld [vmem:[#allocation312_spill] sm:$0xff] }
 0x884   :  { %v14335_v18 = vpop.xlane.xlu1 %2474  ;;  %17905 = vst [vmem:[#allocation276_spill] sm:$0xff] %v14342_v27  ;;  %v2832_v8 = vsel %vm16624_vm1, %v2830_v34, %v2825_v56  ;;  %v2844_v6 = vrot.slane %v2553_v50, %v14325_v37  ;;  %v14357_v29 = vsub.s32 %v2854_v45, %v17844_v36  ;;  %v2575_v5 = vadd.f32 %v17913_v59, %v17912_v32  ;;  %v17918_v56 = vld [vmem:[#allocation323_spill] sm:$0xff]  ;;  %v17919_v28 = vld [vmem:[#allocation216_spill] sm:$0xff]  ;;  %v17921_v59 = vld [vmem:[#allocation389_spill] sm:$0xff] }
 0x885   :  { %17902 = vst [vmem:[#allocation282_spill] sm:$0xff] %v14335_v18  ;;  %v14348_v61 = vpop.xlane.xlu0 %2468  ;;  %v2837_v38 = vrot.slane %v2552_v7, %v14288_v48  ;;  %v2554_v46 = vadd.f32 %v17915_v40, %v17914_v39  ;;  %v2555_v31 = vadd.f32 %v17917_v10, %v17916_v54  ;;  %v2898_v34 = vsel %vm2796_vm12, %v2897_v25, %v2893_v23  ;;  %v17920_v32 = vld [vmem:[#allocation332_spill] sm:$0xff]  ;;  %v17924_v23 = vld [vmem:[#allocation210_spill] sm:$0xff]  ;;  %v17925_v39 = vld [vmem:[#allocation333_spill] sm:$0xff] }
 0x886   :  { %17908 = vst [vmem:[#allocation284_spill] sm:$0xff] %v14348_v61  ;;  %17911 = vst [vmem:[#allocation279_spill] sm:$0xff] %v14357_v29  ;;  %v2903_v50 = vsel %vm2803_vm15, %v2902_v0, %v2898_v34  ;;  %v2912_v45 = vrot.slane %v2565_v47, %v14274_v1  ;;  %v2567_v9 = vadd.f32 %v17919_v28, %v17918_v56  ;;  %v2868_v40 = vadd.s32 4294967176, %v17841_v26  ;;  %v17923_v54 = vld [vmem:[#allocation324_spill] sm:$0xff] }
 0x887   :  { %v2574_v18 = vadd.f32 %v17921_v59, %v17920_v32  ;;  %v2839_v7 = vsel %vm16622_vm3, %v2837_v38, %v2832_v8  ;;  %v2907_v10 = vrot.slane %v2564_v42, %v14247_v41  ;;  %v2566_v25 = vadd.f32 %v17924_v23, %v17923_v54  ;;  %v17926_v34 = vld [vmem:[#allocation392_spill] sm:$0xff]  ;;  %v17927_v8 = vld [vmem:[#allocation314_spill] sm:$0xff]  ;;  %v17928_v38 = vld [vmem:[#allocation201_spill] sm:$0xff] }
 0x888   :  { %v14361_v11 = vpop.xlane.xlu1 %2478  ;;  %v2846_v0 = vsel %vm16623_vm2, %v2844_v6, %v2839_v7  ;;  %v2961_v47 = vrot.slane %v2575_v5, %v14200_v33  ;;  %v2577_v56 = vadd.f32 %v17926_v34, %v17925_v39  ;;  %v2851_v32 = vrot.slane %v2554_v46, %v14314_v58  ;;  %v17929_v59 = vld [vmem:[#allocation334_spill] sm:$0xff] }
 0x889   :  { %v14375_v61 = vpop.xlane.xlu0 %2472  ;;  %v14391_v26 = vadd.f32 %v17928_v38, %v17927_v8  ;;  %v2908_v42 = vsel %vm2810_vm14, %v2907_v10, %v2903_v50  ;;  %v17930_v54 = vld [vmem:[#allocation390_spill] sm:$0xff]  ;;  %v2858_v6 = vrot.slane %v2555_v31, %v14357_v29  ;;  %v2922_v7 = vrot.slane %v2567_v9, %v14292_v43  ;;  %v17933_v10 = vld [vmem:[#allocation325_spill] sm:$0xff]  ;;  %v17934_v38 = vld [vmem:[#allocation387_spill] sm:$0xff] }
 0x88a   :  { %17922 = vst [vmem:[#allocation286_spill] sm:$0xff] %v14375_v61  ;;  %v2576_v23 = vadd.f32 %v17930_v54, %v17929_v59  ;;  %v2913_v5 = vsel %vm2817_vm13, %v2912_v45, %v2908_v42  ;;  %v2957_v39 = vrot.slane %v2574_v18, %v14212_v19  ;;  %v2853_v46 = vsel %vm16625_vm9, %v2851_v32, %v2846_v0  ;;  %v17935_v54 = vld [vmem:[#allocation326_spill] sm:$0xff]  ;;  %v17937_v18 = vld [vmem:[#allocation335_spill] sm:$0xff]  ;;  %v17938_v42 = vld [vmem:[#allocation393_spill] sm:$0xff] }
 0x88b   :  { %v14404_v8 = vsub.s32 %v2868_v40, %v17844_v36  ;;  %v2917_v50 = vrot.slane %v2566_v25, %v14265_v22  ;;  %v2569_v59 = vadd.f32 %v17934_v38, %v17933_v10  ;;  %v17936_v31 = vld [vmem:[#allocation214_spill] sm:$0xff]  ;;  %v2971_v9 = vrot.slane %v2577_v56, %v14228_v4  ;;  %v17940_v25 = vld [vmem:[#allocation336_spill] sm:$0xff]  ;;  %v17941_v32 = vld [vmem:[#allocation391_spill] sm:$0xff] }
 0x88c   :  { %v14386_v28 = vpop.xlane.xlu1 %2482  ;;  %v2568_v61 = vadd.f32 %v17936_v31, %v17935_v54  ;;  %v2962_v45 = vsel %vm2775_vm5, %v2961_v47, %v2957_v39  ;;  %v2966_v0 = vrot.slane %v2576_v23, %v14217_v44  ;;  %v2578_v36 = vadd.f32 %v17941_v32, %v17940_v25  ;;  %v17942_v10 = vld [vmem:[#allocation347_spill] sm:$0xff]  ;;  %v17943_v38 = vld [vmem:[#allocation406_spill] sm:$0xff]  ;;  %v17944_v54 = vld [vmem:[#allocation328_spill] sm:$0xff] }
 0x88d   :  { %v14400_v34 = vpop.xlane.xlu0 %2476  ;;  %17932 = vst [vmem:[#allocation283_spill] sm:$0xff] %v14404_v8  ;;  %v2918_v40 = vsel %vm2824_vm0, %v2917_v50, %v2913_v5  ;;  %v2591_v24 = vadd.f32 %v17943_v38, %v17942_v10  ;;  %v14426_v56 = vsel %vm2859_vm10, %v2858_v6, %v2853_v46  ;;  %v17945_v31 = vld [vmem:[#allocation218_spill] sm:$0xff]  ;;  %v2932_v23 = vrot.slane %v2569_v59, %v14325_v37  ;;  %v17946_v50 = vld [vmem:[#allocation327_spill] sm:$0xff]  ;;  %v17948_v10 = vld [vmem:[#allocation348_spill] sm:$0xff] }
 0x88e   :  { %17931 = vst [vmem:[#allocation281_spill] sm:$0xff] %v14400_v34  ;;  %v2579_v34 = vadd.f32 %v17938_v42, %v17937_v18  ;;  %v2923_v39 = vsel %vm16624_vm1, %v2922_v7, %v2918_v40  ;;  %v2570_v18 = vadd.f32 %v17945_v31, %v17944_v54  ;;  %v17947_v42 = vld [vmem:[#allocation213_spill] sm:$0xff]  ;;  %v2967_v32 = vsel %vm2782_vm7, %v2966_v0, %v2962_v45  ;;  %v17949_v38 = vld [vmem:[#allocation399_spill] sm:$0xff]  ;;  %v17951_v54 = vld [vmem:[#allocation396_spill] sm:$0xff] }
 0x88f   :  { %v2571_v25 = vadd.f32 %v17947_v42, %v17946_v50  ;;  %v2590_v47 = vadd.f32 %v17949_v38, %v17948_v10  ;;  %v2927_v6 = vrot.slane %v2568_v61, %v14288_v48  ;;  %v2972_v46 = vsel %vm2789_vm8, %v2971_v9, %v2967_v32  ;;  %v17950_v40 = vld [vmem:[#allocation337_spill] sm:$0xff]  ;;  %v17953_v50 = vld [vmem:[#allocation338_spill] sm:$0xff]  ;;  %v17954_v42 = vld [vmem:[#allocation219_spill] sm:$0xff] }
 0x890   :  { %v14415_v57 = vpop.xlane.xlu1 %2486  ;;  %v2981_v7 = vrot.slane %v2579_v34, %v14253_v13  ;;  %v2581_v31 = vadd.f32 %v17951_v54, %v17950_v40  ;;  %v2976_v59 = vrot.slane %v2578_v36, %v14240_v3  ;;  %v2580_v45 = vadd.f32 %v17954_v42, %v17953_v50  ;;  %v17955_v10 = vld [vmem:[#allocation349_spill] sm:$0xff]  ;;  %v17956_v38 = vld [vmem:[#allocation407_spill] sm:$0xff]  ;;  %v17957_v32 = vld [vmem:[#allocation330_spill] sm:$0xff] }
 0x891   :  { %17939 = vst [vmem:[#allocation285_spill] sm:$0xff] %v14415_v57  ;;  %v14431_v5 = vpop.xlane.xlu0 %2480  ;;  %v3040_v0 = vrot.slane %v2591_v24, %v14200_v33  ;;  %v2593_v61 = vadd.f32 %v17956_v38, %v17955_v10  ;;  %v2937_v9 = vrot.slane %v2570_v18, %v14314_v58  ;;  %v2928_v34 = vsel %vm16622_vm3, %v2927_v6, %v2923_v39  ;;  %v17959_v54 = vld [vmem:[#allocation350_spill] sm:$0xff]  ;;  %v17961_v10 = vld [vmem:[#allocation340_spill] sm:$0xff]  ;;  %v17962_v39 = vld [vmem:[#allocation221_spill] sm:$0xff] }
 0x892   :  { %v2572_v40 = vadd.f32 %v17958_v52, %v17957_v32  ;;  %v2933_v36 = vsel %vm16623_vm2, %v2932_v23, %v2928_v34  ;;  %v2942_v50 = vrot.slane %v2571_v25, %v14357_v29  ;;  %v2977_v24 = vsel %vm2796_vm12, %v2976_v59, %v2972_v46  ;;  %v17963_v38 = vld [vmem:[#allocation339_spill] sm:$0xff]  ;;  %v17964_v32 = vld [vmem:[#allocation398_spill] sm:$0xff] }
 0x893   :  { %v3036_v42 = vrot.slane %v2590_v47, %v14212_v19  ;;  %v2982_v18 = vsel %vm2803_vm15, %v2981_v7, %v2977_v24  ;;  %v2582_v6 = vadd.f32 %v17962_v39, %v17961_v10  ;;  %v2991_v52 = vrot.slane %v2581_v31, %v14274_v1  ;;  %v17966_v59 = vld [vmem:[#allocation351_spill] sm:$0xff]  ;;  %v17967_v47 = vld [vmem:[#allocation408_spill] sm:$0xff]  ;;  %v17968_v7 = vld [vmem:[#allocation313_spill] sm:$0xff] }
 0x894   :  { %v14444_v35 = vpop.xlane.xlu1 %2490  ;;  %v2986_v23 = vrot.slane %v2580_v45, %v14247_v41  ;;  %v3050_v46 = vrot.slane %v2593_v61, %v14228_v4  ;;  %v2595_v34 = vadd.f32 %v17967_v47, %v17966_v59  ;;  %v17969_v24 = vld [vmem:[#allocation200_spill] sm:$0xff]  ;;  %v2938_v10 = vsel %vm16625_vm9, %v2937_v9, %v2933_v36  ;;  %v17973_v61 = vld [vmem:[#allocation329_spill] sm:$0xff] }
 0x895   :  { %17952 = vst [vmem:[#allocation9_spill] sm:$0xff] %v14444_v35  ;;  %v17960_v35 = vld [vmem:[#allocation400_spill] sm:$0xff]  ;;  %v14458_v15 = vpop.xlane.xlu0 %2484  ;;  %v3041_v25 = vsel %vm2775_vm5, %v3040_v0, %v3036_v42  ;;  %v2557_v63 = vadd.f32 %v17969_v24, %v17968_v7  ;;  %v2947_v45 = vrot.slane %v2572_v40, %v14342_v27  ;;  %v2943_v0 = vsel %vm2859_vm10, %v2942_v50, %v2938_v10  ;;  %v17974_v42 = vld [vmem:[#allocation215_spill] sm:$0xff]  ;;  %v17976_v24 = vld [vmem:[#allocation341_spill] sm:$0xff] }
 0x896   :  { %v2592_v57 = vadd.f32 %v17960_v35, %v17959_v54  ;;  %v2583_v35 = vadd.f32 %v17964_v32, %v17963_v38  ;;  %v17970_v39 = vld [vmem:[#allocation352_spill] sm:$0xff]  ;;  %v17971_v38 = vld [vmem:[#allocation402_spill] sm:$0xff]  ;;  %v2573_v16 = vadd.f32 %v17974_v42, %v17973_v61  ;;  %v2987_v59 = vsel %vm2810_vm14, %v2986_v23, %v2982_v18  ;;  %v17979_v61 = vld [vmem:[#allocation409_spill] sm:$0xff] }
 0x897   :  { %v2594_v32 = vadd.f32 %v17971_v38, %v17970_v39  ;;  %v2996_v47 = vrot.slane %v2582_v6, %v14265_v22  ;;  %v2992_v9 = vsel %vm2817_vm13, %v2991_v52, %v2987_v59  ;;  %v17977_v39 = vld [vmem:[#allocation401_spill] sm:$0xff]  ;;  %v3060_v10 = vrot.slane %v2595_v34, %v14253_v13  ;;  %v17980_v23 = vld [vmem:[#allocation342_spill] sm:$0xff]  ;;  %v17983_v59 = vld [vmem:[#allocation404_spill] sm:$0xff] }
 0x898   :  { %v14470_v54 = vpop.xlane.xlu1 %2494  ;;  %v3045_v31 = vrot.slane %v2592_v57, %v14217_v44  ;;  %v3001_v57 = vrot.slane %v2583_v35, %v14292_v43  ;;  %v2585_v40 = vadd.f32 %v17977_v39, %v17976_v24  ;;  %v17978_v38 = vld [vmem:[#allocation353_spill] sm:$0xff]  ;;  %v17981_v6 = vld [vmem:[#allocation394_spill] sm:$0xff]  ;;  %v2952_v34 = vrot.slane %v2573_v16, %v14404_v8  ;;  %v17987_v16 = vld [vmem:[#allocation403_spill] sm:$0xff] }
 0x899   :  { %17965 = vst [vmem:[#allocation10_spill] sm:$0xff] %v14470_v54  ;;  %v14483_v54 = vpop.xlane.xlu0 %2488  ;;  %v2597_v18 = vadd.f32 %v17979_v61, %v17978_v38  ;;  %v2584_v42 = vadd.f32 %v17981_v6, %v17980_v23  ;;  %v3055_v52 = vrot.slane %v2594_v32, %v14240_v3  ;;  %v17982_v35 = vld [vmem:[#allocation354_spill] sm:$0xff]  ;;  %v17985_v24 = vrot.slane %v14391_v26, %v14342_v27  ;;  %v17986_v23 = vld [vmem:[#allocation343_spill] sm:$0xff] }
 0x89a   :  { %17972 = vst [vmem:[#allocation11_spill] sm:$0xff] %v14483_v54  ;;  %v3046_v36 = vsel %vm2782_vm7, %v3045_v31, %v3041_v25  ;;  %v2596_v25 = vadd.f32 %v17983_v59, %v17982_v35  ;;  %v17984_v31 = vld [vmem:[#allocation356_spill] sm:$0xff]  ;;  %v2948_v39 = vsel %vm2866_vm4, %v2947_v45, %v2943_v0  ;;  %v2587_v6 = vadd.f32 %v17987_v16, %v17986_v23  ;;  %v17989_v35 = vld [vmem:[#allocation395_spill] sm:$0xff]  ;;  %v17990_v59 = vld [vmem:[#allocation358_spill] sm:$0xff] }
 0x89b   :  { %v3051_v50 = vsel %vm2789_vm8, %v3050_v46, %v3046_v36  ;;  %v2872_v46 = vrot.slane %v2557_v63, %v14404_v8  ;;  %v2997_v36 = vsel %vm2824_vm0, %v2996_v47, %v2992_v9  ;;  %v2867_v32 = vsel %vm2866_vm4, %v17985_v24, %v14426_v56  ;;  %v17988_v56 = vld [vmem:[#allocation344_spill] sm:$0xff] }
 0x89c   :  { %v14494_v7 = vpop.xlane.xlu1 %2498  ;;  %v3002_v38 = vsel %vm16624_vm1, %v3001_v57, %v2997_v36  ;;  %v3011_v63 = vrot.slane %v2585_v40, %v14325_v37  ;;  %v3070_v9 = vrot.slane %v2597_v18, %v14274_v1  ;;  %v3006_v26 = vrot.slane %v2584_v42, %v14288_v48  ;;  %v17991_v42 = vld [vmem:[#allocation346_spill] sm:$0xff] }
 0x89d   :  { %17975 = vst [vmem:[#allocation12_spill] sm:$0xff] %v14494_v7  ;;  %v2598_v7 = vadd.f32 %v14093_v2, %v17984_v31  ;;  %v14509_v54 = vpop.xlane.xlu0 %2492  ;;  %v3056_v2 = vsel %vm2796_vm12, %v3055_v52, %v3051_v50  ;;  %v2586_v45 = vadd.f32 %v17989_v35, %v17988_v56  ;;  %v3065_v0 = vrot.slane %v2596_v25, %v14247_v41  ;;  %v17992_v31 = vld [vmem:[#allocation397_spill] sm:$0xff]  ;;  %v17993_v25 = vld [vmem:[#allocation355_spill] sm:$0xff]  ;;  %v17996_v56 = vld [vmem:[#allocation364_spill] sm:$0xff] }
 0x89e   :  { %v3061_v47 = vsel %vm2803_vm15, %v3060_v10, %v3056_v2  ;;  %v2874_v40 = vsel %vm2873_vm11, %v2872_v46, %v2867_v32  ;;  %v2953_v52 = vsel %vm2873_vm11, %v2952_v34, %v2948_v39  ;;  %v2600_v10 = vadd.f32 %v14101_v53, %v17990_v59  ;;  %v17994_v39 = vld [vmem:[#allocation363_spill] sm:$0xff]  ;;  %v17997_v35 = vld [vmem:[#allocation345_spill] sm:$0xff] }
 0x89f   :  { %v3075_v57 = vrot.slane %v2598_v7, %v14265_v22  ;;  %v3007_v18 = vsel %vm16622_vm3, %v3006_v26, %v3002_v38  ;;  %v2588_v36 = vadd.f32 %v17992_v31, %v17991_v42  ;;  %v3066_v24 = vsel %vm2810_vm14, %v3065_v0, %v3061_v47  ;;  %v17995_v26 = vld [vmem:[#allocation360_spill] sm:$0xff]  ;;  %v17998_v0 = vld [vmem:[#allocation405_spill] sm:$0xff]  ;;  %v18001_v31 = vld [vmem:[#allocation359_spill] sm:$0xff] }
 0x8a0   :  { %v14522_v61 = vpop.xlane.xlu1 %2502  ;;  %v2599_v7 = vadd.f32 %v14105_v62, %v17993_v25  ;;  %v3012_v46 = vsel %vm16623_vm2, %v3011_v63, %v3007_v18  ;;  %v3021_v32 = vrot.slane %v2587_v6, %v14357_v29  ;;  %v3071_v34 = vsel %vm2817_vm13, %v3070_v9, %v3066_v24  ;;  %v18000_v18 = vld [vmem:[#allocation365_spill] sm:$0xff] }
 0x8a1   :  { %v14534_v50 = vpop.xlane.xlu0 %2496  ;;  %v2607_v53 = vadd.f32 %v14147_v51, %v17994_v39  ;;  %v14553_v38 = vsel %vm3349_vm6, %v2953_v52, %v2874_v40  ;;  %v3016_v23 = vrot.slane %v2586_v45, %v14314_v58  ;;  %v3076_v16 = vsel %vm2824_vm0, %v3075_v57, %v3071_v34  ;;  %v17999_v40 = vld [vmem:[#allocation357_spill] sm:$0xff] }
 0x8a2   :  { %v3085_v62 = vrot.slane %v2600_v10, %v14288_v48  ;;  %v2602_v63 = vadd.f32 %v14109_v17, %v17995_v26  ;;  %v2606_v6 = vadd.f32 %v14121_v20, %v17996_v56  ;;  %v9683_v9 = vmov 6   ;;  %v18003_v34 = vld [vmem:[#allocation377_spill] sm:$0xff] }
 0x8a3   :  { %8963 = vset.pattern.permute.xlu0 %v9683_v9  ;;  %8964 = vset.pattern.permute.xlu1 %v9683_v9  ;;  %v3017_v51 = vsel %vm16625_vm9, %v3016_v23, %v3012_v46  ;;  %v14567_v45 = vadd.f32 %v17998_v0, %v17997_v35  ;;  %v3080_v57 = vrot.slane %v2599_v7, %v14292_v43  ;;  %v18002_v46 = vld [vmem:[#allocation366_spill] sm:$0xff]  ;;  %v18006_v9 = vld [vmem:[#allocation368_spill] sm:$0xff]  ;;  %vm3351_vm6 = vcmask 1043459  }
 0x8a4   :  { %v14546_v2 = vpop.xlane.xlu1 %2506  ;;  %v2601_v52 = vadd.f32 %v14113_v21, %v17999_v40  ;;  %v3026_v17 = vrot.slane %v2588_v36, %v14342_v27  ;;  %v3022_v10 = vsel %vm2859_vm10, %v3021_v32, %v3017_v51  ;;  %v3119_v20 = vrot.slane %v2607_v53, %v14200_v33  ;;  %v18004_v36 = vld [vmem:[#allocation361_spill] sm:$0xff]  ;;  %v18008_v40 = vld [vmem:[#allocation379_spill] sm:$0xff] }
 0x8a5   :  { %v14557_v47 = vpop.xlane.xlu0 %2500  ;;  %v2609_v42 = vadd.f32 %v14243_v49, %v18000_v18  ;;  %v2603_v24 = vadd.f32 %v14119_v55, %v18001_v31  ;;  %v3081_v25 = vsel %vm16624_vm1, %v3080_v57, %v3076_v16  ;;  %v2608_v7 = vadd.f32 %v14135_v30, %v18002_v46  ;;  %v18005_v16 = vld [vmem:[#allocation383_spill] sm:$0xff]  ;;  %v18010_v18 = vld [vmem:[#allocation362_spill] sm:$0xff] }
 0x8a6   :  { %v2623_v21 = vadd.f32 %v14431_v5, %v18003_v34  ;;  %v14588_v32 = vadd.f32 %v14123_v14, %v18004_v36  ;;  %v3086_v53 = vsel %vm16622_vm3, %v3085_v62, %v3081_v25  ;;  %v3095_v49 = vrot.slane %v2602_v63, %v14314_v58  ;;  %v18012_v25 = vld [vmem:[#allocation371_spill] sm:$0xff] }
 0x8a7   :  { %v3115_v55 = vrot.slane %v2606_v6, %v14212_v19  ;;  %v14594_v23 = vsel %vm2866_vm4, %v3026_v17, %v3022_v10  ;;  %v3031_v30 = vrot.slane %v14567_v45, %v14404_v8  ;;  %v3090_v5 = vrot.slane %v2601_v52, %v14325_v37  ;;  %v18007_v6 = vld [vmem:[#allocation367_spill] sm:$0xff] }
 0x8a8   :  { %v2511_v59 = vpop.xlane.xlu1 %2510  ;;  %v2622_v26 = vadd.f32 %v14361_v11, %v18005_v16  ;;  %v2610_v62 = vadd.f32 %v14189_v60, %v18006_v9  ;;  %v3129_v63 = vrot.slane %v2609_v42, %v14228_v4  ;;  %v2611_v51 = vadd.f32 %v14270_v12, %v18007_v6  ;;  %v18011_v42 = vld [vmem:[#allocation227_spill] sm:$0xff] }
 0x8a9   :  { %v14584_v39 = vpop.xlane.xlu0 %2504  ;;  %v3120_v14 = vsel %vm2775_vm5, %v3119_v20, %v3115_v55  ;;  %v3091_v35 = vsel %vm16623_vm2, %v3090_v5, %v3086_v53  ;;  %v3124_v0 = vrot.slane %v2608_v7, %v14217_v44  ;;  %v3198_v57 = vrot.slane %v2623_v21, %v14200_v33  ;;  %v18009_v20 = vld [vmem:[#allocation384_spill] sm:$0xff]  ;;  %v18013_v46 = vld [vmem:[#allocation251_spill] sm:$0xff]  ;;  %v18015_v55 = vld [vmem:[#allocation369_spill] sm:$0xff] }
 0x8aa   :  { %v2625_v11 = vadd.f32 %v14458_v15, %v18008_v40  ;;  %v3100_v17 = vrot.slane %v2603_v24, %v14357_v29  ;;  %v3110_v60 = vrot.slane %v14588_v32, %v14404_v8  ;;  %v3096_v10 = vsel %vm16625_vm9, %v3095_v49, %v3091_v35  ;;  %v18014_v49 = vld [vmem:[#allocation183_spill] sm:$0xff]  ;;  %v18016_v5 = vld [vmem:[#allocation266_spill] sm:$0xff]  ;;  %v18017_v35 = vld [vmem:[#allocation380_spill] sm:$0xff] }
 0x8ab   :  { %v2624_v12 = vadd.f32 %v14386_v28, %v18009_v20  ;;  %v14622_v31 = vadd.f32 %v18011_v42, %v18010_v18  ;;  %v2612_v7 = vadd.f32 %v18013_v46, %v18012_v25  ;;  %v3125_v15 = vsel %vm2782_vm7, %v3124_v0, %v3120_v14  ;;  %v18018_v14 = vld [vmem:[#allocation11_spill] sm:$0xff]  ;;  %v18022_v25 = vld [vmem:[#allocation373_spill] sm:$0xff] }
 0x8ac   :  { %v2515_v56 = vpop.xlane.xlu1 %2514  ;;  %v3194_v34 = vrot.slane %v2622_v26, %v14212_v19  ;;  %v3134_v21 = vrot.slane %v2610_v62, %v14240_v3  ;;  %v3130_v36 = vsel %vm2789_vm8, %v3129_v63, %v3125_v15  ;;  %v3139_v53 = vrot.slane %v2611_v51, %v14253_v13  ;;  %v18019_v63 = vld [vmem:[#allocation385_spill] sm:$0xff]  ;;  %v18024_v15 = vld [vmem:[#allocation72_spill] sm:$0xff] }
 0x8ad   :  { %v14612_v52 = vpop.xlane.xlu0 %2508  ;;  %v2638_v28 = vadd.f32 %v2511_v59, %v18014_v49  ;;  %v2613_v16 = vadd.f32 %v18016_v5, %v18015_v55  ;;  %v3208_v6 = vrot.slane %v2625_v11, %v14228_v4  ;;  %v2627_v0 = vadd.f32 %v18018_v14, %v18017_v35  ;;  %v18020_v51 = vld [vmem:[#allocation285_spill] sm:$0xff]  ;;  %v18025_v14 = vld [vmem:[#allocation382_spill] sm:$0xff] }
 0x8ae   :  { %v3199_v9 = vsel %vm2775_vm5, %v3198_v57, %v3194_v34  ;;  %v14639_v40 = vsel %vm2859_vm10, %v3100_v17, %v3096_v10  ;;  %v3203_v62 = vrot.slane %v2624_v12, %v14217_v44  ;;  %v2626_v20 = vadd.f32 %v18020_v51, %v18019_v63  ;;  %v18021_v59 = vld [vmem:[#allocation69_spill] sm:$0xff]  ;;  %v18023_v57 = vld [vmem:[#allocation256_spill] sm:$0xff]  ;;  %v18029_v51 = vld [vmem:[#allocation74_spill] sm:$0xff] }
 0x8af   :  { %v3144_v42 = vrot.slane %v2612_v7, %v14247_v41  ;;  %v2614_v46 = vadd.f32 %v18023_v57, %v18022_v25  ;;  %v3135_v11 = vsel %vm2796_vm12, %v3134_v21, %v3130_v36  ;;  %v2640_v34 = vadd.f32 %v2515_v56, %v18024_v15  ;;  %v18031_v25 = vld [vmem:[#allocation280_spill] sm:$0xff] }
 0x8b0   :  { %v2519_v24 = vpop.xlane.xlu1 %2518  ;;  %v3140_v17 = vsel %vm2803_vm15, %v3139_v53, %v3135_v11  ;;  %v3204_v10 = vsel %vm2782_vm7, %v3203_v62, %v3199_v9  ;;  %v3273_v12 = vrot.slane %v2638_v28, %v14212_v19  ;;  %v3149_v5 = vrot.slane %v2613_v16, %v14274_v1  ;;  %v18027_v53 = vld [vmem:[#allocation9_spill] sm:$0xff]  ;;  %v18028_v28 = vld [vmem:[#allocation71_spill] sm:$0xff] }
 0x8b1   :  { %v2513_v26 = vpop.xlane.xlu0 %2512  ;;  %v3209_v7 = vsel %vm2789_vm8, %v3208_v6, %v3204_v10  ;;  %v3218_v35 = vrot.slane %v2627_v0, %v14253_v13  ;;  %v2629_v21 = vadd.f32 %v14509_v54, %v18025_v14  ;;  %v3213_v56 = vrot.slane %v2626_v20, %v14240_v3  ;;  %v18030_v20 = vld [vmem:[#allocation370_spill] sm:$0xff]  ;;  %v18032_v14 = vld [vmem:[#allocation180_spill] sm:$0xff] }
 0x8b2   :  { %v2639_v18 = vadd.f32 %v2513_v26, %v18021_v59  ;;  %v18026_v26 = vld [vmem:[#allocation386_spill] sm:$0xff]  ;;  %v3105_v16 = vrot.slane %v14622_v31, %v14342_v27  ;;  %v3154_v6 = vrot.slane %v2614_v46, %v14265_v22  ;;  %v3282_v0 = vrot.slane %v2640_v34, %v14217_v44 }
 0x8b3   :  { %v2628_v63 = vadd.f32 %v18027_v53, %v18026_v26  ;;  %v2642_v59 = vadd.f32 %v2519_v24, %v18029_v51  ;;  %v2615_v57 = vadd.f32 %v18031_v25, %v18030_v20  ;;  %v3214_v11 = vsel %vm2796_vm12, %v3213_v56, %v3209_v7  ;;  %v18034_v56 = vld [vmem:[#allocation376_spill] sm:$0xff]  ;;  %v18035_v26 = vld [vmem:[#allocation271_spill] sm:$0xff]  ;;  %v18040_v51 = vld [vmem:[#allocation277_spill] sm:$0xff] }
 0x8b4   :  { %v2523_v49 = vpop.xlane.xlu1 %2522  ;;  %v3277_v55 = vrot.slane %v2639_v18, %v14200_v33  ;;  %v3145_v18 = vsel %vm2810_vm14, %v3144_v42, %v3140_v17  ;;  %v3228_v46 = vrot.slane %v2629_v21, %v14274_v1  ;;  %v2631_v42 = vadd.f32 %v14534_v50, %v18032_v14 }
 0x8b5   :  { %v2517_v36 = vpop.xlane.xlu0 %2516  ;;  %v3150_v10 = vsel %vm2817_vm13, %v3149_v5, %v3145_v18  ;;  %v3223_v24 = vrot.slane %v2628_v63, %v14247_v41  ;;  %v2616_v53 = vadd.f32 %v18035_v26, %v18034_v56  ;;  %v18036_v5 = vld [vmem:[#allocation177_spill] sm:$0xff]  ;;  %v3292_v21 = vrot.slane %v2642_v59, %v14240_v3  ;;  %v18043_v56 = vld [vmem:[#allocation182_spill] sm:$0xff] }
 0x8b6   :  { %v3278_v9 = vsel %vm2775_vm5, %v3277_v55, %v3273_v12  ;;  %v2641_v62 = vadd.f32 %v2517_v36, %v18028_v28  ;;  %v3219_v12 = vsel %vm2803_vm15, %v3218_v35, %v3214_v11  ;;  %v18033_v36 = vld [vmem:[#allocation73_spill] sm:$0xff]  ;;  %v18037_v28 = vld [vmem:[#allocation10_spill] sm:$0xff]  ;;  %v3159_v18 = vrot.slane %v2615_v57, %v14292_v43 }
 0x8b7   :  { %v3283_v34 = vsel %vm2782_vm7, %v3282_v0, %v3278_v9  ;;  %v2630_v35 = vadd.f32 %v18037_v28, %v18036_v5  ;;  %v18039_v0 = vld [vmem:[#allocation378_spill] sm:$0xff]  ;;  %v3224_v50 = vsel %vm2810_vm14, %v3223_v24, %v3219_v12  ;;  %v3155_v11 = vsel %vm2824_vm0, %v3154_v6, %v3150_v10  ;;  %v18044_v24 = vld [vmem:[#allocation75_spill] sm:$0xff]  ;;  %v18046_v10 = vld [vmem:[#allocation12_spill] sm:$0xff] }
 0x8b8   :  { %v2527_v54 = vpop.xlane.xlu1 %2526  ;;  %v3287_v15 = vrot.slane %v2641_v62, %v14228_v4  ;;  %v18038_v62 = vld [vmem:[#allocation76_spill] sm:$0xff]  ;;  %v2618_v63 = vadd.f32 %v18040_v51, %v18039_v0  ;;  %v3229_v14 = vsel %vm2817_vm13, %v3228_v46, %v3224_v50  ;;  %v2633_v57 = vadd.f32 %v14557_v47, %v18043_v56  ;;  %v18045_v6 = vld [vmem:[#allocation179_spill] sm:$0xff]  ;;  %v18047_v46 = vld [vmem:[#allocation78_spill] sm:$0xff] }
 0x8b9   :  { %v2521_v55 = vpop.xlane.xlu0 %2520  ;;  %v2644_v9 = vadd.f32 %v2523_v49, %v18038_v62  ;;  %v3233_v26 = vrot.slane %v2630_v35, %v14265_v22  ;;  %v2632_v5 = vadd.f32 %v18046_v10, %v18045_v6  ;;  %v2646_v62 = vadd.f32 %v2527_v54, %v18047_v46  ;;  %v18048_v51 = vld [vmem:[#allocation374_spill] sm:$0xff] }
 0x8ba   :  { %v3288_v17 = vsel %vm2789_vm8, %v3287_v15, %v3283_v34  ;;  %v2643_v7 = vadd.f32 %v2521_v55, %v18033_v36  ;;  %v18041_v15 = vld [vmem:[#allocation372_spill] sm:$0xff]  ;;  %v3238_v36 = vrot.slane %v2631_v42, %v14292_v43  ;;  %v3174_v42 = vrot.slane %v2618_v63, %v14314_v58  ;;  %v18049_v50 = vld [vmem:[#allocation286_spill] sm:$0xff] }
 0x8bb   :  { %v18042_v34 = vld [vmem:[#allocation284_spill] sm:$0xff]  ;;  %v3293_v59 = vsel %vm2796_vm12, %v3292_v21, %v3288_v17  ;;  %v3302_v28 = vrot.slane %v2644_v9, %v14247_v41  ;;  %v3164_v17 = vrot.slane %v2616_v53, %v14288_v48  ;;  %v3160_v21 = vsel %vm16624_vm1, %v3159_v18, %v3155_v11  ;;  %v18050_v18 = vld [vmem:[#allocation77_spill] sm:$0xff] }
 0x8bc   :  { %v3297_v20 = vrot.slane %v2643_v7, %v14253_v13  ;;  %v2531_v25 = vpop.xlane.xlu1 %2530  ;;  %v2617_v55 = vadd.f32 %v18042_v34, %v18041_v15  ;;  %v2619_v35 = vadd.f32 %v18049_v50, %v18048_v51  ;;  %v3248_v53 = vrot.slane %v2633_v57, %v14325_v37 }
 0x8bd   :  { %v2525_v49 = vpop.xlane.xlu0 %2524  ;;  %v3312_v56 = vrot.slane %v2646_v62, %v14265_v22  ;;  %v3165_v57 = vsel %vm16622_vm3, %v3164_v17, %v3160_v21  ;;  %v18056_v62 = vld [vmem:[#allocation375_spill] sm:$0xff] }
 0x8be   :  { %v3298_v12 = vsel %vm2803_vm15, %v3297_v20, %v3293_v59  ;;  %v2645_v7 = vadd.f32 %v2525_v49, %v18044_v24  ;;  %v3169_v0 = vrot.slane %v2617_v55, %v14325_v37  ;;  %v3234_v20 = vsel %vm2824_vm0, %v3233_v26, %v3229_v14  ;;  %v18051_v55 = vld [vmem:[#allocation255_spill] sm:$0xff]  ;;  %v18052_v14 = vld [vmem:[#allocation80_spill] sm:$0xff]  ;;  %v18055_v26 = vld [vmem:[#allocation181_spill] sm:$0xff] }
 0x8bf   :  { %v3303_v15 = vsel %vm2810_vm14, %v3302_v28, %v3298_v12  ;;  %v3239_v54 = vsel %vm16624_vm1, %v3238_v36, %v3234_v20  ;;  %v3243_v59 = vrot.slane %v2632_v5, %v14288_v48  ;;  %v2635_v49 = vadd.f32 %v14584_v39, %v18051_v55  ;;  %v18053_v12 = vld [vmem:[#allocation381_spill] sm:$0xff]  ;;  %v18058_v21 = vld [vmem:[#allocation79_spill] sm:$0xff] }
 0x8c0   :  { %v3307_v47 = vrot.slane %v2645_v7, %v14274_v1  ;;  %v2535_v34 = vpop.xlane.xlu1 %2534  ;;  %v2648_v24 = vadd.f32 %v2531_v25, %v18052_v14  ;;  %v18054_v7 = vld [vmem:[#allocation282_spill] sm:$0xff]  ;;  %v2634_v6 = vadd.f32 %v14522_v61, %v18055_v26  ;;  %v3170_v5 = vsel %vm16623_vm2, %v3169_v0, %v3165_v57 }
 0x8c1   :  { %v2529_v9 = vpop.xlane.xlu0 %2528  ;;  %v2620_v36 = vadd.f32 %v18054_v7, %v18053_v12  ;;  %v3179_v28 = vrot.slane %v2619_v35, %v14357_v29  ;;  %v3244_v39 = vsel %vm16622_vm3, %v3243_v59, %v3239_v54  ;;  %v3258_v20 = vrot.slane %v2635_v49, %v14357_v29  ;;  %v18062_v12 = vld [vmem:[#allocation81_spill] sm:$0xff] }
 0x8c2   :  { %v3308_v63 = vsel %vm2817_vm13, %v3307_v47, %v3303_v15  ;;  %v2647_v11 = vadd.f32 %v2529_v9, %v18050_v18  ;;  %v18057_v47 = vld [vmem:[#allocation281_spill] sm:$0xff]  ;;  %v3249_v50 = vsel %vm16623_vm2, %v3248_v53, %v3244_v39  ;;  %v18059_v15 = vld [vmem:[#allocation70_spill] sm:$0xff]  ;;  %v3322_v35 = vrot.slane %v2648_v24, %v14288_v48 }
 0x8c3   :  { %v3313_v46 = vsel %vm2824_vm0, %v3312_v56, %v3308_v63  ;;  %v2621_v51 = vadd.f32 %v18057_v47, %v18056_v62  ;;  %v2637_v0 = vadd.f32 %v14612_v52, %v18059_v15  ;;  %v18060_v9 = vld [vmem:[#allocation82_spill] sm:$0xff]  ;;  %v3175_v63 = vsel %vm16625_vm9, %v3174_v42, %v3170_v5 }
 0x8c4   :  { %v3317_v10 = vrot.slane %v2647_v11, %v14292_v43  ;;  %v2650_v54 = vadd.f32 %v2535_v34, %v18060_v9  ;;  %v3253_v18 = vrot.slane %v2634_v6, %v14314_v58  ;;  %v18061_v11 = vld [vmem:[#allocation258_spill] sm:$0xff]  ;;  %v2539_v59 = vpop.xlane.xlu1 %2538  ;;  %v3106_v52 = vsel %vm2866_vm4, %v3105_v16, %v14639_v40  ;;  %v18063_v16 = vld [vmem:[#allocation84_spill] sm:$0xff] }
 0x8c5   :  { %v2533_v25 = vpop.xlane.xlu0 %2532  ;;  %v2636_v53 = vadd.f32 %v14546_v2, %v18061_v11  ;;  %v3184_v49 = vrot.slane %v2620_v36, %v14342_v27  ;;  %v3180_v34 = vsel %vm2859_vm10, %v3179_v28, %v3175_v63  ;;  %v3189_v14 = vrot.slane %v2621_v51, %v14404_v8 }
 0x8c6   :  { %v3318_v17 = vsel %vm16624_vm1, %v3317_v10, %v3313_v46  ;;  %v2649_v61 = vadd.f32 %v2533_v25, %v18058_v21  ;;  %v3254_v2 = vsel %vm16625_vm9, %v3253_v18, %v3249_v50  ;;  %v3268_v31 = vrot.slane %v2637_v0, %v14404_v8  ;;  %v18064_v25 = vld [vmem:[#allocation83_spill] sm:$0xff] }
 0x8c7   :  { %v3323_v42 = vsel %vm16622_vm3, %v3322_v35, %v3318_v17  ;;  %v3259_v57 = vsel %vm2859_vm10, %v3258_v20, %v3254_v2  ;;  %v3332_v40 = vrot.slane %v2650_v54, %v14314_v58  ;;  %v2652_v36 = vadd.f32 %v2539_v59, %v18063_v16  ;;  %v170_v21 = vld [vmem:[%s16029_s2] sm:$0xff] }
 0x8c8   :  { %v3327_v55 = vrot.slane %v2649_v61, %v14325_v37  ;;  %v3032_v26 = vsel %vm2873_vm11, %v3031_v30, %v14594_v23  ;;  %vm3353_vm3 = vcmask 1044484   ;;  %v3263_v6 = vrot.slane %v2636_v53, %v14342_v27 }
 0x8c9   :  { %v2537_v56 = vpop.xlane.xlu0 %2536  ;;  %v3111_v5 = vsel %vm2873_vm11, %v3110_v60, %v3106_v52  ;;  %v3185_v28 = vsel %vm2866_vm4, %v3184_v49, %v3180_v34  ;;  %v3352_v47 = vsel %vm3351_vm6, %v3032_v26, %v14553_v38  ;;  %vm3357_vm1 = vcmask 1046534   ;;  %v18069_v26 = vld [vmem:[#allocation18_spill] sm:$0xff] }
 0x8ca   :  { %v3328_v24 = vsel %vm16623_vm2, %v3327_v55, %v3323_v42  ;;  %v2651_v7 = vadd.f32 %v2537_v56, %v18062_v12  ;;  %vm3355_vm2 = vcmask 1045509   ;;  %v3190_v45 = vsel %vm2873_vm11, %v3189_v14, %v3185_v28  ;;  %v18065_v12 = vld [vmem:[#allocation34_spill] sm:$0xff]  ;;  %v18071_v28 = vld [vmem:[#allocation24_spill] sm:$0xff] }
 0x8cb   :  { %v3333_v39 = vsel %vm16625_vm9, %v3332_v40, %v3328_v24  ;;  %v3264_v23 = vsel %vm2866_vm4, %v3263_v6, %v3259_v57  ;;  %v3342_v60 = vrot.slane %v2652_v36, %v14342_v27  ;;  %v3354_v51 = vsel %vm3353_vm3, %v3111_v5, %v3352_v47  ;;  %v18070_v6 = vld [vmem:[#allocation20_spill] sm:$0xff]  ;;  %v18077_v47 = vld [vmem:[#allocation23_spill] sm:$0xff] }
 0x8cc   :  { %v3337_v10 = vrot.slane %v2651_v7, %v14357_v29  ;;  %v3269_v32 = vsel %vm2873_vm11, %v3268_v31, %v3264_v23  ;;  %vm3359_vm9 = vcmask 1047559   ;;  %v3356_v17 = vsel %vm3355_vm2, %v3190_v45, %v3354_v51  ;;  %v18074_v45 = vld [vmem:[#allocation17_spill] sm:$0xff] }
 0x8cd   :  { %v2541_v46 = vpop.xlane.xlu0 %2540  ;;  %v3358_v20 = vsel %vm3357_vm1, %v3269_v32, %v3356_v17  ;;  %v3470_v15 = vrot.slane %v170_v21, 4  ;;  %vm3366_vm6 = vcmask 1046528   ;;  %v18066_v7 = vmov 0.0   ;;  %v18078_v32 = vld [vmem:[#allocation26_spill] sm:$0xff]  ;;  %v18080_v17 = vld [vmem:[#allocation29_spill] sm:$0xff] }
 0x8ce   :  { %v3338_v30 = vsel %vm2859_vm10, %v3337_v10, %v3333_v39  ;;  %v2653_v62 = vadd.f32 %v2541_v46, %v18064_v25  ;;  %v18067_v31 = vsub.s32 0, %v18065_v12  ;;  %v18068_v16 = vsub.s32 1, %v18065_v12  ;;  %v18072_v39 = vld [vmem:[#allocation15_spill] sm:$0xff]  ;;  %v18073_v46 = vld [vmem:[#allocation28_spill] sm:$0xff]  ;;  %v18076_v25 = vld [vmem:[#allocation22_spill] sm:$0xff] }
 0x8cf   :  { %v3343_v61 = vsel %vm2866_vm4, %v3342_v60, %v3338_v30  ;;  %v3471_v54 = vadd.f32 %v3470_v15, %v170_v21  ;;  %v18075_v30 = vld [vmem:[#allocation21_spill] sm:$0xff] }
 0x8d0   :  { %v3347_v50 = vrot.slane %v2653_v62, %v14404_v8 }
 0x8d1   :  { %v3472_v11 = vrot.slane %v3471_v54, 2 }
 0x8d2   :  { %v3348_v38 = vsel %vm2873_vm11, %v3347_v50, %v3343_v61  ;;  %v18079_v50 = vld [vmem:[#allocation25_spill] sm:$0xff] }
 0x8d3   :  { %v3360_v0 = vsel %vm3359_vm9, %v3348_v38, %v3358_v20  ;;  %v3473_v55 = vadd.f32 %v3472_v11, %v3471_v54  ;;  %v18081_v20 = vld [vmem:[#allocation27_spill] sm:$0xff]  ;;  %v18082_v38 = vld [vmem:[#allocation30_spill] sm:$0xff] }
 0x8d4   :  { %v3362_v35 = vmul.f32 %v3360_v0, %v170_v21 }
 0x8d5   :  { %v3474_v34 = vrot.slane %v3473_v55, 1 }
 0x8d6   :  { %v3364_v9 = vrot.slane %v3362_v35, 1  ;;  %v18083_v35 = vld [vmem:[#allocation31_spill] sm:$0xff] }
 0x8d7   :  { %v3475_v56 = vadd.f32 %v3474_v34, %v3473_v55 }
 0x8d8   :  { %v3367_v63 = vsel %vm3366_vm6, %v3364_v9, 0.0 }
 0x8d9   :  { %v3368_v18 = vrot.slane %v3367_v63, 4  ;;  %v8937_v14 = vtrunc.f32 %v3475_v56 }
 0x8db   :  { %v3369_v53 = vadd.f32 %v3368_v18, %v3367_v63  ;;  %v8938_v2 = vcvt.f32.s32 %v8937_v14  ;;  %v18084_v63 = vld [vmem:[#allocation32_spill] sm:$0xff] }
 0x8dd   :  { %v3370_v59 = vrot.slane %v3369_v53, 2  ;;  %v7734_v24 = vadd.s32 4294967295, %v8938_v2 }
 0x8df   :  { %v3371_v52 = vadd.f32 %v3370_v59, %v3369_v53  ;;  %vm3480_vm1 = vcmp.eq.s32.totalorder %v18065_v12, %v7734_v24 }
 0x8e0   :  { %v14798_v57 = vsel %vm3480_vm1, 1.0, %v18066_v7 }
 0x8e1   :  { %v3372_v49 = vrot.slane %v3371_v52, 1  ;;  %v3486_v40 = vrot.slane %v14798_v57, %v18067_v31  ;;  %v3553_v36 = vrot.slane %v14798_v57, %v18068_v16 }
 0x8e3   :  { %v3373_v42 = vadd.f32 %v3372_v49, %v3371_v52 }
 0x8e5   :  { %3380 = vbcast.lane.b32.xlu0 %v3373_v42, 264  ;;  %3376 = vbcast.lane.b32.xlu1 %v3373_v42, 256 }
 0x8e9   :  { %3392 = vbcast.lane.b32.xlu0 %v3373_v42, 288  ;;  %3384 = vbcast.lane.b32.xlu1 %v3373_v42, 272 }
 0x8ed   :  { %3400 = vbcast.lane.b32.xlu0 %v3373_v42, 304  ;;  %3388 = vbcast.lane.b32.xlu1 %v3373_v42, 280 }
 0x8f1   :  { %3408 = vbcast.lane.b32.xlu0 %v3373_v42, 320  ;;  %3396 = vbcast.lane.b32.xlu1 %v3373_v42, 296 }
 0x8f5   :  { %3416 = vbcast.lane.b32.xlu0 %v3373_v42, 336  ;;  %3404 = vbcast.lane.b32.xlu1 %v3373_v42, 312 }
 0x8f9   :  { %3424 = vbcast.lane.b32.xlu0 %v3373_v42, 352  ;;  %3412 = vbcast.lane.b32.xlu1 %v3373_v42, 328 }
 0x8fd   :  { %3432 = vbcast.lane.b32.xlu0 %v3373_v42, 368  ;;  %3420 = vbcast.lane.b32.xlu1 %v3373_v42, 344 }
 0x901   :  { %3488 = vbcast.lane.b32.xlu0 %v3486_v40, 256  ;;  %3428 = vbcast.lane.b32.xlu1 %v3373_v42, 360 }
 0x905   :  { %3496 = vbcast.lane.b32.xlu0 %v3486_v40, 272  ;;  %3436 = vbcast.lane.b32.xlu1 %v3373_v42, 376  ;;  %v18089_v42 = vsub.s32 2, %v18065_v12 }
 0x907   :  { %v14865_v56 = vrot.slane %v14798_v57, %v18089_v42 }
 0x909   :  { %3504 = vbcast.lane.b32.xlu0 %v3486_v40, 288  ;;  %3492 = vbcast.lane.b32.xlu1 %v3486_v40, 264 }
 0x90d   :  { %3512 = vbcast.lane.b32.xlu0 %v3486_v40, 304  ;;  %3500 = vbcast.lane.b32.xlu1 %v3486_v40, 280 }
 0x911   :  { %3520 = vbcast.lane.b32.xlu0 %v3486_v40, 320  ;;  %3508 = vbcast.lane.b32.xlu1 %v3486_v40, 296 }
 0x915   :  { %3528 = vbcast.lane.b32.xlu0 %v3486_v40, 336  ;;  %3516 = vbcast.lane.b32.xlu1 %v3486_v40, 312 }
 0x919   :  { %3536 = vbcast.lane.b32.xlu0 %v3486_v40, 352  ;;  %3524 = vbcast.lane.b32.xlu1 %v3486_v40, 328 }
 0x91d   :  { %3544 = vbcast.lane.b32.xlu0 %v3486_v40, 368  ;;  %3532 = vbcast.lane.b32.xlu1 %v3486_v40, 344 }
 0x921   :  { %3555 = vbcast.lane.b32.xlu0 %v3553_v36, 256  ;;  %3540 = vbcast.lane.b32.xlu1 %v3486_v40, 360 }
 0x925   :  { %3563 = vbcast.lane.b32.xlu0 %v3553_v36, 272  ;;  %3548 = vbcast.lane.b32.xlu1 %v3486_v40, 376 }
 0x929   :  { %6677 = vperm.xlu0 %8963, %v18069_v26   ;;  %3559 = vbcast.lane.b32.xlu1 %v3553_v36, 264 }
 0x92d   :  { %6686 = vperm.xlu0 %8963, %v18070_v6   ;;  %3567 = vbcast.lane.b32.xlu1 %v3553_v36, 280 }
 0x92f   :  { %v14808_v10 = vpop.f32.mrb[80].mxu1 }
 0x930   :  { %v14810_v5 = vpop.f32.mrb[81].mxu1 }
 0x931   :  { %6692 = vperm.xlu0 %8963, %v18071_v28   ;;  %6680 = vperm.xlu1 %8964, %v18072_v39   ;;  %9353 = vlog2.f32 %v14810_v5 }
 0x935   :  { %6698 = vperm.xlu0 %8963, %v18073_v46   ;;  %6683 = vperm.xlu1 %8964, %v18074_v45  }
 0x939   :  { %v14816_v23 = vpop.f32.mrb[82].mxu1  ;;  %6704 = vperm.xlu0 %8963, %v18075_v30   ;;  %6689 = vperm.xlu1 %8964, %v18076_v25  }
 0x93a   :  { %v14820_v62 = vpop.f32.mrb[83].mxu1  ;;  %9355 = vlog2.f32 %v14816_v23 }
 0x93b   :  { %9357 = vlog2.f32 %v14808_v10 }
 0x93d   :  { %6710 = vperm.xlu0 %8963, %v18077_v47   ;;  %6695 = vperm.xlu1 %8964, %v18078_v32  }
 0x941   :  { %v14824_v60 = vpop.f32.mrb[84].mxu1  ;;  %6716 = vperm.xlu0 %8963, %v18079_v50   ;;  %6701 = vperm.xlu1 %8964, %v18080_v17  }
 0x942   :  { %v14826_v51 = vpop.f32.mrb[85].mxu1  ;;  %9359 = vlog2.f32 %v14824_v60 }
 0x943   :  { %9361 = vlog2.f32 %v14820_v62 }
 0x945   :  { %v14830_v21 = vpop.f32.mrb[86].mxu1  ;;  %6722 = vperm.xlu0 %8963, %v18081_v20   ;;  %6707 = vperm.xlu1 %8964, %v18082_v38  }
 0x946   :  { %v14832_v61 = vpop.f32.mrb[87].mxu1  ;;  %9363 = vlog2.f32 %v14830_v21  ;;  %v18116_v21 = vld [vmem:[#allocation8_spill] sm:$0xff] }
 0x947   :  { %9365 = vlog2.f32 %v14826_v51  ;;  %v18117_v51 = vld [vmem:[#allocation224_spill] sm:$0xff] }
 0x949   :  { %v14836_v15 = vpop.f32.mrb[88].mxu1  ;;  %6713 = vperm.xlu1 %8964, %v18083_v35   ;;  %3575 = vbcast.lane.b32.xlu0 %v3553_v36, 296 }
 0x94a   :  { %v14838_v0 = vpop.f32.mrb[89].mxu1  ;;  %9367 = vlog2.f32 %v14836_v15 }
 0x94b   :  { %9369 = vlog2.f32 %v14832_v61 }
 0x94d   :  { %v14841_v9 = vpop.f32.mrb[90].mxu1  ;;  %6719 = vperm.xlu1 %8964, %v18084_v63   ;;  %3579 = vbcast.lane.b32.xlu0 %v3553_v36, 304 }
 0x94e   :  { %v14843_v54 = vpop.f32.mrb[91].mxu1  ;;  %9371 = vlog2.f32 %v14841_v9 }
 0x94f   :  { %9373 = vlog2.f32 %v14838_v0  ;;  %v18123_v0 = vld [vmem:[#allocation411_spill] sm:$0xff] }
 0x951   :  { %v14846_v18 = vpop.f32.mrb[92].mxu1  ;;  %3571 = vbcast.lane.b32.xlu1 %v3553_v36, 288  ;;  %3591 = vbcast.lane.b32.xlu0 %v3553_v36, 328 }
 0x952   :  { %v14848_v11 = vpop.f32.mrb[93].mxu1  ;;  %9375 = vlog2.f32 %v14846_v18 }
 0x953   :  { %9377 = vlog2.f32 %v14843_v54  ;;  %v9592_v54 = vld [vmem:[#allocation2 + $0x318] sm:$0xff] }
 0x955   :  { %v14850_v53 = vpop.f32.mrb[94].mxu1  ;;  %3583 = vbcast.lane.b32.xlu1 %v3553_v36, 312  ;;  %3599 = vbcast.lane.b32.xlu0 %v3553_v36, 344 }
 0x956   :  { %v14852_v59 = vpop.f32.mrb[95].mxu1  ;;  %9379 = vlog2.f32 %v14850_v53  ;;  %v18127_v53 = vld [vmem:[#allocation226_spill] sm:$0xff] }
 0x957   :  { %v14854_v55 = vpop.permute.xlu0 %3380  ;;  %v14856_v52 = vpop.permute.xlu1 %3376  ;;  %9381 = vlog2.f32 %v14848_v11  ;;  %v18130_v11 = vld [vmem:[#allocation410_spill] sm:$0xff] }
 0x958   :  { %18085 = vst [vmem:[#allocation13_spill] sm:$0xff] %v14854_v55  ;;  %18086 = vst [vmem:[#allocation36_spill] sm:$0xff] %v14856_v52  ;;  %9383 = vlog2.f32 %v14852_v59  ;;  %v18135_v59 = vld [vmem:[#allocation412_spill] sm:$0xff] }
 0x959   :  { %3587 = vbcast.lane.b32.xlu1 %v3553_v36, 320  ;;  %3607 = vbcast.lane.b32.xlu0 %v3553_v36, 360 }
 0x95b   :  { %v14858_v49 = vpop.permute.xlu0 %3392  ;;  %v14860_v34 = vpop.permute.xlu1 %3384 }
 0x95c   :  { %18087 = vst [vmem:[#allocation14_spill] sm:$0xff] %v14858_v49  ;;  %18088 = vst [vmem:[#allocation299_spill] sm:$0xff] %v14860_v34 }
 0x95d   :  { %3595 = vbcast.lane.b32.xlu1 %v3553_v36, 336  ;;  %3615 = vbcast.lane.b32.xlu0 %v3553_v36, 376 }
 0x95f   :  { %v14867_v14 = vpop.permute.xlu0 %3400  ;;  %v14869_v2 = vpop.permute.xlu1 %3388 }
 0x960   :  { %18090 = vst [vmem:[#allocation184_spill] sm:$0xff] %v14867_v14  ;;  %18091 = vst [vmem:[#allocation300_spill] sm:$0xff] %v14869_v2 }
 0x961   :  { %3603 = vbcast.lane.b32.xlu1 %v3553_v36, 352  ;;  %3626 = vbcast.lane.b32.xlu0 %v14865_v56, 264 }
 0x963   :  { %v14872_v24 = vpop.permute.xlu0 %3408  ;;  %v14874_v7 = vpop.permute.xlu1 %3396 }
 0x964   :  { %18092 = vst [vmem:[#allocation185_spill] sm:$0xff] %v14872_v24  ;;  %18093 = vst [vmem:[#allocation16_spill] sm:$0xff] %v14874_v7 }
 0x965   :  { %3611 = vbcast.lane.b32.xlu1 %v3553_v36, 368  ;;  %3634 = vbcast.lane.b32.xlu0 %v14865_v56, 280 }
 0x967   :  { %v14877_v31 = vpop.permute.xlu0 %3416  ;;  %v14879_v40 = vpop.permute.xlu1 %3404 }
 0x968   :  { %18094 = vst [vmem:[#allocation301_spill] sm:$0xff] %v14877_v31  ;;  %18095 = vst [vmem:[#allocation186_spill] sm:$0xff] %v14879_v40 }
 0x969   :  { %3622 = vbcast.lane.b32.xlu1 %v14865_v56, 256  ;;  %3642 = vbcast.lane.b32.xlu0 %v14865_v56, 296 }
 0x96b   :  { %v14883_v16 = vpop.permute.xlu0 %3424  ;;  %v14885_v42 = vpop.permute.xlu1 %3412 }
 0x96c   :  { %18096 = vst [vmem:[#allocation302_spill] sm:$0xff] %v14883_v16  ;;  %18097 = vst [vmem:[#allocation187_spill] sm:$0xff] %v14885_v42  ;;  %v9354_v16 = vpop.eup %9353 }
 0x96d   :  { %3630 = vbcast.lane.b32.xlu1 %v14865_v56, 272  ;;  %3650 = vbcast.lane.b32.xlu0 %v14865_v56, 312  ;;  %v6597_v5 = vmul.f32 0.6931472, %v9354_v16  ;;  %v9356_v31 = vpop.eup %9355 }
 0x96e   :  { %v9358_v10 = vpop.eup %9357  ;;  %v6603_v24 = vmul.f32 0.6931472, %v9356_v31  ;;  %v18120_v31 = vld [vmem:[#allocation222_spill] sm:$0xff] }
 0x96f   :  { %v14889_v8 = vpop.permute.xlu0 %3432  ;;  %v14891_v36 = vpop.permute.xlu1 %3420  ;;  %v6599_v14 = vmul.f32 0.6931472, %v9358_v10  ;;  %v18121_v10 = vld [vmem:[#allocation228_spill] sm:$0xff] }
 0x970   :  { %18098 = vst [vmem:[#allocation19_spill] sm:$0xff] %v14889_v8  ;;  %18099 = vst [vmem:[#allocation303_spill] sm:$0xff] %v14891_v36  ;;  %v9360_v42 = vpop.eup %9359  ;;  %v6631_v40 = vadd.f32 %v6603_v24, %v18117_v51 }
 0x971   :  { %3638 = vbcast.lane.b32.xlu1 %v14865_v56, 288  ;;  %3658 = vbcast.lane.b32.xlu0 %v14865_v56, 328  ;;  %v9362_v62 = vpop.eup %9361  ;;  %v6607_v49 = vmul.f32 0.6931472, %v9360_v42  ;;  %v9591_v42 = vld [vmem:[#allocation2 + $0x300] sm:$0xff] }
 0x972   :  { %v9364_v15 = vpop.eup %9363  ;;  %v6601_v34 = vmul.f32 0.6931472, %v9362_v62  ;;  %v6647_v9 = vadd.f32 %v6631_v40, %v18116_v21  ;;  %v18122_v62 = vld [vmem:[#allocation233_spill] sm:$0xff] }
 0x973   :  { %v14895_v27 = vpop.permute.xlu0 %3488  ;;  %v14897_v29 = vpop.permute.xlu1 %3428  ;;  %v6611_v2 = vmul.f32 0.6931472, %v9364_v15 }
 0x974   :  { %18100 = vst [vmem:[#allocation188_spill] sm:$0xff] %v14897_v29  ;;  %v18114_v29 = vld [vmem:[#allocation229_spill] sm:$0xff]  ;;  %v9366_v61 = vpop.eup %9365  ;;  %v6630_v55 = vadd.f32 %v6601_v34, %v18122_v62 }
 0x975   :  { %3646 = vbcast.lane.b32.xlu1 %v14865_v56, 304  ;;  %v6628_v60 = vadd.f32 %v6597_v5, %v18114_v29  ;;  %v6629_v5 = vadd.f32 %v6599_v14, %v18120_v31  ;;  %v9368_v52 = vpop.eup %9367  ;;  %v6605_v14 = vmul.f32 0.6931472, %v9366_v61  ;;  %v18126_v61 = vld [vmem:[#allocation223_spill] sm:$0xff] }
 0x976   :  { %v6615_v31 = vmul.f32 0.6931472, %v9368_v52  ;;  %v9593_v52 = vld [vmem:[#allocation2 + $0x308] sm:$0xff] }
 0x977   :  { %v14900_v58 = vpop.permute.xlu0 %3496  ;;  %v14902_v37 = vpop.permute.xlu1 %3436  ;;  %v6644_v16 = vadd.f32 %v6628_v60, %v18116_v21  ;;  %v6633_v60 = vadd.f32 %v6607_v49, %v18121_v10  ;;  %v6645_v18 = vadd.f32 %v6629_v5, %v18116_v21  ;;  %v6646_v5 = vadd.f32 %v6630_v55, %v18116_v21 }
 0x978   :  { %18101 = vst [vmem:[#allocation304_spill] sm:$0xff] %v14900_v58  ;;  %18102 = vst [vmem:[#allocation189_spill] sm:$0xff] %v14902_v37  ;;  %v9370_v49 = vpop.eup %9369  ;;  %v6632_v62 = vadd.f32 %v6605_v14, %v18127_v53  ;;  %v18129_v14 = vld [vmem:[#allocation414_spill] sm:$0xff] }
 0x979   :  { %3654 = vbcast.lane.b32.xlu1 %v14865_v56, 320  ;;  %v6660_v51 = vadd.f32 %v9591_v42, %v6644_v16  ;;  %v6649_v40 = vadd.f32 %v6633_v60, %v18116_v21  ;;  %v18124_v16 = vld [vmem:[#allocation232_spill] sm:$0xff]  ;;  %v9372_v42 = vpop.eup %9371 }
 0x97a   :  { %v6635_v15 = vadd.f32 %v6611_v2, %v18124_v16  ;;  %v6661_v2 = vadd.f32 %v9593_v52, %v6645_v18  ;;  %v9374_v60 = vpop.eup %9373  ;;  %v9595_v18 = vld [vmem:[#allocation2 + $0x310] sm:$0xff] }
 0x97b   :  { %v14905_v48 = vpop.permute.xlu0 %3504  ;;  %v14907_v43 = vpop.permute.xlu1 %3492  ;;  %v6662_v52 = vadd.f32 %v9595_v18, %v6646_v5  ;;  %v9596_v5 = vld [vmem:[#allocation2 + $0x338] sm:$0xff]  ;;  %v18136_v18 = vld [vmem:[#allocation241_spill] sm:$0xff] }
 0x97c   :  { %18103 = vst [vmem:[#allocation315_spill] sm:$0xff] %v14905_v48  ;;  %18104 = vst [vmem:[#allocation204_spill] sm:$0xff] %v14907_v43  ;;  %v6651_v16 = vadd.f32 %v6635_v15, %v18116_v21  ;;  %v6648_v15 = vadd.f32 %v6632_v62, %v18116_v21 }
 0x97d   :  { %3662 = vbcast.lane.b32.xlu1 %v14865_v56, 336 }
 0x97f   :  { %v14910_v22 = vpop.permute.xlu1 %3500  ;;  %v14912_v1 = vpop.permute.xlu0 %3512 }
 0x980   :  { %18105 = vst [vmem:[#allocation305_spill] sm:$0xff] %v14910_v22  ;;  %18106 = vst [vmem:[#allocation190_spill] sm:$0xff] %v14912_v1 }
 0x983   :  { %v14914_v13 = vpop.permute.xlu1 %3508  ;;  %v14916_v41 = vpop.permute.xlu0 %3520 }
 0x984   :  { %18107 = vst [vmem:[#allocation316_spill] sm:$0xff] %v14914_v13  ;;  %18108 = vst [vmem:[#allocation205_spill] sm:$0xff] %v14916_v41 }
 0x987   :  { %v14918_v4 = vpop.permute.xlu1 %3516  ;;  %v14920_v3 = vpop.permute.xlu0 %3528 }
 0x988   :  { %18109 = vst [vmem:[#allocation306_spill] sm:$0xff] %v14918_v4 }
 0x98b   :  { %v14922_v44 = vpop.permute.xlu1 %3524  ;;  %v14925_v19 = vpop.permute.xlu0 %3536 }
 0x98c   :  { %18110 = vst [vmem:[#allocation191_spill] sm:$0xff] %v14922_v44 }
 0x98f   :  { %v14928_v33 = vpop.permute.xlu1 %3532  ;;  %v14932_v8 = vpop.permute.xlu0 %3544 }
 0x990   :  { %18111 = vst [vmem:[#allocation317_spill] sm:$0xff] %v14928_v33  ;;  %18112 = vst [vmem:[#allocation206_spill] sm:$0xff] %v14932_v8  ;;  %v18131_v33 = vld [vmem:[#allocation237_spill] sm:$0xff] }
 0x993   :  { %v14935_v37 = vpop.permute.xlu1 %3540  ;;  %v14939_v23 = vpop.permute.xlu0 %3555 }
 0x994   :  { %18113 = vst [vmem:[#allocation318_spill] sm:$0xff] %v14935_v37  ;;  %v9594_v37 = vld [vmem:[#allocation2 + $0x328] sm:$0xff] }
 0x997   :  { %v14943_v36 = vpop.permute.xlu1 %3548  ;;  %v14949_v7 = vpop.permute.xlu0 %3563 }
 0x998   :  { %18115 = vst [vmem:[#allocation207_spill] sm:$0xff] %v14943_v36  ;;  %18118 = vst [vmem:[#allocation307_spill] sm:$0xff] %v14949_v7 }
 0x99b   :  { %v14952_v29 = vpop.permute.xlu1 %3559 }
 0x99c   :  { %18119 = vst [vmem:[#allocation192_spill] sm:$0xff] %v14952_v29 }
 0x99f   :  { %v14968_v10 = vpop.permute.xlu1 %3567 }
 0x9a0   :  { %18125 = vst [vmem:[#allocation308_spill] sm:$0xff] %v14968_v10 }
 0x9a8   :  { %v6678_v24 = vpop.permute.xlu0 %6677 }
 0x9a9   :  { %vm6724_vm3 = vcmp.eq.s32.totalorder %v6678_v24, 1  ;;  %v6663_v24 = vadd.f32 %v9592_v54, %v6647_v9  ;;  %v18128_v9 = vld [vmem:[#allocation236_spill] sm:$0xff] }
 0x9aa   :  { %v14961_v8 = vsel %vm6724_vm3, %v6660_v51, %v18123_v0  ;;  %v6609_v0 = vmul.f32 0.6931472, %v9370_v49  ;;  %v6637_v54 = vadd.f32 %v6615_v31, %v18128_v9 }
 0x9ab   :  { %6756 = vmax.xlane.f32.xlu1 %v14961_v8 }
 0x9ac   :  { %v6687_v34 = vpop.permute.xlu0 %6686  ;;  %v6634_v31 = vadd.f32 %v6609_v0, %v18131_v33  ;;  %v18133_v33 = vld [vmem:[#allocation416_spill] sm:$0xff] }
 0x9ad   :  { %vm6727_vm2 = vcmp.eq.s32.totalorder %v6687_v34, 1  ;;  %v6619_v34 = vmul.f32 0.6931472, %v9372_v42  ;;  %v6613_v42 = vmul.f32 0.6931472, %v9374_v60 }
 0x9ae   :  { %v14972_v51 = vsel %vm6727_vm2, %v6663_v24, %v18126_v61  ;;  %v6665_v24 = vadd.f32 %v9594_v37, %v6649_v40  ;;  %v9376_v61 = vpop.eup %9375  ;;  %v18132_v40 = vld [vmem:[#allocation240_spill] sm:$0xff] }
 0x9af   :  { %6762 = vmax.xlane.f32.xlu1 %v14972_v51  ;;  %v9378_v37 = vpop.eup %9377  ;;  %v6639_v9 = vadd.f32 %v6619_v34, %v18132_v40  ;;  %v9597_v34 = vld [vmem:[#allocation2 + $0x320] sm:$0xff]  ;;  %v18137_v40 = vld [vmem:[#allocation250_spill] sm:$0xff] }
 0x9b0   :  { %v6693_v36 = vpop.permute.xlu0 %6692  ;;  %v6681_v55 = vpop.permute.xlu1 %6680  ;;  %v6617_v44 = vmul.f32 0.6931472, %v9378_v37  ;;  %v18140_v37 = vld [vmem:[#allocation413_spill] sm:$0xff] }
 0x9b1   :  { %vm6729_vm9 = vcmp.eq.s32.totalorder %v6693_v36, 1  ;;  %vm6725_vm6 = vcmp.eq.s32.totalorder %v6681_v55, 1  ;;  %v6653_v36 = vadd.f32 %v6637_v54, %v18116_v21  ;;  %v9380_v62 = vpop.eup %9379  ;;  %v6636_v54 = vadd.f32 %v6613_v42, %v18136_v18 }
 0x9b2   :  { %v14980_v49 = vsel %vm6729_vm9, %v6665_v24, %v18129_v14  ;;  %v14983_v53 = vsel %vm6725_vm6, %v6661_v2, %v18130_v11  ;;  %v6623_v2 = vmul.f32 0.6931472, %v9376_v61  ;;  %v6667_v14 = vadd.f32 %v9596_v5, %v6651_v16 }
 0x9b3   :  { %6766 = vmax.xlane.f32.xlu1 %v14980_v49  ;;  %6758 = vmax.xlane.f32.xlu0 %v14983_v53  ;;  %v6650_v11 = vadd.f32 %v6634_v31, %v18116_v21  ;;  %v6664_v16 = vadd.f32 %v9597_v34, %v6648_v15  ;;  %v6655_v61 = vadd.f32 %v6639_v9, %v18116_v21  ;;  %v18138_v31 = vld [vmem:[#allocation418_spill] sm:$0xff] }
 0x9b4   :  { %v6699_v55 = vpop.permute.xlu0 %6698  ;;  %v6684_v24 = vpop.permute.xlu1 %6683  ;;  %v6652_v15 = vadd.f32 %v6636_v54, %v18116_v21  ;;  %v18141_v34 = vld [vmem:[#allocation246_spill] sm:$0xff]  ;;  %v18143_v54 = vld [vmem:[#allocation225_spill] sm:$0xff] }
 0x9b5   :  { %vm6731_vm1 = vcmp.eq.s32.totalorder %v6699_v55, 1  ;;  %vm6726_vm3 = vcmp.eq.s32.totalorder %v6684_v24, 1  ;;  %v6641_v55 = vadd.f32 %v6623_v2, %v18137_v40  ;;  %v6627_v24 = vmul.f32 0.6931472, %v9380_v62  ;;  %v9599_v2 = vld [vmem:[#allocation2 + $0x330] sm:$0xff] }
 0x9b6   :  { %v14993_v0 = vsel %vm6731_vm1, %v6667_v14, %v18133_v33  ;;  %v14996_v60 = vsel %vm6726_vm3, %v6662_v52, %v18135_v59  ;;  %v9598_v52 = vld [vmem:[#allocation2 + $0x348] sm:$0xff]  ;;  %v9382_v59 = vpop.eup %9381  ;;  %v6638_v9 = vadd.f32 %v6617_v44, %v18141_v34  ;;  %v6666_v62 = vadd.f32 %v9599_v2, %v6650_v11 }
 0x9b7   :  { %18134 = vst [vmem:[#allocation193_spill] sm:$0xff] %v14993_v0  ;;  %6770 = vmax.xlane.f32.xlu1 %v14993_v0  ;;  %6760 = vmax.xlane.f32.xlu0 %v14996_v60  ;;  %v6669_v33 = vadd.f32 %v9598_v52, %v6653_v36  ;;  %v6657_v36 = vadd.f32 %v6641_v55, %v18116_v21  ;;  %v6621_v40 = vmul.f32 0.6931472, %v9382_v59  ;;  %v18145_v34 = vld [vmem:[#allocation220_spill] sm:$0xff] }
 0x9b8   :  { %v6705_v5 = vpop.permute.xlu0 %6704  ;;  %v6690_v14 = vpop.permute.xlu1 %6689  ;;  %v6654_v11 = vadd.f32 %v6638_v9, %v18116_v21  ;;  %v9601_v55 = vld [vmem:[#allocation2 + $0x340] sm:$0xff] }
 0x9b9   :  { %vm6733_vm2 = vcmp.eq.s32.totalorder %v6705_v5, 1  ;;  %vm6728_vm9 = vcmp.eq.s32.totalorder %v6690_v14, 1  ;;  %v18142_v5 = vld [vmem:[#allocation249_spill] sm:$0xff]  ;;  %v18147_v59 = vld [vmem:[#allocation248_spill] sm:$0xff]  ;;  %v18150_v9 = vld [vmem:[#allocation415_spill] sm:$0xff] }
 0x9ba   :  { %v15005_v42 = vsel %vm6733_vm2, %v6669_v33, %v18138_v31  ;;  %v15008_v18 = vsel %vm6728_vm9, %v6664_v16, %v18140_v37  ;;  %v6643_v14 = vadd.f32 %v6627_v24, %v18142_v5  ;;  %v9600_v31 = vld [vmem:[#allocation2 + $0x358] sm:$0xff]  ;;  %v9384_v37 = vpop.eup %9383  ;;  %v6668_v24 = vadd.f32 %v9601_v55, %v6652_v15 }
 0x9bb   :  { %18139 = vst [vmem:[#allocation319_spill] sm:$0xff] %v15005_v42  ;;  %6774 = vmax.xlane.f32.xlu1 %v15005_v42  ;;  %6764 = vmax.xlane.f32.xlu0 %v15008_v18  ;;  %v6671_v16 = vadd.f32 %v9600_v31, %v6655_v61  ;;  %v6640_v2 = vadd.f32 %v6621_v40, %v18147_v59  ;;  %v6625_v5 = vmul.f32 0.6931472, %v9384_v37  ;;  %v9602_v31 = vld [vmem:[#allocation2 + $0x368] sm:$0xff]  ;;  %v9603_v59 = vld [vmem:[#allocation2 + $0x378] sm:$0xff] }
 0x9bc   :  { %v6711_v52 = vpop.permute.xlu0 %6710  ;;  %v6696_v33 = vpop.permute.xlu1 %6695  ;;  %v6659_v61 = vadd.f32 %v6643_v14, %v18116_v21  ;;  %v18152_v40 = vld [vmem:[#allocation252_spill] sm:$0xff] }
 0x9bd   :  { %vm6735_vm6 = vcmp.eq.s32.totalorder %v6711_v52, 1  ;;  %vm6730_vm1 = vcmp.eq.s32.totalorder %v6696_v33, 1  ;;  %v6656_v15 = vadd.f32 %v6640_v2, %v18116_v21  ;;  %v6642_v14 = vadd.f32 %v6625_v5, %v18152_v40 }
 0x9be   :  { %v15017_v44 = vsel %vm6735_vm6, %v6671_v16, %v18143_v54  ;;  %v15020_v41 = vsel %vm6730_vm1, %v6666_v62, %v18145_v34  ;;  %v6673_v16 = vadd.f32 %v9602_v31, %v6657_v36  ;;  %v18148_v62 = vld [vmem:[#allocation420_spill] sm:$0xff]  ;;  %v6675_v36 = vadd.f32 %v9603_v59, %v6659_v61  ;;  %v18153_v31 = vld [vmem:[#allocation422_spill] sm:$0xff]  ;;  %v18157_v61 = vld [vmem:[#allocation419_spill] sm:$0xff] }
 0x9bf   :  { %18144 = vst [vmem:[#allocation208_spill] sm:$0xff] %v15017_v44  ;;  %18146 = vst [vmem:[#allocation320_spill] sm:$0xff] %v15020_v41  ;;  %6778 = vmax.xlane.f32.xlu1 %v15017_v44  ;;  %6768 = vmax.xlane.f32.xlu0 %v15020_v41  ;;  %v6658_v2 = vadd.f32 %v6642_v14, %v18116_v21  ;;  %v18161_v14 = vsub.s32 3, %v18065_v12 }
 0x9c0   :  { %v6717_v52 = vpop.permute.xlu0 %6716  ;;  %v6702_v33 = vpop.permute.xlu1 %6701 }
 0x9c1   :  { %vm6737_vm3 = vcmp.eq.s32.totalorder %v6717_v52, 1  ;;  %vm6732_vm2 = vcmp.eq.s32.totalorder %v6702_v33, 1  ;;  %v9604_v52 = vld [vmem:[#allocation2 + $0x350] sm:$0xff] }
 0x9c2   :  { %v15028_v54 = vsel %vm6737_vm3, %v6673_v16, %v18148_v62  ;;  %v15031_v34 = vsel %vm6732_vm2, %v6668_v24, %v18150_v9  ;;  %v6670_v33 = vadd.f32 %v9604_v52, %v6654_v11  ;;  %v18155_v24 = vld [vmem:[#allocation417_spill] sm:$0xff]  ;;  %v9605_v9 = vld [vmem:[#allocation2 + $0x360] sm:$0xff] }
 0x9c3   :  { %18149 = vst [vmem:[#allocation209_spill] sm:$0xff] %v15028_v54  ;;  %18151 = vst [vmem:[#allocation309_spill] sm:$0xff] %v15031_v34  ;;  %6782 = vmax.xlane.f32.xlu1 %v15028_v54  ;;  %6772 = vmax.xlane.f32.xlu0 %v15031_v34  ;;  %v6672_v40 = vadd.f32 %v9605_v9, %v6656_v15  ;;  %v3687_v15 = vrot.slane %v14798_v57, %v18161_v14 }
 0x9c4   :  { %v6723_v37 = vpop.permute.xlu0 %6722  ;;  %v6708_v55 = vpop.permute.xlu1 %6707 }
 0x9c5   :  { %vm6739_vm9 = vcmp.eq.s32.totalorder %v6723_v37, 1  ;;  %vm6734_vm6 = vcmp.eq.s32.totalorder %v6708_v55, 1  ;;  %v9606_v55 = vld [vmem:[#allocation2 + $0x370] sm:$0xff] }
 0x9c6   :  { %v15038_v16 = vsel %vm6739_vm9, %v6675_v36, %v18153_v31  ;;  %v15041_v62 = vsel %vm6734_vm6, %v6670_v33, %v18155_v24  ;;  %v6674_v59 = vadd.f32 %v9606_v55, %v6658_v2  ;;  %v18159_v36 = vld [vmem:[#allocation421_spill] sm:$0xff]  ;;  %v18164_v24 = vsub.s32 4, %v18065_v12 }
 0x9c7   :  { %18154 = vst [vmem:[#allocation194_spill] sm:$0xff] %v15038_v16  ;;  %18156 = vst [vmem:[#allocation310_spill] sm:$0xff] %v15041_v62  ;;  %6786 = vmax.xlane.f32.xlu1 %v15038_v16  ;;  %6776 = vmax.xlane.f32.xlu0 %v15041_v62 }
 0x9c8   :  { %v6714_v5 = vpop.permute.xlu1 %6713  ;;  %v3754_v2 = vrot.slane %v14798_v57, %v18164_v24  ;;  %v15071_v9 = vpop.permute.xlu0 %3575  ;;  %v18172_v24 = vsub.s32 5, %v18065_v12 }
 0x9c9   :  { %vm6736_vm1 = vcmp.eq.s32.totalorder %v6714_v5, 1  ;;  %18166 = vst [vmem:[#allocation331_spill] sm:$0xff] %v15071_v9 }
 0x9ca   :  { %v15047_v11 = vsel %vm6736_vm1, %v6672_v40, %v18157_v61 }
 0x9cb   :  { %18158 = vst [vmem:[#allocation195_spill] sm:$0xff] %v15047_v11  ;;  %6780 = vmax.xlane.f32.xlu0 %v15047_v11 }
 0x9cc   :  { %v6720_v37 = vpop.permute.xlu1 %6719  ;;  %v15075_v40 = vpop.permute.xlu0 %3579 }
 0x9cd   :  { %vm6738_vm3 = vcmp.eq.s32.totalorder %v6720_v37, 1  ;;  %18167 = vst [vmem:[#allocation217_spill] sm:$0xff] %v15075_v40 }
 0x9ce   :  { %v15051_v52 = vsel %vm6738_vm3, %v6674_v59, %v18159_v36 }
 0x9cf   :  { %18160 = vst [vmem:[#allocation321_spill] sm:$0xff] %v15051_v52  ;;  %6784 = vmax.xlane.f32.xlu0 %v15051_v52 }
 0x9d0   :  { %v15062_v33 = vpop.permute.xlu1 %3571  ;;  %v15079_v37 = vpop.permute.xlu0 %3591 }
 0x9d1   :  { %18162 = vst [vmem:[#allocation212_spill] sm:$0xff] %v15062_v33  ;;  %18168 = vst [vmem:[#allocation312_spill] sm:$0xff] %v15079_v37  ;;  %v9684_v37 = vmov 7  }
 0x9d2   :  { %8965 = vset.pattern.permute.xlu0 %v9684_v37  ;;  %8966 = vset.pattern.permute.xlu1 %v9684_v37 }
 0x9d4   :  { %v15064_v31 = vpop.permute.xlu1 %3583  ;;  %v15083_v59 = vpop.permute.xlu0 %3599 }
 0x9d5   :  { %18163 = vst [vmem:[#allocation322_spill] sm:$0xff] %v15064_v31  ;;  %18170 = vst [vmem:[#allocation311_spill] sm:$0xff] %v15083_v59 }
 0x9d8   :  { %3670 = vbcast.lane.b32.xlu1 %v14865_v56, 352  ;;  %v15069_v5 = vpop.permute.xlu1 %3587  ;;  %v15087_v14 = vpop.permute.xlu0 %3607 }
 0x9d9   :  { %18165 = vst [vmem:[#allocation211_spill] sm:$0xff] %v15069_v5  ;;  %18171 = vst [vmem:[#allocation196_spill] sm:$0xff] %v15087_v14  ;;  %v15092_v5 = vrot.slane %v14798_v57, %v18172_v24 }
 0x9dc   :  { %3678 = vbcast.lane.b32.xlu1 %v14865_v56, 368 }
 0x9e0   :  { %3689 = vbcast.lane.b32.xlu1 %v3687_v15, 256 }
 0x9e4   :  { %3697 = vbcast.lane.b32.xlu1 %v3687_v15, 272 }
 0x9e5   :  { %3666 = vbcast.lane.b32.xlu0 %v14865_v56, 344 }
 0x9e8   :  { %3705 = vbcast.lane.b32.xlu1 %v3687_v15, 288 }
 0x9e9   :  { %3674 = vbcast.lane.b32.xlu0 %v14865_v56, 360 }
 0x9ec   :  { %3713 = vbcast.lane.b32.xlu1 %v3687_v15, 304 }
 0x9ed   :  { %3682 = vbcast.lane.b32.xlu0 %v14865_v56, 376  ;;  %v15073_v56 = vpop.permute.xlu1 %3595 }
 0x9f0   :  { %3721 = vbcast.lane.b32.xlu1 %v3687_v15, 320 }
 0x9f1   :  { %3693 = vbcast.lane.b32.xlu0 %v3687_v15, 264  ;;  %v15077_v61 = vpop.permute.xlu1 %3603 }
 0x9f4   :  { %3729 = vbcast.lane.b32.xlu1 %v3687_v15, 336 }
 0x9f5   :  { %3701 = vbcast.lane.b32.xlu0 %v3687_v15, 280  ;;  %v15081_v55 = vpop.permute.xlu1 %3611 }
 0x9f6   :  { %18169 = vst [vmem:[#allocation197_spill] sm:$0xff] %v15081_v55  ;;  %v15096_v55 = vpop.permute.xlu0 %3615 }
 0x9f7   :  { %18174 = vst [vmem:[#allocation216_spill] sm:$0xff] %v15096_v55 }
 0x9f8   :  { %3737 = vbcast.lane.b32.xlu1 %v3687_v15, 352 }
 0x9f9   :  { %3709 = vbcast.lane.b32.xlu0 %v3687_v15, 296  ;;  %v15085_v36 = vpop.permute.xlu1 %3622 }
 0x9fa   :  { %v15101_v14 = vpop.permute.xlu0 %3626 }
 0x9fb   :  { %18176 = vst [vmem:[#allocation389_spill] sm:$0xff] %v15101_v14 }
 0x9fc   :  { %3745 = vbcast.lane.b32.xlu1 %v3687_v15, 368 }
 0x9fd   :  { %3717 = vbcast.lane.b32.xlu0 %v3687_v15, 312 }
 0xa00   :  { %3756 = vbcast.lane.b32.xlu1 %v3754_v2, 256 }
 0xa01   :  { %3725 = vbcast.lane.b32.xlu0 %v3687_v15, 328 }
 0xa04   :  { %3764 = vbcast.lane.b32.xlu1 %v3754_v2, 272 }
 0xa05   :  { %3733 = vbcast.lane.b32.xlu0 %v3687_v15, 344 }
 0xa08   :  { %3772 = vbcast.lane.b32.xlu1 %v3754_v2, 288 }
 0xa09   :  { %3741 = vbcast.lane.b32.xlu0 %v3687_v15, 360 }
 0xa0c   :  { %3780 = vbcast.lane.b32.xlu1 %v3754_v2, 304 }
 0xa0d   :  { %3749 = vbcast.lane.b32.xlu0 %v3687_v15, 376  ;;  %v15094_v15 = vpop.permute.xlu1 %3630 }
 0xa0e   :  { %18173 = vst [vmem:[#allocation323_spill] sm:$0xff] %v15094_v15  ;;  %v15107_v15 = vpop.permute.xlu0 %3634 }
 0xa0f   :  { %18178 = vst [vmem:[#allocation210_spill] sm:$0xff] %v15107_v15 }
 0xa10   :  { %3788 = vbcast.lane.b32.xlu1 %v3754_v2, 320 }
 0xa11   :  { %3760 = vbcast.lane.b32.xlu0 %v3754_v2, 264  ;;  %v15099_v59 = vpop.permute.xlu1 %3638 }
 0xa12   :  { %18175 = vst [vmem:[#allocation332_spill] sm:$0xff] %v15099_v59  ;;  %v15112_v59 = vpop.permute.xlu0 %3642 }
 0xa13   :  { %18180 = vst [vmem:[#allocation392_spill] sm:$0xff] %v15112_v59  ;;  %v18182_v59 = vsub.s32 6, %v18065_v12 }
 0xa14   :  { %3796 = vbcast.lane.b32.xlu1 %v3754_v2, 336 }
 0xa15   :  { %3768 = vbcast.lane.b32.xlu0 %v3754_v2, 280  ;;  %v15104_v24 = vpop.permute.xlu1 %3646  ;;  %v15131_v4 = vrot.slane %v14798_v57, %v18182_v59 }
 0xa16   :  { %18177 = vst [vmem:[#allocation324_spill] sm:$0xff] %v15104_v24  ;;  %v15120_v24 = vpop.permute.xlu0 %3650 }
 0xa17   :  { %18181 = vst [vmem:[#allocation314_spill] sm:$0xff] %v15120_v24 }
 0xa18   :  { %3804 = vbcast.lane.b32.xlu1 %v3754_v2, 352 }
 0xa19   :  { %3776 = vbcast.lane.b32.xlu0 %v3754_v2, 296  ;;  %v15110_v55 = vpop.permute.xlu1 %3654 }
 0xa1a   :  { %18179 = vst [vmem:[#allocation333_spill] sm:$0xff] %v15110_v55  ;;  %v15133_v13 = vpop.permute.xlu0 %3658 }
 0xa1b   :  { %18183 = vst [vmem:[#allocation201_spill] sm:$0xff] %v15133_v13 }
 0xa1c   :  { %3812 = vbcast.lane.b32.xlu1 %v3754_v2, 368 }
 0xa1d   :  { %3784 = vbcast.lane.b32.xlu0 %v3754_v2, 312  ;;  %v15116_v37 = vpop.permute.xlu1 %3662 }
 0xa20   :  { %3823 = vbcast.lane.b32.xlu1 %v15092_v5, 256 }
 0xa21   :  { %3792 = vbcast.lane.b32.xlu0 %v3754_v2, 328 }
 0xa24   :  { %3831 = vbcast.lane.b32.xlu1 %v15092_v5, 272 }
 0xa25   :  { %3800 = vbcast.lane.b32.xlu0 %v3754_v2, 344 }
 0xa28   :  { %3839 = vbcast.lane.b32.xlu1 %v15092_v5, 288 }
 0xa29   :  { %3808 = vbcast.lane.b32.xlu0 %v3754_v2, 360 }
 0xa2c   :  { %3847 = vbcast.lane.b32.xlu1 %v15092_v5, 304 }
 0xa2d   :  { %3816 = vbcast.lane.b32.xlu0 %v3754_v2, 376 }
 0xa30   :  { %3855 = vbcast.lane.b32.xlu1 %v15092_v5, 320 }
 0xa31   :  { %3827 = vbcast.lane.b32.xlu0 %v15092_v5, 264 }
 0xa34   :  { %3863 = vbcast.lane.b32.xlu1 %v15092_v5, 336 }
 0xa35   :  { %3835 = vbcast.lane.b32.xlu0 %v15092_v5, 280 }
 0xa38   :  { %v15122_v15 = vpop.xlane.xlu1 %6756  ;;  %3871 = vbcast.lane.b32.xlu1 %v15092_v5, 352 }
 0xa39   :  { %v6788_v2 = vsub.f32 %v14961_v8, %v15122_v15  ;;  %3843 = vbcast.lane.b32.xlu0 %v15092_v5, 296 }
 0xa3b   :  { %v6804_v55 = vmul.f32 1.442695, %v6788_v2 }
 0xa3c   :  { %v15135_v14 = vpop.xlane.xlu1 %6762  ;;  %3879 = vbcast.lane.b32.xlu1 %v15092_v5, 368 }
 0xa3d   :  { %9385 = vpow2.f32 %v6804_v55  ;;  %3851 = vbcast.lane.b32.xlu0 %v15092_v5, 312  ;;  %v6791_v59 = vsub.f32 %v14972_v51, %v15135_v14 }
 0xa3f   :  { %v6810_v40 = vmul.f32 1.442695, %v6791_v59 }
 0xa40   :  { %v15139_v24 = vpop.xlane.xlu0 %6758  ;;  %v15141_v31 = vpop.xlane.xlu1 %6766  ;;  %3890 = vbcast.lane.b32.xlu1 %v15131_v4, 256 }
 0xa41   :  { %v6789_v2 = vsub.f32 %v14983_v53, %v15139_v24  ;;  %3859 = vbcast.lane.b32.xlu0 %v15092_v5, 328  ;;  %v6793_v9 = vsub.f32 %v14980_v49, %v15141_v31 }
 0xa43   :  { %v6806_v13 = vmul.f32 1.442695, %v6789_v2  ;;  %v6814_v59 = vmul.f32 1.442695, %v6793_v9 }
 0xa44   :  { %v15149_v33 = vpop.xlane.xlu0 %6760  ;;  %v15151_v55 = vpop.xlane.xlu1 %6770  ;;  %3898 = vbcast.lane.b32.xlu1 %v15131_v4, 272 }
 0xa45   :  { %9387 = vpow2.f32 %v6806_v13  ;;  %v6790_v22 = vsub.f32 %v14996_v60, %v15149_v33  ;;  %3867 = vbcast.lane.b32.xlu0 %v15092_v5, 344  ;;  %v6795_v7 = vsub.f32 %v14993_v0, %v15151_v55 }
 0xa47   :  { %v9386_v10 = vpop.eup %9385  ;;  %v6808_v1 = vmul.f32 1.442695, %v6790_v22 }
 0xa48   :  { %v15159_v29 = vpop.xlane.xlu0 %6764  ;;  %8657 = vmatprep.mubr.f32.mxu1 %v9386_v10  ;;  %v15161_v2 = vpop.xlane.xlu1 %6774  ;;  %3906 = vbcast.lane.b32.xlu1 %v15131_v4, 288  ;;  %v6818_v10 = vmul.f32 1.442695, %v6795_v7 }
 0xa49   :  { %9389 = vpow2.f32 %v6808_v1  ;;  %v6792_v13 = vsub.f32 %v15008_v18, %v15159_v29  ;;  %3875 = vbcast.lane.b32.xlu0 %v15092_v5, 360  ;;  %v6797_v9 = vsub.f32 %v15005_v42, %v15161_v2 }
 0xa4a   :  { %9391 = vpow2.f32 %v6810_v40 }
 0xa4b   :  { %v6812_v43 = vmul.f32 1.442695, %v6792_v13  ;;  %v6822_v7 = vmul.f32 1.442695, %v6797_v9 }
 0xa4c   :  { %v15169_v22 = vpop.xlane.xlu0 %6768  ;;  %v15171_v48 = vpop.xlane.xlu1 %6778  ;;  %3914 = vbcast.lane.b32.xlu1 %v15131_v4, 304 }
 0xa4d   :  { %9393 = vpow2.f32 %v6812_v43  ;;  %v6794_v1 = vsub.f32 %v15020_v41, %v15169_v22  ;;  %3883 = vbcast.lane.b32.xlu0 %v15092_v5, 376  ;;  %v6799_v5 = vsub.f32 %v15017_v44, %v15171_v48 }
 0xa4e   :  { %9395 = vpow2.f32 %v6814_v59 }
 0xa4f   :  { %v9388_v40 = vpop.eup %9387  ;;  %v6816_v58 = vmul.f32 1.442695, %v6794_v1 }
 0xa50   :  { %v15179_v13 = vpop.xlane.xlu0 %6772  ;;  %8658 = vmatmul.mubr.f32.vlgmr.msra.gmra.mrb[96].mxu1 %v9388_v40  ;;  %v15181_v0 = vpop.xlane.xlu1 %6782  ;;  %3922 = vbcast.lane.b32.xlu1 %v15131_v4, 320 }
 0xa51   :  { %18184 = vst [vmem:[#allocation334_spill] sm:$0xff] %v15179_v13  ;;  %18185 = vst [vmem:[#allocation390_spill] sm:$0xff] %v15181_v0  ;;  %9397 = vpow2.f32 %v6816_v58  ;;  %v6796_v43 = vsub.f32 %v15031_v34, %v15179_v13  ;;  %3894 = vbcast.lane.b32.xlu0 %v15131_v4, 264  ;;  %v6801_v9 = vsub.f32 %v15028_v54, %v15181_v0 }
 0xa52   :  { %9399 = vpow2.f32 %v6818_v10  ;;  %v6826_v10 = vmul.f32 1.442695, %v6799_v5 }
 0xa53   :  { %v9390_v59 = vpop.eup %9389  ;;  %v6820_v1 = vmul.f32 1.442695, %v6796_v43 }
 0xa54   :  { %v9392_v42 = vpop.eup %9391  ;;  %v15189_v41 = vpop.xlane.xlu0 %6776  ;;  %8660 = vmatprep.mubr.f32.mxu1 %v9390_v59  ;;  %3930 = vbcast.lane.b32.xlu1 %v15131_v4, 336 }
 0xa55   :  { %v15191_v40 = vpop.xlane.xlu1 %6786  ;;  %9401 = vpow2.f32 %v6820_v1  ;;  %v6798_v58 = vsub.f32 %v15041_v62, %v15189_v41  ;;  %8661 = vmatmul.mubr.f32.gmra.mrb[98].mxu1 %v9392_v42  ;;  %3902 = vbcast.lane.b32.xlu0 %v15131_v4, 280 }
 0xa56   :  { %18186 = vst [vmem:[#allocation325_spill] sm:$0xff] %v15191_v40  ;;  %9403 = vpow2.f32 %v6822_v7  ;;  %v6830_v7 = vmul.f32 1.442695, %v6801_v9  ;;  %v6803_v5 = vsub.f32 %v15038_v16, %v15191_v40 }
 0xa57   :  { %v9394_v43 = vpop.eup %9393  ;;  %v6824_v34 = vmul.f32 1.442695, %v6798_v58 }
 0xa58   :  { %v9396_v13 = vpop.eup %9395  ;;  %v15199_v59 = vpop.xlane.xlu0 %6780  ;;  %8663 = vmatprep.mubr.f32.mxu1 %v9394_v43  ;;  %3938 = vbcast.lane.b32.xlu1 %v15131_v4, 352  ;;  %v18188_v43 = vsub.s32 7, %v18065_v12 }
 0xa59   :  { %18187 = vst [vmem:[#allocation387_spill] sm:$0xff] %v15199_v59  ;;  %v15201_v44 = vpop.permute.xlu1 %3670  ;;  %9405 = vpow2.f32 %v6824_v34  ;;  %v6800_v42 = vsub.f32 %v15047_v11, %v15199_v59  ;;  %8664 = vmatmul.mubr.f32.gmra.mrb[100].mxu1 %v9396_v13  ;;  %3910 = vbcast.lane.b32.xlu0 %v15131_v4, 296 }
 0xa5a   :  { %9407 = vpow2.f32 %v6826_v10  ;;  %v15212_v62 = vrot.slane %v14798_v57, %v18188_v43  ;;  %v6834_v10 = vmul.f32 1.442695, %v6803_v5 }
 0xa5b   :  { %v9398_v1 = vpop.eup %9397  ;;  %v6828_v58 = vmul.f32 1.442695, %v6800_v42 }
 0xa5c   :  { %v9400_v54 = vpop.eup %9399  ;;  %v15214_v34 = vpop.xlane.xlu0 %6784  ;;  %8666 = vmatprep.mubr.f32.mxu1 %v9398_v1  ;;  %3946 = vbcast.lane.b32.xlu1 %v15131_v4, 368 }
 0xa5d   :  { %18189 = vst [vmem:[#allocation326_spill] sm:$0xff] %v15214_v34  ;;  %v15216_v11 = vpop.permute.xlu1 %3678  ;;  %9409 = vpow2.f32 %v6828_v58  ;;  %v6802_v13 = vsub.f32 %v15051_v52, %v15214_v34  ;;  %8667 = vmatmul.mubr.f32.gmra.mrb[102].mxu1 %v9400_v54  ;;  %3918 = vbcast.lane.b32.xlu0 %v15131_v4, 312 }
 0xa5e   :  { %18190 = vst [vmem:[#allocation214_spill] sm:$0xff] %v15216_v11  ;;  %9411 = vpow2.f32 %v6830_v7 }
 0xa5f   :  { %v9402_v12 = vpop.eup %9401  ;;  %v6832_v9 = vmul.f32 1.442695, %v6802_v13 }
 0xa60   :  { %v9404_v57 = vpop.eup %9403  ;;  %v15222_v42 = vpop.permute.xlu0 %3666  ;;  %8669 = vmatprep.mubr.f32.mxu1 %v9402_v12  ;;  %3957 = vbcast.lane.b32.xlu1 %v15212_v62, 256 }
 0xa61   :  { %18191 = vst [vmem:[#allocation335_spill] sm:$0xff] %v15222_v42  ;;  %v15224_v1 = vpop.permute.xlu1 %3689  ;;  %9413 = vpow2.f32 %v6832_v9  ;;  %8670 = vmatmul.mubr.f32.gmra.mrb[104].mxu1 %v9404_v57  ;;  %3926 = vbcast.lane.b32.xlu0 %v15131_v4, 328 }
 0xa62   :  { %9415 = vpow2.f32 %v6834_v10 }
 0xa63   :  { %v9406_v54 = vpop.eup %9405 }
 0xa64   :  { %v9408_v58 = vpop.eup %9407  ;;  %v15228_v43 = vpop.permute.xlu0 %3674  ;;  %8672 = vmatprep.mubr.f32.mxu1 %v9406_v54  ;;  %3965 = vbcast.lane.b32.xlu1 %v15212_v62, 272 }
 0xa65   :  { %18192 = vst [vmem:[#allocation393_spill] sm:$0xff] %v15228_v43  ;;  %v15230_v7 = vpop.permute.xlu1 %3697  ;;  %8673 = vmatmul.mubr.f32.gmra.mrb[106].mxu1 %v9408_v58  ;;  %3934 = vbcast.lane.b32.xlu0 %v15131_v4, 344 }
 0xa67   :  { %v9410_v5 = vpop.eup %9409 }
 0xa68   :  { %v9412_v13 = vpop.eup %9411  ;;  %v15234_v12 = vpop.permute.xlu0 %3682  ;;  %8675 = vmatprep.mubr.f32.mxu1 %v9410_v5  ;;  %3973 = vbcast.lane.b32.xlu1 %v15212_v62, 288 }
 0xa69   :  { %18193 = vst [vmem:[#allocation336_spill] sm:$0xff] %v15234_v12  ;;  %v15236_v9 = vpop.permute.xlu1 %3705  ;;  %8676 = vmatmul.mubr.f32.gmra.mrb[108].mxu1 %v9412_v13  ;;  %3942 = vbcast.lane.b32.xlu0 %v15131_v4, 360 }
 0xa6b   :  { %v9414_v10 = vpop.eup %9413 }
 0xa6c   :  { %v9416_v57 = vpop.eup %9415  ;;  %v15240_v54 = vpop.permute.xlu0 %3693  ;;  %8678 = vmatprep.mubr.f32.mxu1 %v9414_v10  ;;  %3981 = vbcast.lane.b32.xlu1 %v15212_v62, 304 }
 0xa6d   :  { %v15242_v58 = vpop.permute.xlu1 %3713  ;;  %8679 = vmatmul.mubr.f32.gmra.mrb[110].mxu1 %v9416_v57  ;;  %3950 = vbcast.lane.b32.xlu0 %v15131_v4, 376 }
 0xa70   :  { %v15246_v5 = vpop.permute.xlu0 %3701  ;;  %3989 = vbcast.lane.b32.xlu1 %v15212_v62, 320 }
 0xa71   :  { %v15248_v11 = vpop.permute.xlu1 %3721  ;;  %3961 = vbcast.lane.b32.xlu0 %v15212_v62, 264 }
 0xa72   :  { %18194 = vst [vmem:[#allocation391_spill] sm:$0xff] %v15248_v11 }
 0xa74   :  { %v15252_v13 = vpop.permute.xlu0 %3709  ;;  %3997 = vbcast.lane.b32.xlu1 %v15212_v62, 336 }
 0xa75   :  { %v15254_v12 = vpop.permute.xlu1 %3729  ;;  %3969 = vbcast.lane.b32.xlu0 %v15212_v62, 280 }
 0xa78   :  { %v15258_v10 = vpop.permute.xlu0 %3717  ;;  %4005 = vbcast.lane.b32.xlu1 %v15212_v62, 352 }
 0xa79   :  { %18195 = vst [vmem:[#allocation347_spill] sm:$0xff] %v15258_v10  ;;  %v15260_v57 = vpop.permute.xlu1 %3737  ;;  %3977 = vbcast.lane.b32.xlu0 %v15212_v62, 296 }
 0xa7c   :  { %v15264_v4 = vpop.permute.xlu0 %3725  ;;  %4013 = vbcast.lane.b32.xlu1 %v15212_v62, 368 }
 0xa7d   :  { %18196 = vst [vmem:[#allocation406_spill] sm:$0xff] %v15264_v4  ;;  %v15266_v11 = vpop.permute.xlu1 %3745  ;;  %3985 = vbcast.lane.b32.xlu0 %v15212_v62, 312 }
 0xa7e   :  { %18197 = vst [vmem:[#allocation328_spill] sm:$0xff] %v15266_v11 }
 0xa80   :  { %v15270_v43 = vpop.permute.xlu0 %3733 }
 0xa81   :  { %18198 = vst [vmem:[#allocation218_spill] sm:$0xff] %v15270_v43  ;;  %v15272_v42 = vpop.permute.xlu1 %3756  ;;  %3993 = vbcast.lane.b32.xlu0 %v15212_v62, 328 }
 0xa84   :  { %v15275_v52 = vpop.permute.xlu0 %3741 }
 0xa85   :  { %18199 = vst [vmem:[#allocation327_spill] sm:$0xff] %v15275_v52  ;;  %v15277_v16 = vpop.permute.xlu1 %3764  ;;  %4001 = vbcast.lane.b32.xlu0 %v15212_v62, 344 }
 0xa86   :  { %18200 = vst [vmem:[#allocation213_spill] sm:$0xff] %v15277_v16 }
 0xa88   :  { %v15280_v10 = vpop.permute.xlu0 %3749 }
 0xa89   :  { %18201 = vst [vmem:[#allocation348_spill] sm:$0xff] %v15280_v10  ;;  %v15282_v4 = vpop.permute.xlu1 %3772  ;;  %4009 = vbcast.lane.b32.xlu0 %v15212_v62, 360 }
 0xa8a   :  { %18202 = vst [vmem:[#allocation399_spill] sm:$0xff] %v15282_v4 }
 0xa8c   :  { %v15285_v11 = vpop.permute.xlu0 %3760 }
 0xa8d   :  { %18203 = vst [vmem:[#allocation337_spill] sm:$0xff] %v15285_v11  ;;  %v15287_v34 = vpop.permute.xlu1 %3780  ;;  %4017 = vbcast.lane.b32.xlu0 %v15212_v62, 376  ;;  %v18240_v11 = vld [vmem:[#allocation123_spill] sm:$0xff] }
 0xa8e   :  { %18204 = vst [vmem:[#allocation396_spill] sm:$0xff] %v15287_v34 }
 0xa90   :  { %v15290_v43 = vpop.permute.xlu0 %3768 }
 0xa91   :  { %18205 = vst [vmem:[#allocation338_spill] sm:$0xff] %v15290_v43  ;;  %v15292_v40 = vpop.permute.xlu1 %3788  ;;  %7062 = vperm.xlu0 %8965, %v18069_v26  }
 0xa92   :  { %18206 = vst [vmem:[#allocation219_spill] sm:$0xff] %v15292_v40 }
 0xa94   :  { %v15295_v52 = vpop.permute.xlu0 %3776 }
 0xa95   :  { %18207 = vst [vmem:[#allocation349_spill] sm:$0xff] %v15295_v52  ;;  %v15297_v16 = vpop.permute.xlu1 %3796  ;;  %7065 = vperm.xlu0 %8965, %v18072_v39  }
 0xa98   :  { %v15300_v10 = vpop.permute.xlu0 %3784 }
 0xa99   :  { %18208 = vst [vmem:[#allocation407_spill] sm:$0xff] %v15300_v10  ;;  %v15302_v4 = vpop.permute.xlu1 %3804  ;;  %7068 = vperm.xlu0 %8965, %v18074_v45  }
 0xa9c   :  { %v15305_v34 = vpop.permute.xlu0 %3792 }
 0xa9d   :  { %18209 = vst [vmem:[#allocation330_spill] sm:$0xff] %v15305_v34  ;;  %v15307_v62 = vpop.permute.xlu1 %3812  ;;  %7071 = vperm.xlu0 %8965, %v18070_v6  }
 0xa9e   :  { %18210 = vst [vmem:[#allocation388_spill] sm:$0xff] %v15307_v62 }
 0xaa0   :  { %v15310_v40 = vpop.permute.xlu0 %3800 }
 0xaa1   :  { %18211 = vst [vmem:[#allocation350_spill] sm:$0xff] %v15310_v40  ;;  %v3824_v26 = vpop.permute.xlu1 %3823  ;;  %7074 = vperm.xlu0 %8965, %v18076_v25  }
 0xaa4   :  { %v15313_v52 = vpop.permute.xlu0 %3808 }
 0xaa5   :  { %18212 = vst [vmem:[#allocation400_spill] sm:$0xff] %v15313_v52  ;;  %v15315_v39 = vpop.permute.xlu1 %3831  ;;  %7077 = vperm.xlu0 %8965, %v18071_v28  }
 0xaa6   :  { %18213 = vst [vmem:[#allocation340_spill] sm:$0xff] %v15315_v39 }
 0xaa8   :  { %v15318_v10 = vpop.permute.xlu0 %3816 }
 0xaa9   :  { %18214 = vst [vmem:[#allocation221_spill] sm:$0xff] %v15318_v10  ;;  %v15320_v45 = vpop.permute.xlu1 %3839  ;;  %7080 = vperm.xlu0 %8965, %v18078_v32  }
 0xaaa   :  { %18215 = vst [vmem:[#allocation339_spill] sm:$0xff] %v15320_v45  ;;  %v18236_v45 = vld [vmem:[#allocation38_spill] sm:$0xff] }
 0xaac   :  { %v15323_v62 = vpop.permute.xlu0 %3827 }
 0xaad   :  { %18216 = vst [vmem:[#allocation398_spill] sm:$0xff] %v15323_v62  ;;  %v15325_v6 = vpop.permute.xlu1 %3847  ;;  %7083 = vperm.xlu0 %8965, %v18073_v46  }
 0xaae   :  { %18217 = vst [vmem:[#allocation351_spill] sm:$0xff] %v15325_v6 }
 0xab0   :  { %v15328_v40 = vpop.permute.xlu0 %3835 }
 0xab1   :  { %18218 = vst [vmem:[#allocation408_spill] sm:$0xff] %v15328_v40  ;;  %v15330_v25 = vpop.permute.xlu1 %3855  ;;  %7089 = vperm.xlu0 %8965, %v18075_v30  }
 0xab2   :  { %18219 = vst [vmem:[#allocation313_spill] sm:$0xff] %v15330_v25 }
 0xab4   :  { %v15333_v52 = vpop.permute.xlu0 %3843 }
 0xab5   :  { %18220 = vst [vmem:[#allocation200_spill] sm:$0xff] %v15333_v52  ;;  %v15335_v28 = vpop.permute.xlu1 %3863  ;;  %7092 = vperm.xlu0 %8965, %v18082_v38  }
 0xab8   :  { %v15338_v10 = vpop.permute.xlu0 %3851 }
 0xab9   :  { %18221 = vst [vmem:[#allocation352_spill] sm:$0xff] %v15338_v10  ;;  %v15340_v32 = vpop.permute.xlu1 %3871  ;;  %7095 = vperm.xlu0 %8965, %v18077_v47   ;;  %v18227_v10 = vmov 0  }
 0xabc   :  { %v15343_v34 = vpop.permute.xlu0 %3859 }
 0xabd   :  { %18222 = vst [vmem:[#allocation402_spill] sm:$0xff] %v15343_v34  ;;  %v15345_v46 = vpop.permute.xlu1 %3879  ;;  %7098 = vperm.xlu0 %8965, %v18083_v35  }
 0xabe   :  { %18223 = vst [vmem:[#allocation329_spill] sm:$0xff] %v15345_v46 }
 0xac0   :  { %v15348_v25 = vpop.permute.xlu0 %3867 }
 0xac1   :  { %18224 = vst [vmem:[#allocation215_spill] sm:$0xff] %v15348_v25  ;;  %v3891_v30 = vpop.permute.xlu1 %3890  ;;  %7104 = vperm.xlu0 %8965, %v18084_v63   ;;  %v18234_v63 = vld [vmem:[#allocation53_spill] sm:$0xff] }
 0xac2   :  { %v4035_v6 = vmul.f32 %v18234_v63, %v14939_v23  ;;  %v4083_v23 = vmul.f32 %v18240_v11, %v15272_v42  ;;  %v15394_v11 = vld [vmem:[%s16032_s5] ss:$0 sm:$0xff] }
 0xac4   :  { %v15351_v52 = vpop.permute.xlu0 %3875 }
 0xac5   :  { %18225 = vst [vmem:[#allocation341_spill] sm:$0xff] %v15351_v52  ;;  %v15353_v38 = vpop.permute.xlu1 %3898  ;;  %8968 = vset.pattern.permute.xlu0 %v18227_v10 }
 0xac6   :  { %18226 = vst [vmem:[#allocation401_spill] sm:$0xff] %v15353_v38  ;;  %v4019_v38 = vmul.f32 %v18236_v45, %v14895_v27 }
 0xac8   :  { %v15356_v40 = vpop.permute.xlu0 %3883  ;;  %v4147_v43 = vadd.f32 %v4035_v6, %v4019_v38 }
 0xac9   :  { %18228 = vst [vmem:[#allocation353_spill] sm:$0xff] %v15356_v40  ;;  %v15358_v47 = vpop.permute.xlu1 %3906  ;;  %v18237_v40 = vld [vmem:[#allocation231_spill] sm:$0xff] }
 0xaca   :  { %18229 = vst [vmem:[#allocation409_spill] sm:$0xff] %v15358_v47  ;;  %v4051_v47 = vmul.f32 %v18237_v40, %v15085_v36  ;;  %v18244_v36 = vld [vmem:[#allocation155_spill] sm:$0xff] }
 0xacb   :  { %v4115_v40 = vmul.f32 %v18244_v36, %v3891_v30 }
 0xacc   :  { %v15360_v34 = vpop.permute.xlu0 %3894 }
 0xacd   :  { %18230 = vst [vmem:[#allocation342_spill] sm:$0xff] %v15360_v34  ;;  %v15362_v46 = vpop.permute.xlu1 %3914  ;;  %v18238_v34 = vld [vmem:[#allocation107_spill] sm:$0xff] }
 0xace   :  { %18231 = vst [vmem:[#allocation394_spill] sm:$0xff] %v15362_v46  ;;  %v4067_v46 = vmul.f32 %v18238_v34, %v15224_v1 }
 0xad0   :  { %v15364_v35 = vpop.permute.xlu0 %3902 }
 0xad1   :  { %18232 = vst [vmem:[#allocation354_spill] sm:$0xff] %v15364_v35  ;;  %v15366_v25 = vpop.permute.xlu1 %3922 }
 0xad2   :  { %18233 = vst [vmem:[#allocation404_spill] sm:$0xff] %v15366_v25  ;;  %v4148_v25 = vadd.f32 %v4147_v43, %v4051_v47 }
 0xad4   :  { %v15370_v52 = vpop.permute.xlu0 %3910  ;;  %v4149_v63 = vadd.f32 %v4148_v25, %v4067_v46 }
 0xad5   :  { %18235 = vst [vmem:[#allocation356_spill] sm:$0xff] %v15370_v52  ;;  %v3931_v62 = vpop.permute.xlu1 %3930  ;;  %v18241_v52 = vld [vmem:[#allocation139_spill] sm:$0xff] }
 0xad6   :  { %v4099_v59 = vmul.f32 %v18241_v52, %v3824_v26  ;;  %v4150_v45 = vadd.f32 %v4149_v63, %v4083_v23  ;;  %v18251_v63 = vld [vmem:[#allocation101_spill] sm:$0xff] }
 0xad8   :  { %v15378_v39 = vpop.permute.xlu0 %3918  ;;  %v4151_v6 = vadd.f32 %v4150_v45, %v4099_v59  ;;  %v18248_v59 = vld [vmem:[#allocation63_spill] sm:$0xff]  ;;  %v4061_v45 = vmul.f32 %v18251_v63, %v15116_v37  ;;  %v18256_v37 = vld [vmem:[#allocation133_spill] sm:$0xff] }
 0xad9   :  { %18239 = vst [vmem:[#allocation343_spill] sm:$0xff] %v15378_v39  ;;  %v3939_v35 = vpop.permute.xlu1 %3938  ;;  %v18246_v39 = vld [vmem:[#allocation169_spill] sm:$0xff]  ;;  %v4045_v46 = vmul.f32 %v18248_v59, %v15073_v56 }
 0xada   :  { %v4152_v1 = vadd.f32 %v4151_v6, %v4115_v40  ;;  %v18252_v40 = vld [vmem:[#allocation64_spill] sm:$0xff] }
 0xadb   :  { %v4047_v6 = vmul.f32 %v18252_v40, %v15077_v61  ;;  %v18257_v61 = vld [vmem:[#allocation119_spill] sm:$0xff] }
 0xadc   :  { %v15383_v0 = vpop.permute.xlu0 %3926  ;;  %v4079_v40 = vmul.f32 %v18257_v61, %v15260_v57  ;;  %v18263_v61 = vld [vmem:[#allocation167_spill] sm:$0xff] }
 0xadd   :  { %18242 = vst [vmem:[#allocation403_spill] sm:$0xff] %v15383_v0  ;;  %v15385_v27 = vpop.permute.xlu1 %3946  ;;  %v18311_v0 = vld [vmem:[#allocation323_spill] sm:$0xff] }
 0xade   :  { %18243 = vst [vmem:[#allocation344_spill] sm:$0xff] %v15385_v27 }
 0xae0   :  { %v15388_v38 = vpop.permute.xlu0 %3934 }
 0xae1   :  { %18245 = vst [vmem:[#allocation395_spill] sm:$0xff] %v15388_v38  ;;  %v3958_v34 = vpop.permute.xlu1 %3957  ;;  %v18310_v38 = vld [vmem:[#allocation238_spill] sm:$0xff] }
 0xae2   :  { %v4131_v43 = vmul.f32 %v18246_v39, %v3958_v34  ;;  %v18250_v39 = vld [vmem:[#allocation47_spill] sm:$0xff]  ;;  %v18253_v34 = vld [vmem:[#allocation117_spill] sm:$0xff] }
 0xae3   :  { %v4029_v23 = vmul.f32 %v18250_v39, %v14920_v3  ;;  %v18255_v3 = vld [vmem:[#allocation103_spill] sm:$0xff] }
 0xae4   :  { %v4153_v52 = vadd.f32 %v4152_v1, %v4131_v43  ;;  %v15396_v42 = vpop.permute.xlu0 %3942  ;;  %v4077_v1 = vmul.f32 %v18253_v34, %v15254_v12  ;;  %v4063_v39 = vmul.f32 %v18255_v3, %v15201_v44  ;;  %v18258_v12 = vld [vmem:[#allocation149_spill] sm:$0xff] }
 0xae5   :  { %18247 = vst [vmem:[#allocation358_spill] sm:$0xff] %v15396_v42  ;;  %v15398_v26 = vpop.permute.xlu1 %3965  ;;  %v4217_v36 = vadd.f32 %v4045_v46, %v4029_v23  ;;  %v4093_v46 = vmul.f32 %v18256_v37, %v15297_v16  ;;  %v4109_v34 = vmul.f32 %v18258_v12, %v15335_v28  ;;  %v4127_v12 = vmul.f32 %v18263_v61, %v3939_v35  ;;  %v18264_v42 = vld [vmem:[#allocation170_spill] sm:$0xff] }
 0xae6   :  { %v4265_v25 = vmul.f32 %v15394_v11, %v4153_v52  ;;  %v18254_v52 = vld [vmem:[#allocation49_spill] sm:$0xff] }
 0xae7   :  { %v4218_v59 = vadd.f32 %v4217_v36, %v4061_v45  ;;  %v18260_v36 = vld [vmem:[#allocation135_spill] sm:$0xff] }
 0xae8   :  { %4281 = vadd.xlane.f32.xlu1 %v4265_v25  ;;  %v15403_v30 = vpop.permute.xlu0 %3950  ;;  %v4031_v25 = vmul.f32 %v18254_v52, %v14925_v19  ;;  %v4095_v44 = vmul.f32 %v18260_v36, %v15302_v4  ;;  %v18261_v52 = vld [vmem:[#allocation165_spill] sm:$0xff] }
 0xae9   :  { %18249 = vst [vmem:[#allocation346_spill] sm:$0xff] %v15403_v30  ;;  %v15405_v47 = vpop.permute.xlu1 %3973  ;;  %v4219_v63 = vadd.f32 %v4218_v59, %v4077_v1  ;;  %v4125_v3 = vmul.f32 %v18261_v52, %v3931_v62  ;;  %v18262_v1 = vld [vmem:[#allocation151_spill] sm:$0xff] }
 0xaea   :  { %v4231_v23 = vadd.f32 %v4047_v6, %v4031_v25  ;;  %v4111_v25 = vmul.f32 %v18262_v1, %v15340_v32 }
 0xaeb   :  { %v4220_v45 = vadd.f32 %v4219_v63, %v4093_v46 }
 0xaec   :  { %v15415_v43 = vpop.permute.xlu0 %3961  ;;  %v4232_v19 = vadd.f32 %v4231_v23, %v4063_v39 }
 0xaed   :  { %v15417_v56 = vpop.permute.xlu1 %3981  ;;  %v4221_v6 = vadd.f32 %v4220_v45, %v4109_v34 }
 0xaee   :  { %v4233_v16 = vadd.f32 %v4232_v19, %v4079_v40  ;;  %v18266_v40 = vld [vmem:[#allocation174_spill] sm:$0xff] }
 0xaef   :  { %v4222_v37 = vadd.f32 %v4221_v6, %v4125_v3 }
 0xaf0   :  { %v15429_v27 = vpop.permute.xlu0 %3969  ;;  %v4234_v28 = vadd.f32 %v4233_v16, %v4095_v44 }
 0xaf1   :  { %v15431_v30 = vpop.permute.xlu1 %3989 }
 0xaf2   :  { %18259 = vst [vmem:[#allocation397_spill] sm:$0xff] %v15431_v30  ;;  %v4235_v46 = vadd.f32 %v4234_v28, %v4111_v25 }
 0xaf4   :  { %v15438_v57 = vpop.permute.xlu0 %3977  ;;  %v4236_v63 = vadd.f32 %v4235_v46, %v4127_v12 }
 0xaf5   :  { %v3998_v59 = vpop.permute.xlu1 %3997 }
 0xaf6   :  { %v4141_v39 = vmul.f32 %v18264_v42, %v3998_v59 }
 0xaf8   :  { %v15442_v23 = vadd.f32 %v4222_v37, %v4141_v39  ;;  %v15444_v4 = vpop.permute.xlu0 %3985 }
 0xaf9   :  { %7086 = vperm.xlu1 %8966, %v18080_v17   ;;  %v4006_v62 = vpop.permute.xlu1 %4005 }
 0xafa   :  { %18265 = vst [vmem:[#allocation355_spill] sm:$0xff] %v15442_v23  ;;  %v4143_v32 = vmul.f32 %v18266_v40, %v4006_v62  ;;  %v18303_v23 = vld [vmem:[#allocation316_spill] sm:$0xff] }
 0xafc   :  { %v15448_v34 = vadd.f32 %v4236_v63, %v4143_v32  ;;  %v15450_v19 = vpop.permute.xlu0 %3993 }
 0xafd   :  { %18268 = vst [vmem:[#allocation360_spill] sm:$0xff] %v15450_v19  ;;  %7101 = vperm.xlu1 %8966, %v18079_v50  }
 0xafe   :  { %18267 = vst [vmem:[#allocation363_spill] sm:$0xff] %v15448_v34  ;;  %v18301_v34 = vld [vmem:[#allocation389_spill] sm:$0xff] }
 0xb00   :  { %v15453_v35 = vpop.permute.xlu0 %4001 }
 0xb01   :  { %18269 = vst [vmem:[#allocation364_spill] sm:$0xff] %v15453_v35  ;;  %7107 = vperm.xlu1 %8966, %v18081_v20   ;;  %v18308_v35 = vld [vmem:[#allocation234_spill] sm:$0xff] }
 0xb04   :  { %v15457_v42 = vpop.permute.xlu0 %4009 }
 0xb05   :  { %8967 = vset.pattern.permute.xlu1 %v18227_v10  ;;  %18270 = vst [vmem:[#allocation345_spill] sm:$0xff] %v15457_v42 }
 0xb08   :  { %v15459_v45 = vpop.permute.xlu0 %4017 }
 0xb09   :  { %18271 = vst [vmem:[#allocation405_spill] sm:$0xff] %v15459_v45  ;;  %v18305_v45 = vld [vmem:[#allocation306_spill] sm:$0xff] }
 0xb10   :  { %v7063_v17 = vpop.permute.xlu0 %7062 }
 0xb11   :  { %vm7109_vm9 = vcmp.eq.s32.totalorder %v7063_v17, 1 }
 0xb14   :  { %v7066_v36 = vpop.permute.xlu0 %7065 }
 0xb15   :  { %vm7110_vm2 = vcmp.eq.s32.totalorder %v7066_v36, 1 }
 0xb18   :  { %v15461_v44 = vpop.permute.xlu0 %7068 }
 0xb19   :  { %vm7111_vm1 = vcmp.eq.s32.totalorder %v15461_v44, 1 }
 0xb1c   :  { %v15463_v52 = vpop.permute.xlu0 %7071 }
 0xb1d   :  { %vm7112_vm6 = vcmp.eq.s32.totalorder %v15463_v52, 1 }
 0xb20   :  { %v15465_v50 = vpop.permute.xlu0 %7074 }
 0xb21   :  { %vm7113_vm3 = vcmp.eq.s32.totalorder %v15465_v50, 1 }
 0xb23   :  { %v8659_v3 = vpop.f32.mrb[96].mxu1 }
 0xb24   :  { %9417 = vlog2.f32 %v8659_v3  ;;  %v6902_v16 = vpop.f32.mrb[97].mxu1  ;;  %v15467_v10 = vpop.permute.xlu0 %7077 }
 0xb25   :  { %9419 = vlog2.f32 %v6902_v16 }
 0xb28   :  { %v8662_v6 = vpop.f32.mrb[98].mxu1  ;;  %v15469_v39 = vpop.permute.xlu0 %7080 }
 0xb29   :  { %9421 = vlog2.f32 %v8662_v6  ;;  %v6912_v20 = vpop.f32.mrb[99].mxu1 }
 0xb2a   :  { %9423 = vlog2.f32 %v6912_v20 }
 0xb2c   :  { %v8665_v1 = vpop.f32.mrb[100].mxu1 }
 0xb2d   :  { %9425 = vlog2.f32 %v8665_v1  ;;  %v6922_v25 = vpop.f32.mrb[101].mxu1  ;;  %v9607_v1 = vld [vmem:[#allocation2 + $0x388] sm:$0xff] }
 0xb2e   :  { %v9418_v59 = vpop.eup %9417  ;;  %9427 = vlog2.f32 %v6922_v25 }
 0xb2f   :  { %v9420_v28 = vpop.eup %9419  ;;  %v6984_v37 = vmul.f32 0.6931472, %v9418_v59 }
 0xb30   :  { %v6982_v61 = vmul.f32 0.6931472, %v9420_v28  ;;  %v8668_v12 = vpop.f32.mrb[102].mxu1  ;;  %v9608_v28 = vld [vmem:[#allocation2 + $0x380] sm:$0xff] }
 0xb31   :  { %v7014_v46 = vadd.f32 %v6984_v37, %v15139_v24  ;;  %9429 = vlog2.f32 %v8668_v12  ;;  %v6932_v62 = vpop.f32.mrb[103].mxu1 }
 0xb32   :  { %v7013_v63 = vadd.f32 %v6982_v61, %v15122_v15  ;;  %9431 = vlog2.f32 %v6932_v62  ;;  %v15478_v61 = vpop.permute.xlu0 %7083 }
 0xb33   :  { %v9422_v40 = vpop.eup %9421  ;;  %v7030_v32 = vadd.f32 %v7014_v46, %v18116_v21 }
 0xb34   :  { %v9424_v3 = vpop.eup %9423  ;;  %v7029_v16 = vadd.f32 %v7013_v63, %v18116_v21  ;;  %v6988_v6 = vmul.f32 0.6931472, %v9422_v40  ;;  %v8671_v20 = vpop.f32.mrb[104].mxu1 }
 0xb35   :  { %v7046_v25 = vadd.f32 %v9607_v1, %v7030_v32  ;;  %v6986_v59 = vmul.f32 0.6931472, %v9424_v3  ;;  %9433 = vlog2.f32 %v8671_v20  ;;  %v15475_v24 = vpop.f32.mrb[105].mxu1  ;;  %v9609_v1 = vld [vmem:[#allocation2 + $0x398] sm:$0xff] }
 0xb36   :  { %v7045_v37 = vadd.f32 %v9608_v28, %v7029_v16  ;;  %v7016_v15 = vadd.f32 %v6988_v6, %v15135_v14  ;;  %v9610_v28 = vld [vmem:[#allocation2 + $0x390] sm:$0xff] }
 0xb37   :  { %v9426_v12 = vpop.eup %9425  ;;  %v7126_v46 = vsel %vm7110_vm2, %v7046_v25, %v14983_v53  ;;  %v7015_v36 = vadd.f32 %v6986_v59, %v15149_v33  ;;  %vm7114_vm2 = vcmp.eq.s32.totalorder %v15467_v10, 1 }
 0xb38   :  { %v9428_v62 = vpop.eup %9427  ;;  %v15484_v63 = vadd.f32 %v15394_v11, %v7126_v46  ;;  %v7032_v40 = vadd.f32 %v7016_v15, %v18116_v21  ;;  %v6992_v32 = vmul.f32 0.6931472, %v9426_v12  ;;  %v8674_v3 = vpop.f32.mrb[106].mxu1  ;;  %v7125_v14 = vsel %vm7109_vm9, %v7045_v37, %v14961_v8 }
 0xb39   :  { %v7031_v16 = vadd.f32 %v7015_v36, %v18116_v21  ;;  %v6990_v6 = vmul.f32 0.6931472, %v9428_v62  ;;  %9435 = vlog2.f32 %v8674_v3  ;;  %v15490_v53 = vpop.f32.mrb[107].mxu1  ;;  %v15493_v33 = vadd.f32 %v15394_v11, %v7125_v14  ;;  %v7090_v36 = vpop.permute.xlu0 %7089  ;;  %v9611_v14 = vld [vmem:[#allocation2 + $0x3a8] sm:$0xff] }
 0xb3a   :  { %v7018_v20 = vadd.f32 %v6992_v32, %v15141_v31  ;;  %v7048_v25 = vadd.f32 %v9609_v1, %v7032_v40  ;;  %7159 = vmax.xlane.f32.xlu1 %v15484_v63  ;;  %vm7115_vm9 = vcmp.eq.s32.totalorder %v15469_v39, 1  ;;  %9437 = vlog2.f32 %v15475_v24  ;;  %v18284_v24 = vld [vmem:[#allocation55_spill] sm:$0xff] }
 0xb3b   :  { %v9430_v59 = vpop.eup %9429  ;;  %v7047_v15 = vadd.f32 %v9610_v28, %v7031_v16  ;;  %v7017_v8 = vadd.f32 %v6990_v6, %v15159_v29  ;;  %7157 = vmax.xlane.f32.xlu0 %v15493_v33  ;;  %v9612_v6 = vld [vmem:[#allocation2 + $0x3a0] sm:$0xff]  ;;  %9439 = vlog2.f32 %v15490_v53 }
 0xb3c   :  { %v9432_v17 = vpop.eup %9431  ;;  %v7034_v37 = vadd.f32 %v7018_v20, %v18116_v21  ;;  %v7128_v31 = vsel %vm7112_vm6, %v7048_v25, %v14972_v51  ;;  %v6996_v12 = vmul.f32 0.6931472, %v9430_v59  ;;  %v15504_v46 = vpop.f32.mrb[108].mxu1  ;;  %vm7116_vm6 = vcmp.eq.s32.totalorder %v15478_v61, 1  ;;  %v18273_v61 = vld [vmem:[#allocation193_spill] sm:$0xff]  ;;  %v18285_v53 = vld [vmem:[#allocation192_spill] sm:$0xff] }
 0xb3d   :  { %v7033_v62 = vadd.f32 %v7017_v8, %v18116_v21  ;;  %v15508_v40 = vadd.f32 %v15394_v11, %v7128_v31  ;;  %v6994_v44 = vmul.f32 0.6931472, %v9432_v17  ;;  %v6962_v29 = vpop.f32.mrb[109].mxu1  ;;  %v7127_v32 = vsel %vm7111_vm1, %v7047_v15, %v14996_v60  ;;  %v9613_v8 = vld [vmem:[#allocation2 + $0x3b8] sm:$0xff] }
 0xb3e   :  { %v7020_v3 = vadd.f32 %v6996_v12, %v15151_v55  ;;  %v7050_v52 = vadd.f32 %v9611_v14, %v7034_v37  ;;  %v15518_v60 = vadd.f32 %v15394_v11, %v7127_v32  ;;  %v15528_v37 = vpop.permute.xlu0 %7092  ;;  %v9614_v12 = vld [vmem:[#allocation2 + $0x3b0] sm:$0xff]  ;;  %vm7118_vm1 = vcmp.eq.s32.totalorder %v7090_v36, 1  ;;  %v18275_v36 = vld [vmem:[#allocation208_spill] sm:$0xff] }
 0xb3f   :  { %v9434_v51 = vpop.eup %9433  ;;  %v7019_v16 = vadd.f32 %v6994_v44, %v15169_v22  ;;  %v7049_v20 = vadd.f32 %v9612_v6, %v7033_v62  ;;  %7163 = vmax.xlane.f32.xlu0 %v15508_v40  ;;  %9441 = vlog2.f32 %v15504_v46 }
 0xb40   :  { %v7036_v1 = vadd.f32 %v7020_v3, %v18116_v21  ;;  %v7000_v25 = vmul.f32 0.6931472, %v9434_v51  ;;  %v8680_v59 = vpop.f32.mrb[110].mxu1  ;;  %v7130_v15 = vsel %vm7114_vm2, %v7050_v52, %v14980_v49  ;;  %v18272_v49 = vld [vmem:[#allocation320_spill] sm:$0xff]  ;;  %9443 = vlog2.f32 %v6962_v29  ;;  %v18287_v29 = vld [vmem:[#allocation190_spill] sm:$0xff] }
 0xb41   :  { %v7035_v55 = vadd.f32 %v7019_v16, %v18116_v21  ;;  %v7129_v50 = vsel %vm7113_vm3, %v7049_v20, %v15008_v18  ;;  %v6972_v22 = vpop.f32.mrb[111].mxu1  ;;  %v9615_v51 = vld [vmem:[#allocation2 + $0x3c8] sm:$0xff]  ;;  %9445 = vlog2.f32 %v8680_v59  ;;  %v18288_v59 = vld [vmem:[#allocation43_spill] sm:$0xff]  ;;  %vm7119_vm2 = vcmp.eq.s32.totalorder %v15528_v37, 1 }
 0xb42   :  { %v15524_v28 = vadd.f32 %v15394_v11, %v7129_v50  ;;  %v7022_v10 = vadd.f32 %v7000_v25, %v15161_v2  ;;  %v7052_v17 = vadd.f32 %v9613_v8, %v7036_v1  ;;  %v15535_v2 = vadd.f32 %v15394_v11, %v7130_v15  ;;  %v7096_v20 = vpop.permute.xlu0 %7095  ;;  %v18274_v1 = vld [vmem:[#allocation319_spill] sm:$0xff] }
 0xb43   :  { %v9436_v31 = vpop.eup %9435  ;;  %v7051_v62 = vadd.f32 %v9614_v12, %v7035_v55  ;;  %7161 = vmax.xlane.f32.xlu0 %v15518_v60  ;;  %v9616_v25 = vld [vmem:[#allocation2 + $0x3d8] sm:$0xff]  ;;  %vm7120_vm3 = vcmp.eq.s32.totalorder %v7096_v20, 1  ;;  %9447 = vlog2.f32 %v6972_v22  ;;  %v18289_v20 = vld [vmem:[#allocation308_spill] sm:$0xff] }
 0xb44   :  { %v7038_v18 = vadd.f32 %v7022_v10, %v18116_v21  ;;  %v7004_v44 = vmul.f32 0.6931472, %v9436_v31  ;;  %7165 = vmax.xlane.f32.xlu1 %v15524_v28  ;;  %v7132_v52 = vsel %vm7116_vm6, %v7052_v17, %v18273_v61  ;;  %v9438_v8 = vpop.eup %9437  ;;  %v18277_v17 = vld [vmem:[#allocation304_spill] sm:$0xff]  ;;  %v18278_v31 = vld [vmem:[#allocation39_spill] sm:$0xff] }
 0xb45   :  { %v7131_v32 = vsel %vm7115_vm9, %v7051_v62, %v18272_v49  ;;  %v15549_v39 = vadd.f32 %v15394_v11, %v7132_v52  ;;  %v4021_v12 = vmul.f32 %v18278_v31, %v18277_v17  ;;  %v9440_v62 = vpop.eup %9439  ;;  %v18283_v52 = vld [vmem:[#allocation307_spill] sm:$0xff]  ;;  %v18295_v31 = vld [vmem:[#allocation305_spill] sm:$0xff]  ;;  %v6998_v42 = vmul.f32 0.6931472, %v9438_v8 }
 0xb46   :  { %v7024_v3 = vadd.f32 %v7004_v44, %v15171_v48  ;;  %v15542_v14 = vadd.f32 %v15394_v11, %v7131_v32  ;;  %v7054_v16 = vadd.f32 %v9615_v51, %v7038_v18  ;;  %v18279_v18 = vld [vmem:[#allocation315_spill] sm:$0xff]  ;;  %v18280_v44 = vld [vmem:[#allocation41_spill] sm:$0xff]  ;;  %v18281_v32 = vld [vmem:[#allocation204_spill] sm:$0xff]  ;;  %v4037_v51 = vmul.f32 %v18284_v24, %v18283_v52 }
 0xb47   :  { %7167 = vmax.xlane.f32.xlu0 %v15535_v2  ;;  %v4023_v49 = vmul.f32 %v18280_v44, %v18279_v18  ;;  %v18291_v22 = vld [vmem:[#allocation331_spill] sm:$0xff]  ;;  %v18296_v18 = vld [vmem:[#allocation40_spill] sm:$0xff]  ;;  %v18299_v24 = vld [vmem:[#allocation322_spill] sm:$0xff] }
 0xb48   :  { %v7040_v6 = vadd.f32 %v7024_v3, %v18116_v21  ;;  %7169 = vmax.xlane.f32.xlu1 %v15542_v14  ;;  %v7134_v48 = vsel %vm7118_vm1, %v7054_v16, %v18274_v1  ;;  %v18282_v3 = vld [vmem:[#allocation37_spill] sm:$0xff]  ;;  %v18286_v16 = vld [vmem:[#allocation54_spill] sm:$0xff]  ;;  %v18290_v1 = vld [vmem:[#allocation56_spill] sm:$0xff]  ;;  %v4022_v44 = vmul.f32 %v18296_v18, %v18295_v31  ;;  %v4161_v30 = vadd.f32 %v4037_v51, %v4021_v12 }
 0xb49   :  { %v15554_v50 = vadd.f32 %v15394_v11, %v7134_v48  ;;  %v4020_v61 = vmul.f32 %v18282_v3, %v18281_v32  ;;  %v4036_v46 = vmul.f32 %v18286_v16, %v18285_v53  ;;  %v4038_v48 = vmul.f32 %v18290_v1, %v18289_v20  ;;  %v18297_v32 = vld [vmem:[#allocation212_spill] sm:$0xff]  ;;  %v18298_v3 = vld [vmem:[#allocation57_spill] sm:$0xff]  ;;  %v18304_v20 = vld [vmem:[#allocation42_spill] sm:$0xff] }
 0xb4a   :  { %v7056_v55 = vadd.f32 %v9616_v25, %v7040_v6  ;;  %v4025_v6 = vmul.f32 %v18288_v59, %v18287_v29  ;;  %v18292_v25 = vld [vmem:[#allocation58_spill] sm:$0xff]  ;;  %v4039_v52 = vmul.f32 %v18298_v3, %v18297_v32  ;;  %v18300_v53 = vld [vmem:[#allocation60_spill] sm:$0xff]  ;;  %v4024_v1 = vmul.f32 %v18304_v20, %v18303_v23  ;;  %v18312_v23 = vld [vmem:[#allocation235_spill] sm:$0xff] }
 0xb4b   :  { %7171 = vmax.xlane.f32.xlu0 %v15549_v39  ;;  %v4042_v16 = vmul.f32 %v18300_v53, %v18299_v24  ;;  %v18302_v29 = vld [vmem:[#allocation230_spill] sm:$0xff]  ;;  %v4154_v31 = vadd.f32 %v4036_v46, %v4020_v61  ;;  %v18309_v3 = vld [vmem:[#allocation392_spill] sm:$0xff]  ;;  %v4168_v19 = vadd.f32 %v4038_v48, %v4022_v44  ;;  %v4053_v20 = vmul.f32 %v18312_v23, %v18311_v0  ;;  %v18314_v12 = vld [vmem:[#allocation239_spill] sm:$0xff] }
 0xb4c   :  { %v7136_v10 = vsel %vm7120_vm3, %v7056_v55, %v18275_v36  ;;  %v4040_v55 = vmul.f32 %v18292_v25, %v18291_v22  ;;  %v18293_v36 = vld [vmem:[#allocation217_spill] sm:$0xff]  ;;  %v4052_v59 = vmul.f32 %v18302_v29, %v18301_v34  ;;  %v18306_v22 = vld [vmem:[#allocation44_spill] sm:$0xff]  ;;  %v18307_v18 = vld [vmem:[#allocation210_spill] sm:$0xff]  ;;  %v4056_v24 = vmul.f32 %v18310_v38, %v18309_v3 }
 0xb4d   :  { %v15559_v15 = vadd.f32 %v15394_v11, %v7136_v10  ;;  %v18294_v10 = vld [vmem:[#allocation59_spill] sm:$0xff]  ;;  %v4026_v25 = vmul.f32 %v18306_v22, %v18305_v45  ;;  %v4054_v32 = vmul.f32 %v18308_v35, %v18307_v18  ;;  %v18315_v51 = vld [vmem:[#allocation324_spill] sm:$0xff]  ;;  %v18317_v22 = vld [vmem:[#allocation109_spill] sm:$0xff] }
 0xb4e   :  { %v4041_v17 = vmul.f32 %v18294_v10, %v18293_v36  ;;  %v7002_v36 = vmul.f32 0.6931472, %v9440_v62  ;;  %v9442_v10 = vpop.eup %9441  ;;  %v4182_v34 = vadd.f32 %v4040_v55, %v4024_v1  ;;  %v4155_v8 = vadd.f32 %v4154_v31, %v4052_v59  ;;  %v18313_v62 = vld [vmem:[#allocation332_spill] sm:$0xff]  ;;  %v18316_v46 = vld [vmem:[#allocation243_spill] sm:$0xff]  ;;  %v18318_v18 = vld [vmem:[#allocation334_spill] sm:$0xff] }
 0xb4f   :  { %7175 = vmax.xlane.f32.xlu0 %v15554_v50  ;;  %18276 = vst [vmem:[#allocation357_spill] sm:$0xff] %v15559_v15  ;;  %v9444_v53 = vpop.eup %9443  ;;  %v15601_v45 = vadd.f32 %v4042_v16, %v4026_v25  ;;  %v4055_v61 = vmul.f32 %v18314_v12, %v18313_v62  ;;  %v4057_v35 = vmul.f32 %v18316_v46, %v18315_v51  ;;  %v7008_v44 = vmul.f32 0.6931472, %v9442_v10  ;;  %v18319_v1 = vld [vmem:[#allocation111_spill] sm:$0xff]  ;;  %v18320_v31 = vld [vmem:[#allocation106_spill] sm:$0xff] }
 0xb50   :  { %v4189_v29 = vadd.f32 %v4041_v17, %v4025_v6  ;;  %v4069_v38 = vmul.f32 %v18317_v22, %v15230_v7  ;;  %v7021_v48 = vadd.f32 %v6998_v42, %v18318_v18  ;;  %v7023_v6 = vadd.f32 %v7002_v36, %v15189_v41  ;;  %v9446_v55 = vpop.eup %9445  ;;  %v18321_v7 = vld [vmem:[#allocation113_spill] sm:$0xff]  ;;  %v18322_v23 = vld [vmem:[#allocation314_spill] sm:$0xff] }
 0xb51   :  { %v4169_v17 = vadd.f32 %v4168_v19, %v4054_v32  ;;  %v4183_v0 = vadd.f32 %v4182_v34, %v4056_v24  ;;  %v9448_v16 = vpop.eup %9447  ;;  %v4162_v59 = vadd.f32 %v4161_v30, %v4053_v20  ;;  %v4071_v25 = vmul.f32 %v18319_v1, %v15236_v9  ;;  %v18323_v41 = vld [vmem:[#allocation242_spill] sm:$0xff]  ;;  %v18324_v32 = vld [vmem:[#allocation108_spill] sm:$0xff]  ;;  %v18328_v18 = vld [vmem:[#allocation213_spill] sm:$0xff] }
 0xb52   :  { %v4068_v3 = vmul.f32 %v18320_v31, %v15240_v54  ;;  %v4073_v42 = vmul.f32 %v18321_v7, %v15242_v58  ;;  %v15621_v36 = vmul.f32 %v18323_v41, %v18322_v23  ;;  %v4070_v10 = vmul.f32 %v18324_v32, %v15246_v5  ;;  %v18325_v24 = vld [vmem:[#allocation110_spill] sm:$0xff]  ;;  %v18327_v58 = vld [vmem:[#allocation387_spill] sm:$0xff]  ;;  %v18329_v1 = vld [vmem:[#allocation125_spill] sm:$0xff]  ;;  %v7099_v32 = vpop.permute.xlu0 %7098 }
 0xb53   :  { %7179 = vmax.xlane.f32.xlu0 %v15559_v15  ;;  %v4175_v15 = vadd.f32 %v4039_v52, %v4023_v49  ;;  %v15611_v49 = vpop.permute.xlu1 %4013  ;;  %v7006_v52 = vmul.f32 0.6931472, %v9444_v53  ;;  %v4072_v30 = vmul.f32 %v18325_v24, %v15252_v13  ;;  %v4190_v53 = vadd.f32 %v4189_v29, %v4057_v35  ;;  %v18326_v20 = vld [vmem:[#allocation390_spill] sm:$0xff]  ;;  %v18338_v24 = vld [vmem:[#allocation347_spill] sm:$0xff] }
 0xb54   :  { %v4163_v34 = vadd.f32 %v4162_v59, %v4069_v38  ;;  %v7037_v9 = vadd.f32 %v7021_v48, %v18116_v21  ;;  %v7039_v54 = vadd.f32 %v7023_v6, %v18116_v21  ;;  %v7026_v62 = vadd.f32 %v7008_v44, %v18326_v20  ;;  %v18330_v38 = vld [vmem:[#allocation399_spill] sm:$0xff]  ;;  %v18332_v59 = vld [vmem:[#allocation337_spill] sm:$0xff]  ;;  %v18333_v44 = vld [vmem:[#allocation122_spill] sm:$0xff] }
 0xb55   :  { %v4176_v19 = vadd.f32 %v4175_v15, %v4055_v61  ;;  %v7025_v12 = vadd.f32 %v7006_v52, %v18327_v58  ;;  %v7012_v51 = vmul.f32 0.6931472, %v9446_v55  ;;  %v7010_v46 = vmul.f32 0.6931472, %v9448_v16  ;;  %v18331_v48 = vld [vmem:[#allocation127_spill] sm:$0xff]  ;;  %v18334_v52 = vld [vmem:[#allocation396_spill] sm:$0xff] }
 0xb56   :  { %v4156_v61 = vadd.f32 %v4155_v8, %v4068_v3  ;;  %v4191_v5 = vadd.f32 %v4190_v53, %v4073_v42  ;;  %v4085_v13 = vmul.f32 %v18329_v1, %v18328_v18  ;;  %v4170_v29 = vadd.f32 %v4169_v17, %v4070_v10  ;;  %v18335_v55 = vld [vmem:[#allocation129_spill] sm:$0xff]  ;;  %v9618_v8 = vld [vmem:[#allocation2 + $0x3c0] sm:$0xff]  ;;  %v18337_v41 = vld [vmem:[#allocation326_spill] sm:$0xff] }
 0xb57   :  { %v4177_v15 = vadd.f32 %v4176_v19, %v4071_v25  ;;  %v15635_v35 = vadd.f32 %v4183_v0, %v4072_v30  ;;  %v4087_v6 = vmul.f32 %v18331_v48, %v18330_v38  ;;  %v4084_v31 = vmul.f32 %v18333_v44, %v18332_v59  ;;  %v9617_v7 = vld [vmem:[#allocation2 + $0x3d0] sm:$0xff]  ;;  %v18339_v30 = vld [vmem:[#allocation112_spill] sm:$0xff] }
 0xb58   :  { %v4089_v16 = vmul.f32 %v18335_v55, %v18334_v52  ;;  %v7055_v23 = vadd.f32 %v9617_v7, %v7039_v54  ;;  %v7053_v25 = vadd.f32 %v9618_v8, %v7037_v9  ;;  %v7042_v3 = vadd.f32 %v7026_v62, %v18116_v21  ;;  %v18336_v0 = vld [vmem:[#allocation325_spill] sm:$0xff]  ;;  %v18340_v54 = vld [vmem:[#allocation340_spill] sm:$0xff]  ;;  %v18342_v62 = vld [vmem:[#allocation338_spill] sm:$0xff] }
 0xb59   :  { %v7041_v17 = vadd.f32 %v7025_v12, %v18116_v21  ;;  %v7028_v42 = vadd.f32 %v7012_v51, %v18336_v0  ;;  %v7027_v19 = vadd.f32 %v7010_v46, %v18337_v41  ;;  %v15650_v53 = vmul.f32 %v18339_v30, %v18338_v24  ;;  %v18341_v58 = vld [vmem:[#allocation141_spill] sm:$0xff]  ;;  %v18343_v38 = vld [vmem:[#allocation124_spill] sm:$0xff]  ;;  %v18347_v55 = vld [vmem:[#allocation310_spill] sm:$0xff] }
 0xb5a   :  { %v4164_v20 = vadd.f32 %v4163_v34, %v4085_v13  ;;  %v4101_v18 = vmul.f32 %v18341_v58, %v18340_v54  ;;  %v4178_v9 = vadd.f32 %v4177_v15, %v4087_v6  ;;  %v4157_v1 = vadd.f32 %v4156_v61, %v4084_v31  ;;  %v18344_v48 = vld [vmem:[#allocation309_spill] sm:$0xff]  ;;  %v9619_v61 = vld [vmem:[#allocation2 + $0x3e0] sm:$0xff] }
 0xb5b   :  { %v4086_v12 = vmul.f32 %v18343_v38, %v18342_v62  ;;  %v4192_v59 = vadd.f32 %v4191_v5, %v4089_v16  ;;  %v18345_v46 = vld [vmem:[#allocation401_spill] sm:$0xff]  ;;  %v7135_v7 = vsel %vm7119_vm2, %v7055_v23, %v18347_v55  ;;  %v7044_v13 = vadd.f32 %v7028_v42, %v18116_v21  ;;  %v18348_v16 = vld [vmem:[#allocation339_spill] sm:$0xff]  ;;  %v18350_v23 = vld [vmem:[#allocation398_spill] sm:$0xff] }
 0xb5c   :  { %v18346_v44 = vld [vmem:[#allocation157_spill] sm:$0xff]  ;;  %v7043_v15 = vadd.f32 %v7027_v19, %v18116_v21  ;;  %v7057_v6 = vadd.f32 %v9619_v61, %v7041_v17  ;;  %v4165_v5 = vadd.f32 %v4164_v20, %v4101_v18  ;;  %v18349_v0 = vld [vmem:[#allocation143_spill] sm:$0xff]  ;;  %vm7121_vm6 = vcmp.eq.s32.totalorder %v7099_v32, 1  ;;  %v7105_v19 = vpop.permute.xlu0 %7104 }
 0xb5d   :  { %v4117_v52 = vmul.f32 %v18346_v44, %v18345_v46  ;;  %v9620_v31 = vld [vmem:[#allocation2 + $0x3e8] sm:$0xff]  ;;  %v4103_v41 = vmul.f32 %v18349_v0, %v18348_v16  ;;  %v4171_v37 = vadd.f32 %v4170_v29, %v4086_v12  ;;  %v18352_v42 = vld [vmem:[#allocation171_spill] sm:$0xff]  ;;  %v15678_v18 = vadd.f32 %v15394_v11, %v7135_v7  ;;  %v18364_v0 = vld [vmem:[#allocation194_spill] sm:$0xff] }
 0xb5e   :  { %v7058_v8 = vadd.f32 %v9620_v31, %v7042_v3  ;;  %v4133_v21 = vmul.f32 %v18352_v42, %v15398_v26  ;;  %v18353_v17 = vld [vmem:[#allocation209_spill] sm:$0xff]  ;;  %v18354_v3 = vld [vmem:[#allocation351_spill] sm:$0xff]  ;;  %v18359_v31 = vld [vmem:[#allocation342_spill] sm:$0xff]  ;;  %vm7123_vm3 = vcmp.eq.s32.totalorder %v7105_v19, 1 }
 0xb5f   :  { %v18355_v54 = vld [vmem:[#allocation145_spill] sm:$0xff]  ;;  %v4166_v58 = vadd.f32 %v4165_v5, %v4117_v52  ;;  %v18357_v62 = vld [vmem:[#allocation159_spill] sm:$0xff]  ;;  %v4179_v61 = vadd.f32 %v4178_v9, %v4103_v41  ;;  %v18361_v7 = vld [vmem:[#allocation408_spill] sm:$0xff] }
 0xb60   :  { %v4105_v20 = vmul.f32 %v18355_v54, %v18354_v3  ;;  %v18356_v29 = vld [vmem:[#allocation409_spill] sm:$0xff]  ;;  %v18358_v12 = vld [vmem:[#allocation195_spill] sm:$0xff]  ;;  %v18365_v9 = vld [vmem:[#allocation198_spill] sm:$0xff] }
 0xb61   :  { %v4119_v38 = vmul.f32 %v18357_v62, %v18356_v29  ;;  %v9622_v46 = vld [vmem:[#allocation2 + $0x3f8] sm:$0xff]  ;;  %v4167_v16 = vadd.f32 %v4166_v58, %v4133_v21  ;;  %v4132_v41 = vmul.f32 %v18365_v9, %v15415_v43  ;;  %v18366_v19 = vld [vmem:[#allocation349_spill] sm:$0xff]  ;;  %v18382_v9 = vld [vmem:[#allocation144_spill] sm:$0xff] }
 0xb62   :  { %v7060_v44 = vadd.f32 %v9622_v46, %v7044_v13  ;;  %v4193_v3 = vadd.f32 %v4192_v59, %v4105_v20  ;;  %v18368_v54 = vld [vmem:[#allocation321_spill] sm:$0xff]  ;;  %v18369_v29 = vld [vmem:[#allocation394_spill] sm:$0xff] }
 0xb63   :  { %v4180_v21 = vadd.f32 %v4179_v61, %v4119_v38  ;;  %v18370_v62 = vld [vmem:[#allocation161_spill] sm:$0xff]  ;;  %v18374_v46 = vld [vmem:[#allocation142_spill] sm:$0xff]  ;;  %v4267_v59 = vmul.f32 %v15394_v11, %v4167_v16 }
 0xb64   :  { %v18375_v38 = vld [vmem:[#allocation202_spill] sm:$0xff] }
 0xb65   :  { %v18376_v61 = vld [vmem:[#allocation166_spill] sm:$0xff] }
 0xb75   :  { %v15631_v22 = vpop.xlane.xlu1 %4281 }
 0xb79   :  { %v7087_v10 = vpop.permute.xlu1 %7086 }
 0xb7a   :  { %vm7117_vm9 = vcmp.eq.s32.totalorder %v7087_v10, 1  ;;  %v18351_v10 = vld [vmem:[#allocation138_spill] sm:$0xff] }
 0xb7b   :  { %v7133_v51 = vsel %vm7117_vm9, %v7053_v25, %v18344_v48  ;;  %v4100_v24 = vmul.f32 %v18351_v10, %v18350_v23  ;;  %v7137_v48 = vsel %vm7121_vm6, %v7057_v6, %v18358_v12  ;;  %v18363_v6 = vld [vmem:[#allocation288_spill] sm:$0xff] }
 0xb7c   :  { %v15663_v34 = vadd.f32 %v15394_v11, %v7133_v51  ;;  %v9621_v51 = vld [vmem:[#allocation2 + $0x3f0] sm:$0xff]  ;;  %v15698_v10 = vadd.f32 %v15394_v11, %v7137_v48  ;;  %v18372_v12 = vld [vmem:[#allocation156_spill] sm:$0xff] }
 0xb7d   :  { %v7102_v25 = vpop.permute.xlu1 %7101  ;;  %v7059_v26 = vadd.f32 %v9621_v51, %v7043_v15  ;;  %v4135_v15 = vmul.f32 %v18363_v6, %v15405_v47  ;;  %v4158_v23 = vadd.f32 %v4157_v1, %v4100_v24  ;;  %v4121_v1 = vmul.f32 %v18370_v62, %v18369_v29  ;;  %v18371_v24 = vld [vmem:[#allocation354_spill] sm:$0xff]  ;;  %v18373_v51 = vld [vmem:[#allocation200_spill] sm:$0xff] }
 0xb7e   :  { %vm7122_vm1 = vcmp.eq.s32.totalorder %v7102_v25, 1  ;;  %7173 = vmax.xlane.f32.xlu1 %v15663_v34  ;;  %v18362_v25 = vld [vmem:[#allocation140_spill] sm:$0xff]  ;;  %v4118_v43 = vmul.f32 %v18372_v12, %v18371_v24 }
 0xb7f   :  { %v7138_v30 = vsel %vm7122_vm1, %v7058_v8, %v18353_v17  ;;  %v18360_v8 = vld [vmem:[#allocation154_spill] sm:$0xff]  ;;  %v4102_v5 = vmul.f32 %v18362_v25, %v18361_v7  ;;  %v7139_v58 = vsel %vm7123_vm3, %v7059_v26, %v18368_v54  ;;  %v4137_v26 = vmul.f32 %v18375_v38, %v15417_v56  ;;  %v18377_v7 = vld [vmem:[#allocation407_spill] sm:$0xff]  ;;  %v18378_v25 = vld [vmem:[#allocation128_spill] sm:$0xff] }
 0xb80   :  { %v15681_v32 = vadd.f32 %v15394_v11, %v7138_v30  ;;  %v4116_v52 = vmul.f32 %v18360_v8, %v18359_v31  ;;  %v18367_v17 = vld [vmem:[#allocation126_spill] sm:$0xff]  ;;  %v4134_v31 = vmul.f32 %v18376_v61, %v15429_v27  ;;  %v15720_v8 = vadd.f32 %v15394_v11, %v7139_v58  ;;  %v18384_v54 = vld [vmem:[#allocation343_spill] sm:$0xff]  ;;  %v18385_v58 = vld [vmem:[#allocation160_spill] sm:$0xff] }
 0xb81   :  { %v7108_v55 = vpop.permute.xlu1 %7107  ;;  %v4088_v30 = vmul.f32 %v18367_v17, %v18366_v19  ;;  %v4172_v48 = vadd.f32 %v4171_v37, %v4102_v5  ;;  %v4090_v5 = vmul.f32 %v18378_v25, %v18377_v7  ;;  %v4194_v6 = vadd.f32 %v4193_v3, %v4121_v1  ;;  %v18383_v19 = vld [vmem:[#allocation289_spill] sm:$0xff]  ;;  %v18386_v62 = vld [vmem:[#allocation168_spill] sm:$0xff] }
 0xb82   :  { %vm7124_vm2 = vcmp.eq.s32.totalorder %v7108_v55, 1  ;;  %7177 = vmax.xlane.f32.xlu1 %v15678_v18  ;;  %7183 = vmax.xlane.f32.xlu0 %v15681_v32  ;;  %v4159_v47 = vadd.f32 %v4158_v23, %v4116_v52  ;;  %v4181_v55 = vadd.f32 %v4180_v21, %v4135_v15  ;;  %v4197_v52 = vadd.f32 %v15601_v45, %v15621_v36  ;;  %v18379_v15 = vld [vmem:[#allocation356_spill] sm:$0xff] }
 0xb83   :  { %v7140_v13 = vsel %vm7124_vm2, %v7060_v44, %v18364_v0  ;;  %v4104_v44 = vmul.f32 %v18374_v46, %v18373_v51  ;;  %v4185_v37 = vadd.f32 %v15635_v35, %v4088_v30  ;;  %v4173_v16 = vadd.f32 %v4172_v48, %v4118_v43  ;;  %v18380_v0 = vld [vmem:[#allocation158_spill] sm:$0xff]  ;;  %v18381_v23 = vld [vmem:[#allocation352_spill] sm:$0xff] }
 0xb84   :  { %v15701_v42 = vadd.f32 %v15394_v11, %v7140_v13  ;;  %v4160_v20 = vadd.f32 %v4159_v47, %v4132_v41  ;;  %v4120_v13 = vmul.f32 %v18380_v0, %v18379_v15  ;;  %v4198_v27 = vadd.f32 %v4197_v52, %v15650_v53 }
 0xb85   :  { %v4186_v56 = vadd.f32 %v4185_v37, %v4104_v44  ;;  %v4106_v41 = vmul.f32 %v18382_v9, %v18381_v23  ;;  %v4269_v45 = vmul.f32 %v15394_v11, %v4181_v55  ;;  %v4195_v36 = vadd.f32 %v4194_v6, %v4137_v26 }
 0xb86   :  { %7181 = vmax.xlane.f32.xlu1 %v15698_v10  ;;  %7187 = vmax.xlane.f32.xlu0 %v15701_v42  ;;  %v4174_v35 = vadd.f32 %v4173_v16, %v4134_v31  ;;  %v4136_v17 = vmul.f32 %v18383_v19, %v15438_v57  ;;  %v4266_v30 = vmul.f32 %v15394_v11, %v4160_v20 }
 0xb87   :  { %v4199_v3 = vadd.f32 %v4198_v27, %v4090_v5  ;;  %v4187_v21 = vadd.f32 %v4186_v56, %v4120_v13  ;;  %v4122_v47 = vmul.f32 %v18385_v58, %v18384_v54  ;;  %v4138_v1 = vmul.f32 %v18386_v62, %v15444_v4  ;;  %v18388_v62 = vld [vmem:[#allocation205_spill] sm:$0xff] }
 0xb88   :  { %v4268_v24 = vmul.f32 %v15394_v11, %v4174_v35  ;;  %v4271_v12 = vmul.f32 %v15394_v11, %v4195_v36 }
 0xb89   :  { %v4200_v53 = vadd.f32 %v4199_v3, %v4106_v41  ;;  %v4188_v29 = vadd.f32 %v4187_v21, %v4136_v17  ;;  %v18387_v41 = vld [vmem:[#allocation357_spill] sm:$0xff] }
 0xb8a   :  { %7185 = vmax.xlane.f32.xlu1 %v15720_v8  ;;  %4285 = vadd.xlane.f32.xlu0 %v4267_v59 }
 0xb8b   :  { %v4201_v43 = vadd.f32 %v4200_v53, %v4122_v47  ;;  %v4270_v48 = vmul.f32 %v15394_v11, %v4188_v29 }
 0xb8d   :  { %v4202_v57 = vadd.f32 %v4201_v43, %v4138_v1  ;;  %v18389_v1 = vld [vmem:[#allocation45_spill] sm:$0xff]  ;;  %v18391_v43 = vld [vmem:[#allocation62_spill] sm:$0xff] }
 0xb8e   :  { %4283 = vadd.xlane.f32.xlu1 %v4266_v30  ;;  %4289 = vadd.xlane.f32.xlu0 %v4269_v45 }
 0xb8f   :  { %v4272_v51 = vmul.f32 %v15394_v11, %v4202_v57 }
 0xb92   :  { %4287 = vadd.xlane.f32.xlu1 %v4268_v24  ;;  %4293 = vadd.xlane.f32.xlu0 %v4271_v12  ;;  %v4027_v24 = vmul.f32 %v18389_v1, %v18388_v62  ;;  %v18390_v12 = vld [vmem:[#allocation312_spill] sm:$0xff] }
 0xb93   :  { %v4044_v57 = vmul.f32 %v18391_v43, %v18390_v12 }
 0xb96   :  { %4291 = vadd.xlane.f32.xlu1 %v4270_v48  ;;  %v18392_v48 = vld [vmem:[#allocation311_spill] sm:$0xff] }
 0xb9a   :  { %4295 = vadd.xlane.f32.xlu1 %v4272_v51 }
 0xbc7   :  { %v15745_v46 = vpop.xlane.xlu1 %7159 }
 0xbc8   :  { %v7190_v44 = vsub.f32 %v15484_v63, %v15745_v46  ;;  %v15749_v4 = vpop.xlane.xlu0 %7157 }
 0xbc9   :  { %v7189_v55 = vsub.f32 %v15493_v33, %v15749_v4 }
 0xbca   :  { %v7207_v59 = vmul.f32 1.442695, %v7190_v44  ;;  %v18394_v44 = vld [vmem:[#allocation191_spill] sm:$0xff] }
 0xbcb   :  { %v7205_v20 = vmul.f32 1.442695, %v7189_v55  ;;  %v18395_v55 = vld [vmem:[#allocation46_spill] sm:$0xff] }
 0xbcc   :  { %9449 = vpow2.f32 %v7207_v59  ;;  %v15753_v38 = vpop.xlane.xlu0 %7163  ;;  %v4028_v59 = vmul.f32 %v18395_v55, %v18394_v44  ;;  %v18415_v44 = vld [vmem:[#allocation130_spill] sm:$0xff]  ;;  %v18417_v55 = vld [vmem:[#allocation99_spill] sm:$0xff] }
 0xbcd   :  { %9451 = vpow2.f32 %v7205_v20  ;;  %v7192_v11 = vsub.f32 %v15508_v40, %v15753_v38  ;;  %v18396_v20 = vld [vmem:[#allocation317_spill] sm:$0xff] }
 0xbcf   :  { %v7211_v26 = vmul.f32 1.442695, %v7192_v11  ;;  %v18397_v11 = vld [vmem:[#allocation48_spill] sm:$0xff] }
 0xbd0   :  { %v15757_v61 = vpop.xlane.xlu0 %7161 }
 0xbd1   :  { %9453 = vpow2.f32 %v7211_v26  ;;  %v7191_v63 = vsub.f32 %v15518_v60, %v15757_v61  ;;  %v15761_v31 = vpop.xlane.xlu1 %7165  ;;  %v4030_v26 = vmul.f32 %v18397_v11, %v18396_v20  ;;  %v18418_v20 = vld [vmem:[#allocation393_spill] sm:$0xff]  ;;  %v18419_v11 = vld [vmem:[#allocation102_spill] sm:$0xff] }
 0xbd2   :  { %v7193_v33 = vsub.f32 %v15524_v28, %v15761_v31 }
 0xbd3   :  { %v7209_v52 = vmul.f32 1.442695, %v7191_v63 }
 0xbd4   :  { %v7213_v37 = vmul.f32 1.442695, %v7193_v33  ;;  %v15765_v7 = vpop.xlane.xlu0 %7167  ;;  %v18398_v33 = vld [vmem:[#allocation318_spill] sm:$0xff] }
 0xbd5   :  { %9455 = vpow2.f32 %v7209_v52  ;;  %v7194_v40 = vsub.f32 %v15535_v2, %v15765_v7  ;;  %v15769_v25 = vpop.xlane.xlu1 %7169  ;;  %v18399_v52 = vld [vmem:[#allocation50_spill] sm:$0xff] }
 0xbd6   :  { %v9450_v5 = vpop.eup %9449  ;;  %v7195_v6 = vsub.f32 %v15542_v14, %v15769_v25  ;;  %9457 = vpow2.f32 %v7213_v37  ;;  %v18400_v37 = vld [vmem:[#allocation196_spill] sm:$0xff] }
 0xbd7   :  { %v9452_v60 = vpop.eup %9451  ;;  %v7215_v16 = vmul.f32 1.442695, %v7194_v40  ;;  %7239 = vadd.xlane.f32.xlu1 %v9450_v5  ;;  %v18401_v40 = vld [vmem:[#allocation66_spill] sm:$0xff] }
 0xbd8   :  { %v7217_v15 = vmul.f32 1.442695, %v7195_v6  ;;  %v15773_v28 = vpop.xlane.xlu0 %7171  ;;  %7237 = vadd.xlane.f32.xlu0 %v9452_v60  ;;  %v4048_v5 = vmul.f32 %v18401_v40, %v18400_v37  ;;  %v18402_v6 = vld [vmem:[#allocation211_spill] sm:$0xff]  ;;  %v18403_v60 = vld [vmem:[#allocation61_spill] sm:$0xff]  ;;  %v18423_v37 = vld [vmem:[#allocation146_spill] sm:$0xff] }
 0xbd9   :  { %9459 = vpow2.f32 %v7215_v16  ;;  %v7196_v0 = vsub.f32 %v15549_v39, %v15773_v28  ;;  %v4043_v16 = vmul.f32 %v18403_v60, %v18402_v6 }
 0xbda   :  { %9461 = vpow2.f32 %v7217_v15  ;;  %v18404_v15 = vld [vmem:[#allocation201_spill] sm:$0xff] }
 0xbdb   :  { %v9454_v13 = vpop.eup %9453  ;;  %v7219_v2 = vmul.f32 1.442695, %v7196_v0  ;;  %v18405_v0 = vld [vmem:[#allocation244_spill] sm:$0xff] }
 0xbdc   :  { %v15777_v27 = vpop.xlane.xlu0 %7175  ;;  %7243 = vadd.xlane.f32.xlu1 %v9454_v13  ;;  %v4060_v13 = vmul.f32 %v18405_v0, %v18404_v15  ;;  %v18425_v15 = vld [vmem:[#allocation115_spill] sm:$0xff] }
 0xbdd   :  { %9463 = vpow2.f32 %v7219_v2  ;;  %v7198_v14 = vsub.f32 %v15554_v50, %v15777_v27 }
 0xbdf   :  { %v9456_v56 = vpop.eup %9455  ;;  %v7223_v23 = vmul.f32 1.442695, %v7198_v14 }
 0xbe0   :  { %v15781_v9 = vpop.xlane.xlu0 %7179  ;;  %7241 = vadd.xlane.f32.xlu0 %v9456_v56  ;;  %v9458_v39 = vpop.eup %9457  ;;  %v18406_v56 = vld [vmem:[#allocation207_spill] sm:$0xff] }
 0xbe1   :  { %9465 = vpow2.f32 %v7223_v23  ;;  %v7200_v45 = vsub.f32 %v18387_v41, %v15781_v9  ;;  %v18407_v23 = vld [vmem:[#allocation52_spill] sm:$0xff] }
 0xbe2   :  { %v4034_v41 = vmul.f32 %v18407_v23, %v18406_v56  ;;  %v18426_v56 = vld [vmem:[#allocation327_spill] sm:$0xff]  ;;  %v18427_v23 = vld [vmem:[#allocation118_spill] sm:$0xff] }
 0xbe3   :  { %v9460_v36 = vpop.eup %9459  ;;  %v7227_v35 = vmul.f32 1.442695, %v7200_v45 }
 0xbe4   :  { %7247 = vadd.xlane.f32.xlu1 %v9460_v36  ;;  %7245 = vadd.xlane.f32.xlu0 %v9458_v39  ;;  %v9462_v19 = vpop.eup %9461  ;;  %v4210_v36 = vadd.f32 %v4044_v57, %v4028_v59 }
 0xbe5   :  { %9467 = vpow2.f32 %v7227_v35 }
 0xbe7   :  { %v9464_v17 = vpop.eup %9463 }
 0xbe8   :  { %7251 = vadd.xlane.f32.xlu1 %v9464_v17  ;;  %7249 = vadd.xlane.f32.xlu0 %v9462_v19  ;;  %v18408_v19 = vld [vmem:[#allocation406_spill] sm:$0xff] }
 0xbe9   :  { %v18409_v17 = vld [vmem:[#allocation114_spill] sm:$0xff] }
 0xbeb   :  { %v9466_v50 = vpop.eup %9465 }
 0xbec   :  { %7255 = vadd.xlane.f32.xlu1 %v9466_v50  ;;  %v4076_v50 = vmul.f32 %v18409_v17, %v18408_v19  ;;  %v18430_v17 = vld [vmem:[#allocation403_spill] sm:$0xff] }
 0xbef   :  { %v9468_v30 = vpop.eup %9467 }
 0xbf0   :  { %7259 = vadd.xlane.f32.xlu1 %v9468_v30  ;;  %v18410_v30 = vld [vmem:[#allocation216_spill] sm:$0xff] }
 0xc0b   :  { %v15785_v3 = vpop.xlane.xlu1 %7173 }
 0xc0c   :  { %v7197_v21 = vsub.f32 %v15663_v34, %v15785_v3  ;;  %v18393_v34 = vld [vmem:[#allocation65_spill] sm:$0xff] }
 0xc0d   :  { %v4046_v51 = vmul.f32 %v18393_v34, %v18392_v48  ;;  %v4203_v48 = vadd.f32 %v4043_v16, %v4027_v24  ;;  %v18414_v34 = vld [vmem:[#allocation330_spill] sm:$0xff]  ;;  %v18424_v16 = vld [vmem:[#allocation391_spill] sm:$0xff] }
 0xc0e   :  { %v7221_v54 = vmul.f32 1.442695, %v7197_v21  ;;  %v18411_v21 = vld [vmem:[#allocation68_spill] sm:$0xff]  ;;  %v4075_v0 = vmul.f32 %v18425_v15, %v18424_v16 }
 0xc0f   :  { %v15789_v58 = vpop.xlane.xlu0 %7183  ;;  %v15791_v47 = vpop.xlane.xlu1 %7177  ;;  %v4224_v35 = vadd.f32 %v4046_v51, %v4030_v26  ;;  %v18416_v51 = vld [vmem:[#allocation333_spill] sm:$0xff]  ;;  %v4064_v26 = vmul.f32 %v18419_v11, %v18418_v20  ;;  %v18439_v20 = vld [vmem:[#allocation104_spill] sm:$0xff] }
 0xc10   :  { %9469 = vpow2.f32 %v7221_v54  ;;  %v7202_v53 = vsub.f32 %v15681_v32, %v15789_v58  ;;  %v7199_v29 = vsub.f32 %v15678_v18, %v15791_v47  ;;  %v4032_v18 = vmul.f32 %v18399_v52, %v18398_v33  ;;  %v18420_v33 = vld [vmem:[#allocation218_spill] sm:$0xff]  ;;  %v18421_v52 = vld [vmem:[#allocation116_spill] sm:$0xff] }
 0xc11   :  { %v4050_v54 = vmul.f32 %v18411_v21, %v18410_v30  ;;  %v4059_v59 = vmul.f32 %v18417_v55, %v18416_v51  ;;  %v4078_v24 = vmul.f32 %v18421_v52, %v18420_v33  ;;  %v18438_v55 = vld [vmem:[#allocation336_spill] sm:$0xff] }
 0xc12   :  { %v7231_v63 = vmul.f32 1.442695, %v7202_v53  ;;  %v7225_v32 = vmul.f32 1.442695, %v7199_v29  ;;  %v18412_v53 = vld [vmem:[#allocation335_spill] sm:$0xff]  ;;  %v18413_v29 = vld [vmem:[#allocation100_spill] sm:$0xff]  ;;  %v4238_v43 = vadd.f32 %v4048_v5, %v4032_v18  ;;  %v4066_v11 = vmul.f32 %v18439_v20, %v18438_v55 }
 0xc13   :  { %v15815_v2 = vpop.xlane.xlu0 %7187  ;;  %v15817_v14 = vpop.xlane.xlu1 %7181  ;;  %v4062_v62 = vmul.f32 %v18413_v29, %v18412_v53  ;;  %v18422_v18 = vld [vmem:[#allocation402_spill] sm:$0xff]  ;;  %v4252_v6 = vadd.f32 %v4050_v54, %v4034_v41  ;;  %v4204_v21 = vadd.f32 %v4203_v48, %v4059_v59  ;;  %v18432_v29 = vld [vmem:[#allocation219_spill] sm:$0xff]  ;;  %v18442_v59 = vld [vmem:[#allocation313_spill] sm:$0xff] }
 0xc14   :  { %9471 = vpow2.f32 %v7231_v63  ;;  %v7204_v45 = vsub.f32 %v15701_v42, %v15815_v2  ;;  %v7201_v39 = vsub.f32 %v15698_v10, %v15817_v14  ;;  %v4211_v42 = vadd.f32 %v4210_v36, %v4060_v13  ;;  %v18429_v36 = vld [vmem:[#allocation132_spill] sm:$0xff]  ;;  %v18433_v41 = vld [vmem:[#allocation131_spill] sm:$0xff]  ;;  %v18441_v48 = vld [vmem:[#allocation134_spill] sm:$0xff] }
 0xc15   :  { %9473 = vpow2.f32 %v7225_v32  ;;  %v4092_v10 = vmul.f32 %v18415_v44, %v18414_v34  ;;  %v4108_v40 = vmul.f32 %v18423_v37, %v18422_v18  ;;  %v4225_v60 = vadd.f32 %v4224_v35, %v4062_v62  ;;  %v18436_v34 = vld [vmem:[#allocation360_spill] sm:$0xff]  ;;  %v18437_v44 = vld [vmem:[#allocation203_spill] sm:$0xff]  ;;  %v18458_v55 = vld [vmem:[#allocation206_spill] sm:$0xff] }
 0xc16   :  { %v7235_v1 = vmul.f32 1.442695, %v7204_v45  ;;  %v7229_v12 = vmul.f32 1.442695, %v7201_v39  ;;  %v4212_v32 = vadd.f32 %v4211_v42, %v4076_v50  ;;  %v4080_v45 = vmul.f32 %v18427_v23, %v18426_v56  ;;  %v18431_v50 = vld [vmem:[#allocation162_spill] sm:$0xff]  ;;  %v18446_v16 = vld [vmem:[#allocation348_spill] sm:$0xff] }
 0xc17   :  { %v15833_v57 = vpop.xlane.xlu1 %7185  ;;  %v4124_v30 = vmul.f32 %v18431_v50, %v18430_v17  ;;  %v4239_v53 = vadd.f32 %v4238_v43, %v4064_v26  ;;  %v4091_v35 = vmul.f32 %v18433_v41, %v18432_v29  ;;  %v4226_v54 = vadd.f32 %v4225_v60, %v4078_v24  ;;  %v18443_v26 = vld [vmem:[#allocation147_spill] sm:$0xff]  ;;  %v18447_v15 = vld [vmem:[#allocation120_spill] sm:$0xff]  ;;  %v18448_v23 = vld [vmem:[#allocation341_spill] sm:$0xff] }
 0xc18   :  { %9475 = vpow2.f32 %v7235_v1  ;;  %v7203_v63 = vsub.f32 %v15720_v8, %v15833_v57  ;;  %v4213_v39 = vadd.f32 %v4212_v32, %v4092_v10  ;;  %v18428_v8 = vld [vmem:[#allocation350_spill] sm:$0xff]  ;;  %v18434_v1 = vld [vmem:[#allocation215_spill] sm:$0xff]  ;;  %v4140_v10 = vmul.f32 %v18437_v44, %v18436_v34  ;;  %v18440_v32 = vld [vmem:[#allocation400_spill] sm:$0xff] }
 0xc19   :  { %9477 = vpow2.f32 %v7229_v12  ;;  %v4094_v19 = vmul.f32 %v18429_v36, %v18428_v8  ;;  %v18435_v12 = vld [vmem:[#allocation148_spill] sm:$0xff]  ;;  %v4096_v43 = vmul.f32 %v18441_v48, %v18440_v32  ;;  %v4107_v33 = vmul.f32 %v18443_v26, %v18442_v59  ;;  %v18451_v36 = vld [vmem:[#allocation163_spill] sm:$0xff]  ;;  %v18452_v50 = vld [vmem:[#allocation197_spill] sm:$0xff] }
 0xc1a   :  { %v9470_v5 = vpop.eup %9469  ;;  %v7233_v13 = vmul.f32 1.442695, %v7203_v63  ;;  %v4214_v62 = vadd.f32 %v4213_v39, %v4108_v40  ;;  %v4110_v42 = vmul.f32 %v18435_v12, %v18434_v1  ;;  %v4205_v63 = vadd.f32 %v4204_v21, %v4075_v0  ;;  %v18444_v40 = vld [vmem:[#allocation395_spill] sm:$0xff]  ;;  %v18449_v0 = vld [vmem:[#allocation150_spill] sm:$0xff]  ;;  %v18450_v8 = vld [vmem:[#allocation404_spill] sm:$0xff] }
 0xc1b   :  { %7253 = vadd.xlane.f32.xlu0 %v9470_v5  ;;  %v4240_v24 = vadd.f32 %v4239_v53, %v4080_v45  ;;  %v4227_v18 = vadd.f32 %v4226_v54, %v4094_v19  ;;  %v18445_v5 = vld [vmem:[#allocation164_spill] sm:$0xff]  ;;  %v4112_v39 = vmul.f32 %v18449_v0, %v18448_v23  ;;  %v4123_v17 = vmul.f32 %v18451_v36, %v18450_v8  ;;  %v18453_v21 = vld [vmem:[#allocation67_spill] sm:$0xff]  ;;  %v18457_v34 = vld [vmem:[#allocation173_spill] sm:$0xff] }
 0xc1c   :  { %9479 = vpow2.f32 %v7233_v13  ;;  %v4215_v37 = vadd.f32 %v4214_v62, %v4124_v30  ;;  %v4126_v60 = vmul.f32 %v18445_v5, %v18444_v40  ;;  %v4082_v13 = vmul.f32 %v18447_v15, %v18446_v16  ;;  %v18454_v53 = vld [vmem:[#allocation364_spill] sm:$0xff]  ;;  %v18459_v20 = vld [vmem:[#allocation51_spill] sm:$0xff]  ;;  %v18460_v32 = vld [vmem:[#allocation221_spill] sm:$0xff] }
 0xc1d   :  { %v4206_v56 = vadd.f32 %v4205_v63, %v4091_v35  ;;  %v4049_v45 = vmul.f32 %v18453_v21, %v18452_v50  ;;  %v4228_v19 = vadd.f32 %v4227_v18, %v4110_v42  ;;  %v18455_v29 = vld [vmem:[#allocation172_spill] sm:$0xff]  ;;  %v4253_v62 = vadd.f32 %v4252_v6, %v4066_v11  ;;  %v18456_v35 = vld [vmem:[#allocation397_spill] sm:$0xff]  ;;  %v18462_v42 = vld [vmem:[#allocation358_spill] sm:$0xff] }
 0xc1e   :  { %v9472_v51 = vpop.eup %9471  ;;  %v4216_v30 = vadd.f32 %v4215_v37, %v4140_v10  ;;  %v4142_v41 = vmul.f32 %v18455_v29, %v18454_v53  ;;  %v4241_v1 = vadd.f32 %v4240_v24, %v4096_v43  ;;  %v4139_v44 = vmul.f32 %v18457_v34, %v18456_v35  ;;  %v18461_v48 = vld [vmem:[#allocation136_spill] sm:$0xff]  ;;  %v18463_v10 = vld [vmem:[#allocation290_spill] sm:$0xff]  ;;  %v18465_v37 = vld [vmem:[#allocation105_spill] sm:$0xff] }
 0xc1f   :  { %v9474_v52 = vpop.eup %9473  ;;  %7263 = vadd.xlane.f32.xlu1 %v9472_v51  ;;  %v4207_v12 = vadd.f32 %v4206_v56, %v4107_v33  ;;  %v4033_v63 = vmul.f32 %v18459_v20, %v18458_v55  ;;  %v4098_v59 = vmul.f32 %v18461_v48, %v18460_v32  ;;  %v4229_v26 = vadd.f32 %v4228_v19, %v4126_v60  ;;  %v18464_v18 = vld [vmem:[#allocation214_spill] sm:$0xff]  ;;  %v18466_v24 = vld [vmem:[#allocation353_spill] sm:$0xff]  ;;  %v18467_v40 = vld [vmem:[#allocation152_spill] sm:$0xff] }
 0xc20   :  { %7257 = vadd.xlane.f32.xlu0 %v9474_v52  ;;  %v4128_v52 = vmul.f32 %v18463_v10, %v18462_v42  ;;  %v4065_v6 = vmul.f32 %v18465_v37, %v18464_v18  ;;  %v4254_v11 = vadd.f32 %v4253_v62, %v4082_v13  ;;  %v4242_v43 = vadd.f32 %v4241_v1, %v4112_v39  ;;  %v18468_v15 = vld [vmem:[#allocation345_spill] sm:$0xff]  ;;  %v18469_v56 = vld [vmem:[#allocation175_spill] sm:$0xff]  ;;  %v18470_v50 = vld [vmem:[#allocation328_spill] sm:$0xff] }
 0xc21   :  { %v4208_v33 = vadd.f32 %v4207_v12, %v4123_v17  ;;  %v4114_v5 = vmul.f32 %v18467_v40, %v18466_v24  ;;  %v4230_v16 = vadd.f32 %v4229_v26, %v4142_v41  ;;  %v4144_v23 = vmul.f32 %v18469_v56, %v18468_v15  ;;  %v9623_v60 = vld [vmem:[%s16032_s5] ss:$0 sm:$0xff]  ;;  %v18471_v21 = vld [vmem:[#allocation121_spill] sm:$0xff]  ;;  %v18472_v53 = vld [vmem:[#allocation346_spill] sm:$0xff]  ;;  %s9685_s5 = smov [#allocation5]  }
 0xc22   :  { %v9476_v54 = vpop.eup %9475  ;;  %v4274_v0 = vmul.f32 %v9623_v60, %v4216_v30  ;;  %v4245_v36 = vadd.f32 %v4049_v45, %v4033_v63  ;;  %v4081_v13 = vmul.f32 %v18471_v21, %v18470_v50  ;;  %v4255_v17 = vadd.f32 %v4254_v11, %v4098_v59  ;;  %v18473_v29 = vld [vmem:[#allocation199_spill] sm:$0xff]  ;;  %v18474_v62 = vld [vmem:[#allocation388_spill] sm:$0xff]  ;;  %v18475_v1 = vld [vmem:[#allocation137_spill] sm:$0xff]  ;;  %s7484_s15 = sshll.u32 %s9685_s5, 4  ;;  %s7485_s15 = int_to_ptr.vmem [resolvable:$true] %s7484_s15 }
 0xc23   :  { %v9478_v51 = vpop.eup %9477  ;;  %7267 = vadd.xlane.f32.xlu1 %v9476_v54  ;;  %v4209_v39 = vadd.f32 %v4208_v33, %v4139_v44  ;;  %v4243_v19 = vadd.f32 %v4242_v43, %v4128_v52  ;;  %v4130_v54 = vmul.f32 %v18473_v29, %v18472_v53  ;;  %v4097_v12 = vmul.f32 %v18475_v1, %v18474_v62  ;;  %v18476_v30 = vld [vmem:[#allocation405_spill] sm:$0xff]  ;;  %v18480_v42 = vld [vmem:[#allocation344_spill] sm:$0xff]  ;;  %v18481_v10 = vld [vmem:[#allocation287_spill] sm:$0xff]  ;;  %s9646_s16 = scalar_lea.vmem %s7485_s15, 16  ;;  %s9650_s0 = scalar_lea.vmem %s7485_s15, 32 }
 0xc24   :  { %7261 = vadd.xlane.f32.xlu0 %v9478_v51  ;;  %v4246_v41 = vadd.f32 %v4245_v36, %v4065_v6  ;;  %v4256_v35 = vadd.f32 %v4255_v17, %v4114_v5  ;;  %v18477_v51 = vld [vmem:[#allocation178_spill] sm:$0xff]  ;;  %v4276_v55 = vmul.f32 %v9623_v60, %v4230_v16  ;;  %v18478_v63 = vld [vmem:[#allocation329_spill] sm:$0xff]  ;;  %v4129_v52 = vmul.f32 %v18481_v10, %v18480_v42  ;;  %v18482_v11 = vld [vmem:[#allocation176_spill] sm:$0xff]  ;;  %v4286_v36 = vpop.xlane.xlu0 %4285  ;;  %p9647_p8 = scmp.ne.s32.totalorder %s7485_s15, %s9646_s16  ;;  %p9651_p9 = scmp.lt.s32.totalorder %s7485_s15, %s7485_s15 }
 0xc25   :  { %v4244_v34 = vadd.f32 %v4243_v19, %v4144_v23  ;;  %v4146_v45 = vmul.f32 %v18477_v51, %v18476_v30  ;;  %v18479_v44 = vld [vmem:[#allocation153_spill] sm:$0xff]  ;;  %v4273_v48 = vmul.f32 %v9623_v60, %v4209_v39  ;;  %v4145_v43 = vmul.f32 %v18482_v11, %v15611_v49  ;;  %v18483_v33 = vld [vmem:[#allocation355_spill] sm:$0xff]  ;;  %v18485_v29 = vld [vmem:[#allocation262_spill] sm:$0xff]  ;;  %p9652_p10 = scmp.lt.s32.totalorder %s9650_s0, %s9646_s16 }
 0xc26   :  { %v9480_v8 = vpop.eup %9479  ;;  %v4247_v20 = vadd.f32 %v4246_v41, %v4081_v13  ;;  %v4113_v32 = vmul.f32 %v18479_v44, %v18478_v63  ;;  %v4257_v59 = vadd.f32 %v4256_v35, %v4130_v54  ;;  %v4275_v24 = vmul.f32 %v9623_v60, %v18483_v33  ;;  %v18484_v15 = vld [vmem:[#allocation363_spill] sm:$0xff]  ;;  %v18487_v62 = vld [vmem:[#allocation260_spill] sm:$0xff] }
 0xc27   :  { %4299 = vadd.xlane.f32.xlu1 %v4274_v0  ;;  %v4278_v37 = vmul.f32 %v9623_v60, %v4244_v34  ;;  %v4277_v56 = vmul.f32 %v9623_v60, %v18484_v15  ;;  %v4284_v0 = vpop.xlane.xlu1 %4283  ;;  %v18488_v1 = vld [vmem:[#allocation35_spill] sm:$0xff]  ;;  %v18489_v34 = vld [vmem:[#allocation13_spill] sm:$0xff]  ;;  %p9653_p11 = por %p9652_p10, %p9651_p9 }
 0xc28   :  { %7265 = vadd.xlane.f32.xlu0 %v9480_v8  ;;  %v4248_v26 = vadd.f32 %v4247_v20, %v4097_v12  ;;  %v4258_v18 = vadd.f32 %v4257_v59, %v4146_v45  ;;  %v15910_v21 = vpop.xlane.xlu0 %4289  ;;  %v1565_v12 = vadd.f32 %v18488_v1, %v18487_v62  ;;  %v18490_v45 = vld [vmem:[#allocation36_spill] sm:$0xff] }
 0xc29   :  { %v18491_v59 = vld [vmem:[#allocation268_spill] sm:$0xff]  ;;  %p9654_p12 = pnand %p9653_p11, %p9647_p8 }
 0xc2a   :  { %v4249_v6 = vadd.f32 %v4248_v26, %v4113_v32  ;;  %v4280_v5 = vmul.f32 %v9623_v60, %v4258_v18  ;;  %v18492_v26 = vld [vmem:[#allocation85_spill] sm:$0xff]  ;;  %v18499_v62 = vld [vmem:[#allocation16_spill] sm:$0xff] }
 0xc2b   :  { %4303 = vadd.xlane.f32.xlu1 %v4276_v55  ;;  %v4288_v8 = vpop.xlane.xlu1 %4287  ;;  %v3454_v55 = vadd.f32 %v18490_v45, %v1565_v12  ;;  %v1568_v42 = vadd.f32 %v18492_v26, %v18491_v59  ;;  %v18504_v59 = vld [vmem:[#allocation89_spill] sm:$0xff] }
 0xc2c   :  { %4297 = vadd.xlane.f32.xlu0 %v4273_v48  ;;  %v4250_v40 = vadd.f32 %v4249_v6, %v4129_v52  ;;  %v15914_v13 = vpop.xlane.xlu0 %4293  ;;  %v18493_v6 = vld [vmem:[#allocation300_spill] sm:$0xff] }
 0xc2d   :  { %v4313_v10 = vadd.f32 %v15631_v22, %v3454_v55  ;;  %v3457_v11 = vadd.f32 %v18493_v6, %v1568_v42  ;;  %v18507_v6 = vld [vmem:[#allocation90_spill] sm:$0xff] }
 0xc2e   :  { %v4251_v16 = vadd.f32 %v4250_v40, %v4145_v43 }
 0xc2f   :  { %4307 = vadd.xlane.f32.xlu1 %v4278_v37  ;;  %v4292_v50 = vpop.xlane.xlu1 %4291  ;;  %v4316_v15 = vadd.f32 %v4288_v8, %v3457_v11 }
 0xc30   :  { %4301 = vadd.xlane.f32.xlu0 %v4275_v24  ;;  %v4279_v23 = vmul.f32 %v9623_v60, %v4251_v16  ;;  %v18486_v60 = vld [vmem:[#allocation33_spill] sm:$0xff] }
 0xc31   :  { %v1566_v54 = vadd.f32 %v18486_v60, %v18485_v29  ;;  %v18497_v29 = vld [vmem:[#allocation272_spill] sm:$0xff]  ;;  %v18498_v60 = vld [vmem:[#allocation87_spill] sm:$0xff] }
 0xc33   :  { %4311 = vadd.xlane.f32.xlu1 %v4280_v5  ;;  %v15912_v49 = vpop.xlane.xlu1 %4295  ;;  %v3455_v30 = vadd.f32 %v18489_v34, %v1566_v54  ;;  %v18494_v5 = vld [vmem:[#allocation265_spill] sm:$0xff]  ;;  %v1570_v54 = vadd.f32 %v18498_v60, %v18497_v29  ;;  %v18501_v34 = vld [vmem:[#allocation88_spill] sm:$0xff] }
 0xc34   :  { %4305 = vadd.xlane.f32.xlu0 %v4277_v56  ;;  %v18512_v60 = vld [vmem:[#allocation293_spill] sm:$0xff] }
 0xc35   :  { %v4314_v32 = vadd.f32 %v4284_v0, %v3455_v30 }
 0xc38   :  { %4309 = vadd.xlane.f32.xlu0 %v4279_v23 }
 0xc64   :  { %v7240_v39 = vpop.xlane.xlu1 %7239 }
 0xc65   :  { %9481 = vlog2.f32 %v7240_v39  ;;  %v7238_v17 = vpop.xlane.xlu0 %7237 }
 0xc66   :  { %9483 = vlog2.f32 %v7238_v17 }
 0xc69   :  { %v7244_v19 = vpop.xlane.xlu1 %7243 }
 0xc6a   :  { %9485 = vlog2.f32 %v7244_v19 }
 0xc6d   :  { %v7242_v53 = vpop.xlane.xlu0 %7241 }
 0xc6e   :  { %9487 = vlog2.f32 %v7242_v53 }
 0xc6f   :  { %v9482_v41 = vpop.eup %9481 }
 0xc70   :  { %v9484_v35 = vpop.eup %9483  ;;  %v7272_v51 = vmul.f32 0.6931472, %v9482_v41 }
 0xc71   :  { %v7270_v20 = vmul.f32 0.6931472, %v9484_v35  ;;  %v7246_v63 = vpop.xlane.xlu0 %7245  ;;  %v7248_v44 = vpop.xlane.xlu1 %7247  ;;  %v18500_v35 = vld [vmem:[#allocation270_spill] sm:$0xff] }
 0xc72   :  { %v7302_v48 = vadd.f32 %v7272_v51, %v15745_v46  ;;  %9489 = vlog2.f32 %v7246_v63  ;;  %v18495_v46 = vld [vmem:[#allocation86_spill] sm:$0xff]  ;;  %v1569_v30 = vadd.f32 %v18501_v34, %v18500_v35  ;;  %v18515_v35 = vld [vmem:[#allocation92_spill] sm:$0xff] }
 0xc73   :  { %v7301_v52 = vadd.f32 %v7270_v20, %v15749_v4  ;;  %9491 = vlog2.f32 %v7248_v44  ;;  %v1567_v16 = vadd.f32 %v18495_v46, %v18494_v5  ;;  %v18496_v4 = vld [vmem:[#allocation299_spill] sm:$0xff] }
 0xc74   :  { %v9486_v18 = vpop.eup %9485  ;;  %v7318_v37 = vsub.f32 %v4314_v32, %v7302_v48  ;;  %v18503_v48 = vld [vmem:[#allocation278_spill] sm:$0xff] }
 0xc75   :  { %v7317_v43 = vsub.f32 %v4313_v10, %v7301_v52  ;;  %v7276_v33 = vmul.f32 0.6931472, %v9486_v18  ;;  %v7252_v24 = vpop.xlane.xlu1 %7251  ;;  %v7250_v40 = vpop.xlane.xlu0 %7249  ;;  %v3456_v23 = vadd.f32 %v18496_v4, %v1567_v16  ;;  %v1572_v26 = vadd.f32 %v18504_v59, %v18503_v48  ;;  %v18505_v10 = vld [vmem:[#allocation186_spill] sm:$0xff]  ;;  %v18509_v4 = vld [vmem:[#allocation291_spill] sm:$0xff] }
 0xc76   :  { %7353 = vperm.xlu1 %8967, %v7318_v37   ;;  %9493 = vlog2.f32 %v7252_v24  ;;  %v18506_v37 = vld [vmem:[#allocation275_spill] sm:$0xff] }
 0xc77   :  { %v7304_v56 = vadd.f32 %v7276_v33, %v15753_v38  ;;  %7350 = vperm.xlu0 %8968, %v7317_v43   ;;  %9495 = vlog2.f32 %v7250_v40  ;;  %v4315_v17 = vadd.f32 %v4286_v36, %v3456_v23  ;;  %v3459_v38 = vadd.f32 %v18499_v62, %v1570_v54  ;;  %v18508_v43 = vld [vmem:[#allocation184_spill] sm:$0xff]  ;;  %v18513_v54 = vld [vmem:[#allocation93_spill] sm:$0xff]  ;;  %v18519_v48 = vld [vmem:[#allocation95_spill] sm:$0xff] }
 0xc78   :  { %v9488_v22 = vpop.eup %9487  ;;  %v3461_v52 = vadd.f32 %v18505_v10, %v1572_v26  ;;  %v1571_v11 = vadd.f32 %v18507_v6, %v18506_v37 }
 0xc79   :  { %v7320_v0 = vsub.f32 %v4316_v15, %v7304_v56  ;;  %v7274_v39 = vmul.f32 0.6931472, %v9488_v22  ;;  %v4318_v51 = vadd.f32 %v4292_v50, %v3459_v38  ;;  %v7256_v46 = vpop.xlane.xlu1 %7255 }
 0xc7a   :  { %v3460_v33 = vadd.f32 %v18508_v43, %v1571_v11  ;;  %9497 = vlog2.f32 %v7256_v46 }
 0xc7b   :  { %v7303_v19 = vadd.f32 %v7274_v39, %v15757_v61  ;;  %7359 = vperm.xlu1 %8967, %v7320_v0   ;;  %v18502_v61 = vld [vmem:[#allocation14_spill] sm:$0xff] }
 0xc7c   :  { %v9490_v53 = vpop.eup %9489  ;;  %v3458_v55 = vadd.f32 %v18502_v61, %v1569_v30 }
 0xc7d   :  { %v9492_v41 = vpop.eup %9491  ;;  %v7319_v8 = vsub.f32 %v4315_v17, %v7303_v19  ;;  %v7278_v1 = vmul.f32 0.6931472, %v9490_v53  ;;  %v7260_v16 = vpop.xlane.xlu1 %7259  ;;  %v18511_v19 = vld [vmem:[#allocation187_spill] sm:$0xff] }
 0xc7e   :  { %v7280_v12 = vmul.f32 0.6931472, %v9492_v41  ;;  %v4317_v42 = vadd.f32 %v15910_v21, %v3458_v55  ;;  %v4319_v21 = vadd.f32 %v15914_v13, %v3460_v33  ;;  %9499 = vlog2.f32 %v7260_v16  ;;  %v18524_v16 = vld [vmem:[#allocation297_spill] sm:$0xff] }
 0xc7f   :  { %7356 = vperm.xlu1 %8967, %v7319_v8   ;;  %v7305_v20 = vadd.f32 %v7278_v1, %v15761_v31  ;;  %v4320_v31 = vadd.f32 %v15912_v49, %v3461_v52  ;;  %v1576_v41 = vadd.f32 %v18513_v54, %v18512_v60  ;;  %v18520_v52 = vld [vmem:[#allocation294_spill] sm:$0xff] }
 0xc80   :  { %v7306_v36 = vadd.f32 %v7280_v12, %v15765_v7  ;;  %v9494_v45 = vpop.eup %9493  ;;  %v18514_v12 = vld [vmem:[#allocation292_spill] sm:$0xff] }
 0xc81   :  { %v7284_v44 = vmul.f32 0.6931472, %v9494_v45  ;;  %v9496_v32 = vpop.eup %9495  ;;  %v7321_v18 = vsub.f32 %v4317_v42, %v7305_v20  ;;  %v1573_v34 = vadd.f32 %v18515_v35, %v18514_v12  ;;  %v18517_v20 = vld [vmem:[#allocation185_spill] sm:$0xff] }
 0xc82   :  { %v7322_v63 = vsub.f32 %v4318_v51, %v7306_v36  ;;  %v7282_v50 = vmul.f32 0.6931472, %v9496_v32  ;;  %v18516_v36 = vld [vmem:[#allocation303_spill] sm:$0xff] }
 0xc83   :  { %v7308_v7 = vadd.f32 %v7284_v44, %v15773_v28  ;;  %v3465_v45 = vadd.f32 %v18516_v36, %v1576_v41  ;;  %v18518_v32 = vld [vmem:[#allocation295_spill] sm:$0xff] }
 0xc84   :  { %7365 = vperm.xlu1 %8967, %v7322_v63   ;;  %v7307_v24 = vadd.f32 %v7282_v50, %v15769_v25  ;;  %v9498_v49 = vpop.eup %9497  ;;  %v18510_v25 = vld [vmem:[#allocation91_spill] sm:$0xff]  ;;  %v3462_v63 = vadd.f32 %v18517_v20, %v1573_v34  ;;  %v1578_v59 = vadd.f32 %v18519_v48, %v18518_v32 }
 0xc85   :  { %v7324_v40 = vsub.f32 %v4320_v31, %v7308_v7  ;;  %v1574_v23 = vadd.f32 %v18510_v25, %v18509_v4  ;;  %v7288_v0 = vmul.f32 0.6931472, %v9498_v49  ;;  %v18522_v31 = vld [vmem:[#allocation188_spill] sm:$0xff] }
 0xc86   :  { %v7323_v5 = vsub.f32 %v4319_v21, %v7307_v24  ;;  %v3467_v43 = vadd.f32 %v18522_v31, %v1578_v59  ;;  %v18527_v4 = vld [vmem:[#allocation96_spill] sm:$0xff]  ;;  %v18537_v31 = vld [vmem:[#allocation257_spill] sm:$0xff] }
 0xc87   :  { %v3463_v53 = vadd.f32 %v18511_v19, %v1574_v23  ;;  %v7310_v38 = vadd.f32 %v7288_v0, %v15777_v27 }
 0xc88   :  { %7362 = vperm.xlu1 %8967, %v7321_v18   ;;  %v9500_v39 = vpop.eup %9499  ;;  %v18521_v18 = vld [vmem:[#allocation94_spill] sm:$0xff] }
 0xc89   :  { %v7292_v8 = vmul.f32 0.6931472, %v9500_v39  ;;  %v1575_v50 = vadd.f32 %v18521_v18, %v18520_v52  ;;  %v18528_v39 = vld [vmem:[#allocation189_spill] sm:$0xff]  ;;  %v18535_v18 = vld [vmem:[#allocation254_spill] sm:$0xff] }
 0xc8b   :  { %v7312_v27 = vadd.f32 %v7292_v8, %v15781_v9  ;;  %v18525_v9 = vld [vmem:[#allocation97_spill] sm:$0xff] }
 0xc8c   :  { %7371 = vperm.xlu1 %8967, %v7324_v40   ;;  %v18523_v40 = vld [vmem:[#allocation301_spill] sm:$0xff] }
 0xc8d   :  { %v3464_v21 = vadd.f32 %v18523_v40, %v1575_v50  ;;  %v18538_v40 = vld [vmem:[#allocation253_spill] sm:$0xff] }
 0xc90   :  { %7368 = vperm.xlu1 %8967, %v7323_v5  }
 0xca8   :  { %v7254_v28 = vpop.xlane.xlu0 %7253 }
 0xca9   :  { %9501 = vlog2.f32 %v7254_v28  ;;  %v1580_v28 = vadd.f32 %v18525_v9, %v18524_v16 }
 0xcac   :  { %v7264_v15 = vpop.xlane.xlu1 %7263 }
 0xcad   :  { %v7258_v56 = vpop.xlane.xlu0 %7257  ;;  %9503 = vlog2.f32 %v7264_v15 }
 0xcae   :  { %9505 = vlog2.f32 %v7258_v56 }
 0xcb0   :  { %v7268_v22 = vpop.xlane.xlu1 %7267 }
 0xcb1   :  { %v7262_v13 = vpop.xlane.xlu0 %7261  ;;  %9507 = vlog2.f32 %v7268_v22 }
 0xcb2   :  { %9509 = vlog2.f32 %v7262_v13 }
 0xcb3   :  { %v9502_v17 = vpop.eup %9501 }
 0xcb4   :  { %v4300_v29 = vpop.xlane.xlu1 %4299  ;;  %v7286_v30 = vmul.f32 0.6931472, %v9502_v17  ;;  %v3469_v17 = vadd.f32 %v18528_v39, %v1580_v28 }
 0xcb5   :  { %v7266_v62 = vpop.xlane.xlu0 %7265  ;;  %v4322_v1 = vadd.f32 %v4300_v29, %v3463_v53  ;;  %v18529_v29 = vld [vmem:[#allocation302_spill] sm:$0xff] }
 0xcb6   :  { %9511 = vlog2.f32 %v7266_v62  ;;  %v7309_v37 = vadd.f32 %v7286_v30, %v15785_v3  ;;  %v18526_v3 = vld [vmem:[#allocation296_spill] sm:$0xff] }
 0xcb7   :  { %v9504_v51 = vpop.eup %9503  ;;  %v7326_v61 = vsub.f32 %v4322_v1, %v7310_v38  ;;  %v1577_v25 = vadd.f32 %v18527_v4, %v18526_v3  ;;  %v18530_v38 = vld [vmem:[#allocation298_spill] sm:$0xff]  ;;  %v18541_v3 = vld [vmem:[#allocation267_spill] sm:$0xff] }
 0xcb8   :  { %v9506_v55 = vpop.eup %9505  ;;  %v4304_v44 = vpop.xlane.xlu1 %4303  ;;  %v7296_v26 = vmul.f32 0.6931472, %v9504_v51  ;;  %v18531_v1 = vld [vmem:[#allocation98_spill] sm:$0xff]  ;;  %v18532_v51 = vld [vmem:[#allocation19_spill] sm:$0xff] }
 0xcb9   :  { %v4298_v42 = vpop.xlane.xlu0 %4297  ;;  %v4324_v10 = vadd.f32 %v4304_v44, %v3465_v45  ;;  %7377 = vperm.xlu1 %8967, %v7326_v61   ;;  %v7290_v7 = vmul.f32 0.6931472, %v9506_v55  ;;  %v3466_v60 = vadd.f32 %v18529_v29, %v1577_v25  ;;  %v1579_v12 = vadd.f32 %v18531_v1, %v18530_v38 }
 0xcba   :  { %v4321_v6 = vadd.f32 %v4298_v42, %v3462_v63  ;;  %v7314_v49 = vadd.f32 %v7296_v26, %v15789_v58  ;;  %v18533_v42 = vld [vmem:[#allocation245_spill] sm:$0xff] }
 0xcbb   :  { %v9508_v11 = vpop.eup %9507  ;;  %v7328_v33 = vsub.f32 %v4324_v10, %v7312_v27  ;;  %v7311_v0 = vadd.f32 %v7290_v7, %v15791_v47  ;;  %v3468_v36 = vadd.f32 %v18532_v51, %v1579_v12  ;;  %v18534_v10 = vld [vmem:[#allocation247_spill] sm:$0xff] }
 0xcbc   :  { %v9510_v24 = vpop.eup %9509  ;;  %v7325_v5 = vsub.f32 %v4321_v6, %v7309_v37  ;;  %v4308_v46 = vpop.xlane.xlu1 %4307  ;;  %v7300_v15 = vmul.f32 0.6931472, %v9508_v11  ;;  %v18536_v37 = vld [vmem:[#allocation261_spill] sm:$0xff] }
 0xcbd   :  { %v4302_v56 = vpop.xlane.xlu0 %4301  ;;  %v4326_v22 = vadd.f32 %v4308_v46, %v3467_v43  ;;  %7383 = vperm.xlu1 %8967, %v7328_v33   ;;  %v7294_v23 = vmul.f32 0.6931472, %v9510_v24  ;;  %v18539_v46 = vld [vmem:[#allocation264_spill] sm:$0xff] }
 0xcbe   :  { %v4323_v13 = vadd.f32 %v4302_v56, %v3464_v21  ;;  %7374 = vperm.xlu0 %8968, %v7325_v5   ;;  %v7316_v58 = vadd.f32 %v7300_v15, %v15815_v2  ;;  %v18540_v56 = vld [vmem:[#allocation259_spill] sm:$0xff] }
 0xcbf   :  { %v7330_v19 = vsub.f32 %v4326_v22, %v7314_v49  ;;  %v7313_v47 = vadd.f32 %v7294_v23, %v15817_v14 }
 0xcc0   :  { %v9512_v53 = vpop.eup %9511  ;;  %v7327_v54 = vsub.f32 %v4323_v13, %v7311_v0  ;;  %v4312_v41 = vpop.xlane.xlu1 %4311  ;;  %v18542_v0 = vld [vmem:[#allocation274_spill] sm:$0xff] }
 0xcc1   :  { %v4306_v8 = vpop.xlane.xlu0 %4305  ;;  %v4328_v62 = vadd.f32 %v4312_v41, %v3469_v17  ;;  %7389 = vperm.xlu1 %8967, %v7330_v19   ;;  %v7298_v35 = vmul.f32 0.6931472, %v9512_v53  ;;  %v18543_v17 = vld [vmem:[#allocation263_spill] sm:$0xff] }
 0xcc2   :  { %v4325_v34 = vadd.f32 %v4306_v8, %v3466_v60  ;;  %7380 = vperm.xlu0 %8968, %v7327_v54   ;;  %v18546_v54 = vld [vmem:[#allocation273_spill] sm:$0xff] }
 0xcc3   :  { %v7332_v30 = vsub.f32 %v4328_v62, %v7316_v58  ;;  %v7315_v55 = vadd.f32 %v7298_v35, %v15833_v57  ;;  %v18547_v58 = vld [vmem:[#allocation269_spill] sm:$0xff]  ;;  %v18550_v35 = vld [vmem:[#allocation279_spill] sm:$0xff] }
 0xcc4   :  { %v7329_v45 = vsub.f32 %v4325_v34, %v7313_v47 }
 0xcc5   :  { %v4310_v61 = vpop.xlane.xlu0 %4309  ;;  %7395 = vperm.xlu1 %8967, %v7332_v30   ;;  %v18551_v30 = vld [vmem:[#allocation276_spill] sm:$0xff] }
 0xcc6   :  { %v4327_v20 = vadd.f32 %v4310_v61, %v3468_v36  ;;  %7386 = vperm.xlu0 %8968, %v7329_v45   ;;  %v18552_v36 = vld [vmem:[#allocation283_spill] sm:$0xff] }
 0xcc8   :  { %v7331_v2 = vsub.f32 %v4327_v20, %v7315_v55 }
 0xcca   :  { %7392 = vperm.xlu0 %8968, %v7331_v2  }
 0xcf5   :  { %v7354_v63 = vpop.permute.xlu1 %7353 }
 0xcf6   :  { %v7351_v14 = vpop.permute.xlu0 %7350  ;;  %v7404_v27 = vrot.slane %v7354_v63, %v18533_v42 }
 0xcf7   :  { %v7400_v52 = vrot.slane %v7351_v14, %v18534_v10 }
 0xcf9   :  { %v7405_v7 = vsel %vm2775_vm5, %v7404_v27, %v7400_v52  ;;  %vm18544_vm5 = vcmask 654912  }
 0xcfa   :  { %v7360_v44 = vpop.permute.xlu1 %7359 }
 0xcfb   :  { %v7414_v43 = vrot.slane %v7360_v44, %v18537_v31 }
 0xcfe   :  { %v7357_v32 = vpop.permute.xlu1 %7356 }
 0xcff   :  { %v7409_v50 = vrot.slane %v7357_v32, %v18535_v18 }
 0xd01   :  { %v7410_v57 = vsel %vm2782_vm7, %v7409_v50, %v7405_v7  ;;  %vm18545_vm7 = vcmask 720512  }
 0xd02   :  { %v7415_v33 = vsel %vm2789_vm8, %v7414_v43, %v7410_v57  ;;  %vm18548_vm8 = vcmask 786112  }
 0xd03   :  { %v7366_v48 = vpop.permute.xlu1 %7365 }
 0xd04   :  { %v7424_v16 = vrot.slane %v7366_v48, %v18539_v46 }
 0xd07   :  { %v7363_v59 = vpop.permute.xlu1 %7362 }
 0xd08   :  { %v7419_v6 = vrot.slane %v7363_v59, %v18536_v37 }
 0xd0a   :  { %v7420_v24 = vsel %vm2796_vm12, %v7419_v6, %v7415_v33  ;;  %vm18549_vm12 = vcmask 851712  }
 0xd0b   :  { %v7372_v26 = vpop.permute.xlu1 %7371  ;;  %v7425_v9 = vsel %vm2803_vm15, %v7424_v16, %v7420_v24 }
 0xd0c   :  { %v7434_v49 = vrot.slane %v7372_v26, %v18540_v56 }
 0xd0f   :  { %v7369_v11 = vpop.permute.xlu1 %7368 }
 0xd10   :  { %v7429_v21 = vrot.slane %v7369_v11, %v18538_v40 }
 0xd12   :  { %v7430_v28 = vsel %vm2810_vm14, %v7429_v21, %v7425_v9 }
 0xd13   :  { %v7435_v25 = vsel %vm2817_vm13, %v7434_v49, %v7430_v28 }
 0xd38   :  { %v7378_v5 = vpop.permute.xlu1 %7377 }
 0xd39   :  { %v7444_v13 = vrot.slane %v7378_v5, %v18542_v0 }
 0xd3c   :  { %v7384_v15 = vpop.permute.xlu1 %7383 }
 0xd3d   :  { %v7375_v22 = vpop.permute.xlu0 %7374  ;;  %v7454_v41 = vrot.slane %v7384_v15, %v18546_v54 }
 0xd3e   :  { %v7439_v4 = vrot.slane %v7375_v22, %v18541_v3 }
 0xd40   :  { %v7440_v23 = vsel %vm2824_vm0, %v7439_v4, %v7435_v25  ;;  %v7390_v53 = vpop.permute.xlu1 %7389 }
 0xd41   :  { %v7381_v39 = vpop.permute.xlu0 %7380  ;;  %v7445_v29 = vsel %vm18544_vm5, %v7444_v13, %v7440_v23  ;;  %v7464_v47 = vrot.slane %v7390_v53, %v18550_v35 }
 0xd42   :  { %v7449_v19 = vrot.slane %v7381_v39, %v18543_v17 }
 0xd44   :  { %v7450_v60 = vsel %vm18545_vm7, %v7449_v19, %v7445_v29  ;;  %v7396_v12 = vpop.permute.xlu1 %7395 }
 0xd45   :  { %v7387_v8 = vpop.permute.xlu0 %7386  ;;  %v7455_v38 = vsel %vm18548_vm8, %v7454_v41, %v7450_v60  ;;  %v7474_v45 = vrot.slane %v7396_v12, %v18552_v36 }
 0xd46   :  { %v7459_v62 = vrot.slane %v7387_v8, %v18547_v58 }
 0xd48   :  { %v7460_v1 = vsel %vm18549_vm12, %v7459_v62, %v7455_v38 }
 0xd49   :  { %v7393_v34 = vpop.permute.xlu0 %7392  ;;  %v7465_v61 = vsel %vm2859_vm10, %v7464_v47, %v7460_v1 }
 0xd4a   :  { %v7469_v51 = vrot.slane %v7393_v34, %v18551_v30 }
 0xd4c   :  { %v7470_v55 = vsel %vm2866_vm4, %v7469_v51, %v7465_v61 }
 0xd4d   :  { %v7475_v20 = vsel %vm2873_vm11, %v7474_v45, %v7470_v55 }
 0xd4e   :  { %7477 = vst [vmem:[#allocation5] sm:$0x1] %v7475_v20 }
 0xd4f   :  { %9657 = shalt.err (!%p9654_p12)
}
 0xd50   :  { %s9658_s19 = scalar_lea.hbm %s16034_s7, 16 }
 0xd51   :  { %p9659_p13 = scmp.ne.s32.totalorder %s16034_s7, %s9658_s19  ;;  %p9662_p0 = scmp.lt.u32.totalorder %s9658_s19, %s16034_s7 }
 0xd53   :  { %p9664_p1 = pnand %p9662_p0, %p9659_p13 }
 0xd55   :  { %9667 = shalt.err (!%p9664_p1)
}
 0xd56   :  { %7487 = dma.vmem_to_hbm [thread:$0]  %s7485_s15, 16, %s16034_s7, [#allocation4]  }
 0xd57   :  { %9670 = dma.done.wait [#allocation4], 16  }
 0xd58   :  { %9671 = vsyncadd [#allocation4], 4294967280 }
 0xd59   :  { %7491 = vsyncpa [#allocation3], 1 }
 0xd5a   :  { %7492 = vsyncpa [#allocation4], 1 }

</bundles_post_ra>
